<compile_context>
chip_gen: v7x
topology: tpu7x:2x2x1
jax: 0.10.0
libtpu: 0.0.40
codegen_flags: <defaults>
</compile_context>

<pallas_src>
import jax
import jax.numpy as jnp
from jax.experimental import pallas as pl
from jax.experimental.pallas import tpu as pltpu


# --------------------------------------------------------------------------
# Fused whole-model kernel (max-norm + AIRS cascade + |.| * max rescale)
# --------------------------------------------------------------------------
def _make_cascade_kernel(conv_channels, relu_cfg, out_ch, H, W):
    """conv_channels: tuple (per layer) of tuples of (cin, cout) per conv."""
    HW = H * W
    num_layers = len(conv_channels)
    n_wb = 2 * sum(len(layer) for layer in conv_channels)

    def kernel(*refs):
        x_ref = refs[0]                      # (1, H*W, C) real input, normalized here
        wb = refs[1:1 + n_wb]                # alternating (w, b) refs, all layers
        o_ref = refs[1 + n_wb]               # (1, H*W, out_ch)
        pad_ref = refs[2 + n_wb]             # VMEM scratch (H+2, W+9, c_max)

        # Zero once per invocation: only the (never re-written) border rows /
        # columns of the pad scratch need to stay zero for "same" padding.
        pad_ref[...] = jnp.zeros_like(pad_ref)

        def conv3x3_same(act_flat, w_ref, b_ref, relu):
            cin = w_ref.shape[2]
            cout = w_ref.shape[3]
            # Interior lives at (row offset 1, sublane offset 8, lane offset 0)
            # -> aligned partial store; borders stay zero.
            pad_ref[1:H + 1, 8:8 + W, :cin] = act_flat.reshape(H, W, cin)
            acc = jnp.zeros((HW, cout), jnp.float32)
            for ky in range(3):              # static taps -> 9 accumulating MXU dots
                for kx in range(3):
                    patch = pad_ref[ky:ky + H, 7 + kx:7 + kx + W, :cin]   # (H, W, cin)
                    acc += jnp.dot(patch.reshape(HW, cin), w_ref[ky, kx],
                                   preferred_element_type=jnp.float32)
            acc = acc + b_ref[...]           # (1, cout) broadcast
            if relu:
                acc = jnp.maximum(acc, 0.0)
            return acc                       # (HW, cout)

        # ---- get_max_val + normalize (fused, per (b, c) spatial max) -------
        x = x_ref[0]                                     # (HW, C)
        m = jnp.max(x, axis=0, keepdims=True)            # (1, C) per-channel max
        xn = x * (1.0 / m)                               # C reciprocals + VPU mul
        mv0 = m[:, 0:1]                                  # (1, 1) channel-0 max
        u_re = xn[:, 0:1]                                # undersampled real part (imag == 0)

        # Residual mask: add u_re only to the real half of the output channels.
        lane = jax.lax.broadcasted_iota(jnp.int32, (1, 2 * out_ch), 1)
        res_mask = (lane < out_ch).astype(jnp.float32)   # (1, 2*out_ch)

        # ---- cascade of AIRS layers (all intermediates stay in VMEM) -------
        state = xn                                       # layer 0: real channels only
        idx = 0
        for li in range(num_layers):
            h = state
            for cj in range(len(conv_channels[li])):
                w_ref, b_ref = wb[idx], wb[idx + 1]
                idx += 2
                h = conv3x3_same(h, w_ref, b_ref, relu_cfg[li][cj])
            # h: (HW, 2*out_ch) as [re | im]; residual adds undersampled to re
            state = h + u_re * res_mask

        # ---- abs(view_as_complex(x)) * max_val[:, :1]  (fused) -------------
        re = state[:, :out_ch]
        im = state[:, out_ch:]
        mag = jnp.sqrt(re * re + im * im)                # (HW, out_ch)
        o_ref[0] = mag * mv0

    return kernel


# --------------------------------------------------------------------------
# AIRSLayer stand-in parameters
# --------------------------------------------------------------------------
def init_airs_layer(key, in_ch, out_ch, chans):
    # TODO(synk): the original AIRSLayer (U-Net with `airs_pools` pooling
    # levels and `first_layer_optimize`) is not defined in the reference file;
    # approximated as a deterministic 3-conv block on the channel-blocked
    # complex image (2*in_ch -> chans -> chans -> 2*out_ch).
    cfg = [(2 * in_ch, chans, True), (chans, chans, True), (chans, 2 * out_ch, False)]
    layers = []
    for ci, co, relu in cfg:
        key, kw, kb = jax.random.split(key, 3)
        scale = 1.0 / jnp.sqrt(9.0 * ci)
        w = scale * jax.random.normal(kw, (3, 3, ci, co), jnp.float32)
        b = 0.01 * jax.random.normal(kb, (co,), jnp.float32)
        layers.append((w, b, relu))
    return layers


# --------------------------------------------------------------------------
# Forward pass (one pallas_call for the whole model)
# --------------------------------------------------------------------------
def my_model_cascade_forward(x, layer_params_list, mask=None):
    """x: (B, C, H, W) float32 (NCHW, as in the PyTorch reference)."""
    B, C, H, W = x.shape
    HW = H * W
    out_ch = layer_params_list[-1][-1][0].shape[-1] // 2      # last conv cout == 2*out_ch

    # Single boundary layout change: NCHW -> (B, H*W, C).
    x_flat = jnp.transpose(x, (0, 2, 3, 1)).reshape(B, HW, C)

    wb_inputs, wb_specs = [], []
    conv_channels, relu_cfg = [], []
    for li, layer in enumerate(layer_params_list):
        ch_l, relu_l = [], []
        for cj, (w, b, relu) in enumerate(layer):
            if li == 0 and cj == 0:
                # first_layer_optimize: the imaginary plane of the initial
                # complex input is identically zero, so the first conv only
                # needs the real-half input channels of its weights.
                w = w[:, :, : w.shape[2] // 2, :]
            cin, cout = w.shape[2], w.shape[3]
            wb_inputs.append(w)
            wb_specs.append(pl.BlockSpec((3, 3, cin, cout), lambda b_: (0, 0, 0, 0)))
            wb_inputs.append(b.reshape(1, cout))
            wb_specs.append(pl.BlockSpec((1, cout), lambda b_: (0, 0)))
            ch_l.append((cin, cout))
            relu_l.append(bool(relu))
        conv_channels.append(tuple(ch_l))
        relu_cfg.append(tuple(relu_l))
    conv_channels = tuple(conv_channels)
    relu_cfg = tuple(relu_cfg)
    c_max = max(ci for layer in conv_channels for (ci, _) in layer)

    kernel = _make_cascade_kernel(conv_channels, relu_cfg, out_ch, H, W)
    out_flat = pl.pallas_call(
        kernel,
        out_shape=jax.ShapeDtypeStruct((B, HW, out_ch), jnp.float32),
        grid=(B,),
        in_specs=[pl.BlockSpec((1, HW, C), lambda b_: (b_, 0, 0))] + wb_specs,
        out_specs=pl.BlockSpec((1, HW, out_ch), lambda b_: (b_, 0, 0)),
        scratch_shapes=[pltpu.VMEM((H + 2, W + 9, c_max), jnp.float32)],
        compiler_params=pltpu.CompilerParams(
            dimension_semantics=("parallel",)),
    )(x_flat, *wb_inputs)

    # Single boundary layout change back to NCHW.
    out = jnp.transpose(out_flat, (0, 2, 1)).reshape(B, out_ch, H, W)
    if out.shape[1] == 1:                                     # torch .squeeze(1)
        out = jnp.squeeze(out, axis=1)
    if mask is not None:
        out = out * mask
    return out


# --------------------------------------------------------------------------
if __name__ == "__main__":
    B, Cin, H, W = 2, 4, 16, 16
    airs_outchans, airs_pools, airs_chans, num_airs_layers = 2, 4, 32, 2

    key = jax.random.PRNGKey(0)
    kx, pkey = jax.random.split(key)
    # Positive inputs (like magnitude images) -> per-channel max > 0, matching
    # the reference module's assumption (it also has no epsilon in x / max).
    x = jax.random.uniform(kx, (B, Cin, H, W), dtype=jnp.float32,
                           minval=0.05, maxval=1.0)

    params = []
    for i in range(num_airs_layers):
        pkey, sub = jax.random.split(pkey)
        in_ch = Cin if i == 0 else airs_outchans
        params.append(init_airs_layer(sub, in_ch, airs_outchans, airs_chans))

    fwd = jax.jit(lambda xx: my_model_cascade_forward(xx, params))
    out = fwd(x)
    jax.block_until_ready(out)
    assert out.shape == (B, airs_outchans, H, W), out.shape
    assert bool(jnp.all(jnp.isfinite(out)))
    print("KERNEL_OK")
</pallas_src>

<mosaic_0001>
module attributes {stable_mosaic.version = 11 : i64} {
  func.func @kernel(%arg0: i32, %arg1: memref<1x256x4xf32, #tpu.memory_space<vmem>>, %arg2: memref<3x3x4x32xf32, #tpu.memory_space<vmem>>, %arg3: memref<1x32xf32, #tpu.memory_space<vmem>>, %arg4: memref<3x3x32x32xf32, #tpu.memory_space<vmem>>, %arg5: memref<1x32xf32, #tpu.memory_space<vmem>>, %arg6: memref<3x3x32x4xf32, #tpu.memory_space<vmem>>, %arg7: memref<1x4xf32, #tpu.memory_space<vmem>>, %arg8: memref<3x3x4x32xf32, #tpu.memory_space<vmem>>, %arg9: memref<1x32xf32, #tpu.memory_space<vmem>>, %arg10: memref<3x3x32x32xf32, #tpu.memory_space<vmem>>, %arg11: memref<1x32xf32, #tpu.memory_space<vmem>>, %arg12: memref<3x3x32x4xf32, #tpu.memory_space<vmem>>, %arg13: memref<1x4xf32, #tpu.memory_space<vmem>>, %arg14: memref<1x256x2xf32, #tpu.memory_space<vmem>>, %arg15: memref<18x25x32xf32, #tpu.memory_space<vmem>>) attributes {dimension_semantics = [#tpu.dimension_semantics<parallel>], iteration_bounds = array<i64: 2>, scalar_prefetch = 0 : i64, scratch_operands = 1 : i64, tpu.core_type = #tpu.core_type<tc>, window_params = [{transform_indices = @transform_0, window_bounds = array<i64: 1, 256, 4>}, {pipeline_mode = #tpu.pipeline_mode<synchronous>, transform_indices = @transform_1, window_bounds = array<i64: 3, 3, 4, 32>}, {pipeline_mode = #tpu.pipeline_mode<synchronous>, transform_indices = @transform_2, window_bounds = array<i64: 1, 32>}, {pipeline_mode = #tpu.pipeline_mode<synchronous>, transform_indices = @transform_3, window_bounds = array<i64: 3, 3, 32, 32>}, {pipeline_mode = #tpu.pipeline_mode<synchronous>, transform_indices = @transform_4, window_bounds = array<i64: 1, 32>}, {pipeline_mode = #tpu.pipeline_mode<synchronous>, transform_indices = @transform_5, window_bounds = array<i64: 3, 3, 32, 4>}, {pipeline_mode = #tpu.pipeline_mode<synchronous>, transform_indices = @transform_6, window_bounds = array<i64: 1, 4>}, {pipeline_mode = #tpu.pipeline_mode<synchronous>, transform_indices = @transform_7, window_bounds = array<i64: 3, 3, 4, 32>}, {pipeline_mode = #tpu.pipeline_mode<synchronous>, transform_indices = @transform_8, window_bounds = array<i64: 1, 32>}, {pipeline_mode = #tpu.pipeline_mode<synchronous>, transform_indices = @transform_9, window_bounds = array<i64: 3, 3, 32, 32>}, {pipeline_mode = #tpu.pipeline_mode<synchronous>, transform_indices = @transform_10, window_bounds = array<i64: 1, 32>}, {pipeline_mode = #tpu.pipeline_mode<synchronous>, transform_indices = @transform_11, window_bounds = array<i64: 3, 3, 32, 4>}, {pipeline_mode = #tpu.pipeline_mode<synchronous>, transform_indices = @transform_12, window_bounds = array<i64: 1, 4>}, {transform_indices = @transform_13, window_bounds = array<i64: 1, 256, 2>}]} {
    %cst = arith.constant 0.000000e+00 : f32
    %0 = vector.broadcast %cst : f32 to vector<18x25x32xf32>
    %c0 = arith.constant 0 : index
    %c0_0 = arith.constant 0 : index
    %c0_1 = arith.constant 0 : index
    %1 = vector.load %arg15[%c0, %c0_0, %c0_1] : memref<18x25x32xf32, #tpu.memory_space<vmem>>, vector<18x25x32xf32>
    tpu.vector_store %arg15[%c0, %c0_0, %c0_1], %0 {strides = array<i32>} : memref<18x25x32xf32, #tpu.memory_space<vmem>>, vector<18x25x32xf32>,
    %c0_2 = arith.constant 0 : index
    %c0_3 = arith.constant 0 : index
    %c0_4 = arith.constant 0 : index
    %2 = vector.load %arg1[%c0_2, %c0_3, %c0_4] : memref<1x256x4xf32, #tpu.memory_space<vmem>>, vector<1x256x4xf32>
    %3 = vector.shape_cast %2 : vector<1x256x4xf32> to vector<256x4xf32>
    %cst_5 = arith.constant dense<0xFF800000> : vector<4xf32>
    %4 = vector.multi_reduction <maximumf>, %3, %cst_5 [0] : vector<256x4xf32> to vector<4xf32>
    %5 = vector.shape_cast %4 : vector<4xf32> to vector<1x4xf32>
    %cst_6 = arith.constant 1.000000e+00 : f32
    %6 = vector.broadcast %cst_6 : f32 to vector<1x4xf32>
    %7 = arith.divf %6, %5 : vector<1x4xf32>
    %8 = vector.broadcast %7 : vector<1x4xf32> to vector<256x4xf32>
    %9 = arith.mulf %3, %8 : vector<256x4xf32>
    %10 = vector.extract_strided_slice %5 {offsets = [0, 0], sizes = [1, 1], strides = [1, 1]} : vector<1x4xf32> to vector<1x1xf32>
    %11 = vector.extract_strided_slice %9 {offsets = [0, 0], sizes = [256, 1], strides = [1, 1]} : vector<256x4xf32> to vector<256x1xf32>
    %12 = tpu.iota {dimensions = array<i32: 1>} : vector<1x4xi32>
    %c2_i32 = arith.constant 2 : i32
    %13 = vector.broadcast %c2_i32 : i32 to vector<1x4xi32>
    %14 = arith.cmpi slt, %12, %13 : vector<1x4xi32>
    %15 = arith.extui %14 : vector<1x4xi1> to vector<1x4xi32>
    %16 = arith.sitofp %15 : vector<1x4xi32> to vector<1x4xf32>
    %17 = vector.shape_cast %9 : vector<256x4xf32> to vector<16x16x4xf32>
    %c1 = arith.constant 1 : index
    %c8 = arith.constant 8 : index
    %c0_7 = arith.constant 0 : index
    %18 = vector.load %arg15[%c1, %c8, %c0_7] : memref<18x25x32xf32, #tpu.memory_space<vmem>>, vector<16x16x4xf32>
    tpu.vector_store %arg15[%c1, %c8, %c0_7], %17 {strides = array<i32>} : memref<18x25x32xf32, #tpu.memory_space<vmem>>, vector<16x16x4xf32>,
    %cst_8 = arith.constant 0.000000e+00 : f32
    %19 = vector.broadcast %cst_8 : f32 to vector<256x32xf32>
    %c0_9 = arith.constant 0 : index
    %c7 = arith.constant 7 : index
    %c0_10 = arith.constant 0 : index
    %20 = vector.load %arg15[%c0_9, %c7, %c0_10] : memref<18x25x32xf32, #tpu.memory_space<vmem>>, vector<16x16x4xf32>
    %21 = vector.shape_cast %20 : vector<16x16x4xf32> to vector<256x4xf32>
    %c0_11 = arith.constant 0 : index
    %c0_12 = arith.constant 0 : index
    %c0_13 = arith.constant 0 : index
    %c0_14 = arith.constant 0 : index
    %22 = vector.load %arg2[%c0_11, %c0_12, %c0_13, %c0_14] : memref<3x3x4x32xf32, #tpu.memory_space<vmem>>, vector<1x1x4x32xf32>
    %23 = vector.shape_cast %22 : vector<1x1x4x32xf32> to vector<4x32xf32>
    %cst_15 = arith.constant dense<0.000000e+00> : vector<256x32xf32>
    %24 = tpu.matmul %21, %23, %cst_15 {dimension_numbers = #tpu.dot_dimension_numbers<[1], [0], [0], [1], [0, 0, 1, 1], [], []>} : vector<256x4xf32>, vector<4x32xf32>, vector<256x32xf32> -> vector<256x32xf32>
    %25 = arith.addf %19, %24 : vector<256x32xf32>
    %c0_16 = arith.constant 0 : index
    %c8_17 = arith.constant 8 : index
    %c0_18 = arith.constant 0 : index
    %26 = vector.load %arg15[%c0_16, %c8_17, %c0_18] : memref<18x25x32xf32, #tpu.memory_space<vmem>>, vector<16x16x4xf32>
    %27 = vector.shape_cast %26 : vector<16x16x4xf32> to vector<256x4xf32>
    %c0_19 = arith.constant 0 : index
    %c1_20 = arith.constant 1 : index
    %c0_21 = arith.constant 0 : index
    %c0_22 = arith.constant 0 : index
    %28 = vector.load %arg2[%c0_19, %c1_20, %c0_21, %c0_22] : memref<3x3x4x32xf32, #tpu.memory_space<vmem>>, vector<1x1x4x32xf32>
    %29 = vector.shape_cast %28 : vector<1x1x4x32xf32> to vector<4x32xf32>
    %cst_23 = arith.constant dense<0.000000e+00> : vector<256x32xf32>
    %30 = tpu.matmul %27, %29, %cst_23 {dimension_numbers = #tpu.dot_dimension_numbers<[1], [0], [0], [1], [0, 0, 1, 1], [], []>} : vector<256x4xf32>, vector<4x32xf32>, vector<256x32xf32> -> vector<256x32xf32>
    %31 = arith.addf %25, %30 : vector<256x32xf32>
    %c0_24 = arith.constant 0 : index
    %c9 = arith.constant 9 : index
    %c0_25 = arith.constant 0 : index
    %32 = vector.load %arg15[%c0_24, %c9, %c0_25] : memref<18x25x32xf32, #tpu.memory_space<vmem>>, vector<16x16x4xf32>
    %33 = vector.shape_cast %32 : vector<16x16x4xf32> to vector<256x4xf32>
    %c0_26 = arith.constant 0 : index
    %c2 = arith.constant 2 : index
    %c0_27 = arith.constant 0 : index
    %c0_28 = arith.constant 0 : index
    %34 = vector.load %arg2[%c0_26, %c2, %c0_27, %c0_28] : memref<3x3x4x32xf32, #tpu.memory_space<vmem>>, vector<1x1x4x32xf32>
    %35 = vector.shape_cast %34 : vector<1x1x4x32xf32> to vector<4x32xf32>
    %cst_29 = arith.constant dense<0.000000e+00> : vector<256x32xf32>
    %36 = tpu.matmul %33, %35, %cst_29 {dimension_numbers = #tpu.dot_dimension_numbers<[1], [0], [0], [1], [0, 0, 1, 1], [], []>} : vector<256x4xf32>, vector<4x32xf32>, vector<256x32xf32> -> vector<256x32xf32>
    %37 = arith.addf %31, %36 : vector<256x32xf32>
    %c1_30 = arith.constant 1 : index
    %c7_31 = arith.constant 7 : index
    %c0_32 = arith.constant 0 : index
    %38 = vector.load %arg15[%c1_30, %c7_31, %c0_32] : memref<18x25x32xf32, #tpu.memory_space<vmem>>, vector<16x16x4xf32>
    %39 = vector.shape_cast %38 : vector<16x16x4xf32> to vector<256x4xf32>
    %c1_33 = arith.constant 1 : index
    %c0_34 = arith.constant 0 : index
    %c0_35 = arith.constant 0 : index
    %c0_36 = arith.constant 0 : index
    %40 = vector.load %arg2[%c1_33, %c0_34, %c0_35, %c0_36] : memref<3x3x4x32xf32, #tpu.memory_space<vmem>>, vector<1x1x4x32xf32>
    %41 = vector.shape_cast %40 : vector<1x1x4x32xf32> to vector<4x32xf32>
    %cst_37 = arith.constant dense<0.000000e+00> : vector<256x32xf32>
    %42 = tpu.matmul %39, %41, %cst_37 {dimension_numbers = #tpu.dot_dimension_numbers<[1], [0], [0], [1], [0, 0, 1, 1], [], []>} : vector<256x4xf32>, vector<4x32xf32>, vector<256x32xf32> -> vector<256x32xf32>
    %43 = arith.addf %37, %42 : vector<256x32xf32>
    %c1_38 = arith.constant 1 : index
    %c8_39 = arith.constant 8 : index
    %c0_40 = arith.constant 0 : index
    %44 = vector.load %arg15[%c1_38, %c8_39, %c0_40] : memref<18x25x32xf32, #tpu.memory_space<vmem>>, vector<16x16x4xf32>
    %45 = vector.shape_cast %44 : vector<16x16x4xf32> to vector<256x4xf32>
    %c1_41 = arith.constant 1 : index
    %c1_42 = arith.constant 1 : index
    %c0_43 = arith.constant 0 : index
    %c0_44 = arith.constant 0 : index
    %46 = vector.load %arg2[%c1_41, %c1_42, %c0_43, %c0_44] : memref<3x3x4x32xf32, #tpu.memory_space<vmem>>, vector<1x1x4x32xf32>
    %47 = vector.shape_cast %46 : vector<1x1x4x32xf32> to vector<4x32xf32>
    %cst_45 = arith.constant dense<0.000000e+00> : vector<256x32xf32>
    %48 = tpu.matmul %45, %47, %cst_45 {dimension_numbers = #tpu.dot_dimension_numbers<[1], [0], [0], [1], [0, 0, 1, 1], [], []>} : vector<256x4xf32>, vector<4x32xf32>, vector<256x32xf32> -> vector<256x32xf32>
    %49 = arith.addf %43, %48 : vector<256x32xf32>
    %c1_46 = arith.constant 1 : index
    %c9_47 = arith.constant 9 : index
    %c0_48 = arith.constant 0 : index
    %50 = vector.load %arg15[%c1_46, %c9_47, %c0_48] : memref<18x25x32xf32, #tpu.memory_space<vmem>>, vector<16x16x4xf32>
    %51 = vector.shape_cast %50 : vector<16x16x4xf32> to vector<256x4xf32>
    %c1_49 = arith.constant 1 : index
    %c2_50 = arith.constant 2 : index
    %c0_51 = arith.constant 0 : index
    %c0_52 = arith.constant 0 : index
    %52 = vector.load %arg2[%c1_49, %c2_50, %c0_51, %c0_52] : memref<3x3x4x32xf32, #tpu.memory_space<vmem>>, vector<1x1x4x32xf32>
    %53 = vector.shape_cast %52 : vector<1x1x4x32xf32> to vector<4x32xf32>
    %cst_53 = arith.constant dense<0.000000e+00> : vector<256x32xf32>
    %54 = tpu.matmul %51, %53, %cst_53 {dimension_numbers = #tpu.dot_dimension_numbers<[1], [0], [0], [1], [0, 0, 1, 1], [], []>} : vector<256x4xf32>, vector<4x32xf32>, vector<256x32xf32> -> vector<256x32xf32>
    %55 = arith.addf %49, %54 : vector<256x32xf32>
    %c2_54 = arith.constant 2 : index
    %c7_55 = arith.constant 7 : index
    %c0_56 = arith.constant 0 : index
    %56 = vector.load %arg15[%c2_54, %c7_55, %c0_56] : memref<18x25x32xf32, #tpu.memory_space<vmem>>, vector<16x16x4xf32>
    %57 = vector.shape_cast %56 : vector<16x16x4xf32> to vector<256x4xf32>
    %c2_57 = arith.constant 2 : index
    %c0_58 = arith.constant 0 : index
    %c0_59 = arith.constant 0 : index
    %c0_60 = arith.constant 0 : index
    %58 = vector.load %arg2[%c2_57, %c0_58, %c0_59, %c0_60] : memref<3x3x4x32xf32, #tpu.memory_space<vmem>>, vector<1x1x4x32xf32>
    %59 = vector.shape_cast %58 : vector<1x1x4x32xf32> to vector<4x32xf32>
    %cst_61 = arith.constant dense<0.000000e+00> : vector<256x32xf32>
    %60 = tpu.matmul %57, %59, %cst_61 {dimension_numbers = #tpu.dot_dimension_numbers<[1], [0], [0], [1], [0, 0, 1, 1], [], []>} : vector<256x4xf32>, vector<4x32xf32>, vector<256x32xf32> -> vector<256x32xf32>
    %61 = arith.addf %55, %60 : vector<256x32xf32>
    %c2_62 = arith.constant 2 : index
    %c8_63 = arith.constant 8 : index
    %c0_64 = arith.constant 0 : index
    %62 = vector.load %arg15[%c2_62, %c8_63, %c0_64] : memref<18x25x32xf32, #tpu.memory_space<vmem>>, vector<16x16x4xf32>
    %63 = vector.shape_cast %62 : vector<16x16x4xf32> to vector<256x4xf32>
    %c2_65 = arith.constant 2 : index
    %c1_66 = arith.constant 1 : index
    %c0_67 = arith.constant 0 : index
    %c0_68 = arith.constant 0 : index
    %64 = vector.load %arg2[%c2_65, %c1_66, %c0_67, %c0_68] : memref<3x3x4x32xf32, #tpu.memory_space<vmem>>, vector<1x1x4x32xf32>
    %65 = vector.shape_cast %64 : vector<1x1x4x32xf32> to vector<4x32xf32>
    %cst_69 = arith.constant dense<0.000000e+00> : vector<256x32xf32>
    %66 = tpu.matmul %63, %65, %cst_69 {dimension_numbers = #tpu.dot_dimension_numbers<[1], [0], [0], [1], [0, 0, 1, 1], [], []>} : vector<256x4xf32>, vector<4x32xf32>, vector<256x32xf32> -> vector<256x32xf32>
    %67 = arith.addf %61, %66 : vector<256x32xf32>
    %c2_70 = arith.constant 2 : index
    %c9_71 = arith.constant 9 : index
    %c0_72 = arith.constant 0 : index
    %68 = vector.load %arg15[%c2_70, %c9_71, %c0_72] : memref<18x25x32xf32, #tpu.memory_space<vmem>>, vector<16x16x4xf32>
    %69 = vector.shape_cast %68 : vector<16x16x4xf32> to vector<256x4xf32>
    %c2_73 = arith.constant 2 : index
    %c2_74 = arith.constant 2 : index
    %c0_75 = arith.constant 0 : index
    %c0_76 = arith.constant 0 : index
    %70 = vector.load %arg2[%c2_73, %c2_74, %c0_75, %c0_76] : memref<3x3x4x32xf32, #tpu.memory_space<vmem>>, vector<1x1x4x32xf32>
    %71 = vector.shape_cast %70 : vector<1x1x4x32xf32> to vector<4x32xf32>
    %cst_77 = arith.constant dense<0.000000e+00> : vector<256x32xf32>
    %72 = tpu.matmul %69, %71, %cst_77 {dimension_numbers = #tpu.dot_dimension_numbers<[1], [0], [0], [1], [0, 0, 1, 1], [], []>} : vector<256x4xf32>, vector<4x32xf32>, vector<256x32xf32> -> vector<256x32xf32>
    %73 = arith.addf %67, %72 : vector<256x32xf32>
    %c0_78 = arith.constant 0 : index
    %c0_79 = arith.constant 0 : index
    %74 = vector.load %arg3[%c0_78, %c0_79] : memref<1x32xf32, #tpu.memory_space<vmem>>, vector<1x32xf32>
    %75 = vector.broadcast %74 : vector<1x32xf32> to vector<256x32xf32>
    %76 = arith.addf %73, %75 : vector<256x32xf32>
    %cst_80 = arith.constant 0.000000e+00 : f32
    %77 = vector.broadcast %cst_80 : f32 to vector<256x32xf32>
    %78 = arith.maximumf %76, %77 : vector<256x32xf32>
    %79 = vector.shape_cast %78 : vector<256x32xf32> to vector<16x16x32xf32>
    %c1_81 = arith.constant 1 : index
    %c8_82 = arith.constant 8 : index
    %c0_83 = arith.constant 0 : index
    %80 = vector.load %arg15[%c1_81, %c8_82, %c0_83] : memref<18x25x32xf32, #tpu.memory_space<vmem>>, vector<16x16x32xf32>
    tpu.vector_store %arg15[%c1_81, %c8_82, %c0_83], %79 {strides = array<i32>} : memref<18x25x32xf32, #tpu.memory_space<vmem>>, vector<16x16x32xf32>,
    %cst_84 = arith.constant 0.000000e+00 : f32
    %81 = vector.broadcast %cst_84 : f32 to vector<256x32xf32>
    %c0_85 = arith.constant 0 : index
    %c7_86 = arith.constant 7 : index
    %c0_87 = arith.constant 0 : index
    %82 = vector.load %arg15[%c0_85, %c7_86, %c0_87] : memref<18x25x32xf32, #tpu.memory_space<vmem>>, vector<16x16x32xf32>
    %83 = vector.shape_cast %82 : vector<16x16x32xf32> to vector<256x32xf32>
    %c0_88 = arith.constant 0 : index
    %c0_89 = arith.constant 0 : index
    %c0_90 = arith.constant 0 : index
    %c0_91 = arith.constant 0 : index
    %84 = vector.load %arg4[%c0_88, %c0_89, %c0_90, %c0_91] : memref<3x3x32x32xf32, #tpu.memory_space<vmem>>, vector<1x1x32x32xf32>
    %85 = vector.shape_cast %84 : vector<1x1x32x32xf32> to vector<32x32xf32>
    %cst_92 = arith.constant dense<0.000000e+00> : vector<256x32xf32>
    %86 = tpu.matmul %83, %85, %cst_92 {dimension_numbers = #tpu.dot_dimension_numbers<[1], [0], [0], [1], [0, 0, 1, 1], [], []>} : vector<256x32xf32>, vector<32x32xf32>, vector<256x32xf32> -> vector<256x32xf32>
    %87 = arith.addf %81, %86 : vector<256x32xf32>
    %c0_93 = arith.constant 0 : index
    %c8_94 = arith.constant 8 : index
    %c0_95 = arith.constant 0 : index
    %88 = vector.load %arg15[%c0_93, %c8_94, %c0_95] : memref<18x25x32xf32, #tpu.memory_space<vmem>>, vector<16x16x32xf32>
    %89 = vector.shape_cast %88 : vector<16x16x32xf32> to vector<256x32xf32>
    %c0_96 = arith.constant 0 : index
    %c1_97 = arith.constant 1 : index
    %c0_98 = arith.constant 0 : index
    %c0_99 = arith.constant 0 : index
    %90 = vector.load %arg4[%c0_96, %c1_97, %c0_98, %c0_99] : memref<3x3x32x32xf32, #tpu.memory_space<vmem>>, vector<1x1x32x32xf32>
    %91 = vector.shape_cast %90 : vector<1x1x32x32xf32> to vector<32x32xf32>
    %cst_100 = arith.constant dense<0.000000e+00> : vector<256x32xf32>
    %92 = tpu.matmul %89, %91, %cst_100 {dimension_numbers = #tpu.dot_dimension_numbers<[1], [0], [0], [1], [0, 0, 1, 1], [], []>} : vector<256x32xf32>, vector<32x32xf32>, vector<256x32xf32> -> vector<256x32xf32>
    %93 = arith.addf %87, %92 : vector<256x32xf32>
    %c0_101 = arith.constant 0 : index
    %c9_102 = arith.constant 9 : index
    %c0_103 = arith.constant 0 : index
    %94 = vector.load %arg15[%c0_101, %c9_102, %c0_103] : memref<18x25x32xf32, #tpu.memory_space<vmem>>, vector<16x16x32xf32>
    %95 = vector.shape_cast %94 : vector<16x16x32xf32> to vector<256x32xf32>
    %c0_104 = arith.constant 0 : index
    %c2_105 = arith.constant 2 : index
    %c0_106 = arith.constant 0 : index
    %c0_107 = arith.constant 0 : index
    %96 = vector.load %arg4[%c0_104, %c2_105, %c0_106, %c0_107] : memref<3x3x32x32xf32, #tpu.memory_space<vmem>>, vector<1x1x32x32xf32>
    %97 = vector.shape_cast %96 : vector<1x1x32x32xf32> to vector<32x32xf32>
    %cst_108 = arith.constant dense<0.000000e+00> : vector<256x32xf32>
    %98 = tpu.matmul %95, %97, %cst_108 {dimension_numbers = #tpu.dot_dimension_numbers<[1], [0], [0], [1], [0, 0, 1, 1], [], []>} : vector<256x32xf32>, vector<32x32xf32>, vector<256x32xf32> -> vector<256x32xf32>
    %99 = arith.addf %93, %98 : vector<256x32xf32>
    %c1_109 = arith.constant 1 : index
    %c7_110 = arith.constant 7 : index
    %c0_111 = arith.constant 0 : index
    %100 = vector.load %arg15[%c1_109, %c7_110, %c0_111] : memref<18x25x32xf32, #tpu.memory_space<vmem>>, vector<16x16x32xf32>
    %101 = vector.shape_cast %100 : vector<16x16x32xf32> to vector<256x32xf32>
    %c1_112 = arith.constant 1 : index
    %c0_113 = arith.constant 0 : index
    %c0_114 = arith.constant 0 : index
    %c0_115 = arith.constant 0 : index
    %102 = vector.load %arg4[%c1_112, %c0_113, %c0_114, %c0_115] : memref<3x3x32x32xf32, #tpu.memory_space<vmem>>, vector<1x1x32x32xf32>
    %103 = vector.shape_cast %102 : vector<1x1x32x32xf32> to vector<32x32xf32>
    %cst_116 = arith.constant dense<0.000000e+00> : vector<256x32xf32>
    %104 = tpu.matmul %101, %103, %cst_116 {dimension_numbers = #tpu.dot_dimension_numbers<[1], [0], [0], [1], [0, 0, 1, 1], [], []>} : vector<256x32xf32>, vector<32x32xf32>, vector<256x32xf32> -> vector<256x32xf32>
    %105 = arith.addf %99, %104 : vector<256x32xf32>
    %c1_117 = arith.constant 1 : index
    %c8_118 = arith.constant 8 : index
    %c0_119 = arith.constant 0 : index
    %106 = vector.load %arg15[%c1_117, %c8_118, %c0_119] : memref<18x25x32xf32, #tpu.memory_space<vmem>>, vector<16x16x32xf32>
    %107 = vector.shape_cast %106 : vector<16x16x32xf32> to vector<256x32xf32>
    %c1_120 = arith.constant 1 : index
    %c1_121 = arith.constant 1 : index
    %c0_122 = arith.constant 0 : index
    %c0_123 = arith.constant 0 : index
    %108 = vector.load %arg4[%c1_120, %c1_121, %c0_122, %c0_123] : memref<3x3x32x32xf32, #tpu.memory_space<vmem>>, vector<1x1x32x32xf32>
    %109 = vector.shape_cast %108 : vector<1x1x32x32xf32> to vector<32x32xf32>
    %cst_124 = arith.constant dense<0.000000e+00> : vector<256x32xf32>
    %110 = tpu.matmul %107, %109, %cst_124 {dimension_numbers = #tpu.dot_dimension_numbers<[1], [0], [0], [1], [0, 0, 1, 1], [], []>} : vector<256x32xf32>, vector<32x32xf32>, vector<256x32xf32> -> vector<256x32xf32>
    %111 = arith.addf %105, %110 : vector<256x32xf32>
    %c1_125 = arith.constant 1 : index
    %c9_126 = arith.constant 9 : index
    %c0_127 = arith.constant 0 : index
    %112 = vector.load %arg15[%c1_125, %c9_126, %c0_127] : memref<18x25x32xf32, #tpu.memory_space<vmem>>, vector<16x16x32xf32>
    %113 = vector.shape_cast %112 : vector<16x16x32xf32> to vector<256x32xf32>
    %c1_128 = arith.constant 1 : index
    %c2_129 = arith.constant 2 : index
    %c0_130 = arith.constant 0 : index
    %c0_131 = arith.constant 0 : index
    %114 = vector.load %arg4[%c1_128, %c2_129, %c0_130, %c0_131] : memref<3x3x32x32xf32, #tpu.memory_space<vmem>>, vector<1x1x32x32xf32>
    %115 = vector.shape_cast %114 : vector<1x1x32x32xf32> to vector<32x32xf32>
    %cst_132 = arith.constant dense<0.000000e+00> : vector<256x32xf32>
    %116 = tpu.matmul %113, %115, %cst_132 {dimension_numbers = #tpu.dot_dimension_numbers<[1], [0], [0], [1], [0, 0, 1, 1], [], []>} : vector<256x32xf32>, vector<32x32xf32>, vector<256x32xf32> -> vector<256x32xf32>
    %117 = arith.addf %111, %116 : vector<256x32xf32>
    %c2_133 = arith.constant 2 : index
    %c7_134 = arith.constant 7 : index
    %c0_135 = arith.constant 0 : index
    %118 = vector.load %arg15[%c2_133, %c7_134, %c0_135] : memref<18x25x32xf32, #tpu.memory_space<vmem>>, vector<16x16x32xf32>
    %119 = vector.shape_cast %118 : vector<16x16x32xf32> to vector<256x32xf32>
    %c2_136 = arith.constant 2 : index
    %c0_137 = arith.constant 0 : index
    %c0_138 = arith.constant 0 : index
    %c0_139 = arith.constant 0 : index
    %120 = vector.load %arg4[%c2_136, %c0_137, %c0_138, %c0_139] : memref<3x3x32x32xf32, #tpu.memory_space<vmem>>, vector<1x1x32x32xf32>
    %121 = vector.shape_cast %120 : vector<1x1x32x32xf32> to vector<32x32xf32>
    %cst_140 = arith.constant dense<0.000000e+00> : vector<256x32xf32>
    %122 = tpu.matmul %119, %121, %cst_140 {dimension_numbers = #tpu.dot_dimension_numbers<[1], [0], [0], [1], [0, 0, 1, 1], [], []>} : vector<256x32xf32>, vector<32x32xf32>, vector<256x32xf32> -> vector<256x32xf32>
    %123 = arith.addf %117, %122 : vector<256x32xf32>
    %c2_141 = arith.constant 2 : index
    %c8_142 = arith.constant 8 : index
    %c0_143 = arith.constant 0 : index
    %124 = vector.load %arg15[%c2_141, %c8_142, %c0_143] : memref<18x25x32xf32, #tpu.memory_space<vmem>>, vector<16x16x32xf32>
    %125 = vector.shape_cast %124 : vector<16x16x32xf32> to vector<256x32xf32>
    %c2_144 = arith.constant 2 : index
    %c1_145 = arith.constant 1 : index
    %c0_146 = arith.constant 0 : index
    %c0_147 = arith.constant 0 : index
    %126 = vector.load %arg4[%c2_144, %c1_145, %c0_146, %c0_147] : memref<3x3x32x32xf32, #tpu.memory_space<vmem>>, vector<1x1x32x32xf32>
    %127 = vector.shape_cast %126 : vector<1x1x32x32xf32> to vector<32x32xf32>
    %cst_148 = arith.constant dense<0.000000e+00> : vector<256x32xf32>
    %128 = tpu.matmul %125, %127, %cst_148 {dimension_numbers = #tpu.dot_dimension_numbers<[1], [0], [0], [1], [0, 0, 1, 1], [], []>} : vector<256x32xf32>, vector<32x32xf32>, vector<256x32xf32> -> vector<256x32xf32>
    %129 = arith.addf %123, %128 : vector<256x32xf32>
    %c2_149 = arith.constant 2 : index
    %c9_150 = arith.constant 9 : index
    %c0_151 = arith.constant 0 : index
    %130 = vector.load %arg15[%c2_149, %c9_150, %c0_151] : memref<18x25x32xf32, #tpu.memory_space<vmem>>, vector<16x16x32xf32>
    %131 = vector.shape_cast %130 : vector<16x16x32xf32> to vector<256x32xf32>
    %c2_152 = arith.constant 2 : index
    %c2_153 = arith.constant 2 : index
    %c0_154 = arith.constant 0 : index
    %c0_155 = arith.constant 0 : index
    %132 = vector.load %arg4[%c2_152, %c2_153, %c0_154, %c0_155] : memref<3x3x32x32xf32, #tpu.memory_space<vmem>>, vector<1x1x32x32xf32>
    %133 = vector.shape_cast %132 : vector<1x1x32x32xf32> to vector<32x32xf32>
    %cst_156 = arith.constant dense<0.000000e+00> : vector<256x32xf32>
    %134 = tpu.matmul %131, %133, %cst_156 {dimension_numbers = #tpu.dot_dimension_numbers<[1], [0], [0], [1], [0, 0, 1, 1], [], []>} : vector<256x32xf32>, vector<32x32xf32>, vector<256x32xf32> -> vector<256x32xf32>
    %135 = arith.addf %129, %134 : vector<256x32xf32>
    %c0_157 = arith.constant 0 : index
    %c0_158 = arith.constant 0 : index
    %136 = vector.load %arg5[%c0_157, %c0_158] : memref<1x32xf32, #tpu.memory_space<vmem>>, vector<1x32xf32>
    %137 = vector.broadcast %136 : vector<1x32xf32> to vector<256x32xf32>
    %138 = arith.addf %135, %137 : vector<256x32xf32>
    %cst_159 = arith.constant 0.000000e+00 : f32
    %139 = vector.broadcast %cst_159 : f32 to vector<256x32xf32>
    %140 = arith.maximumf %138, %139 : vector<256x32xf32>
    %141 = vector.shape_cast %140 : vector<256x32xf32> to vector<16x16x32xf32>
    %c1_160 = arith.constant 1 : index
    %c8_161 = arith.constant 8 : index
    %c0_162 = arith.constant 0 : index
    %142 = vector.load %arg15[%c1_160, %c8_161, %c0_162] : memref<18x25x32xf32, #tpu.memory_space<vmem>>, vector<16x16x32xf32>
    tpu.vector_store %arg15[%c1_160, %c8_161, %c0_162], %141 {strides = array<i32>} : memref<18x25x32xf32, #tpu.memory_space<vmem>>, vector<16x16x32xf32>,
    %cst_163 = arith.constant 0.000000e+00 : f32
    %143 = vector.broadcast %cst_163 : f32 to vector<256x4xf32>
    %c0_164 = arith.constant 0 : index
    %c7_165 = arith.constant 7 : index
    %c0_166 = arith.constant 0 : index
    %144 = vector.load %arg15[%c0_164, %c7_165, %c0_166] : memref<18x25x32xf32, #tpu.memory_space<vmem>>, vector<16x16x32xf32>
    %145 = vector.shape_cast %144 : vector<16x16x32xf32> to vector<256x32xf32>
    %c0_167 = arith.constant 0 : index
    %c0_168 = arith.constant 0 : index
    %c0_169 = arith.constant 0 : index
    %c0_170 = arith.constant 0 : index
    %146 = vector.load %arg6[%c0_167, %c0_168, %c0_169, %c0_170] : memref<3x3x32x4xf32, #tpu.memory_space<vmem>>, vector<1x1x32x4xf32>
    %147 = vector.shape_cast %146 : vector<1x1x32x4xf32> to vector<32x4xf32>
    %cst_171 = arith.constant dense<0.000000e+00> : vector<256x4xf32>
    %148 = tpu.matmul %145, %147, %cst_171 {dimension_numbers = #tpu.dot_dimension_numbers<[1], [0], [0], [1], [0, 0, 1, 1], [], []>} : vector<256x32xf32>, vector<32x4xf32>, vector<256x4xf32> -> vector<256x4xf32>
    %149 = arith.addf %143, %148 : vector<256x4xf32>
    %c0_172 = arith.constant 0 : index
    %c8_173 = arith.constant 8 : index
    %c0_174 = arith.constant 0 : index
    %150 = vector.load %arg15[%c0_172, %c8_173, %c0_174] : memref<18x25x32xf32, #tpu.memory_space<vmem>>, vector<16x16x32xf32>
    %151 = vector.shape_cast %150 : vector<16x16x32xf32> to vector<256x32xf32>
    %c0_175 = arith.constant 0 : index
    %c1_176 = arith.constant 1 : index
    %c0_177 = arith.constant 0 : index
    %c0_178 = arith.constant 0 : index
    %152 = vector.load %arg6[%c0_175, %c1_176, %c0_177, %c0_178] : memref<3x3x32x4xf32, #tpu.memory_space<vmem>>, vector<1x1x32x4xf32>
    %153 = vector.shape_cast %152 : vector<1x1x32x4xf32> to vector<32x4xf32>
    %cst_179 = arith.constant dense<0.000000e+00> : vector<256x4xf32>
    %154 = tpu.matmul %151, %153, %cst_179 {dimension_numbers = #tpu.dot_dimension_numbers<[1], [0], [0], [1], [0, 0, 1, 1], [], []>} : vector<256x32xf32>, vector<32x4xf32>, vector<256x4xf32> -> vector<256x4xf32>
    %155 = arith.addf %149, %154 : vector<256x4xf32>
    %c0_180 = arith.constant 0 : index
    %c9_181 = arith.constant 9 : index
    %c0_182 = arith.constant 0 : index
    %156 = vector.load %arg15[%c0_180, %c9_181, %c0_182] : memref<18x25x32xf32, #tpu.memory_space<vmem>>, vector<16x16x32xf32>
    %157 = vector.shape_cast %156 : vector<16x16x32xf32> to vector<256x32xf32>
    %c0_183 = arith.constant 0 : index
    %c2_184 = arith.constant 2 : index
    %c0_185 = arith.constant 0 : index
    %c0_186 = arith.constant 0 : index
    %158 = vector.load %arg6[%c0_183, %c2_184, %c0_185, %c0_186] : memref<3x3x32x4xf32, #tpu.memory_space<vmem>>, vector<1x1x32x4xf32>
    %159 = vector.shape_cast %158 : vector<1x1x32x4xf32> to vector<32x4xf32>
    %cst_187 = arith.constant dense<0.000000e+00> : vector<256x4xf32>
    %160 = tpu.matmul %157, %159, %cst_187 {dimension_numbers = #tpu.dot_dimension_numbers<[1], [0], [0], [1], [0, 0, 1, 1], [], []>} : vector<256x32xf32>, vector<32x4xf32>, vector<256x4xf32> -> vector<256x4xf32>
    %161 = arith.addf %155, %160 : vector<256x4xf32>
    %c1_188 = arith.constant 1 : index
    %c7_189 = arith.constant 7 : index
    %c0_190 = arith.constant 0 : index
    %162 = vector.load %arg15[%c1_188, %c7_189, %c0_190] : memref<18x25x32xf32, #tpu.memory_space<vmem>>, vector<16x16x32xf32>
    %163 = vector.shape_cast %162 : vector<16x16x32xf32> to vector<256x32xf32>
    %c1_191 = arith.constant 1 : index
    %c0_192 = arith.constant 0 : index
    %c0_193 = arith.constant 0 : index
    %c0_194 = arith.constant 0 : index
    %164 = vector.load %arg6[%c1_191, %c0_192, %c0_193, %c0_194] : memref<3x3x32x4xf32, #tpu.memory_space<vmem>>, vector<1x1x32x4xf32>
    %165 = vector.shape_cast %164 : vector<1x1x32x4xf32> to vector<32x4xf32>
    %cst_195 = arith.constant dense<0.000000e+00> : vector<256x4xf32>
    %166 = tpu.matmul %163, %165, %cst_195 {dimension_numbers = #tpu.dot_dimension_numbers<[1], [0], [0], [1], [0, 0, 1, 1], [], []>} : vector<256x32xf32>, vector<32x4xf32>, vector<256x4xf32> -> vector<256x4xf32>
    %167 = arith.addf %161, %166 : vector<256x4xf32>
    %c1_196 = arith.constant 1 : index
    %c8_197 = arith.constant 8 : index
    %c0_198 = arith.constant 0 : index
    %168 = vector.load %arg15[%c1_196, %c8_197, %c0_198] : memref<18x25x32xf32, #tpu.memory_space<vmem>>, vector<16x16x32xf32>
    %169 = vector.shape_cast %168 : vector<16x16x32xf32> to vector<256x32xf32>
    %c1_199 = arith.constant 1 : index
    %c1_200 = arith.constant 1 : index
    %c0_201 = arith.constant 0 : index
    %c0_202 = arith.constant 0 : index
    %170 = vector.load %arg6[%c1_199, %c1_200, %c0_201, %c0_202] : memref<3x3x32x4xf32, #tpu.memory_space<vmem>>, vector<1x1x32x4xf32>
    %171 = vector.shape_cast %170 : vector<1x1x32x4xf32> to vector<32x4xf32>
    %cst_203 = arith.constant dense<0.000000e+00> : vector<256x4xf32>
    %172 = tpu.matmul %169, %171, %cst_203 {dimension_numbers = #tpu.dot_dimension_numbers<[1], [0], [0], [1], [0, 0, 1, 1], [], []>} : vector<256x32xf32>, vector<32x4xf32>, vector<256x4xf32> -> vector<256x4xf32>
    %173 = arith.addf %167, %172 : vector<256x4xf32>
    %c1_204 = arith.constant 1 : index
    %c9_205 = arith.constant 9 : index
    %c0_206 = arith.constant 0 : index
    %174 = vector.load %arg15[%c1_204, %c9_205, %c0_206] : memref<18x25x32xf32, #tpu.memory_space<vmem>>, vector<16x16x32xf32>
    %175 = vector.shape_cast %174 : vector<16x16x32xf32> to vector<256x32xf32>
    %c1_207 = arith.constant 1 : index
    %c2_208 = arith.constant 2 : index
    %c0_209 = arith.constant 0 : index
    %c0_210 = arith.constant 0 : index
    %176 = vector.load %arg6[%c1_207, %c2_208, %c0_209, %c0_210] : memref<3x3x32x4xf32, #tpu.memory_space<vmem>>, vector<1x1x32x4xf32>
    %177 = vector.shape_cast %176 : vector<1x1x32x4xf32> to vector<32x4xf32>
    %cst_211 = arith.constant dense<0.000000e+00> : vector<256x4xf32>
    %178 = tpu.matmul %175, %177, %cst_211 {dimension_numbers = #tpu.dot_dimension_numbers<[1], [0], [0], [1], [0, 0, 1, 1], [], []>} : vector<256x32xf32>, vector<32x4xf32>, vector<256x4xf32> -> vector<256x4xf32>
    %179 = arith.addf %173, %178 : vector<256x4xf32>
    %c2_212 = arith.constant 2 : index
    %c7_213 = arith.constant 7 : index
    %c0_214 = arith.constant 0 : index
    %180 = vector.load %arg15[%c2_212, %c7_213, %c0_214] : memref<18x25x32xf32, #tpu.memory_space<vmem>>, vector<16x16x32xf32>
    %181 = vector.shape_cast %180 : vector<16x16x32xf32> to vector<256x32xf32>
    %c2_215 = arith.constant 2 : index
    %c0_216 = arith.constant 0 : index
    %c0_217 = arith.constant 0 : index
    %c0_218 = arith.constant 0 : index
    %182 = vector.load %arg6[%c2_215, %c0_216, %c0_217, %c0_218] : memref<3x3x32x4xf32, #tpu.memory_space<vmem>>, vector<1x1x32x4xf32>
    %183 = vector.shape_cast %182 : vector<1x1x32x4xf32> to vector<32x4xf32>
    %cst_219 = arith.constant dense<0.000000e+00> : vector<256x4xf32>
    %184 = tpu.matmul %181, %183, %cst_219 {dimension_numbers = #tpu.dot_dimension_numbers<[1], [0], [0], [1], [0, 0, 1, 1], [], []>} : vector<256x32xf32>, vector<32x4xf32>, vector<256x4xf32> -> vector<256x4xf32>
    %185 = arith.addf %179, %184 : vector<256x4xf32>
    %c2_220 = arith.constant 2 : index
    %c8_221 = arith.constant 8 : index
    %c0_222 = arith.constant 0 : index
    %186 = vector.load %arg15[%c2_220, %c8_221, %c0_222] : memref<18x25x32xf32, #tpu.memory_space<vmem>>, vector<16x16x32xf32>
    %187 = vector.shape_cast %186 : vector<16x16x32xf32> to vector<256x32xf32>
    %c2_223 = arith.constant 2 : index
    %c1_224 = arith.constant 1 : index
    %c0_225 = arith.constant 0 : index
    %c0_226 = arith.constant 0 : index
    %188 = vector.load %arg6[%c2_223, %c1_224, %c0_225, %c0_226] : memref<3x3x32x4xf32, #tpu.memory_space<vmem>>, vector<1x1x32x4xf32>
    %189 = vector.shape_cast %188 : vector<1x1x32x4xf32> to vector<32x4xf32>
    %cst_227 = arith.constant dense<0.000000e+00> : vector<256x4xf32>
    %190 = tpu.matmul %187, %189, %cst_227 {dimension_numbers = #tpu.dot_dimension_numbers<[1], [0], [0], [1], [0, 0, 1, 1], [], []>} : vector<256x32xf32>, vector<32x4xf32>, vector<256x4xf32> -> vector<256x4xf32>
    %191 = arith.addf %185, %190 : vector<256x4xf32>
    %c2_228 = arith.constant 2 : index
    %c9_229 = arith.constant 9 : index
    %c0_230 = arith.constant 0 : index
    %192 = vector.load %arg15[%c2_228, %c9_229, %c0_230] : memref<18x25x32xf32, #tpu.memory_space<vmem>>, vector<16x16x32xf32>
    %193 = vector.shape_cast %192 : vector<16x16x32xf32> to vector<256x32xf32>
    %c2_231 = arith.constant 2 : index
    %c2_232 = arith.constant 2 : index
    %c0_233 = arith.constant 0 : index
    %c0_234 = arith.constant 0 : index
    %194 = vector.load %arg6[%c2_231, %c2_232, %c0_233, %c0_234] : memref<3x3x32x4xf32, #tpu.memory_space<vmem>>, vector<1x1x32x4xf32>
    %195 = vector.shape_cast %194 : vector<1x1x32x4xf32> to vector<32x4xf32>
    %cst_235 = arith.constant dense<0.000000e+00> : vector<256x4xf32>
    %196 = tpu.matmul %193, %195, %cst_235 {dimension_numbers = #tpu.dot_dimension_numbers<[1], [0], [0], [1], [0, 0, 1, 1], [], []>} : vector<256x32xf32>, vector<32x4xf32>, vector<256x4xf32> -> vector<256x4xf32>
    %197 = arith.addf %191, %196 : vector<256x4xf32>
    %c0_236 = arith.constant 0 : index
    %c0_237 = arith.constant 0 : index
    %198 = vector.load %arg7[%c0_236, %c0_237] : memref<1x4xf32, #tpu.memory_space<vmem>>, vector<1x4xf32>
    %199 = vector.broadcast %198 : vector<1x4xf32> to vector<256x4xf32>
    %200 = arith.addf %197, %199 : vector<256x4xf32>
    %201 = vector.broadcast %11 : vector<256x1xf32> to vector<256x4xf32>
    %202 = vector.broadcast %16 : vector<1x4xf32> to vector<256x4xf32>
    %203 = arith.mulf %201, %202 : vector<256x4xf32>
    %204 = arith.addf %200, %203 : vector<256x4xf32>
    %205 = vector.shape_cast %204 : vector<256x4xf32> to vector<16x16x4xf32>
    %c1_238 = arith.constant 1 : index
    %c8_239 = arith.constant 8 : index
    %c0_240 = arith.constant 0 : index
    %206 = vector.load %arg15[%c1_238, %c8_239, %c0_240] : memref<18x25x32xf32, #tpu.memory_space<vmem>>, vector<16x16x4xf32>
    tpu.vector_store %arg15[%c1_238, %c8_239, %c0_240], %205 {strides = array<i32>} : memref<18x25x32xf32, #tpu.memory_space<vmem>>, vector<16x16x4xf32>,
    %cst_241 = arith.constant 0.000000e+00 : f32
    %207 = vector.broadcast %cst_241 : f32 to vector<256x32xf32>
    %c0_242 = arith.constant 0 : index
    %c7_243 = arith.constant 7 : index
    %c0_244 = arith.constant 0 : index
    %208 = vector.load %arg15[%c0_242, %c7_243, %c0_244] : memref<18x25x32xf32, #tpu.memory_space<vmem>>, vector<16x16x4xf32>
    %209 = vector.shape_cast %208 : vector<16x16x4xf32> to vector<256x4xf32>
    %c0_245 = arith.constant 0 : index
    %c0_246 = arith.constant 0 : index
    %c0_247 = arith.constant 0 : index
    %c0_248 = arith.constant 0 : index
    %210 = vector.load %arg8[%c0_245, %c0_246, %c0_247, %c0_248] : memref<3x3x4x32xf32, #tpu.memory_space<vmem>>, vector<1x1x4x32xf32>
    %211 = vector.shape_cast %210 : vector<1x1x4x32xf32> to vector<4x32xf32>
    %cst_249 = arith.constant dense<0.000000e+00> : vector<256x32xf32>
    %212 = tpu.matmul %209, %211, %cst_249 {dimension_numbers = #tpu.dot_dimension_numbers<[1], [0], [0], [1], [0, 0, 1, 1], [], []>} : vector<256x4xf32>, vector<4x32xf32>, vector<256x32xf32> -> vector<256x32xf32>
    %213 = arith.addf %207, %212 : vector<256x32xf32>
    %c0_250 = arith.constant 0 : index
    %c8_251 = arith.constant 8 : index
    %c0_252 = arith.constant 0 : index
    %214 = vector.load %arg15[%c0_250, %c8_251, %c0_252] : memref<18x25x32xf32, #tpu.memory_space<vmem>>, vector<16x16x4xf32>
    %215 = vector.shape_cast %214 : vector<16x16x4xf32> to vector<256x4xf32>
    %c0_253 = arith.constant 0 : index
    %c1_254 = arith.constant 1 : index
    %c0_255 = arith.constant 0 : index
    %c0_256 = arith.constant 0 : index
    %216 = vector.load %arg8[%c0_253, %c1_254, %c0_255, %c0_256] : memref<3x3x4x32xf32, #tpu.memory_space<vmem>>, vector<1x1x4x32xf32>
    %217 = vector.shape_cast %216 : vector<1x1x4x32xf32> to vector<4x32xf32>
    %cst_257 = arith.constant dense<0.000000e+00> : vector<256x32xf32>
    %218 = tpu.matmul %215, %217, %cst_257 {dimension_numbers = #tpu.dot_dimension_numbers<[1], [0], [0], [1], [0, 0, 1, 1], [], []>} : vector<256x4xf32>, vector<4x32xf32>, vector<256x32xf32> -> vector<256x32xf32>
    %219 = arith.addf %213, %218 : vector<256x32xf32>
    %c0_258 = arith.constant 0 : index
    %c9_259 = arith.constant 9 : index
    %c0_260 = arith.constant 0 : index
    %220 = vector.load %arg15[%c0_258, %c9_259, %c0_260] : memref<18x25x32xf32, #tpu.memory_space<vmem>>, vector<16x16x4xf32>
    %221 = vector.shape_cast %220 : vector<16x16x4xf32> to vector<256x4xf32>
    %c0_261 = arith.constant 0 : index
    %c2_262 = arith.constant 2 : index
    %c0_263 = arith.constant 0 : index
    %c0_264 = arith.constant 0 : index
    %222 = vector.load %arg8[%c0_261, %c2_262, %c0_263, %c0_264] : memref<3x3x4x32xf32, #tpu.memory_space<vmem>>, vector<1x1x4x32xf32>
    %223 = vector.shape_cast %222 : vector<1x1x4x32xf32> to vector<4x32xf32>
    %cst_265 = arith.constant dense<0.000000e+00> : vector<256x32xf32>
    %224 = tpu.matmul %221, %223, %cst_265 {dimension_numbers = #tpu.dot_dimension_numbers<[1], [0], [0], [1], [0, 0, 1, 1], [], []>} : vector<256x4xf32>, vector<4x32xf32>, vector<256x32xf32> -> vector<256x32xf32>
    %225 = arith.addf %219, %224 : vector<256x32xf32>
    %c1_266 = arith.constant 1 : index
    %c7_267 = arith.constant 7 : index
    %c0_268 = arith.constant 0 : index
    %226 = vector.load %arg15[%c1_266, %c7_267, %c0_268] : memref<18x25x32xf32, #tpu.memory_space<vmem>>, vector<16x16x4xf32>
    %227 = vector.shape_cast %226 : vector<16x16x4xf32> to vector<256x4xf32>
    %c1_269 = arith.constant 1 : index
    %c0_270 = arith.constant 0 : index
    %c0_271 = arith.constant 0 : index
    %c0_272 = arith.constant 0 : index
    %228 = vector.load %arg8[%c1_269, %c0_270, %c0_271, %c0_272] : memref<3x3x4x32xf32, #tpu.memory_space<vmem>>, vector<1x1x4x32xf32>
    %229 = vector.shape_cast %228 : vector<1x1x4x32xf32> to vector<4x32xf32>
    %cst_273 = arith.constant dense<0.000000e+00> : vector<256x32xf32>
    %230 = tpu.matmul %227, %229, %cst_273 {dimension_numbers = #tpu.dot_dimension_numbers<[1], [0], [0], [1], [0, 0, 1, 1], [], []>} : vector<256x4xf32>, vector<4x32xf32>, vector<256x32xf32> -> vector<256x32xf32>
    %231 = arith.addf %225, %230 : vector<256x32xf32>
    %c1_274 = arith.constant 1 : index
    %c8_275 = arith.constant 8 : index
    %c0_276 = arith.constant 0 : index
    %232 = vector.load %arg15[%c1_274, %c8_275, %c0_276] : memref<18x25x32xf32, #tpu.memory_space<vmem>>, vector<16x16x4xf32>
    %233 = vector.shape_cast %232 : vector<16x16x4xf32> to vector<256x4xf32>
    %c1_277 = arith.constant 1 : index
    %c1_278 = arith.constant 1 : index
    %c0_279 = arith.constant 0 : index
    %c0_280 = arith.constant 0 : index
    %234 = vector.load %arg8[%c1_277, %c1_278, %c0_279, %c0_280] : memref<3x3x4x32xf32, #tpu.memory_space<vmem>>, vector<1x1x4x32xf32>
    %235 = vector.shape_cast %234 : vector<1x1x4x32xf32> to vector<4x32xf32>
    %cst_281 = arith.constant dense<0.000000e+00> : vector<256x32xf32>
    %236 = tpu.matmul %233, %235, %cst_281 {dimension_numbers = #tpu.dot_dimension_numbers<[1], [0], [0], [1], [0, 0, 1, 1], [], []>} : vector<256x4xf32>, vector<4x32xf32>, vector<256x32xf32> -> vector<256x32xf32>
    %237 = arith.addf %231, %236 : vector<256x32xf32>
    %c1_282 = arith.constant 1 : index
    %c9_283 = arith.constant 9 : index
    %c0_284 = arith.constant 0 : index
    %238 = vector.load %arg15[%c1_282, %c9_283, %c0_284] : memref<18x25x32xf32, #tpu.memory_space<vmem>>, vector<16x16x4xf32>
    %239 = vector.shape_cast %238 : vector<16x16x4xf32> to vector<256x4xf32>
    %c1_285 = arith.constant 1 : index
    %c2_286 = arith.constant 2 : index
    %c0_287 = arith.constant 0 : index
    %c0_288 = arith.constant 0 : index
    %240 = vector.load %arg8[%c1_285, %c2_286, %c0_287, %c0_288] : memref<3x3x4x32xf32, #tpu.memory_space<vmem>>, vector<1x1x4x32xf32>
    %241 = vector.shape_cast %240 : vector<1x1x4x32xf32> to vector<4x32xf32>
    %cst_289 = arith.constant dense<0.000000e+00> : vector<256x32xf32>
    %242 = tpu.matmul %239, %241, %cst_289 {dimension_numbers = #tpu.dot_dimension_numbers<[1], [0], [0], [1], [0, 0, 1, 1], [], []>} : vector<256x4xf32>, vector<4x32xf32>, vector<256x32xf32> -> vector<256x32xf32>
    %243 = arith.addf %237, %242 : vector<256x32xf32>
    %c2_290 = arith.constant 2 : index
    %c7_291 = arith.constant 7 : index
    %c0_292 = arith.constant 0 : index
    %244 = vector.load %arg15[%c2_290, %c7_291, %c0_292] : memref<18x25x32xf32, #tpu.memory_space<vmem>>, vector<16x16x4xf32>
    %245 = vector.shape_cast %244 : vector<16x16x4xf32> to vector<256x4xf32>
    %c2_293 = arith.constant 2 : index
    %c0_294 = arith.constant 0 : index
    %c0_295 = arith.constant 0 : index
    %c0_296 = arith.constant 0 : index
    %246 = vector.load %arg8[%c2_293, %c0_294, %c0_295, %c0_296] : memref<3x3x4x32xf32, #tpu.memory_space<vmem>>, vector<1x1x4x32xf32>
    %247 = vector.shape_cast %246 : vector<1x1x4x32xf32> to vector<4x32xf32>
    %cst_297 = arith.constant dense<0.000000e+00> : vector<256x32xf32>
    %248 = tpu.matmul %245, %247, %cst_297 {dimension_numbers = #tpu.dot_dimension_numbers<[1], [0], [0], [1], [0, 0, 1, 1], [], []>} : vector<256x4xf32>, vector<4x32xf32>, vector<256x32xf32> -> vector<256x32xf32>
    %249 = arith.addf %243, %248 : vector<256x32xf32>
    %c2_298 = arith.constant 2 : index
    %c8_299 = arith.constant 8 : index
    %c0_300 = arith.constant 0 : index
    %250 = vector.load %arg15[%c2_298, %c8_299, %c0_300] : memref<18x25x32xf32, #tpu.memory_space<vmem>>, vector<16x16x4xf32>
    %251 = vector.shape_cast %250 : vector<16x16x4xf32> to vector<256x4xf32>
    %c2_301 = arith.constant 2 : index
    %c1_302 = arith.constant 1 : index
    %c0_303 = arith.constant 0 : index
    %c0_304 = arith.constant 0 : index
    %252 = vector.load %arg8[%c2_301, %c1_302, %c0_303, %c0_304] : memref<3x3x4x32xf32, #tpu.memory_space<vmem>>, vector<1x1x4x32xf32>
    %253 = vector.shape_cast %252 : vector<1x1x4x32xf32> to vector<4x32xf32>
    %cst_305 = arith.constant dense<0.000000e+00> : vector<256x32xf32>
    %254 = tpu.matmul %251, %253, %cst_305 {dimension_numbers = #tpu.dot_dimension_numbers<[1], [0], [0], [1], [0, 0, 1, 1], [], []>} : vector<256x4xf32>, vector<4x32xf32>, vector<256x32xf32> -> vector<256x32xf32>
    %255 = arith.addf %249, %254 : vector<256x32xf32>
    %c2_306 = arith.constant 2 : index
    %c9_307 = arith.constant 9 : index
    %c0_308 = arith.constant 0 : index
    %256 = vector.load %arg15[%c2_306, %c9_307, %c0_308] : memref<18x25x32xf32, #tpu.memory_space<vmem>>, vector<16x16x4xf32>
    %257 = vector.shape_cast %256 : vector<16x16x4xf32> to vector<256x4xf32>
    %c2_309 = arith.constant 2 : index
    %c2_310 = arith.constant 2 : index
    %c0_311 = arith.constant 0 : index
    %c0_312 = arith.constant 0 : index
    %258 = vector.load %arg8[%c2_309, %c2_310, %c0_311, %c0_312] : memref<3x3x4x32xf32, #tpu.memory_space<vmem>>, vector<1x1x4x32xf32>
    %259 = vector.shape_cast %258 : vector<1x1x4x32xf32> to vector<4x32xf32>
    %cst_313 = arith.constant dense<0.000000e+00> : vector<256x32xf32>
    %260 = tpu.matmul %257, %259, %cst_313 {dimension_numbers = #tpu.dot_dimension_numbers<[1], [0], [0], [1], [0, 0, 1, 1], [], []>} : vector<256x4xf32>, vector<4x32xf32>, vector<256x32xf32> -> vector<256x32xf32>
    %261 = arith.addf %255, %260 : vector<256x32xf32>
    %c0_314 = arith.constant 0 : index
    %c0_315 = arith.constant 0 : index
    %262 = vector.load %arg9[%c0_314, %c0_315] : memref<1x32xf32, #tpu.memory_space<vmem>>, vector<1x32xf32>
    %263 = vector.broadcast %262 : vector<1x32xf32> to vector<256x32xf32>
    %264 = arith.addf %261, %263 : vector<256x32xf32>
    %cst_316 = arith.constant 0.000000e+00 : f32
    %265 = vector.broadcast %cst_316 : f32 to vector<256x32xf32>
    %266 = arith.maximumf %264, %265 : vector<256x32xf32>
    %267 = vector.shape_cast %266 : vector<256x32xf32> to vector<16x16x32xf32>
    %c1_317 = arith.constant 1 : index
    %c8_318 = arith.constant 8 : index
    %c0_319 = arith.constant 0 : index
    %268 = vector.load %arg15[%c1_317, %c8_318, %c0_319] : memref<18x25x32xf32, #tpu.memory_space<vmem>>, vector<16x16x32xf32>
    tpu.vector_store %arg15[%c1_317, %c8_318, %c0_319], %267 {strides = array<i32>} : memref<18x25x32xf32, #tpu.memory_space<vmem>>, vector<16x16x32xf32>,
    %cst_320 = arith.constant 0.000000e+00 : f32
    %269 = vector.broadcast %cst_320 : f32 to vector<256x32xf32>
    %c0_321 = arith.constant 0 : index
    %c7_322 = arith.constant 7 : index
    %c0_323 = arith.constant 0 : index
    %270 = vector.load %arg15[%c0_321, %c7_322, %c0_323] : memref<18x25x32xf32, #tpu.memory_space<vmem>>, vector<16x16x32xf32>
    %271 = vector.shape_cast %270 : vector<16x16x32xf32> to vector<256x32xf32>
    %c0_324 = arith.constant 0 : index
    %c0_325 = arith.constant 0 : index
    %c0_326 = arith.constant 0 : index
    %c0_327 = arith.constant 0 : index
    %272 = vector.load %arg10[%c0_324, %c0_325, %c0_326, %c0_327] : memref<3x3x32x32xf32, #tpu.memory_space<vmem>>, vector<1x1x32x32xf32>
    %273 = vector.shape_cast %272 : vector<1x1x32x32xf32> to vector<32x32xf32>
    %cst_328 = arith.constant dense<0.000000e+00> : vector<256x32xf32>
    %274 = tpu.matmul %271, %273, %cst_328 {dimension_numbers = #tpu.dot_dimension_numbers<[1], [0], [0], [1], [0, 0, 1, 1], [], []>} : vector<256x32xf32>, vector<32x32xf32>, vector<256x32xf32> -> vector<256x32xf32>
    %275 = arith.addf %269, %274 : vector<256x32xf32>
    %c0_329 = arith.constant 0 : index
    %c8_330 = arith.constant 8 : index
    %c0_331 = arith.constant 0 : index
    %276 = vector.load %arg15[%c0_329, %c8_330, %c0_331] : memref<18x25x32xf32, #tpu.memory_space<vmem>>, vector<16x16x32xf32>
    %277 = vector.shape_cast %276 : vector<16x16x32xf32> to vector<256x32xf32>
    %c0_332 = arith.constant 0 : index
    %c1_333 = arith.constant 1 : index
    %c0_334 = arith.constant 0 : index
    %c0_335 = arith.constant 0 : index
    %278 = vector.load %arg10[%c0_332, %c1_333, %c0_334, %c0_335] : memref<3x3x32x32xf32, #tpu.memory_space<vmem>>, vector<1x1x32x32xf32>
    %279 = vector.shape_cast %278 : vector<1x1x32x32xf32> to vector<32x32xf32>
    %cst_336 = arith.constant dense<0.000000e+00> : vector<256x32xf32>
    %280 = tpu.matmul %277, %279, %cst_336 {dimension_numbers = #tpu.dot_dimension_numbers<[1], [0], [0], [1], [0, 0, 1, 1], [], []>} : vector<256x32xf32>, vector<32x32xf32>, vector<256x32xf32> -> vector<256x32xf32>
    %281 = arith.addf %275, %280 : vector<256x32xf32>
    %c0_337 = arith.constant 0 : index
    %c9_338 = arith.constant 9 : index
    %c0_339 = arith.constant 0 : index
    %282 = vector.load %arg15[%c0_337, %c9_338, %c0_339] : memref<18x25x32xf32, #tpu.memory_space<vmem>>, vector<16x16x32xf32>
    %283 = vector.shape_cast %282 : vector<16x16x32xf32> to vector<256x32xf32>
    %c0_340 = arith.constant 0 : index
    %c2_341 = arith.constant 2 : index
    %c0_342 = arith.constant 0 : index
    %c0_343 = arith.constant 0 : index
    %284 = vector.load %arg10[%c0_340, %c2_341, %c0_342, %c0_343] : memref<3x3x32x32xf32, #tpu.memory_space<vmem>>, vector<1x1x32x32xf32>
    %285 = vector.shape_cast %284 : vector<1x1x32x32xf32> to vector<32x32xf32>
    %cst_344 = arith.constant dense<0.000000e+00> : vector<256x32xf32>
    %286 = tpu.matmul %283, %285, %cst_344 {dimension_numbers = #tpu.dot_dimension_numbers<[1], [0], [0], [1], [0, 0, 1, 1], [], []>} : vector<256x32xf32>, vector<32x32xf32>, vector<256x32xf32> -> vector<256x32xf32>
    %287 = arith.addf %281, %286 : vector<256x32xf32>
    %c1_345 = arith.constant 1 : index
    %c7_346 = arith.constant 7 : index
    %c0_347 = arith.constant 0 : index
    %288 = vector.load %arg15[%c1_345, %c7_346, %c0_347] : memref<18x25x32xf32, #tpu.memory_space<vmem>>, vector<16x16x32xf32>
    %289 = vector.shape_cast %288 : vector<16x16x32xf32> to vector<256x32xf32>
    %c1_348 = arith.constant 1 : index
    %c0_349 = arith.constant 0 : index
    %c0_350 = arith.constant 0 : index
    %c0_351 = arith.constant 0 : index
    %290 = vector.load %arg10[%c1_348, %c0_349, %c0_350, %c0_351] : memref<3x3x32x32xf32, #tpu.memory_space<vmem>>, vector<1x1x32x32xf32>
    %291 = vector.shape_cast %290 : vector<1x1x32x32xf32> to vector<32x32xf32>
    %cst_352 = arith.constant dense<0.000000e+00> : vector<256x32xf32>
    %292 = tpu.matmul %289, %291, %cst_352 {dimension_numbers = #tpu.dot_dimension_numbers<[1], [0], [0], [1], [0, 0, 1, 1], [], []>} : vector<256x32xf32>, vector<32x32xf32>, vector<256x32xf32> -> vector<256x32xf32>
    %293 = arith.addf %287, %292 : vector<256x32xf32>
    %c1_353 = arith.constant 1 : index
    %c8_354 = arith.constant 8 : index
    %c0_355 = arith.constant 0 : index
    %294 = vector.load %arg15[%c1_353, %c8_354, %c0_355] : memref<18x25x32xf32, #tpu.memory_space<vmem>>, vector<16x16x32xf32>
    %295 = vector.shape_cast %294 : vector<16x16x32xf32> to vector<256x32xf32>
    %c1_356 = arith.constant 1 : index
    %c1_357 = arith.constant 1 : index
    %c0_358 = arith.constant 0 : index
    %c0_359 = arith.constant 0 : index
    %296 = vector.load %arg10[%c1_356, %c1_357, %c0_358, %c0_359] : memref<3x3x32x32xf32, #tpu.memory_space<vmem>>, vector<1x1x32x32xf32>
    %297 = vector.shape_cast %296 : vector<1x1x32x32xf32> to vector<32x32xf32>
    %cst_360 = arith.constant dense<0.000000e+00> : vector<256x32xf32>
    %298 = tpu.matmul %295, %297, %cst_360 {dimension_numbers = #tpu.dot_dimension_numbers<[1], [0], [0], [1], [0, 0, 1, 1], [], []>} : vector<256x32xf32>, vector<32x32xf32>, vector<256x32xf32> -> vector<256x32xf32>
    %299 = arith.addf %293, %298 : vector<256x32xf32>
    %c1_361 = arith.constant 1 : index
    %c9_362 = arith.constant 9 : index
    %c0_363 = arith.constant 0 : index
    %300 = vector.load %arg15[%c1_361, %c9_362, %c0_363] : memref<18x25x32xf32, #tpu.memory_space<vmem>>, vector<16x16x32xf32>
    %301 = vector.shape_cast %300 : vector<16x16x32xf32> to vector<256x32xf32>
    %c1_364 = arith.constant 1 : index
    %c2_365 = arith.constant 2 : index
    %c0_366 = arith.constant 0 : index
    %c0_367 = arith.constant 0 : index
    %302 = vector.load %arg10[%c1_364, %c2_365, %c0_366, %c0_367] : memref<3x3x32x32xf32, #tpu.memory_space<vmem>>, vector<1x1x32x32xf32>
    %303 = vector.shape_cast %302 : vector<1x1x32x32xf32> to vector<32x32xf32>
    %cst_368 = arith.constant dense<0.000000e+00> : vector<256x32xf32>
    %304 = tpu.matmul %301, %303, %cst_368 {dimension_numbers = #tpu.dot_dimension_numbers<[1], [0], [0], [1], [0, 0, 1, 1], [], []>} : vector<256x32xf32>, vector<32x32xf32>, vector<256x32xf32> -> vector<256x32xf32>
    %305 = arith.addf %299, %304 : vector<256x32xf32>
    %c2_369 = arith.constant 2 : index
    %c7_370 = arith.constant 7 : index
    %c0_371 = arith.constant 0 : index
    %306 = vector.load %arg15[%c2_369, %c7_370, %c0_371] : memref<18x25x32xf32, #tpu.memory_space<vmem>>, vector<16x16x32xf32>
    %307 = vector.shape_cast %306 : vector<16x16x32xf32> to vector<256x32xf32>
    %c2_372 = arith.constant 2 : index
    %c0_373 = arith.constant 0 : index
    %c0_374 = arith.constant 0 : index
    %c0_375 = arith.constant 0 : index
    %308 = vector.load %arg10[%c2_372, %c0_373, %c0_374, %c0_375] : memref<3x3x32x32xf32, #tpu.memory_space<vmem>>, vector<1x1x32x32xf32>
    %309 = vector.shape_cast %308 : vector<1x1x32x32xf32> to vector<32x32xf32>
    %cst_376 = arith.constant dense<0.000000e+00> : vector<256x32xf32>
    %310 = tpu.matmul %307, %309, %cst_376 {dimension_numbers = #tpu.dot_dimension_numbers<[1], [0], [0], [1], [0, 0, 1, 1], [], []>} : vector<256x32xf32>, vector<32x32xf32>, vector<256x32xf32> -> vector<256x32xf32>
    %311 = arith.addf %305, %310 : vector<256x32xf32>
    %c2_377 = arith.constant 2 : index
    %c8_378 = arith.constant 8 : index
    %c0_379 = arith.constant 0 : index
    %312 = vector.load %arg15[%c2_377, %c8_378, %c0_379] : memref<18x25x32xf32, #tpu.memory_space<vmem>>, vector<16x16x32xf32>
    %313 = vector.shape_cast %312 : vector<16x16x32xf32> to vector<256x32xf32>
    %c2_380 = arith.constant 2 : index
    %c1_381 = arith.constant 1 : index
    %c0_382 = arith.constant 0 : index
    %c0_383 = arith.constant 0 : index
    %314 = vector.load %arg10[%c2_380, %c1_381, %c0_382, %c0_383] : memref<3x3x32x32xf32, #tpu.memory_space<vmem>>, vector<1x1x32x32xf32>
    %315 = vector.shape_cast %314 : vector<1x1x32x32xf32> to vector<32x32xf32>
    %cst_384 = arith.constant dense<0.000000e+00> : vector<256x32xf32>
    %316 = tpu.matmul %313, %315, %cst_384 {dimension_numbers = #tpu.dot_dimension_numbers<[1], [0], [0], [1], [0, 0, 1, 1], [], []>} : vector<256x32xf32>, vector<32x32xf32>, vector<256x32xf32> -> vector<256x32xf32>
    %317 = arith.addf %311, %316 : vector<256x32xf32>
    %c2_385 = arith.constant 2 : index
    %c9_386 = arith.constant 9 : index
    %c0_387 = arith.constant 0 : index
    %318 = vector.load %arg15[%c2_385, %c9_386, %c0_387] : memref<18x25x32xf32, #tpu.memory_space<vmem>>, vector<16x16x32xf32>
    %319 = vector.shape_cast %318 : vector<16x16x32xf32> to vector<256x32xf32>
    %c2_388 = arith.constant 2 : index
    %c2_389 = arith.constant 2 : index
    %c0_390 = arith.constant 0 : index
    %c0_391 = arith.constant 0 : index
    %320 = vector.load %arg10[%c2_388, %c2_389, %c0_390, %c0_391] : memref<3x3x32x32xf32, #tpu.memory_space<vmem>>, vector<1x1x32x32xf32>
    %321 = vector.shape_cast %320 : vector<1x1x32x32xf32> to vector<32x32xf32>
    %cst_392 = arith.constant dense<0.000000e+00> : vector<256x32xf32>
    %322 = tpu.matmul %319, %321, %cst_392 {dimension_numbers = #tpu.dot_dimension_numbers<[1], [0], [0], [1], [0, 0, 1, 1], [], []>} : vector<256x32xf32>, vector<32x32xf32>, vector<256x32xf32> -> vector<256x32xf32>
    %323 = arith.addf %317, %322 : vector<256x32xf32>
    %c0_393 = arith.constant 0 : index
    %c0_394 = arith.constant 0 : index
    %324 = vector.load %arg11[%c0_393, %c0_394] : memref<1x32xf32, #tpu.memory_space<vmem>>, vector<1x32xf32>
    %325 = vector.broadcast %324 : vector<1x32xf32> to vector<256x32xf32>
    %326 = arith.addf %323, %325 : vector<256x32xf32>
    %cst_395 = arith.constant 0.000000e+00 : f32
    %327 = vector.broadcast %cst_395 : f32 to vector<256x32xf32>
    %328 = arith.maximumf %326, %327 : vector<256x32xf32>
    %329 = vector.shape_cast %328 : vector<256x32xf32> to vector<16x16x32xf32>
    %c1_396 = arith.constant 1 : index
    %c8_397 = arith.constant 8 : index
    %c0_398 = arith.constant 0 : index
    %330 = vector.load %arg15[%c1_396, %c8_397, %c0_398] : memref<18x25x32xf32, #tpu.memory_space<vmem>>, vector<16x16x32xf32>
    tpu.vector_store %arg15[%c1_396, %c8_397, %c0_398], %329 {strides = array<i32>} : memref<18x25x32xf32, #tpu.memory_space<vmem>>, vector<16x16x32xf32>,
    %cst_399 = arith.constant 0.000000e+00 : f32
    %331 = vector.broadcast %cst_399 : f32 to vector<256x4xf32>
    %c0_400 = arith.constant 0 : index
    %c7_401 = arith.constant 7 : index
    %c0_402 = arith.constant 0 : index
    %332 = vector.load %arg15[%c0_400, %c7_401, %c0_402] : memref<18x25x32xf32, #tpu.memory_space<vmem>>, vector<16x16x32xf32>
    %333 = vector.shape_cast %332 : vector<16x16x32xf32> to vector<256x32xf32>
    %c0_403 = arith.constant 0 : index
    %c0_404 = arith.constant 0 : index
    %c0_405 = arith.constant 0 : index
    %c0_406 = arith.constant 0 : index
    %334 = vector.load %arg12[%c0_403, %c0_404, %c0_405, %c0_406] : memref<3x3x32x4xf32, #tpu.memory_space<vmem>>, vector<1x1x32x4xf32>
    %335 = vector.shape_cast %334 : vector<1x1x32x4xf32> to vector<32x4xf32>
    %cst_407 = arith.constant dense<0.000000e+00> : vector<256x4xf32>
    %336 = tpu.matmul %333, %335, %cst_407 {dimension_numbers = #tpu.dot_dimension_numbers<[1], [0], [0], [1], [0, 0, 1, 1], [], []>} : vector<256x32xf32>, vector<32x4xf32>, vector<256x4xf32> -> vector<256x4xf32>
    %337 = arith.addf %331, %336 : vector<256x4xf32>
    %c0_408 = arith.constant 0 : index
    %c8_409 = arith.constant 8 : index
    %c0_410 = arith.constant 0 : index
    %338 = vector.load %arg15[%c0_408, %c8_409, %c0_410] : memref<18x25x32xf32, #tpu.memory_space<vmem>>, vector<16x16x32xf32>
    %339 = vector.shape_cast %338 : vector<16x16x32xf32> to vector<256x32xf32>
    %c0_411 = arith.constant 0 : index
    %c1_412 = arith.constant 1 : index
    %c0_413 = arith.constant 0 : index
    %c0_414 = arith.constant 0 : index
    %340 = vector.load %arg12[%c0_411, %c1_412, %c0_413, %c0_414] : memref<3x3x32x4xf32, #tpu.memory_space<vmem>>, vector<1x1x32x4xf32>
    %341 = vector.shape_cast %340 : vector<1x1x32x4xf32> to vector<32x4xf32>
    %cst_415 = arith.constant dense<0.000000e+00> : vector<256x4xf32>
    %342 = tpu.matmul %339, %341, %cst_415 {dimension_numbers = #tpu.dot_dimension_numbers<[1], [0], [0], [1], [0, 0, 1, 1], [], []>} : vector<256x32xf32>, vector<32x4xf32>, vector<256x4xf32> -> vector<256x4xf32>
    %343 = arith.addf %337, %342 : vector<256x4xf32>
    %c0_416 = arith.constant 0 : index
    %c9_417 = arith.constant 9 : index
    %c0_418 = arith.constant 0 : index
    %344 = vector.load %arg15[%c0_416, %c9_417, %c0_418] : memref<18x25x32xf32, #tpu.memory_space<vmem>>, vector<16x16x32xf32>
    %345 = vector.shape_cast %344 : vector<16x16x32xf32> to vector<256x32xf32>
    %c0_419 = arith.constant 0 : index
    %c2_420 = arith.constant 2 : index
    %c0_421 = arith.constant 0 : index
    %c0_422 = arith.constant 0 : index
    %346 = vector.load %arg12[%c0_419, %c2_420, %c0_421, %c0_422] : memref<3x3x32x4xf32, #tpu.memory_space<vmem>>, vector<1x1x32x4xf32>
    %347 = vector.shape_cast %346 : vector<1x1x32x4xf32> to vector<32x4xf32>
    %cst_423 = arith.constant dense<0.000000e+00> : vector<256x4xf32>
    %348 = tpu.matmul %345, %347, %cst_423 {dimension_numbers = #tpu.dot_dimension_numbers<[1], [0], [0], [1], [0, 0, 1, 1], [], []>} : vector<256x32xf32>, vector<32x4xf32>, vector<256x4xf32> -> vector<256x4xf32>
    %349 = arith.addf %343, %348 : vector<256x4xf32>
    %c1_424 = arith.constant 1 : index
    %c7_425 = arith.constant 7 : index
    %c0_426 = arith.constant 0 : index
    %350 = vector.load %arg15[%c1_424, %c7_425, %c0_426] : memref<18x25x32xf32, #tpu.memory_space<vmem>>, vector<16x16x32xf32>
    %351 = vector.shape_cast %350 : vector<16x16x32xf32> to vector<256x32xf32>
    %c1_427 = arith.constant 1 : index
    %c0_428 = arith.constant 0 : index
    %c0_429 = arith.constant 0 : index
    %c0_430 = arith.constant 0 : index
    %352 = vector.load %arg12[%c1_427, %c0_428, %c0_429, %c0_430] : memref<3x3x32x4xf32, #tpu.memory_space<vmem>>, vector<1x1x32x4xf32>
    %353 = vector.shape_cast %352 : vector<1x1x32x4xf32> to vector<32x4xf32>
    %cst_431 = arith.constant dense<0.000000e+00> : vector<256x4xf32>
    %354 = tpu.matmul %351, %353, %cst_431 {dimension_numbers = #tpu.dot_dimension_numbers<[1], [0], [0], [1], [0, 0, 1, 1], [], []>} : vector<256x32xf32>, vector<32x4xf32>, vector<256x4xf32> -> vector<256x4xf32>
    %355 = arith.addf %349, %354 : vector<256x4xf32>
    %c1_432 = arith.constant 1 : index
    %c8_433 = arith.constant 8 : index
    %c0_434 = arith.constant 0 : index
    %356 = vector.load %arg15[%c1_432, %c8_433, %c0_434] : memref<18x25x32xf32, #tpu.memory_space<vmem>>, vector<16x16x32xf32>
    %357 = vector.shape_cast %356 : vector<16x16x32xf32> to vector<256x32xf32>
    %c1_435 = arith.constant 1 : index
    %c1_436 = arith.constant 1 : index
    %c0_437 = arith.constant 0 : index
    %c0_438 = arith.constant 0 : index
    %358 = vector.load %arg12[%c1_435, %c1_436, %c0_437, %c0_438] : memref<3x3x32x4xf32, #tpu.memory_space<vmem>>, vector<1x1x32x4xf32>
    %359 = vector.shape_cast %358 : vector<1x1x32x4xf32> to vector<32x4xf32>
    %cst_439 = arith.constant dense<0.000000e+00> : vector<256x4xf32>
    %360 = tpu.matmul %357, %359, %cst_439 {dimension_numbers = #tpu.dot_dimension_numbers<[1], [0], [0], [1], [0, 0, 1, 1], [], []>} : vector<256x32xf32>, vector<32x4xf32>, vector<256x4xf32> -> vector<256x4xf32>
    %361 = arith.addf %355, %360 : vector<256x4xf32>
    %c1_440 = arith.constant 1 : index
    %c9_441 = arith.constant 9 : index
    %c0_442 = arith.constant 0 : index
    %362 = vector.load %arg15[%c1_440, %c9_441, %c0_442] : memref<18x25x32xf32, #tpu.memory_space<vmem>>, vector<16x16x32xf32>
    %363 = vector.shape_cast %362 : vector<16x16x32xf32> to vector<256x32xf32>
    %c1_443 = arith.constant 1 : index
    %c2_444 = arith.constant 2 : index
    %c0_445 = arith.constant 0 : index
    %c0_446 = arith.constant 0 : index
    %364 = vector.load %arg12[%c1_443, %c2_444, %c0_445, %c0_446] : memref<3x3x32x4xf32, #tpu.memory_space<vmem>>, vector<1x1x32x4xf32>
    %365 = vector.shape_cast %364 : vector<1x1x32x4xf32> to vector<32x4xf32>
    %cst_447 = arith.constant dense<0.000000e+00> : vector<256x4xf32>
    %366 = tpu.matmul %363, %365, %cst_447 {dimension_numbers = #tpu.dot_dimension_numbers<[1], [0], [0], [1], [0, 0, 1, 1], [], []>} : vector<256x32xf32>, vector<32x4xf32>, vector<256x4xf32> -> vector<256x4xf32>
    %367 = arith.addf %361, %366 : vector<256x4xf32>
    %c2_448 = arith.constant 2 : index
    %c7_449 = arith.constant 7 : index
    %c0_450 = arith.constant 0 : index
    %368 = vector.load %arg15[%c2_448, %c7_449, %c0_450] : memref<18x25x32xf32, #tpu.memory_space<vmem>>, vector<16x16x32xf32>
    %369 = vector.shape_cast %368 : vector<16x16x32xf32> to vector<256x32xf32>
    %c2_451 = arith.constant 2 : index
    %c0_452 = arith.constant 0 : index
    %c0_453 = arith.constant 0 : index
    %c0_454 = arith.constant 0 : index
    %370 = vector.load %arg12[%c2_451, %c0_452, %c0_453, %c0_454] : memref<3x3x32x4xf32, #tpu.memory_space<vmem>>, vector<1x1x32x4xf32>
    %371 = vector.shape_cast %370 : vector<1x1x32x4xf32> to vector<32x4xf32>
    %cst_455 = arith.constant dense<0.000000e+00> : vector<256x4xf32>
    %372 = tpu.matmul %369, %371, %cst_455 {dimension_numbers = #tpu.dot_dimension_numbers<[1], [0], [0], [1], [0, 0, 1, 1], [], []>} : vector<256x32xf32>, vector<32x4xf32>, vector<256x4xf32> -> vector<256x4xf32>
    %373 = arith.addf %367, %372 : vector<256x4xf32>
    %c2_456 = arith.constant 2 : index
    %c8_457 = arith.constant 8 : index
    %c0_458 = arith.constant 0 : index
    %374 = vector.load %arg15[%c2_456, %c8_457, %c0_458] : memref<18x25x32xf32, #tpu.memory_space<vmem>>, vector<16x16x32xf32>
    %375 = vector.shape_cast %374 : vector<16x16x32xf32> to vector<256x32xf32>
    %c2_459 = arith.constant 2 : index
    %c1_460 = arith.constant 1 : index
    %c0_461 = arith.constant 0 : index
    %c0_462 = arith.constant 0 : index
    %376 = vector.load %arg12[%c2_459, %c1_460, %c0_461, %c0_462] : memref<3x3x32x4xf32, #tpu.memory_space<vmem>>, vector<1x1x32x4xf32>
    %377 = vector.shape_cast %376 : vector<1x1x32x4xf32> to vector<32x4xf32>
    %cst_463 = arith.constant dense<0.000000e+00> : vector<256x4xf32>
    %378 = tpu.matmul %375, %377, %cst_463 {dimension_numbers = #tpu.dot_dimension_numbers<[1], [0], [0], [1], [0, 0, 1, 1], [], []>} : vector<256x32xf32>, vector<32x4xf32>, vector<256x4xf32> -> vector<256x4xf32>
    %379 = arith.addf %373, %378 : vector<256x4xf32>
    %c2_464 = arith.constant 2 : index
    %c9_465 = arith.constant 9 : index
    %c0_466 = arith.constant 0 : index
    %380 = vector.load %arg15[%c2_464, %c9_465, %c0_466] : memref<18x25x32xf32, #tpu.memory_space<vmem>>, vector<16x16x32xf32>
    %381 = vector.shape_cast %380 : vector<16x16x32xf32> to vector<256x32xf32>
    %c2_467 = arith.constant 2 : index
    %c2_468 = arith.constant 2 : index
    %c0_469 = arith.constant 0 : index
    %c0_470 = arith.constant 0 : index
    %382 = vector.load %arg12[%c2_467, %c2_468, %c0_469, %c0_470] : memref<3x3x32x4xf32, #tpu.memory_space<vmem>>, vector<1x1x32x4xf32>
    %383 = vector.shape_cast %382 : vector<1x1x32x4xf32> to vector<32x4xf32>
    %cst_471 = arith.constant dense<0.000000e+00> : vector<256x4xf32>
    %384 = tpu.matmul %381, %383, %cst_471 {dimension_numbers = #tpu.dot_dimension_numbers<[1], [0], [0], [1], [0, 0, 1, 1], [], []>} : vector<256x32xf32>, vector<32x4xf32>, vector<256x4xf32> -> vector<256x4xf32>
    %385 = arith.addf %379, %384 : vector<256x4xf32>
    %c0_472 = arith.constant 0 : index
    %c0_473 = arith.constant 0 : index
    %386 = vector.load %arg13[%c0_472, %c0_473] : memref<1x4xf32, #tpu.memory_space<vmem>>, vector<1x4xf32>
    %387 = vector.broadcast %386 : vector<1x4xf32> to vector<256x4xf32>
    %388 = arith.addf %385, %387 : vector<256x4xf32>
    %389 = vector.broadcast %11 : vector<256x1xf32> to vector<256x4xf32>
    %390 = vector.broadcast %16 : vector<1x4xf32> to vector<256x4xf32>
    %391 = arith.mulf %389, %390 : vector<256x4xf32>
    %392 = arith.addf %388, %391 : vector<256x4xf32>
    %393 = vector.extract_strided_slice %392 {offsets = [0, 0], sizes = [256, 2], strides = [1, 1]} : vector<256x4xf32> to vector<256x2xf32>
    %394 = vector.extract_strided_slice %392 {offsets = [0, 2], sizes = [256, 2], strides = [1, 1]} : vector<256x4xf32> to vector<256x2xf32>
    %395 = arith.mulf %393, %393 : vector<256x2xf32>
    %396 = arith.mulf %394, %394 : vector<256x2xf32>
    %397 = arith.addf %395, %396 : vector<256x2xf32>
    %398 = math.sqrt %397 : vector<256x2xf32>
    %399 = vector.broadcast %10 : vector<1x1xf32> to vector<256x2xf32>
    %400 = arith.mulf %398, %399 : vector<256x2xf32>
    %c0_474 = arith.constant 0 : index
    %c0_475 = arith.constant 0 : index
    %c0_476 = arith.constant 0 : index
    %401 = vector.load %arg14[%c0_474, %c0_475, %c0_476] : memref<1x256x2xf32, #tpu.memory_space<vmem>>, vector<1x256x2xf32>
    %402 = vector.shape_cast %401 : vector<1x256x2xf32> to vector<256x2xf32>
    %403 = vector.shape_cast %400 : vector<256x2xf32> to vector<1x256x2xf32>
    tpu.vector_store %arg14[%c0_474, %c0_475, %c0_476], %403 {strides = array<i32>} : memref<1x256x2xf32, #tpu.memory_space<vmem>>, vector<1x256x2xf32>,
    return
  }
  func.func @transform_0(%arg0: i32) -> (i32, i32, i32) {
    %c0_i32 = arith.constant 0 : i32
    %c0_i32_0 = arith.constant 0 : i32
    %c0_i32_1 = arith.constant 0 : i32
    return %arg0, %c0_i32, %c0_i32_0 : i32, i32, i32
  }
  func.func @transform_1(%arg0: i32) -> (i32, i32, i32, i32) {
    %c0_i32 = arith.constant 0 : i32
    %c0_i32_0 = arith.constant 0 : i32
    %c0_i32_1 = arith.constant 0 : i32
    %c0_i32_2 = arith.constant 0 : i32
    %c0_i32_3 = arith.constant 0 : i32
    return %c0_i32, %c0_i32_0, %c0_i32_1, %c0_i32_2 : i32, i32, i32, i32
  }
  func.func @transform_2(%arg0: i32) -> (i32, i32) {
    %c0_i32 = arith.constant 0 : i32
    %c0_i32_0 = arith.constant 0 : i32
    %c0_i32_1 = arith.constant 0 : i32
    return %c0_i32, %c0_i32_0 : i32, i32
  }
  func.func @transform_3(%arg0: i32) -> (i32, i32, i32, i32) {
    %c0_i32 = arith.constant 0 : i32
    %c0_i32_0 = arith.constant 0 : i32
    %c0_i32_1 = arith.constant 0 : i32
    %c0_i32_2 = arith.constant 0 : i32
    %c0_i32_3 = arith.constant 0 : i32
    return %c0_i32, %c0_i32_0, %c0_i32_1, %c0_i32_2 : i32, i32, i32, i32
  }
  func.func @transform_4(%arg0: i32) -> (i32, i32) {
    %c0_i32 = arith.constant 0 : i32
    %c0_i32_0 = arith.constant 0 : i32
    %c0_i32_1 = arith.constant 0 : i32
    return %c0_i32, %c0_i32_0 : i32, i32
  }
  func.func @transform_5(%arg0: i32) -> (i32, i32, i32, i32) {
    %c0_i32 = arith.constant 0 : i32
    %c0_i32_0 = arith.constant 0 : i32
    %c0_i32_1 = arith.constant 0 : i32
    %c0_i32_2 = arith.constant 0 : i32
    %c0_i32_3 = arith.constant 0 : i32
    return %c0_i32, %c0_i32_0, %c0_i32_1, %c0_i32_2 : i32, i32, i32, i32
  }
  func.func @transform_6(%arg0: i32) -> (i32, i32) {
    %c0_i32 = arith.constant 0 : i32
    %c0_i32_0 = arith.constant 0 : i32
    %c0_i32_1 = arith.constant 0 : i32
    return %c0_i32, %c0_i32_0 : i32, i32
  }
  func.func @transform_7(%arg0: i32) -> (i32, i32, i32, i32) {
    %c0_i32 = arith.constant 0 : i32
    %c0_i32_0 = arith.constant 0 : i32
    %c0_i32_1 = arith.constant 0 : i32
    %c0_i32_2 = arith.constant 0 : i32
    %c0_i32_3 = arith.constant 0 : i32
    return %c0_i32, %c0_i32_0, %c0_i32_1, %c0_i32_2 : i32, i32, i32, i32
  }
  func.func @transform_8(%arg0: i32) -> (i32, i32) {
    %c0_i32 = arith.constant 0 : i32
    %c0_i32_0 = arith.constant 0 : i32
    %c0_i32_1 = arith.constant 0 : i32
    return %c0_i32, %c0_i32_0 : i32, i32
  }
  func.func @transform_9(%arg0: i32) -> (i32, i32, i32, i32) {
    %c0_i32 = arith.constant 0 : i32
    %c0_i32_0 = arith.constant 0 : i32
    %c0_i32_1 = arith.constant 0 : i32
    %c0_i32_2 = arith.constant 0 : i32
    %c0_i32_3 = arith.constant 0 : i32
    return %c0_i32, %c0_i32_0, %c0_i32_1, %c0_i32_2 : i32, i32, i32, i32
  }
  func.func @transform_10(%arg0: i32) -> (i32, i32) {
    %c0_i32 = arith.constant 0 : i32
    %c0_i32_0 = arith.constant 0 : i32
    %c0_i32_1 = arith.constant 0 : i32
    return %c0_i32, %c0_i32_0 : i32, i32
  }
  func.func @transform_11(%arg0: i32) -> (i32, i32, i32, i32) {
    %c0_i32 = arith.constant 0 : i32
    %c0_i32_0 = arith.constant 0 : i32
    %c0_i32_1 = arith.constant 0 : i32
    %c0_i32_2 = arith.constant 0 : i32
    %c0_i32_3 = arith.constant 0 : i32
    return %c0_i32, %c0_i32_0, %c0_i32_1, %c0_i32_2 : i32, i32, i32, i32
  }
  func.func @transform_12(%arg0: i32) -> (i32, i32) {
    %c0_i32 = arith.constant 0 : i32
    %c0_i32_0 = arith.constant 0 : i32
    %c0_i32_1 = arith.constant 0 : i32
    return %c0_i32, %c0_i32_0 : i32, i32
  }
  func.func @transform_13(%arg0: i32) -> (i32, i32, i32) {
    %c0_i32 = arith.constant 0 : i32
    %c0_i32_0 = arith.constant 0 : i32
    %c0_i32_1 = arith.constant 0 : i32
    return %arg0, %c0_i32, %c0_i32_0 : i32, i32, i32
  }
}

</mosaic_0001>

<bundles_post_ra>
// kernel: _lambda_.1
= control target key start
LH: loop header
LB: loop body
LE: loop exit
PB: predicated region body
PF: predicated region fallthrough
CT: control target
= control target key end

     0   :  { %s38336_s0 = inlined_call_operand.vmem [shape: f32[2,256,4], index: 0, kind: input, shape index: {}]   ;;  %s38337_s1 = inlined_call_operand.vmem [shape: f32[3,3,4,32], index: 1, kind: input, shape index: {}]   ;;  %s38338_s2 = inlined_call_operand.vmem [shape: f32[1,32], index: 2, kind: input, shape index: {}]   ;;  %s38339_s3 = inlined_call_operand.hbm [shape: f32[3,3,32,32], index: 3, kind: input, shape index: {}]   ;;  %s38340_s4 = inlined_call_operand.vmem [shape: f32[1,32], index: 4, kind: input, shape index: {}]   ;;  %s38341_s5 = inlined_call_operand.hbm [shape: f32[3,3,32,4], index: 5, kind: input, shape index: {}]   ;;  %s38342_s6 = inlined_call_operand.vmem [shape: f32[1,4], index: 6, kind: input, shape index: {}]   ;;  %s38343_s7 = inlined_call_operand.vmem [shape: f32[3,3,4,32], index: 7, kind: input, shape index: {}]   ;;  %s38344_s8 = inlined_call_operand.vmem [shape: f32[1,32], index: 8, kind: input, shape index: {}]   ;;  %s38345_s9 = inlined_call_operand.vmem [shape: f32[3,3,32,32], index: 9, kind: input, shape index: {}]   ;;  %s38346_s10 = inlined_call_operand.hbm [shape: f32[1,32], index: 10, kind: input, shape index: {}]   ;;  %s38347_s11 = inlined_call_operand.vmem [shape: f32[3,3,32,4], index: 11, kind: input, shape index: {}]   ;;  %s38348_s12 = inlined_call_operand.hbm [shape: f32[1,4], index: 12, kind: input, shape index: {}]   ;;  %s38349_s13 = inlined_call_operand.vmem [shape: f32[2,256,2], index: 13, kind: output, shape index: {}]  }
   0x1   :  { %38800 = sst [smem:[#allocation81_spill]] %s38347_s11 }
   0x2   :  { %38801 = sst [smem:[#allocation82_spill]] %s38349_s13 }
   0x3   :  { %18 = vsyncpa [#allocation4], 0 }
   0x4   :  { %19 = vsyncpa [#allocation6], 0 }
   0x5   :  { %20 = vsyncpa [#allocation9], 0  ;;  %s31593_s25 = smov 0  }
   0x6 LB: > { %38802 = sst [smem:[#allocation13_spill]] %s31512_s25  ;;  %s31599_s26 = sadd.s32 4294967295, %s31512_s25   ;;  %s31512_s25 = sphi %s31593_s25, %s26_s25  }
   0x7   : > { %p22778_p0 = scmp.ge.s32.totalorder %s31512_s25, 1  ;;  %p335_p1 = scmp.lt.s32.totalorder %s31512_s25, 3 }
   0x8   : > { %p38352_p2 = scmp.eq.s32.totalorder %s31599_s26, 0  ;;  %s31514_s28 = smov [#allocation5]  }
   0x9   : > { %p31604_p3 = pnand %p22778_p0, %p335_p1  ;;  %s369_s29 = sshll.u32 %s31514_s28, 4  ;;  %s31608_s29 = int_to_ptr.vmem [resolvable:$true] %s369_s29 }
   0xa   : > { %s31515_s30 = smov [#allocation3]   ;;  %s31516_s16 = smov [#allocation7]  }
   0xb   : > { %s38803_s27 = scalar_select %p31604_p3, 1, 0 }
   0xc   : > { %p31276_p4 = pneg %p31604_p3  ;;  %s353_s14 = sshll.u32 %s31515_s30, 4  ;;  %s31612_s14 = int_to_ptr.vmem [resolvable:$true] %s353_s14 }
   0xd   : > { %s395_s17 = sshll.u32 %s31516_s16, 4  ;;  %s31517_s18 = smov [#allocation8]   ;;  %s31620_s17 = int_to_ptr.vmem [resolvable:$true] %s395_s17 }
   0xe   : > { %p31616_p5 = pnand %p38352_p2, %p31276_p4  ;;  %s31622_s19 = sshll.u32 %s31517_s18, 4  ;;  %s410_s19 = int_to_ptr.vmem [resolvable:$true] %s31622_s19 }
   0xf   : > { %s31382_s22 = scalar_lea.hbm %s38341_s5, 4608 }
  0x10   : > { %p31383_p6 = scmp.ne.s32.totalorder %s38341_s5, %s31382_s22  ;;  %p31632_p7 = pneg %p31616_p5 }
  0x11   : > { %p31389_p10 = scmp.lt.u32.totalorder %s31382_s22, %s38341_s5 }
  0x12   : > { %p31385_p8 = pnand %p31632_p7, %p31383_p6 }
  0x14   : > { %p31386_p9 = pneg %p31385_p8 }
  0x16   : > { %p31391_p11 = pnand %p31389_p10, %p31386_p9 }
  0x18   : > { %31394 = shalt.err (!%p31391_p11)
}
  0x19   : > { %s31395_s18 = scalar_lea.vmem %s31608_s29, 4608  ;;  %p31403_p1 = scmp.lt.s32.totalorder %s31608_s29, %s31608_s29 }
  0x1a   : > { %p31396_p12 = scmp.ne.s32.totalorder %s31608_s29, %s31395_s18  ;;  %p31404_p4 = scmp.lt.s32.totalorder %s31395_s18, %s31395_s18 }
  0x1c   : > { %p31398_p13 = pnand %p31396_p12, %p31632_p7  ;;  %p31405_p6 = por %p31404_p4, %p31403_p1 }
  0x1e   : > { %p31399_p0 = pneg %p31398_p13 }
  0x20   : > { %p31406_p8 = pnand %p31405_p6, %p31399_p0 }
  0x22   : > { %31409 = shalt.err (!%p31406_p8)
}
  0x23   : > { %s31518_s20 = smov 128   ;;  %s31519_s21 = smov 8  }
  0x24   : > { %31282 = dma.hbm_to_vmem [thread:$0]  (!%p31616_p5), %s38341_s5, 4608, %s31608_s29, [#allocation6], %s31518_s20, %s31518_s20, %s31519_s21  }
  0x25   : > { %s31410_s16 = scalar_lea.hbm %s38339_s3, 4608 }
  0x26   : > { %p31411_p9 = scmp.ne.s32.totalorder %s38339_s3, %s31410_s16  ;;  %p31417_p12 = scmp.lt.u32.totalorder %s31410_s16, %s38339_s3 }
  0x28   : > { %p31413_p10 = pnand %p31411_p9, %p31632_p7 }
  0x2a   : > { %p31414_p11 = pneg %p31413_p10 }
  0x2c   : > { %p31419_p13 = pnand %p31417_p12, %p31414_p11 }
  0x2e   : > { %31422 = shalt.err (!%p31419_p13)
}
  0x2f   : > { %s31423_s29 = scalar_lea.vmem %s31612_s14, 4608  ;;  %p31431_p6 = scmp.lt.s32.totalorder %s31612_s14, %s31612_s14 }
  0x30   : > { %p31424_p0 = scmp.ne.s32.totalorder %s31612_s14, %s31423_s29  ;;  %p31432_p8 = scmp.lt.s32.totalorder %s31423_s29, %s31423_s29 }
  0x32   : > { %p31426_p1 = pnand %p31424_p0, %p31632_p7  ;;  %p31433_p9 = por %p31432_p8, %p31431_p6 }
  0x34   : > { %p31427_p4 = pneg %p31426_p1 }
  0x36   : > { %p31434_p10 = pnand %p31433_p9, %p31427_p4 }
  0x38   : > { %31437 = shalt.err (!%p31434_p10)
}
  0x39   : > { %31279 = dma.hbm_to_vmem [thread:$0]  (!%p31616_p5), %s38339_s3, 4608, %s31612_s14, [#allocation4], %s31518_s20, %s31518_s20, %s31519_s21  }
  0x3a   : > { %s31438_s23 = scalar_lea.hbm %s38346_s10, 16 }
  0x3b   : > { %p31439_p11 = scmp.ne.s32.totalorder %s38346_s10, %s31438_s23  ;;  %p31445_p0 = scmp.lt.u32.totalorder %s31438_s23, %s38346_s10 }
  0x3d   : > { %p31441_p12 = pnand %p31439_p11, %p31632_p7 }
  0x3f   : > { %p31442_p13 = pneg %p31441_p12 }
  0x41   : > { %p31447_p1 = pnand %p31445_p0, %p31442_p13 }
  0x43   : > { %31450 = shalt.err (!%p31447_p1)
}
  0x44   : > { %s31451_s14 = scalar_lea.vmem %s31620_s17, 16  ;;  %s31458_s20 = scalar_lea.vmem %s31620_s17, 32 }
  0x45   : > { %p31452_p4 = scmp.ne.s32.totalorder %s31620_s17, %s31451_s14  ;;  %p31459_p9 = scmp.lt.s32.totalorder %s31620_s17, %s31620_s17 }
  0x46   : > { %p31460_p10 = scmp.lt.s32.totalorder %s31458_s20, %s31451_s14 }
  0x47   : > { %p31454_p6 = pnand %p31452_p4, %p31632_p7 }
  0x48   : > { %p31461_p11 = por %p31460_p10, %p31459_p9 }
  0x49   : > { %p31455_p8 = pneg %p31454_p6 }
  0x4b   : > { %p31462_p12 = pnand %p31461_p11, %p31455_p8 }
  0x4d   : > { %31465 = shalt.err (!%p31462_p12)
}
  0x4e   : > { %31285 = dma.hbm_to_vmem [thread:$0]  (!%p31616_p5), %s38346_s10, 16, %s31620_s17, [#allocation6]  }
  0x4f   : > { %s31466_s25 = scalar_lea.hbm %s38348_s12, 16 }
  0x50   : > { %p31467_p13 = scmp.ne.s32.totalorder %s38348_s12, %s31466_s25  ;;  %p31473_p4 = scmp.lt.u32.totalorder %s31466_s25, %s38348_s12 }
  0x52   : > { %p31469_p0 = pnand %p31467_p13, %p31632_p7 }
  0x54   : > { %p31470_p1 = pneg %p31469_p0 }
  0x56   : > { %p31475_p6 = pnand %p31473_p4, %p31470_p1 }
  0x58   : > { %31478 = shalt.err (!%p31475_p6)
}
  0x59   : > { %s31479_s16 = scalar_lea.vmem %s410_s19, 16  ;;  %s31486_s17 = scalar_lea.vmem %s410_s19, 32 }
  0x5a   : > { %p31480_p8 = scmp.ne.s32.totalorder %s410_s19, %s31479_s16  ;;  %p31487_p11 = scmp.lt.s32.totalorder %s410_s19, %s410_s19 }
  0x5b   : > { %p31488_p12 = scmp.lt.s32.totalorder %s31486_s17, %s31479_s16 }
  0x5c   : > { %p31482_p9 = pnand %p31480_p8, %p31632_p7 }
  0x5d   : > { %p31489_p2 = por %p31488_p12, %p31487_p11 }
  0x5e   : > { %p31483_p10 = pneg %p31482_p9 }
  0x60   : > { %p31490_p3 = pnand %p31489_p2, %p31483_p10 }
  0x62   : > { %31493 = shalt.err (!%p31490_p3)
}
  0x63   : > { %31288 = dma.hbm_to_vmem [thread:$0]  (!%p31616_p5), %s38348_s12, 16, %s410_s19, [#allocation9]  }
  0x64   : > { %p38806_p13 = scmp.ne.s32.totalorder %s38803_s27, 0 }
  0x66   : > { %430 = sbr.rel (%p38806_p13) target bundleno = 4793 (0x12b9), region = 72 }
  0x6d   : > { %p38807_p0 = scmp.eq.s32.totalorder %s31599_s26, 0 }
  0x6f   : > { %31499 = dma.done.wait (%p38807_p0), [#allocation4], 4608   ;;  %p38808_p7 = pmov %p38807_p0 }
  0x70   : > { %p38809_p1 = pmov %p38807_p0 }
  0x71   : > { %31501 = vsyncadd (%p38808_p7), [#allocation4], 4294962688 }
  0x72   : > { %31503 = dma.done.wait (%p38809_p1), [#allocation6], 4624   ;;  %p38810_p2 = pmov %p38807_p0 }
  0x73   : > { %p38811_p3 = pmov %p38807_p0 }
  0x74   : > { %31505 = vsyncadd (%p38810_p2), [#allocation6], 4294962672 }
  0x75   : > { %31507 = dma.done.wait (%p38811_p3), [#allocation9], 16   ;;  %p38812_p5 = pmov %p38807_p0 }
  0x76   : > { %vm496_vm0 = vcmask 261120   ;;  %v38354_v0 = vmov 0.0   ;;  %p486_p4 = scmp.lt.s32.totalorder %s31599_s26, 1  ;;  %vm907_vm1 = vcmask 1043456   ;;  %vm602_vm2 = vcmask 31744   ;;  %s31522_s22 = smov 126  }
  0x77   : > { %31509 = vsyncadd (%p38812_p5), [#allocation9], 4294967280  ;;  %498 = vst.msk [vmem:[#allocation2 + $0x8] sm:$0xff] %vm496_vm0, %v38354_v0  ;;  %v22794_v1 = vld [vmem:[%s38337_s1 + $0x4] sm:$0xf]  ;;  %vm500_vm3 = vcmask 253952  }
  0x78   : > { %497 = vst.msk [vmem:[#allocation2] sm:$0xff] %vm496_vm0, %v38354_v0  ;;  %499 = vst.msk [vmem:[#allocation2 + $0x10] sm:$0xff] %vm496_vm0, %v38354_v0  ;;  %s39412_s26 = smov (!%p486_p4, %s31599_s26), 1  ;;  %v776_v2 = vld [vmem:[%s38337_s1] sm:$0xf]  ;;  %26520 = vmatprep.subr.msk.mxu0 %vm907_vm1, %v22794_v1  ;;  %s39409_s30 = sld [smem:[#allocation82_spill]] }
  0x79   : > { %502 = vst.msk [vmem:[#allocation2 + $0x20] sm:$0xff] %vm496_vm0, %v38354_v0  ;;  %503 = vst.msk [vmem:[#allocation2 + $0x28] sm:$0xff] %vm496_vm0, %v38354_v0  ;;  %s24628_s27 = sshll.u32 %s39412_s26, 8  ;;  %26521 = vmatpush3.msk.msra.mxu0 %vm907_vm1, %v22794_v1 }
  0x7a   : > { %504 = vst.msk [vmem:[#allocation2 + $0x30] sm:$0xff] %vm496_vm0, %v38354_v0  ;;  %506 = vst.msk [vmem:[#allocation2 + $0x40] sm:$0xff] %vm496_vm0, %v38354_v0  ;;  %s31851_s28 = scalar_lea.vmem %s38336_s0, %s24628_s27  ;;  %26570 = vmatprep.subr.msk.mxu0 %vm907_vm1, %v776_v2 }
  0x7b   : > { %507 = vst.msk [vmem:[#allocation2 + $0x48] sm:$0xff] %vm496_vm0, %v38354_v0  ;;  %508 = vst.msk [vmem:[#allocation2 + $0x50] sm:$0xff] %vm496_vm0, %v38354_v0  ;;  %v31860_v3 = vld [vmem:[%s31851_s28] sm:$0xff]  ;;  %v31864_v6 = vld [vmem:[%s31851_s28 + $0x8] sm:$0xff] }
  0x7c   : > { %510 = vst.msk [vmem:[#allocation2 + $0x60] sm:$0xff] %vm496_vm0, %v38354_v0  ;;  %511 = vst.msk [vmem:[#allocation2 + $0x68] sm:$0xff] %vm496_vm0, %v38354_v0  ;;  %v603_v7 = vsel %vm602_vm2, %v31860_v3, -inf  ;;  %v31871_v8 = vld [vmem:[%s31851_s28 + $0x10] sm:$0xff]  ;;  %v31874_v9 = vld [vmem:[%s31851_s28 + $0x18] sm:$0xff]  ;;  %v604_v11 = vsel %vm602_vm2, %v31864_v6, -inf }
  0x7d   : > { %512 = vst.msk [vmem:[#allocation2 + $0x70] sm:$0xff] %vm496_vm0, %v38354_v0  ;;  %514 = vst.msk [vmem:[#allocation2 + $0x80] sm:$0xff] %vm496_vm0, %v38354_v0  ;;  %v31877_v10 = vld [vmem:[%s31851_s28 + $0x20] sm:$0xff]  ;;  %v31884_v12 = vld [vmem:[%s31851_s28 + $0x28] sm:$0xff]  ;;  %v605_v15 = vsel %vm602_vm2, %v31871_v8, -inf  ;;  %v606_v16 = vsel %vm602_vm2, %v31874_v9, -inf }
  0x7e   : > { %515 = vst.msk [vmem:[#allocation2 + $0x88] sm:$0xff] %vm496_vm0, %v38354_v0  ;;  %516 = vst.msk [vmem:[#allocation2 + $0x90] sm:$0xff] %vm496_vm0, %v38354_v0  ;;  %v777_v4 = vld [vmem:[#allocation2 + $0x8] sm:$0xff]  ;;  %v31887_v13 = vld [vmem:[%s31851_s28 + $0x30] sm:$0xff]  ;;  %v607_v17 = vsel %vm602_vm2, %v31877_v10, -inf  ;;  %v609_v22 = vsel %vm602_vm2, %v31884_v12, -inf  ;;  %s38224_s16 = scalar_lea.vmem %s39409_s30, %s24628_s27 }
  0x7f   : > { %518 = vst.msk [vmem:[#allocation2 + $0xa0] sm:$0xff] %vm496_vm0, %v38354_v0  ;;  %519 = vst.msk [vmem:[#allocation2 + $0xa8] sm:$0xff] %vm496_vm0, %v38354_v0  ;;  %v778_v5 = vld [vmem:[#allocation2 + $0x10] sm:$0xff]  ;;  %26522 = vmatprep.mubr.msk.f32.mxu0 %vm602_vm2, %v777_v4  ;;  %v31890_v14 = vld [vmem:[%s31851_s28 + $0x38] sm:$0xff]  ;;  %v608_v21 = vmax.f32 %v603_v7, %v607_v17  ;;  %v611_v23 = vsel %vm602_vm2, %v31887_v13, -inf  ;;  %v610_v28 = vmax.f32 %v604_v11, %v609_v22 }
  0x80   : > { %520 = vst.msk [vmem:[#allocation2 + $0xb0] sm:$0xff] %vm496_vm0, %v38354_v0  ;;  %522 = vst.msk [vmem:[#allocation2 + $0xc0] sm:$0xff] %vm496_vm0, %v38354_v0  ;;  %26523 = vmatmul.mubr.msk.f32.vlgmr.msra.gmra.mrb[0].mxu0 %vm602_vm2, %v778_v5  ;;  %v31900_v18 = vld [vmem:[%s31851_s28 + $0x40] sm:$0xff]  ;;  %v31903_v19 = vld [vmem:[%s31851_s28 + $0x48] sm:$0xff]  ;;  %v613_v24 = vsel %vm602_vm2, %v31890_v14, -inf  ;;  %v612_v29 = vmax.f32 %v605_v15, %v611_v23 }
  0x81   : > { %523 = vst.msk [vmem:[#allocation2 + $0xc8] sm:$0xff] %vm496_vm0, %v38354_v0  ;;  %524 = vst.msk [vmem:[#allocation2 + $0xd0] sm:$0xff] %vm496_vm0, %v38354_v0  ;;  %26571 = vmatpush3.msk.msra.mxu0 %vm907_vm1, %v776_v2  ;;  %v31906_v20 = vld [vmem:[%s31851_s28 + $0x50] sm:$0xff]  ;;  %v31915_v25 = vld [vmem:[%s31851_s28 + $0x58] sm:$0xff]  ;;  %v614_v30 = vmax.f32 %v606_v16, %v613_v24  ;;  %v615_v31 = vsel %vm602_vm2, %v31900_v18, -inf  ;;  %v617_v36 = vsel %vm602_vm2, %v31903_v19, -inf }
  0x82   : > { %526 = vst.msk [vmem:[#allocation2 + $0xe0] sm:$0xff] %vm496_vm0, %v38354_v0  ;;  %527 = vst.msk [vmem:[#allocation2 + $0xe8] sm:$0xff] %vm496_vm0, %v38354_v0  ;;  %v31918_v26 = vld [vmem:[%s31851_s28 + $0x60] sm:$0xff]  ;;  %v31921_v27 = vld [vmem:[%s31851_s28 + $0x68] sm:$0xff]  ;;  %v616_v35 = vmax.f32 %v608_v21, %v615_v31  ;;  %v619_v37 = vsel %vm602_vm2, %v31906_v20, -inf  ;;  %v621_v38 = vsel %vm602_vm2, %v31915_v25, -inf  ;;  %v618_v42 = vmax.f32 %v610_v28, %v617_v36 }
  0x83   : > { %528 = vst.msk [vmem:[#allocation2 + $0xf0] sm:$0xff] %vm496_vm0, %v38354_v0  ;;  %530 = vst.msk [vmem:[#allocation2 + $0x100] sm:$0xff] %vm496_vm0, %v38354_v0  ;;  %v31926_v32 = vld [vmem:[%s31851_s28 + $0x70] sm:$0xff]  ;;  %v31929_v33 = vld [vmem:[%s31851_s28 + $0x78] sm:$0xff]  ;;  %v620_v43 = vmax.f32 %v612_v29, %v619_v37  ;;  %v622_v44 = vmax.f32 %v614_v30, %v621_v38  ;;  %v623_v45 = vsel %vm602_vm2, %v31918_v26, -inf  ;;  %v625_v48 = vsel %vm602_vm2, %v31921_v27, -inf }
  0x84   : > { %531 = vst.msk [vmem:[#allocation2 + $0x108] sm:$0xff] %vm496_vm0, %v38354_v0  ;;  %532 = vst.msk [vmem:[#allocation2 + $0x110] sm:$0xff] %vm496_vm0, %v38354_v0  ;;  %v31932_v34 = vld [vmem:[%s31851_s28 + $0x80] sm:$0xff]  ;;  %v31941_v39 = vld [vmem:[%s31851_s28 + $0x88] sm:$0xff]  ;;  %v624_v47 = vmax.f32 %v616_v35, %v623_v45  ;;  %v627_v49 = vsel %vm602_vm2, %v31926_v32, -inf  ;;  %v629_v50 = vsel %vm602_vm2, %v31929_v33, -inf  ;;  %v626_v54 = vmax.f32 %v618_v42, %v625_v48 }
  0x85   : > { %534 = vst.msk [vmem:[#allocation2 + $0x120] sm:$0xff] %vm496_vm0, %v38354_v0  ;;  %535 = vst.msk [vmem:[#allocation2 + $0x128] sm:$0xff] %vm496_vm0, %v38354_v0  ;;  %v31944_v40 = vld [vmem:[%s31851_s28 + $0x90] sm:$0xff]  ;;  %v31947_v41 = vld [vmem:[%s31851_s28 + $0x98] sm:$0xff]  ;;  %v628_v55 = vmax.f32 %v620_v43, %v627_v49  ;;  %v630_v56 = vmax.f32 %v622_v44, %v629_v50  ;;  %v631_v57 = vsel %vm602_vm2, %v31932_v34, -inf  ;;  %v633_v60 = vsel %vm602_vm2, %v31941_v39, -inf }
  0x86   : > { %536 = vst.msk [vmem:[#allocation2 + $0x130] sm:$0xff] %vm496_vm0, %v38354_v0  ;;  %538 = vst.msk [vmem:[#allocation2 + $0x140] sm:$0xff] %vm496_vm0, %v38354_v0  ;;  %v31952_v46 = vld [vmem:[%s31851_s28 + $0xa0] sm:$0xff]  ;;  %v31961_v51 = vld [vmem:[%s31851_s28 + $0xa8] sm:$0xff]  ;;  %v632_v59 = vmax.f32 %v624_v47, %v631_v57  ;;  %v635_v61 = vsel %vm602_vm2, %v31944_v40, -inf  ;;  %v637_v62 = vsel %vm602_vm2, %v31947_v41, -inf  ;;  %v634_v4 = vmax.f32 %v626_v54, %v633_v60 }
  0x87   : > { %539 = vst.msk [vmem:[#allocation2 + $0x148] sm:$0xff] %vm496_vm0, %v38354_v0  ;;  %540 = vst.msk [vmem:[#allocation2 + $0x150] sm:$0xff] %vm496_vm0, %v38354_v0  ;;  %v31964_v52 = vld [vmem:[%s31851_s28 + $0xb0] sm:$0xff]  ;;  %v31967_v53 = vld [vmem:[%s31851_s28 + $0xb8] sm:$0xff]  ;;  %v636_v5 = vmax.f32 %v628_v55, %v635_v61  ;;  %v638_v7 = vmax.f32 %v630_v56, %v637_v62  ;;  %v639_v11 = vsel %vm602_vm2, %v31952_v46, -inf  ;;  %v641_v17 = vsel %vm602_vm2, %v31961_v51, -inf }
  0x88   : > { %542 = vst.msk [vmem:[#allocation2 + $0x160] sm:$0xff] %vm496_vm0, %v38354_v0  ;;  %543 = vst.msk [vmem:[#allocation2 + $0x168] sm:$0xff] %vm496_vm0, %v38354_v0  ;;  %v31972_v58 = vld [vmem:[%s31851_s28 + $0xc0] sm:$0xff]  ;;  %v31981_v63 = vld [vmem:[%s31851_s28 + $0xc8] sm:$0xff]  ;;  %v640_v16 = vmax.f32 %v632_v59, %v639_v11  ;;  %v643_v21 = vsel %vm602_vm2, %v31964_v52, -inf  ;;  %v645_v22 = vsel %vm602_vm2, %v31967_v53, -inf  ;;  %v642_v30 = vmax.f32 %v634_v4, %v641_v17 }
  0x89   : > { %544 = vst.msk [vmem:[#allocation2 + $0x170] sm:$0xff] %vm496_vm0, %v38354_v0  ;;  %546 = vst.msk [vmem:[#allocation2 + $0x180] sm:$0xff] %vm496_vm0, %v38354_v0  ;;  %v31984_v1 = vld [vmem:[%s31851_s28 + $0xd0] sm:$0xff]  ;;  %v31987_v2 = vld [vmem:[%s31851_s28 + $0xd8] sm:$0xff]  ;;  %v644_v31 = vmax.f32 %v636_v5, %v643_v21  ;;  %v646_v35 = vmax.f32 %v638_v7, %v645_v22  ;;  %v647_v36 = vsel %vm602_vm2, %v31972_v58, -inf  ;;  %v649_v38 = vsel %vm602_vm2, %v31981_v63, -inf }
  0x8a   : > { %547 = vst.msk [vmem:[#allocation2 + $0x188] sm:$0xff] %vm496_vm0, %v38354_v0  ;;  %548 = vst.msk [vmem:[#allocation2 + $0x190] sm:$0xff] %vm496_vm0, %v38354_v0  ;;  %v31992_v15 = vld [vmem:[%s31851_s28 + $0xe0] sm:$0xff]  ;;  %v32003_v23 = vld [vmem:[%s38337_s1 + $0x8] sm:$0xf]  ;;  %v648_v37 = vmax.f32 %v640_v16, %v647_v36  ;;  %v651_v42 = vsel %vm602_vm2, %v31984_v1, -inf  ;;  %v650_v44 = vmax.f32 %v642_v30, %v649_v38 }
  0x8b   : > { %550 = vst.msk [vmem:[#allocation2 + $0x1a0] sm:$0xff] %vm496_vm0, %v38354_v0  ;;  %551 = vst.msk [vmem:[#allocation2 + $0x1a8] sm:$0xff] %vm496_vm0, %v38354_v0  ;;  %v32006_v24 = vld [vmem:[%s31851_s28 + $0xe8] sm:$0xff]  ;;  %v32009_v28 = vld [vmem:[%s31851_s28 + $0xf0] sm:$0xff]  ;;  %26620 = vmatprep.subr.msk.mxu0 %vm907_vm1, %v32003_v23  ;;  %v653_v43 = vsel %vm602_vm2, %v31987_v2, -inf  ;;  %v652_v45 = vmax.f32 %v644_v31, %v651_v42  ;;  %v655_v48 = vsel %vm602_vm2, %v31992_v15, -inf }
  0x8c   : > { %552 = vst.msk [vmem:[#allocation2 + $0x1b0] sm:$0xff] %vm496_vm0, %v38354_v0  ;;  %554 = vst.msk [vmem:[#allocation2 + $0x1c0] sm:$0xff] %vm496_vm0, %v38354_v0  ;;  %v601_v29 = vld [vmem:[%s31851_s28 + $0xf8] sm:$0xff]  ;;  %v654_v47 = vmax.f32 %v646_v35, %v653_v43  ;;  %v656_v49 = vmax.f32 %v648_v37, %v655_v48  ;;  %v657_v50 = vsel %vm602_vm2, %v32006_v24, -inf  ;;  %v659_v54 = vsel %vm602_vm2, %v32009_v28, -inf  ;;  %s39285_s28 = sld [smem:[#allocation81_spill]] }
  0x8d   : > { %555 = vst.msk [vmem:[#allocation2 + $0x1c8] sm:$0xff] %vm496_vm0, %v38354_v0  ;;  %556 = vst.msk [vmem:[#allocation2 + $0x1d0] sm:$0xff] %vm496_vm0, %v38354_v0  ;;  %v661_v55 = vsel %vm602_vm2, %v601_v29, -inf  ;;  %v658_v56 = vmax.f32 %v650_v44, %v657_v50  ;;  %v660_v57 = vmax.f32 %v652_v45, %v659_v54 }
  0x8e   : > { %558 = vst.msk [vmem:[#allocation2 + $0x1e0] sm:$0xff] %vm496_vm0, %v38354_v0  ;;  %559 = vst.msk [vmem:[#allocation2 + $0x1e8] sm:$0xff] %vm496_vm0, %v38354_v0  ;;  %v662_v59 = vmax.f32 %v654_v47, %v661_v55 }
  0x8f   : > { %560 = vst.msk [vmem:[#allocation2 + $0x1f0] sm:$0xff] %vm496_vm0, %v38354_v0  ;;  %562 = vst.msk [vmem:[#allocation2 + $0x200] sm:$0xff] %vm496_vm0, %v38354_v0  ;;  %v663_v60 = vmax.f32 %v656_v49, %v658_v56 }
  0x90   : > { %563 = vst.msk [vmem:[#allocation2 + $0x208] sm:$0xff] %vm496_vm0, %v38354_v0  ;;  %564 = vst.msk [vmem:[#allocation2 + $0x210] sm:$0xff] %vm496_vm0, %v38354_v0  ;;  %v664_v61 = vmax.f32 %v660_v57, %v662_v59 }
  0x91   : > { %566 = vst.msk [vmem:[#allocation2 + $0x220] sm:$0xff] %vm496_vm0, %v38354_v0  ;;  %567 = vst.msk [vmem:[#allocation2 + $0x228] sm:$0xff] %vm496_vm0, %v38354_v0 }
  0x92   : > { %568 = vst.msk [vmem:[#allocation2 + $0x230] sm:$0xff] %vm496_vm0, %v38354_v0  ;;  %v665_v62 = vmax.f32 %v663_v60, %v664_v61 }
  0x93   : > { %501 = vst.msk [vmem:[#allocation2 + $0x18] sm:$0x1] %vm500_vm3, %v38354_v0  ;;  %505 = vst.msk [vmem:[#allocation2 + $0x38] sm:$0x1] %vm500_vm3, %v38354_v0 }
  0x94   : > { %v666_v4 = vrot.slane %v665_v62, 4  ;;  %509 = vst.msk [vmem:[#allocation2 + $0x58] sm:$0x1] %vm500_vm3, %v38354_v0  ;;  %513 = vst.msk [vmem:[#allocation2 + $0x78] sm:$0x1] %vm500_vm3, %v38354_v0 }
  0x95   : > { %517 = vst.msk [vmem:[#allocation2 + $0x98] sm:$0x1] %vm500_vm3, %v38354_v0  ;;  %521 = vst.msk [vmem:[#allocation2 + $0xb8] sm:$0x1] %vm500_vm3, %v38354_v0 }
  0x96   : > { %v667_v5 = vmax.f32 %v665_v62, %v666_v4  ;;  %525 = vst.msk [vmem:[#allocation2 + $0xd8] sm:$0x1] %vm500_vm3, %v38354_v0  ;;  %529 = vst.msk [vmem:[#allocation2 + $0xf8] sm:$0x1] %vm500_vm3, %v38354_v0 }
  0x97   : > { %533 = vst.msk [vmem:[#allocation2 + $0x118] sm:$0x1] %vm500_vm3, %v38354_v0  ;;  %537 = vst.msk [vmem:[#allocation2 + $0x138] sm:$0x1] %vm500_vm3, %v38354_v0 }
  0x98   : > { %v668_v7 = vrot.slane %v667_v5, 2  ;;  %541 = vst.msk [vmem:[#allocation2 + $0x158] sm:$0x1] %vm500_vm3, %v38354_v0  ;;  %545 = vst.msk [vmem:[#allocation2 + $0x178] sm:$0x1] %vm500_vm3, %v38354_v0 }
  0x99   : > { %549 = vst.msk [vmem:[#allocation2 + $0x198] sm:$0x1] %vm500_vm3, %v38354_v0  ;;  %553 = vst.msk [vmem:[#allocation2 + $0x1b8] sm:$0x1] %vm500_vm3, %v38354_v0 }
  0x9a   : > { %v669_v11 = vmax.f32 %v667_v5, %v668_v7  ;;  %557 = vst.msk [vmem:[#allocation2 + $0x1d8] sm:$0x1] %vm500_vm3, %v38354_v0  ;;  %561 = vst.msk [vmem:[#allocation2 + $0x1f8] sm:$0x1] %vm500_vm3, %v38354_v0 }
  0x9b   : > { %565 = vst.msk [vmem:[#allocation2 + $0x218] sm:$0x1] %vm500_vm3, %v38354_v0  ;;  %569 = vst.msk [vmem:[#allocation2 + $0x238] sm:$0x1] %vm500_vm3, %v38354_v0 }
  0x9c   : > { %v670_v16 = vrot.slane %v669_v11, 1 }
  0x9e   : > { %v32029_v17 = vmax.f32 %v669_v11, %v670_v16 }
  0xa0   : > { %38813 = vst [vmem:[#allocation14_spill] sm:$0xff] %v32029_v17  ;;  %31316 = vrcp.f32 %v32029_v17 }
  0xaa   : > { %v32032_v21 = vpop.eup %31316 }
  0xab   : > { %v32072_v22 = vmul.f32 %v32032_v21, %v31860_v3  ;;  %v32075_v30 = vmul.f32 %v32032_v21, %v601_v29  ;;  %v32079_v31 = vmul.f32 %v32032_v21, %v31864_v6  ;;  %v32083_v35 = vmul.f32 %v32032_v21, %v31871_v8 }
  0xac   : > { %v32087_v36 = vmul.f32 %v32032_v21, %v31874_v9  ;;  %v32091_v37 = vmul.f32 %v32032_v21, %v31877_v10  ;;  %v32095_v3 = vmul.f32 %v32032_v21, %v31884_v12  ;;  %v32099_v6 = vmul.f32 %v32032_v21, %v31887_v13 }
  0xad   : > { %38814 = vst [vmem:[#allocation15_spill] sm:$0xff] %v32072_v22  ;;  %38815 = vst [vmem:[#allocation16_spill] sm:$0xff] %v32075_v30  ;;  %v32111_v8 = vmul.f32 %v32032_v21, %v31890_v14  ;;  %v32115_v9 = vmul.f32 %v32032_v21, %v31900_v18  ;;  %v32119_v10 = vmul.f32 %v32032_v21, %v31903_v19 }
  0xae   : > { %38816 = vst [vmem:[#allocation17_spill] sm:$0xff] %v32079_v31  ;;  %38817 = vst [vmem:[#allocation18_spill] sm:$0xff] %v32083_v35  ;;  %v32123_v12 = vmul.f32 %v32032_v21, %v31906_v20  ;;  %v32135_v13 = vmul.f32 %v32032_v21, %v31915_v25  ;;  %v32139_v14 = vmul.f32 %v32032_v21, %v31918_v26 }
  0xaf   : > { %38818 = vst [vmem:[#allocation19_spill] sm:$0xff] %v32087_v36  ;;  %38819 = vst [vmem:[#allocation20_spill] sm:$0xff] %v32091_v37  ;;  %v32143_v18 = vmul.f32 %v32032_v21, %v31921_v27  ;;  %v32147_v19 = vmul.f32 %v32032_v21, %v31926_v32  ;;  %v32159_v20 = vmul.f32 %v32032_v21, %v31929_v33 }
  0xb0   : > { %38820 = vst [vmem:[#allocation21_spill] sm:$0xff] %v32095_v3  ;;  %38821 = vst [vmem:[#allocation22_spill] sm:$0xff] %v32099_v6  ;;  %v32163_v25 = vmul.f32 %v32032_v21, %v31932_v34  ;;  %v32167_v26 = vmul.f32 %v32032_v21, %v31941_v39  ;;  %v32171_v27 = vmul.f32 %v32032_v21, %v31944_v40 }
  0xb1   : > { %712 = vst.msk [vmem:[#allocation2 + $0x28] sm:$0xff] %vm602_vm2, %v32072_v22  ;;  %743 = vst.msk [vmem:[#allocation2 + $0x210] sm:$0xff] %vm602_vm2, %v32075_v30  ;;  %v32183_v32 = vmul.f32 %v32032_v21, %v31947_v41  ;;  %v32187_v33 = vmul.f32 %v32032_v21, %v31952_v46  ;;  %v32191_v34 = vmul.f32 %v32032_v21, %v31961_v51  ;;  %v744_v30 = vld [vmem:[#allocation2 + $0x7] sm:$0xff] }
  0xb2   : > { %713 = vst.msk [vmem:[#allocation2 + $0x30] sm:$0xff] %vm602_vm2, %v32079_v31  ;;  %714 = vst.msk [vmem:[#allocation2 + $0x48] sm:$0xff] %vm602_vm2, %v32083_v35  ;;  %v32195_v39 = vmul.f32 %v32032_v21, %v31964_v52  ;;  %v32207_v40 = vmul.f32 %v32032_v21, %v31967_v53  ;;  %v32211_v41 = vmul.f32 %v32032_v21, %v31972_v58 }
  0xb3   : > { %38822 = vst [vmem:[#allocation23_spill] sm:$0xff] %v32111_v8  ;;  %38823 = vst [vmem:[#allocation24_spill] sm:$0xff] %v32115_v9  ;;  %v32215_v46 = vmul.f32 %v32032_v21, %v31981_v63  ;;  %v32219_v51 = vmul.f32 %v32032_v21, %v31984_v1  ;;  %v32231_v52 = vmul.f32 %v32032_v21, %v31987_v2 }
  0xb4   : > { %38824 = vst [vmem:[#allocation25_spill] sm:$0xff] %v32119_v10  ;;  %38825 = vst [vmem:[#allocation26_spill] sm:$0xff] %v32123_v12  ;;  %v32235_v53 = vmul.f32 %v32032_v21, %v31992_v15  ;;  %v32239_v58 = vmul.f32 %v32032_v21, %v32006_v24 }
  0xb5   : > { %715 = vst.msk [vmem:[#allocation2 + $0x50] sm:$0xff] %vm602_vm2, %v32087_v36  ;;  %716 = vst.msk [vmem:[#allocation2 + $0x68] sm:$0xff] %vm602_vm2, %v32091_v37  ;;  %v32490_v37 = vmul.f32 %v32032_v21, %v32009_v28  ;;  %v1460_v21 = vld [vmem:[#allocation2 + $0x9] sm:$0xff] }
  0xb6   : > { %717 = vst.msk [vmem:[#allocation2 + $0x70] sm:$0xff] %vm602_vm2, %v32095_v3  ;;  %718 = vst.msk [vmem:[#allocation2 + $0x88] sm:$0xff] %vm602_vm2, %v32099_v6 }
  0xb7   : > { %38826 = vst [vmem:[#allocation27_spill] sm:$0xff] %v32135_v13  ;;  %38827 = vst [vmem:[#allocation28_spill] sm:$0xff] %v32139_v14 }
  0xb8   : > { %38828 = vst [vmem:[#allocation29_spill] sm:$0xff] %v32143_v18  ;;  %38829 = vst [vmem:[#allocation30_spill] sm:$0xff] %v32147_v19  ;;  %v32249_v63 = vld [vmem:[#allocation2 + $0x28] sm:$0xff] }
  0xb9   : > { %719 = vst.msk [vmem:[#allocation2 + $0x90] sm:$0xff] %vm602_vm2, %v32111_v8  ;;  %720 = vst.msk [vmem:[#allocation2 + $0xa8] sm:$0xff] %vm602_vm2, %v32115_v9  ;;  %v32251_v1 = vld [vmem:[#allocation2 + $0x30] sm:$0xff]  ;;  %v32253_v2 = vld [vmem:[#allocation2 + $0x48] sm:$0xff]  ;;  %26525 = vmatprep.mubr.msk.f32.mxu0 %vm602_vm2, %v32249_v63 }
  0xba   : > { %721 = vst.msk [vmem:[#allocation2 + $0xb0] sm:$0xff] %vm602_vm2, %v32119_v10  ;;  %722 = vst.msk [vmem:[#allocation2 + $0xc8] sm:$0xff] %vm602_vm2, %v32123_v12  ;;  %26526 = vmatmul.mubr.msk.f32.gmra.mrb[2].mxu0 %vm602_vm2, %v32251_v1  ;;  %v32513_v22 = vld [vmem:[#allocation2 + $0x29] sm:$0xff] }
  0xbb   : > { %38830 = vst [vmem:[#allocation31_spill] sm:$0xff] %v32159_v20  ;;  %38831 = vst [vmem:[#allocation32_spill] sm:$0xff] %v32163_v25  ;;  %26528 = vmatprep.mubr.msk.f32.mxu0 %vm602_vm2, %v32253_v2 }
  0xbc   : > { %38832 = vst [vmem:[#allocation33_spill] sm:$0xff] %v32167_v26  ;;  %38833 = vst [vmem:[#allocation34_spill] sm:$0xff] %v32171_v27  ;;  %v32267_v15 = vld [vmem:[#allocation2 + $0x50] sm:$0xff]  ;;  %v32269_v24 = vld [vmem:[#allocation2 + $0x68] sm:$0xff] }
  0xbd   : > { %723 = vst.msk [vmem:[#allocation2 + $0xd0] sm:$0xff] %vm602_vm2, %v32135_v13  ;;  %724 = vst.msk [vmem:[#allocation2 + $0xe8] sm:$0xff] %vm602_vm2, %v32139_v14  ;;  %v32275_v29 = vld [vmem:[#allocation2 + $0x70] sm:$0xff]  ;;  %v32277_v38 = vld [vmem:[#allocation2 + $0x88] sm:$0xff] }
  0xbe   : > { %725 = vst.msk [vmem:[#allocation2 + $0xf0] sm:$0xff] %vm602_vm2, %v32143_v18  ;;  %726 = vst.msk [vmem:[#allocation2 + $0x108] sm:$0xff] %vm602_vm2, %v32147_v19  ;;  %26529 = vmatmul.mubr.msk.f32.gmra.mrb[4].mxu0 %vm602_vm2, %v32267_v15 }
  0xbf   : > { %38834 = vst [vmem:[#allocation35_spill] sm:$0xff] %v32183_v32  ;;  %38835 = vst [vmem:[#allocation36_spill] sm:$0xff] %v32187_v33  ;;  %26531 = vmatprep.mubr.msk.f32.mxu0 %vm602_vm2, %v32269_v24 }
  0xc0   : > { %38836 = vst [vmem:[#allocation37_spill] sm:$0xff] %v32191_v34  ;;  %38837 = vst [vmem:[#allocation38_spill] sm:$0xff] %v32195_v39  ;;  %v32283_v42 = vld [vmem:[#allocation2 + $0x90] sm:$0xff]  ;;  %v32285_v43 = vld [vmem:[#allocation2 + $0xa8] sm:$0xff] }
  0xc1   : > { %727 = vst.msk [vmem:[#allocation2 + $0x110] sm:$0xff] %vm602_vm2, %v32159_v20  ;;  %728 = vst.msk [vmem:[#allocation2 + $0x128] sm:$0xff] %vm602_vm2, %v32163_v25  ;;  %v32291_v44 = vld [vmem:[#allocation2 + $0xb0] sm:$0xff]  ;;  %v32293_v45 = vld [vmem:[#allocation2 + $0xc8] sm:$0xff] }
  0xc2   : > { %729 = vst.msk [vmem:[#allocation2 + $0x130] sm:$0xff] %vm602_vm2, %v32167_v26  ;;  %730 = vst.msk [vmem:[#allocation2 + $0x148] sm:$0xff] %vm602_vm2, %v32171_v27  ;;  %26532 = vmatmul.mubr.msk.f32.gmra.mrb[6].mxu0 %vm602_vm2, %v32275_v29 }
  0xc3   : > { %38838 = vst [vmem:[#allocation39_spill] sm:$0xff] %v32207_v40  ;;  %38839 = vst [vmem:[#allocation40_spill] sm:$0xff] %v32211_v41  ;;  %26534 = vmatprep.mubr.msk.f32.mxu0 %vm602_vm2, %v32277_v38 }
  0xc4   : > { %38840 = vst [vmem:[#allocation41_spill] sm:$0xff] %v32215_v46  ;;  %38841 = vst [vmem:[#allocation42_spill] sm:$0xff] %v32219_v51  ;;  %v32299_v47 = vld [vmem:[#allocation2 + $0xd0] sm:$0xff]  ;;  %v32301_v48 = vld [vmem:[#allocation2 + $0xe8] sm:$0xff] }
  0xc5   : > { %731 = vst.msk [vmem:[#allocation2 + $0x150] sm:$0xff] %vm602_vm2, %v32183_v32  ;;  %732 = vst.msk [vmem:[#allocation2 + $0x168] sm:$0xff] %vm602_vm2, %v32187_v33  ;;  %v32307_v49 = vld [vmem:[#allocation2 + $0xf0] sm:$0xff]  ;;  %v32309_v50 = vld [vmem:[#allocation2 + $0x108] sm:$0xff] }
  0xc6   : > { %733 = vst.msk [vmem:[#allocation2 + $0x170] sm:$0xff] %vm602_vm2, %v32191_v34  ;;  %734 = vst.msk [vmem:[#allocation2 + $0x188] sm:$0xff] %vm602_vm2, %v32195_v39  ;;  %26535 = vmatmul.mubr.msk.f32.gmra.mrb[8].mxu0 %vm602_vm2, %v32283_v42  ;;  %v32416_v39 = vld [vmem:[#allocation2 + $0xa7] sm:$0xff]  ;;  %v32422_v34 = vld [vmem:[#allocation2 + $0xaf] sm:$0xff] }
  0xc7   : > { %38842 = vst [vmem:[#allocation43_spill] sm:$0xff] %v32231_v52  ;;  %38843 = vst [vmem:[#allocation44_spill] sm:$0xff] %v32235_v53  ;;  %26537 = vmatprep.mubr.msk.f32.mxu0 %vm602_vm2, %v32285_v43  ;;  %v32424_v33 = vld [vmem:[#allocation2 + $0xc7] sm:$0xff]  ;;  %v32430_v32 = vld [vmem:[#allocation2 + $0xcf] sm:$0xff] }
  0xc8   : > { %38844 = vst [vmem:[#allocation45_spill] sm:$0xff] %v32239_v58  ;;  %735 = vst.msk [vmem:[#allocation2 + $0x190] sm:$0xff] %vm602_vm2, %v32207_v40  ;;  %v32315_v54 = vld [vmem:[#allocation2 + $0x110] sm:$0xff]  ;;  %v32317_v55 = vld [vmem:[#allocation2 + $0x128] sm:$0xff] }
  0xc9   : > { %736 = vst.msk [vmem:[#allocation2 + $0x1a8] sm:$0xff] %vm602_vm2, %v32211_v41  ;;  %737 = vst.msk [vmem:[#allocation2 + $0x1b0] sm:$0xff] %vm602_vm2, %v32215_v46  ;;  %v32323_v56 = vld [vmem:[#allocation2 + $0x130] sm:$0xff]  ;;  %v32325_v57 = vld [vmem:[#allocation2 + $0x148] sm:$0xff] }
  0xca   : > { %738 = vst.msk [vmem:[#allocation2 + $0x1c8] sm:$0xff] %vm602_vm2, %v32219_v51  ;;  %739 = vst.msk [vmem:[#allocation2 + $0x1d0] sm:$0xff] %vm602_vm2, %v32231_v52  ;;  %26538 = vmatmul.mubr.msk.f32.gmra.mrb[10].mxu0 %vm602_vm2, %v32291_v44  ;;  %v32381_v52 = vld [vmem:[%s38337_s1 + $0xc] sm:$0xf] }
  0xcb   : > { %740 = vst.msk [vmem:[#allocation2 + $0x1e8] sm:$0xff] %vm602_vm2, %v32235_v53  ;;  %741 = vst.msk [vmem:[#allocation2 + $0x1f0] sm:$0xff] %vm602_vm2, %v32239_v58  ;;  %26540 = vmatprep.mubr.msk.f32.mxu0 %vm602_vm2, %v32293_v45  ;;  %v745_v58 = vld [vmem:[#allocation2 + $0xf] sm:$0xff]  ;;  %v32376_v53 = vld [vmem:[#allocation2 + $0x27] sm:$0xff] }
  0xcc   : > { %v32331_v59 = vld [vmem:[#allocation2 + $0x150] sm:$0xff]  ;;  %v32333_v60 = vld [vmem:[#allocation2 + $0x168] sm:$0xff]  ;;  %38848 = vst [vmem:[#allocation49_spill] sm:$0xff] %v32490_v37  ;;  %742 = vst.msk [vmem:[#allocation2 + $0x208] sm:$0xff] %vm602_vm2, %v32490_v37 }
  0xcd   : > { %v32339_v61 = vld [vmem:[#allocation2 + $0x170] sm:$0xff]  ;;  %v32341_v62 = vld [vmem:[#allocation2 + $0x188] sm:$0xff]  ;;  %38849 = vst [vmem:[#allocation50_spill] sm:$0xff] %v32513_v22 }
  0xce   : > { %26541 = vmatmul.mubr.msk.f32.gmra.mrb[12].mxu0 %vm602_vm2, %v32299_v47  ;;  %v32388_v51 = vld [vmem:[#allocation2 + $0x2f] sm:$0xff]  ;;  %v32390_v46 = vld [vmem:[#allocation2 + $0x47] sm:$0xff] }
  0xcf   : > { %26543 = vmatprep.mubr.msk.f32.mxu0 %vm602_vm2, %v32301_v48  ;;  %v32347_v4 = vld [vmem:[#allocation2 + $0x190] sm:$0xff]  ;;  %v32408_v41 = vld [vmem:[#allocation2 + $0x87] sm:$0xff] }
  0xd0   : > { %v32349_v5 = vld [vmem:[#allocation2 + $0x1a8] sm:$0xff]  ;;  %v32355_v7 = vld [vmem:[#allocation2 + $0x1b0] sm:$0xff] }
  0xd1   : > { %v32357_v11 = vld [vmem:[#allocation2 + $0x1c8] sm:$0xff]  ;;  %v32363_v16 = vld [vmem:[#allocation2 + $0x1d0] sm:$0xff] }
  0xd2   : > { %26544 = vmatmul.mubr.msk.f32.gmra.mrb[14].mxu0 %vm602_vm2, %v32307_v49  ;;  %38845 = vst [vmem:[#allocation46_spill] sm:$0xff] %v32363_v16  ;;  %v32365_v0 = vld [vmem:[#allocation2 + $0x1e8] sm:$0xff]  ;;  %v32371_v17 = vld [vmem:[#allocation2 + $0x1f0] sm:$0xff] }
  0xd3   : > { %26546 = vmatprep.mubr.msk.f32.mxu0 %vm602_vm2, %v32309_v50  ;;  %38846 = vst [vmem:[#allocation47_spill] sm:$0xff] %v32365_v0  ;;  %38847 = vst [vmem:[#allocation48_spill] sm:$0xff] %v32371_v17  ;;  %v32414_v40 = vld [vmem:[#allocation2 + $0x8f] sm:$0xff]  ;;  %v32432_v27 = vld [vmem:[#allocation2 + $0xe7] sm:$0xff] }
  0xd4   : > { %v32438_v26 = vld [vmem:[#allocation2 + $0xef] sm:$0xff]  ;;  %v32440_v25 = vld [vmem:[#allocation2 + $0x107] sm:$0xff] }
  0xd5   : > { %v32446_v20 = vld [vmem:[#allocation2 + $0x10f] sm:$0xff]  ;;  %v32448_v19 = vld [vmem:[#allocation2 + $0x127] sm:$0xff] }
  0xd6   : > { %26547 = vmatmul.mubr.msk.f32.gmra.mrb[16].mxu0 %vm602_vm2, %v32315_v54  ;;  %v32454_v18 = vld [vmem:[#allocation2 + $0x12f] sm:$0xff]  ;;  %v32456_v14 = vld [vmem:[#allocation2 + $0x147] sm:$0xff] }
  0xd7   : > { %26549 = vmatprep.mubr.msk.f32.mxu0 %vm602_vm2, %v32317_v55  ;;  %v32462_v13 = vld [vmem:[#allocation2 + $0x14f] sm:$0xff]  ;;  %v32464_v12 = vld [vmem:[#allocation2 + $0x167] sm:$0xff] }
  0xd8   : > { %v32470_v10 = vld [vmem:[#allocation2 + $0x16f] sm:$0xff]  ;;  %v32472_v9 = vld [vmem:[#allocation2 + $0x187] sm:$0xff] }
  0xd9   : > { %v32478_v8 = vld [vmem:[#allocation2 + $0x18f] sm:$0xff]  ;;  %v32480_v6 = vld [vmem:[#allocation2 + $0x1a7] sm:$0xff] }
  0xda   : > { %26550 = vmatmul.mubr.msk.f32.gmra.mrb[18].mxu0 %vm602_vm2, %v32323_v56  ;;  %v32486_v3 = vld [vmem:[#allocation2 + $0x1af] sm:$0xff]  ;;  %v32492_v36 = vld [vmem:[#allocation2 + $0x1c7] sm:$0xff] }
  0xdb   : > { %26552 = vmatprep.mubr.msk.f32.mxu0 %vm602_vm2, %v32325_v57  ;;  %v32500_v31 = vld [vmem:[#allocation2 + $0x1cf] sm:$0xff]  ;;  %v32502_v35 = vld [vmem:[#allocation2 + $0x1e7] sm:$0xff] }
  0xdc   : > { %v32508_v28 = vld [vmem:[#allocation2 + $0x1ef] sm:$0xff] }
  0xdd   : > { %v1461_v37 = vld [vmem:[#allocation2 + $0x11] sm:$0xff] }
  0xde   : > { %26553 = vmatmul.mubr.msk.f32.gmra.mrb[20].mxu0 %vm602_vm2, %v32331_v59 }
  0xdf   : > { %26555 = vmatprep.mubr.msk.f32.mxu0 %vm602_vm2, %v32333_v60 }
  0xe2   : > { %26556 = vmatmul.mubr.msk.f32.gmra.mrb[22].mxu0 %vm602_vm2, %v32339_v61 }
  0xe3   : > { %26558 = vmatprep.mubr.msk.f32.mxu0 %vm602_vm2, %v32341_v62 }
  0xe6   : > { %26559 = vmatmul.mubr.msk.f32.gmra.mrb[24].mxu0 %vm602_vm2, %v32347_v4 }
  0xe7   : > { %26561 = vmatprep.mubr.msk.f32.mxu0 %vm602_vm2, %v32349_v5 }
  0xea   : > { %26562 = vmatmul.mubr.msk.f32.gmra.mrb[26].mxu0 %vm602_vm2, %v32355_v7 }
  0xeb   : > { %26564 = vmatprep.mubr.msk.f32.mxu0 %vm602_vm2, %v32357_v11 }
  0xee   : > { %26565 = vmatmul.mubr.msk.f32.gmra.mrb[28].mxu0 %vm602_vm2, %v32363_v16  ;;  %v32527_v16 = vld [vmem:[#allocation2 + $0x49] sm:$0xff] }
  0xef   : > { %26567 = vmatprep.mubr.msk.f32.mxu0 %vm602_vm2, %v32365_v0  ;;  %v32525_v0 = vld [vmem:[#allocation2 + $0x31] sm:$0xff]  ;;  %38851 = vst [vmem:[#allocation52_spill] sm:$0xff] %v32527_v16 }
  0xf0   : > { %38850 = vst [vmem:[#allocation51_spill] sm:$0xff] %v32525_v0 }
  0xf2   : > { %26568 = vmatmul.mubr.msk.f32.gmra.mrb[30].mxu0 %vm602_vm2, %v32371_v17  ;;  %v32518_v17 = vld [vmem:[%s38337_s1 + $0x10] sm:$0xf] }
  0xf3   : > { %26572 = vmatprep.mubr.msk.f32.mxu0 %vm602_vm2, %v744_v30  ;;  %v32398_v30 = vld [vmem:[#allocation2 + $0x4f] sm:$0xff] }
  0xf6   : > { %26573 = vmatmul.mubr.msk.f32.vlgmr.msra.gmra.mrb[0].mxu0 %vm602_vm2, %v745_v58  ;;  %v32400_v58 = vld [vmem:[#allocation2 + $0x67] sm:$0xff] }
  0xf7   : > { %26621 = vmatpush3.msk.msra.mxu0 %vm907_vm1, %v32003_v23  ;;  %26575 = vmatprep.mubr.msk.f32.mxu0 %vm602_vm2, %v32376_v53  ;;  %v32406_v23 = vld [vmem:[#allocation2 + $0x6f] sm:$0xff] }
  0xf8   : > { %26670 = vmatprep.subr.msk.mxu0 %vm907_vm1, %v32381_v52 }
  0xfa   : > { %26576 = vmatmul.mubr.msk.f32.gmra.mrb[2].mxu0 %vm602_vm2, %v32388_v51 }
  0xfb   : > { %26578 = vmatprep.mubr.msk.f32.mxu0 %vm602_vm2, %v32390_v46 }
  0xfe   : > { %26579 = vmatmul.mubr.msk.f32.gmra.mrb[4].mxu0 %vm602_vm2, %v32398_v30 }
  0xff   : > { %26581 = vmatprep.mubr.msk.f32.mxu0 %vm602_vm2, %v32400_v58 }
 0x102   : > { %26582 = vmatmul.mubr.msk.f32.gmra.mrb[6].mxu0 %vm602_vm2, %v32406_v23 }
 0x103   : > { %26584 = vmatprep.mubr.msk.f32.mxu0 %vm602_vm2, %v32408_v41 }
 0x106   : > { %26585 = vmatmul.mubr.msk.f32.gmra.mrb[8].mxu0 %vm602_vm2, %v32414_v40 }
 0x107   : > { %26587 = vmatprep.mubr.msk.f32.mxu0 %vm602_vm2, %v32416_v39 }
 0x10a   : > { %26588 = vmatmul.mubr.msk.f32.gmra.mrb[10].mxu0 %vm602_vm2, %v32422_v34 }
 0x10b   : > { %26590 = vmatprep.mubr.msk.f32.mxu0 %vm602_vm2, %v32424_v33 }
 0x10e   : > { %26591 = vmatmul.mubr.msk.f32.gmra.mrb[12].mxu0 %vm602_vm2, %v32430_v32 }
 0x10f   : > { %26593 = vmatprep.mubr.msk.f32.mxu0 %vm602_vm2, %v32432_v27 }
 0x112   : > { %26594 = vmatmul.mubr.msk.f32.gmra.mrb[14].mxu0 %vm602_vm2, %v32438_v26 }
 0x113   : > { %26596 = vmatprep.mubr.msk.f32.mxu0 %vm602_vm2, %v32440_v25 }
 0x116   : > { %26597 = vmatmul.mubr.msk.f32.gmra.mrb[16].mxu0 %vm602_vm2, %v32446_v20 }
 0x117   : > { %26599 = vmatprep.mubr.msk.f32.mxu0 %vm602_vm2, %v32448_v19 }
 0x11a   : > { %26600 = vmatmul.mubr.msk.f32.gmra.mrb[18].mxu0 %vm602_vm2, %v32454_v18 }
 0x11b   : > { %26602 = vmatprep.mubr.msk.f32.mxu0 %vm602_vm2, %v32456_v14 }
 0x11e   : > { %26603 = vmatmul.mubr.msk.f32.gmra.mrb[20].mxu0 %vm602_vm2, %v32462_v13 }
 0x11f   : > { %26605 = vmatprep.mubr.msk.f32.mxu0 %vm602_vm2, %v32464_v12 }
 0x122   : > { %26606 = vmatmul.mubr.msk.f32.gmra.mrb[22].mxu0 %vm602_vm2, %v32470_v10 }
 0x123   : > { %26608 = vmatprep.mubr.msk.f32.mxu0 %vm602_vm2, %v32472_v9 }
 0x126   : > { %26609 = vmatmul.mubr.msk.f32.gmra.mrb[24].mxu0 %vm602_vm2, %v32478_v8 }
 0x127   : > { %26611 = vmatprep.mubr.msk.f32.mxu0 %vm602_vm2, %v32480_v6 }
 0x12a   : > { %26612 = vmatmul.mubr.msk.f32.gmra.mrb[26].mxu0 %vm602_vm2, %v32486_v3 }
 0x12b   : > { %26614 = vmatprep.mubr.msk.f32.mxu0 %vm602_vm2, %v32492_v36 }
 0x12e   : > { %26615 = vmatmul.mubr.msk.f32.gmra.mrb[28].mxu0 %vm602_vm2, %v32500_v31 }
 0x12f   : > { %26617 = vmatprep.mubr.msk.f32.mxu0 %vm602_vm2, %v32502_v35 }
 0x132   : > { %26618 = vmatmul.mubr.msk.f32.gmra.mrb[30].mxu0 %vm602_vm2, %v32508_v28 }
 0x133   : > { %26622 = vmatprep.mubr.msk.f32.mxu0 %vm602_vm2, %v1460_v21  ;;  %v32537_v21 = vld [vmem:[#allocation2 + $0x69] sm:$0xff] }
 0x134   : > { %38853 = vst [vmem:[#allocation54_spill] sm:$0xff] %v32537_v21 }
 0x136   : > { %26623 = vmatmul.mubr.msk.f32.vlgmr.msra.gmra.mrb[0].mxu0 %vm602_vm2, %v1461_v37  ;;  %v32535_v37 = vld [vmem:[#allocation2 + $0x51] sm:$0xff] }
 0x137   : > { %26671 = vmatpush3.msk.msra.mxu0 %vm907_vm1, %v32381_v52  ;;  %26625 = vmatprep.mubr.msk.f32.mxu0 %vm602_vm2, %v32513_v22  ;;  %38852 = vst [vmem:[#allocation53_spill] sm:$0xff] %v32535_v37  ;;  %v32543_v52 = vld [vmem:[#allocation2 + $0x71] sm:$0xff]  ;;  %v32545_v22 = vld [vmem:[#allocation2 + $0x89] sm:$0xff] }
 0x138   : > { %26720 = vmatprep.subr.msk.mxu0 %vm907_vm1, %v32518_v17  ;;  %38854 = vst [vmem:[#allocation55_spill] sm:$0xff] %v32543_v52  ;;  %38855 = vst [vmem:[#allocation56_spill] sm:$0xff] %v32545_v22 }
 0x13a   : > { %26626 = vmatmul.mubr.msk.f32.gmra.mrb[2].mxu0 %vm602_vm2, %v32525_v0  ;;  %v32553_v0 = vld [vmem:[#allocation2 + $0xa9] sm:$0xff] }
 0x13b   : > { %26628 = vmatprep.mubr.msk.f32.mxu0 %vm602_vm2, %v32527_v16  ;;  %v32551_v16 = vld [vmem:[#allocation2 + $0x91] sm:$0xff]  ;;  %38857 = vst [vmem:[#allocation58_spill] sm:$0xff] %v32553_v0 }
 0x13c   : > { %38856 = vst [vmem:[#allocation57_spill] sm:$0xff] %v32551_v16 }
 0x13e   : > { %26629 = vmatmul.mubr.msk.f32.gmra.mrb[4].mxu0 %vm602_vm2, %v32535_v37  ;;  %v32561_v37 = vld [vmem:[#allocation2 + $0xc9] sm:$0xff] }
 0x13f   : > { %26631 = vmatprep.mubr.msk.f32.mxu0 %vm602_vm2, %v32537_v21  ;;  %v32559_v21 = vld [vmem:[#allocation2 + $0xb1] sm:$0xff]  ;;  %38859 = vst [vmem:[#allocation60_spill] sm:$0xff] %v32561_v37 }
 0x140   : > { %38858 = vst [vmem:[#allocation59_spill] sm:$0xff] %v32559_v21 }
 0x142   : > { %26632 = vmatmul.mubr.msk.f32.gmra.mrb[6].mxu0 %vm602_vm2, %v32543_v52  ;;  %v32569_v52 = vld [vmem:[#allocation2 + $0xe9] sm:$0xff] }
 0x143   : > { %26634 = vmatprep.mubr.msk.f32.mxu0 %vm602_vm2, %v32545_v22  ;;  %v32567_v22 = vld [vmem:[#allocation2 + $0xd1] sm:$0xff]  ;;  %38861 = vst [vmem:[#allocation62_spill] sm:$0xff] %v32569_v52 }
 0x144   : > { %38860 = vst [vmem:[#allocation61_spill] sm:$0xff] %v32567_v22 }
 0x146   : > { %26635 = vmatmul.mubr.msk.f32.gmra.mrb[8].mxu0 %vm602_vm2, %v32551_v16  ;;  %v32577_v16 = vld [vmem:[#allocation2 + $0x109] sm:$0xff] }
 0x147   : > { %26637 = vmatprep.mubr.msk.f32.mxu0 %vm602_vm2, %v32553_v0  ;;  %v32575_v0 = vld [vmem:[#allocation2 + $0xf1] sm:$0xff]  ;;  %38863 = vst [vmem:[#allocation64_spill] sm:$0xff] %v32577_v16 }
 0x148   : > { %38862 = vst [vmem:[#allocation63_spill] sm:$0xff] %v32575_v0 }
 0x14a   : > { %26638 = vmatmul.mubr.msk.f32.gmra.mrb[10].mxu0 %vm602_vm2, %v32559_v21  ;;  %v32585_v21 = vld [vmem:[#allocation2 + $0x129] sm:$0xff] }
 0x14b   : > { %26640 = vmatprep.mubr.msk.f32.mxu0 %vm602_vm2, %v32561_v37  ;;  %v32583_v37 = vld [vmem:[#allocation2 + $0x111] sm:$0xff]  ;;  %38865 = vst [vmem:[#allocation66_spill] sm:$0xff] %v32585_v21 }
 0x14c   : > { %38864 = vst [vmem:[#allocation65_spill] sm:$0xff] %v32583_v37 }
 0x14e   : > { %26641 = vmatmul.mubr.msk.f32.gmra.mrb[12].mxu0 %vm602_vm2, %v32567_v22  ;;  %v32593_v22 = vld [vmem:[#allocation2 + $0x149] sm:$0xff] }
 0x14f   : > { %26643 = vmatprep.mubr.msk.f32.mxu0 %vm602_vm2, %v32569_v52  ;;  %v32591_v52 = vld [vmem:[#allocation2 + $0x131] sm:$0xff]  ;;  %38867 = vst [vmem:[#allocation68_spill] sm:$0xff] %v32593_v22 }
 0x150   : > { %38866 = vst [vmem:[#allocation67_spill] sm:$0xff] %v32591_v52 }
 0x152   : > { %26644 = vmatmul.mubr.msk.f32.gmra.mrb[14].mxu0 %vm602_vm2, %v32575_v0  ;;  %v32601_v0 = vld [vmem:[#allocation2 + $0x169] sm:$0xff] }
 0x153   : > { %26646 = vmatprep.mubr.msk.f32.mxu0 %vm602_vm2, %v32577_v16  ;;  %v32599_v16 = vld [vmem:[#allocation2 + $0x151] sm:$0xff]  ;;  %38869 = vst [vmem:[#allocation70_spill] sm:$0xff] %v32601_v0 }
 0x154   : > { %38868 = vst [vmem:[#allocation69_spill] sm:$0xff] %v32599_v16 }
 0x156   : > { %26647 = vmatmul.mubr.msk.f32.gmra.mrb[16].mxu0 %vm602_vm2, %v32583_v37  ;;  %v32609_v37 = vld [vmem:[#allocation2 + $0x189] sm:$0xff] }
 0x157   : > { %26649 = vmatprep.mubr.msk.f32.mxu0 %vm602_vm2, %v32585_v21  ;;  %v32607_v21 = vld [vmem:[#allocation2 + $0x171] sm:$0xff]  ;;  %38871 = vst [vmem:[#allocation72_spill] sm:$0xff] %v32609_v37 }
 0x158   : > { %38870 = vst [vmem:[#allocation71_spill] sm:$0xff] %v32607_v21 }
 0x15a   : > { %26650 = vmatmul.mubr.msk.f32.gmra.mrb[18].mxu0 %vm602_vm2, %v32591_v52  ;;  %v32617_v52 = vld [vmem:[#allocation2 + $0x1a9] sm:$0xff] }
 0x15b   : > { %26652 = vmatprep.mubr.msk.f32.mxu0 %vm602_vm2, %v32593_v22  ;;  %v32615_v22 = vld [vmem:[#allocation2 + $0x191] sm:$0xff]  ;;  %38872 = vst [vmem:[#allocation73_spill] sm:$0xff] %v32617_v52 }
 0x15e   : > { %26653 = vmatmul.mubr.msk.f32.gmra.mrb[20].mxu0 %vm602_vm2, %v32599_v16  ;;  %v32625_v16 = vld [vmem:[#allocation2 + $0x1c9] sm:$0xff] }
 0x15f   : > { %26655 = vmatprep.mubr.msk.f32.mxu0 %vm602_vm2, %v32601_v0  ;;  %v32623_v0 = vld [vmem:[#allocation2 + $0x1b1] sm:$0xff]  ;;  %38873 = vst [vmem:[#allocation74_spill] sm:$0xff] %v32625_v16 }
 0x162   : > { %26656 = vmatmul.mubr.msk.f32.gmra.mrb[22].mxu0 %vm602_vm2, %v32607_v21  ;;  %v32633_v21 = vld [vmem:[#allocation2 + $0x1e9] sm:$0xff] }
 0x163   : > { %26658 = vmatprep.mubr.msk.f32.mxu0 %vm602_vm2, %v32609_v37  ;;  %v32631_v37 = vld [vmem:[#allocation2 + $0x1d1] sm:$0xff]  ;;  %38874 = vst [vmem:[#allocation75_spill] sm:$0xff] %v32633_v21 }
 0x166   : > { %26659 = vmatmul.mubr.msk.f32.gmra.mrb[24].mxu0 %vm602_vm2, %v32615_v22 }
 0x167   : > { %26661 = vmatprep.mubr.msk.f32.mxu0 %vm602_vm2, %v32617_v52  ;;  %v32639_v52 = vld [vmem:[#allocation2 + $0x1f1] sm:$0xff] }
 0x16a   : > { %26662 = vmatmul.mubr.msk.f32.gmra.mrb[26].mxu0 %vm602_vm2, %v32623_v0 }
 0x16b   : > { %26664 = vmatprep.mubr.msk.f32.mxu0 %vm602_vm2, %v32625_v16  ;;  %v22963_v16 = vld [vmem:[%s38337_s1 + $0x14] sm:$0xf] }
 0x16e   : > { %26665 = vmatmul.mubr.msk.f32.gmra.mrb[28].mxu0 %vm602_vm2, %v32631_v37 }
 0x16f   : > { %26667 = vmatprep.mubr.msk.f32.mxu0 %vm602_vm2, %v32633_v21 }
 0x172   : > { %26668 = vmatmul.mubr.msk.f32.gmra.mrb[30].mxu0 %vm602_vm2, %v32639_v52 }
 0x173   : > { %26672 = vmatprep.mubr.msk.f32.mxu0 %vm602_vm2, %v32376_v53  ;;  %v22997_v53 = vld [vmem:[%s38337_s1 + $0x18] sm:$0xf] }
 0x176   : > { %26673 = vmatmul.mubr.msk.f32.vlgmr.msra.gmra.mrb[0].mxu0 %vm602_vm2, %v32388_v51  ;;  %v32713_v51 = vld [vmem:[#allocation2 + $0x20f] sm:$0xff] }
 0x177   : > { %26721 = vmatpush3.msk.msra.mxu0 %vm907_vm1, %v32518_v17  ;;  %26675 = vmatprep.mubr.msk.f32.mxu0 %vm602_vm2, %v32390_v46  ;;  %v32707_v17 = vld [vmem:[#allocation2 + $0x207] sm:$0xff] }
 0x178   : > { %26770 = vmatprep.subr.msk.mxu0 %vm907_vm1, %v22963_v16 }
 0x17a   : > { %26676 = vmatmul.mubr.msk.f32.gmra.mrb[2].mxu0 %vm602_vm2, %v32398_v30 }
 0x17b   : > { %26678 = vmatprep.mubr.msk.f32.mxu0 %vm602_vm2, %v32400_v58 }
 0x17e   : > { %26679 = vmatmul.mubr.msk.f32.gmra.mrb[4].mxu0 %vm602_vm2, %v32406_v23 }
 0x17f   : > { %26681 = vmatprep.mubr.msk.f32.mxu0 %vm602_vm2, %v32408_v41 }
 0x182   : > { %26682 = vmatmul.mubr.msk.f32.gmra.mrb[6].mxu0 %vm602_vm2, %v32414_v40 }
 0x183   : > { %26684 = vmatprep.mubr.msk.f32.mxu0 %vm602_vm2, %v32416_v39 }
 0x186   : > { %26685 = vmatmul.mubr.msk.f32.gmra.mrb[8].mxu0 %vm602_vm2, %v32422_v34 }
 0x187   : > { %26687 = vmatprep.mubr.msk.f32.mxu0 %vm602_vm2, %v32424_v33 }
 0x18a   : > { %26688 = vmatmul.mubr.msk.f32.gmra.mrb[10].mxu0 %vm602_vm2, %v32430_v32 }
 0x18b   : > { %26690 = vmatprep.mubr.msk.f32.mxu0 %vm602_vm2, %v32432_v27 }
 0x18e   : > { %26691 = vmatmul.mubr.msk.f32.gmra.mrb[12].mxu0 %vm602_vm2, %v32438_v26 }
 0x18f   : > { %26693 = vmatprep.mubr.msk.f32.mxu0 %vm602_vm2, %v32440_v25 }
 0x192   : > { %26694 = vmatmul.mubr.msk.f32.gmra.mrb[14].mxu0 %vm602_vm2, %v32446_v20 }
 0x193   : > { %26696 = vmatprep.mubr.msk.f32.mxu0 %vm602_vm2, %v32448_v19 }
 0x196   : > { %26697 = vmatmul.mubr.msk.f32.gmra.mrb[16].mxu0 %vm602_vm2, %v32454_v18 }
 0x197   : > { %26699 = vmatprep.mubr.msk.f32.mxu0 %vm602_vm2, %v32456_v14 }
 0x19a   : > { %26700 = vmatmul.mubr.msk.f32.gmra.mrb[18].mxu0 %vm602_vm2, %v32462_v13 }
 0x19b   : > { %26702 = vmatprep.mubr.msk.f32.mxu0 %vm602_vm2, %v32464_v12 }
 0x19e   : > { %26703 = vmatmul.mubr.msk.f32.gmra.mrb[20].mxu0 %vm602_vm2, %v32470_v10 }
 0x19f   : > { %26705 = vmatprep.mubr.msk.f32.mxu0 %vm602_vm2, %v32472_v9 }
 0x1a2   : > { %26706 = vmatmul.mubr.msk.f32.gmra.mrb[22].mxu0 %vm602_vm2, %v32478_v8 }
 0x1a3   : > { %26708 = vmatprep.mubr.msk.f32.mxu0 %vm602_vm2, %v32480_v6 }
 0x1a6   : > { %26709 = vmatmul.mubr.msk.f32.gmra.mrb[24].mxu0 %vm602_vm2, %v32486_v3 }
 0x1a7   : > { %26711 = vmatprep.mubr.msk.f32.mxu0 %vm602_vm2, %v32492_v36 }
 0x1aa   : > { %26712 = vmatmul.mubr.msk.f32.gmra.mrb[26].mxu0 %vm602_vm2, %v32500_v31 }
 0x1ab   : > { %26714 = vmatprep.mubr.msk.f32.mxu0 %vm602_vm2, %v32502_v35 }
 0x1ae   : > { %26715 = vmatmul.mubr.msk.f32.gmra.mrb[28].mxu0 %vm602_vm2, %v32508_v28 }
 0x1af   : > { %26717 = vmatprep.mubr.msk.f32.mxu0 %vm602_vm2, %v32707_v17 }
 0x1b2   : > { %26718 = vmatmul.mubr.msk.f32.gmra.mrb[30].mxu0 %vm602_vm2, %v32713_v51 }
 0x1b3   : > { %26722 = vmatprep.mubr.msk.f32.mxu0 %vm602_vm2, %v32249_v63  ;;  %v38875_v63 = vld [vmem:[#allocation46_spill] sm:$0xff] }
 0x1b6   : > { %26723 = vmatmul.mubr.msk.f32.vlgmr.msra.gmra.mrb[0].mxu0 %vm602_vm2, %v32251_v1  ;;  %v38876_v1 = vld [vmem:[#allocation47_spill] sm:$0xff] }
 0x1b7   : > { %26771 = vmatpush3.msk.msra.mxu0 %vm907_vm1, %v22963_v16  ;;  %26725 = vmatprep.mubr.msk.f32.mxu0 %vm602_vm2, %v32253_v2  ;;  %v32780_v2 = vld [vmem:[#allocation2 + $0x208] sm:$0xff] }
 0x1b8   : > { %26820 = vmatprep.subr.msk.mxu0 %vm907_vm1, %v22997_v53  ;;  %v38886_v16 = vld [vmem:[#allocation58_spill] sm:$0xff] }
 0x1ba   : > { %26726 = vmatmul.mubr.msk.f32.gmra.mrb[2].mxu0 %vm602_vm2, %v32267_v15  ;;  %v38877_v15 = vld [vmem:[#allocation48_spill] sm:$0xff] }
 0x1bb   : > { %26728 = vmatprep.mubr.msk.f32.mxu0 %vm602_vm2, %v32269_v24  ;;  %v32786_v24 = vld [vmem:[#allocation2 + $0x210] sm:$0xff] }
 0x1be   : > { %26729 = vmatmul.mubr.msk.f32.gmra.mrb[4].mxu0 %vm602_vm2, %v32275_v29  ;;  %v38878_v29 = vld [vmem:[#allocation50_spill] sm:$0xff] }
 0x1bf   : > { %26731 = vmatprep.mubr.msk.f32.mxu0 %vm602_vm2, %v32277_v38  ;;  %v23031_v38 = vld [vmem:[%s38337_s1 + $0x1c] sm:$0xf] }
 0x1c2   : > { %26732 = vmatmul.mubr.msk.f32.gmra.mrb[6].mxu0 %vm602_vm2, %v32283_v42  ;;  %v38879_v42 = vld [vmem:[#allocation51_spill] sm:$0xff] }
 0x1c3   : > { %26734 = vmatprep.mubr.msk.f32.mxu0 %vm602_vm2, %v32285_v43  ;;  %v38880_v43 = vld [vmem:[#allocation52_spill] sm:$0xff] }
 0x1c6   : > { %26735 = vmatmul.mubr.msk.f32.gmra.mrb[8].mxu0 %vm602_vm2, %v32291_v44  ;;  %v38881_v44 = vld [vmem:[#allocation53_spill] sm:$0xff] }
 0x1c7   : > { %26737 = vmatprep.mubr.msk.f32.mxu0 %vm602_vm2, %v32293_v45  ;;  %v38882_v45 = vld [vmem:[#allocation54_spill] sm:$0xff] }
 0x1ca   : > { %26738 = vmatmul.mubr.msk.f32.gmra.mrb[10].mxu0 %vm602_vm2, %v32299_v47  ;;  %v38883_v47 = vld [vmem:[#allocation55_spill] sm:$0xff] }
 0x1cb   : > { %26740 = vmatprep.mubr.msk.f32.mxu0 %vm602_vm2, %v32301_v48  ;;  %v38884_v48 = vld [vmem:[#allocation56_spill] sm:$0xff] }
 0x1ce   : > { %26741 = vmatmul.mubr.msk.f32.gmra.mrb[12].mxu0 %vm602_vm2, %v32307_v49  ;;  %v38885_v49 = vld [vmem:[#allocation57_spill] sm:$0xff] }
 0x1cf   : > { %26743 = vmatprep.mubr.msk.f32.mxu0 %vm602_vm2, %v32309_v50 }
 0x1d2   : > { %26744 = vmatmul.mubr.msk.f32.gmra.mrb[14].mxu0 %vm602_vm2, %v32315_v54 }
 0x1d3   : > { %26746 = vmatprep.mubr.msk.f32.mxu0 %vm602_vm2, %v32317_v55 }
 0x1d6   : > { %26747 = vmatmul.mubr.msk.f32.gmra.mrb[16].mxu0 %vm602_vm2, %v32323_v56 }
 0x1d7   : > { %26749 = vmatprep.mubr.msk.f32.mxu0 %vm602_vm2, %v32325_v57 }
 0x1da   : > { %26750 = vmatmul.mubr.msk.f32.gmra.mrb[18].mxu0 %vm602_vm2, %v32331_v59 }
 0x1db   : > { %26752 = vmatprep.mubr.msk.f32.mxu0 %vm602_vm2, %v32333_v60 }
 0x1de   : > { %26753 = vmatmul.mubr.msk.f32.gmra.mrb[20].mxu0 %vm602_vm2, %v32339_v61 }
 0x1df   : > { %26755 = vmatprep.mubr.msk.f32.mxu0 %vm602_vm2, %v32341_v62 }
 0x1e2   : > { %26756 = vmatmul.mubr.msk.f32.gmra.mrb[22].mxu0 %vm602_vm2, %v32347_v4 }
 0x1e3   : > { %26758 = vmatprep.mubr.msk.f32.mxu0 %vm602_vm2, %v32349_v5 }
 0x1e6   : > { %26759 = vmatmul.mubr.msk.f32.gmra.mrb[24].mxu0 %vm602_vm2, %v32355_v7 }
 0x1e7   : > { %26761 = vmatprep.mubr.msk.f32.mxu0 %vm602_vm2, %v32357_v11 }
 0x1ea   : > { %26762 = vmatmul.mubr.msk.f32.gmra.mrb[26].mxu0 %vm602_vm2, %v38875_v63 }
 0x1eb   : > { %26764 = vmatprep.mubr.msk.f32.mxu0 %vm602_vm2, %v38876_v1 }
 0x1ee   : > { %26765 = vmatmul.mubr.msk.f32.gmra.mrb[28].mxu0 %vm602_vm2, %v38877_v15 }
 0x1ef   : > { %26767 = vmatprep.mubr.msk.f32.mxu0 %vm602_vm2, %v32780_v2 }
 0x1f2   : > { %26768 = vmatmul.mubr.msk.f32.gmra.mrb[30].mxu0 %vm602_vm2, %v32786_v24 }
 0x1f3   : > { %26772 = vmatprep.mubr.msk.f32.mxu0 %vm602_vm2, %v38878_v29  ;;  %v38888_v29 = vld [vmem:[#allocation60_spill] sm:$0xff] }
 0x1f6   : > { %26773 = vmatmul.mubr.msk.f32.vlgmr.msra.gmra.mrb[0].mxu0 %vm602_vm2, %v38879_v42  ;;  %v38889_v42 = vld [vmem:[#allocation61_spill] sm:$0xff] }
 0x1f7   : > { %26821 = vmatpush3.msk.msra.mxu0 %vm907_vm1, %v22997_v53  ;;  %26775 = vmatprep.mubr.msk.f32.mxu0 %vm602_vm2, %v38880_v43  ;;  %v38887_v53 = vld [vmem:[#allocation59_spill] sm:$0xff] }
 0x1f8   : > { %26870 = vmatprep.subr.msk.mxu0 %vm907_vm1, %v23031_v38 }
 0x1fa   : > { %26776 = vmatmul.mubr.msk.f32.gmra.mrb[2].mxu0 %vm602_vm2, %v38881_v44 }
 0x1fb   : > { %26778 = vmatprep.mubr.msk.f32.mxu0 %vm602_vm2, %v38882_v45  ;;  %v38890_v45 = vld [vmem:[#allocation62_spill] sm:$0xff] }
 0x1fe   : > { %26779 = vmatmul.mubr.msk.f32.gmra.mrb[4].mxu0 %vm602_vm2, %v38883_v47  ;;  %v38891_v47 = vld [vmem:[#allocation63_spill] sm:$0xff] }
 0x1ff   : > { %26781 = vmatprep.mubr.msk.f32.mxu0 %vm602_vm2, %v38884_v48  ;;  %v38892_v48 = vld [vmem:[#allocation64_spill] sm:$0xff] }
 0x202   : > { %26782 = vmatmul.mubr.msk.f32.gmra.mrb[6].mxu0 %vm602_vm2, %v38885_v49  ;;  %v38893_v49 = vld [vmem:[#allocation65_spill] sm:$0xff] }
 0x203   : > { %26784 = vmatprep.mubr.msk.f32.mxu0 %vm602_vm2, %v38886_v16  ;;  %v38894_v16 = vld [vmem:[#allocation66_spill] sm:$0xff] }
 0x206   : > { %26785 = vmatmul.mubr.msk.f32.gmra.mrb[8].mxu0 %vm602_vm2, %v38887_v53  ;;  %v38895_v53 = vld [vmem:[#allocation67_spill] sm:$0xff] }
 0x207   : > { %26787 = vmatprep.mubr.msk.f32.mxu0 %vm602_vm2, %v38888_v29  ;;  %v38896_v29 = vld [vmem:[#allocation68_spill] sm:$0xff] }
 0x20a   : > { %26788 = vmatmul.mubr.msk.f32.gmra.mrb[10].mxu0 %vm602_vm2, %v38889_v42  ;;  %v38897_v42 = vld [vmem:[#allocation69_spill] sm:$0xff] }
 0x20b   : > { %26790 = vmatprep.mubr.msk.f32.mxu0 %vm602_vm2, %v38890_v45  ;;  %v38898_v45 = vld [vmem:[#allocation70_spill] sm:$0xff] }
 0x20e   : > { %26791 = vmatmul.mubr.msk.f32.gmra.mrb[12].mxu0 %vm602_vm2, %v38891_v47  ;;  %v38899_v47 = vld [vmem:[#allocation71_spill] sm:$0xff] }
 0x20f   : > { %26793 = vmatprep.mubr.msk.f32.mxu0 %vm602_vm2, %v38892_v48  ;;  %v38900_v48 = vld [vmem:[#allocation72_spill] sm:$0xff] }
 0x212   : > { %26794 = vmatmul.mubr.msk.f32.gmra.mrb[14].mxu0 %vm602_vm2, %v38893_v49 }
 0x213   : > { %26796 = vmatprep.mubr.msk.f32.mxu0 %vm602_vm2, %v38894_v16  ;;  %v38901_v16 = vld [vmem:[#allocation73_spill] sm:$0xff] }
 0x216   : > { %26797 = vmatmul.mubr.msk.f32.gmra.mrb[16].mxu0 %vm602_vm2, %v38895_v53 }
 0x217   : > { %26799 = vmatprep.mubr.msk.f32.mxu0 %vm602_vm2, %v38896_v29  ;;  %v38902_v29 = vld [vmem:[#allocation74_spill] sm:$0xff] }
 0x21a   : > { %26800 = vmatmul.mubr.msk.f32.gmra.mrb[18].mxu0 %vm602_vm2, %v38897_v42 }
 0x21b   : > { %26802 = vmatprep.mubr.msk.f32.mxu0 %vm602_vm2, %v38898_v45 }
 0x21e   : > { %26803 = vmatmul.mubr.msk.f32.gmra.mrb[20].mxu0 %vm602_vm2, %v38899_v47  ;;  %v32853_v47 = vld [vmem:[#allocation2 + $0x209] sm:$0xff] }
 0x21f   : > { %26805 = vmatprep.mubr.msk.f32.mxu0 %vm602_vm2, %v38900_v48 }
 0x222   : > { %26806 = vmatmul.mubr.msk.f32.gmra.mrb[22].mxu0 %vm602_vm2, %v32615_v22 }
 0x223   : > { %26808 = vmatprep.mubr.msk.f32.mxu0 %vm602_vm2, %v38901_v16  ;;  %v32859_v16 = vld [vmem:[#allocation2 + $0x211] sm:$0xff] }
 0x226   : > { %26809 = vmatmul.mubr.msk.f32.gmra.mrb[24].mxu0 %vm602_vm2, %v32623_v0 }
 0x227   : > { %26811 = vmatprep.mubr.msk.f32.mxu0 %vm602_vm2, %v38902_v29 }
 0x22a   : > { %26812 = vmatmul.mubr.msk.f32.gmra.mrb[26].mxu0 %vm602_vm2, %v32631_v37 }
 0x22b   : > { %26814 = vmatprep.mubr.msk.f32.mxu0 %vm602_vm2, %v32633_v21  ;;  %v23065_v21 = vld [vmem:[%s38337_s1 + $0x20] sm:$0xf] }
 0x22e   : > { %26815 = vmatmul.mubr.msk.f32.gmra.mrb[28].mxu0 %vm602_vm2, %v32639_v52 }
 0x22f   : > { %26817 = vmatprep.mubr.msk.f32.mxu0 %vm602_vm2, %v32853_v47 }
 0x232   : > { %26818 = vmatmul.mubr.msk.f32.gmra.mrb[30].mxu0 %vm602_vm2, %v32859_v16 }
 0x233   : > { %26822 = vmatprep.mubr.msk.f32.mxu0 %vm602_vm2, %v32390_v46  ;;  %v38910_v46 = vld [vmem:[#allocation61_spill] sm:$0xff] }
 0x236   : > { %26823 = vmatmul.mubr.msk.f32.vlgmr.msra.gmra.mrb[0].mxu0 %vm602_vm2, %v32398_v30 }
 0x237   : > { %26871 = vmatpush3.msk.msra.mxu0 %vm907_vm1, %v23031_v38  ;;  %26825 = vmatprep.mubr.msk.f32.mxu0 %vm602_vm2, %v32400_v58  ;;  %v4330_v58 = vld [vmem:[#allocation2 + $0x8] sm:$0xff] }
 0x238   : > { %26920 = vmatprep.subr.msk.mxu0 %vm907_vm1, %v23065_v21  ;;  %26978 = vmatprep.mubr.msk.f32.mxu1 %vm496_vm0, %v4330_v58 }
 0x23a   : > { %26826 = vmatmul.mubr.msk.f32.gmra.mrb[2].mxu0 %vm602_vm2, %v32406_v23  ;;  %v4331_v23 = vld [vmem:[#allocation2 + $0x10] sm:$0xff] }
 0x23b   : > { %26828 = vmatprep.mubr.msk.f32.mxu0 %vm602_vm2, %v32408_v41  ;;  %v38909_v41 = vld [vmem:[#allocation60_spill] sm:$0xff] }
 0x23e   : > { %26829 = vmatmul.mubr.msk.f32.gmra.mrb[4].mxu0 %vm602_vm2, %v32414_v40  ;;  %v38908_v40 = vld [vmem:[#allocation59_spill] sm:$0xff] }
 0x23f   : > { %26831 = vmatprep.mubr.msk.f32.mxu0 %vm602_vm2, %v32416_v39  ;;  %v38907_v39 = vld [vmem:[#allocation58_spill] sm:$0xff] }
 0x242   : > { %26832 = vmatmul.mubr.msk.f32.gmra.mrb[6].mxu0 %vm602_vm2, %v32422_v34  ;;  %v38906_v34 = vld [vmem:[#allocation57_spill] sm:$0xff] }
 0x243   : > { %26834 = vmatprep.mubr.msk.f32.mxu0 %vm602_vm2, %v32424_v33  ;;  %v38905_v33 = vld [vmem:[#allocation56_spill] sm:$0xff] }
 0x246   : > { %26835 = vmatmul.mubr.msk.f32.gmra.mrb[8].mxu0 %vm602_vm2, %v32430_v32  ;;  %v38904_v32 = vld [vmem:[#allocation55_spill] sm:$0xff] }
 0x247   : > { %26837 = vmatprep.mubr.msk.f32.mxu0 %vm602_vm2, %v32432_v27  ;;  %v38903_v27 = vld [vmem:[#allocation54_spill] sm:$0xff] }
 0x24a   : > { %26838 = vmatmul.mubr.msk.f32.gmra.mrb[10].mxu0 %vm602_vm2, %v32438_v26  ;;  %v3442_v26 = vld [vmem:[#allocation2 + $0x230] sm:$0xff] }
 0x24b   : > { %26840 = vmatprep.mubr.msk.f32.mxu0 %vm602_vm2, %v32440_v25  ;;  %v3441_v25 = vld [vmem:[#allocation2 + $0x228] sm:$0xff] }
 0x24e   : > { %26841 = vmatmul.mubr.msk.f32.gmra.mrb[12].mxu0 %vm602_vm2, %v32446_v20  ;;  %v3422_v20 = vld [vmem:[#allocation2 + $0xf0] sm:$0xff] }
 0x24f   : > { %26843 = vmatprep.mubr.msk.f32.mxu0 %vm602_vm2, %v32448_v19  ;;  %v3421_v19 = vld [vmem:[#allocation2 + $0xe8] sm:$0xff] }
 0x252   : > { %26844 = vmatmul.mubr.msk.f32.gmra.mrb[14].mxu0 %vm602_vm2, %v32454_v18  ;;  %v3420_v18 = vld [vmem:[#allocation2 + $0xd0] sm:$0xff] }
 0x253   : > { %26846 = vmatprep.mubr.msk.f32.mxu0 %vm602_vm2, %v32456_v14  ;;  %v3419_v14 = vld [vmem:[#allocation2 + $0xc8] sm:$0xff] }
 0x256   : > { %26847 = vmatmul.mubr.msk.f32.gmra.mrb[16].mxu0 %vm602_vm2, %v32462_v13  ;;  %v3418_v13 = vld [vmem:[#allocation2 + $0xb0] sm:$0xff] }
 0x257   : > { %26849 = vmatprep.mubr.msk.f32.mxu0 %vm602_vm2, %v32464_v12  ;;  %v3417_v12 = vld [vmem:[#allocation2 + $0xa8] sm:$0xff] }
 0x25a   : > { %26850 = vmatmul.mubr.msk.f32.gmra.mrb[18].mxu0 %vm602_vm2, %v32470_v10  ;;  %v3416_v10 = vld [vmem:[#allocation2 + $0x90] sm:$0xff] }
 0x25b   : > { %26852 = vmatprep.mubr.msk.f32.mxu0 %vm602_vm2, %v32472_v9  ;;  %v3415_v9 = vld [vmem:[#allocation2 + $0x88] sm:$0xff] }
 0x25e   : > { %26853 = vmatmul.mubr.msk.f32.gmra.mrb[20].mxu0 %vm602_vm2, %v32478_v8  ;;  %v3051_v8 = vld [vmem:[#allocation2 + $0x227] sm:$0xff] }
 0x25f   : > { %26855 = vmatprep.mubr.msk.f32.mxu0 %vm602_vm2, %v32480_v6  ;;  %v3414_v6 = vld [vmem:[#allocation2 + $0x70] sm:$0xff] }
 0x262   : > { %26856 = vmatmul.mubr.msk.f32.gmra.mrb[22].mxu0 %vm602_vm2, %v32486_v3  ;;  %v3052_v3 = vld [vmem:[#allocation2 + $0x22f] sm:$0xff] }
 0x263   : > { %26858 = vmatprep.mubr.msk.f32.mxu0 %vm602_vm2, %v32492_v36  ;;  %v3411_v36 = vld [vmem:[#allocation2 + $0x48] sm:$0xff] }
 0x266   : > { %26859 = vmatmul.mubr.msk.f32.gmra.mrb[24].mxu0 %vm602_vm2, %v32500_v31  ;;  %v3412_v31 = vld [vmem:[#allocation2 + $0x50] sm:$0xff] }
 0x267   : > { %26861 = vmatprep.mubr.msk.f32.mxu0 %vm602_vm2, %v32502_v35  ;;  %v3413_v35 = vld [vmem:[#allocation2 + $0x68] sm:$0xff] }
 0x26a   : > { %26862 = vmatmul.mubr.msk.f32.gmra.mrb[26].mxu0 %vm602_vm2, %v32508_v28  ;;  %v4326_v28 = vld [vmem:[#allocation3] sm:$0xff] }
 0x26b   : > { %26864 = vmatprep.mubr.msk.f32.mxu0 %vm602_vm2, %v32707_v17  ;;  %v4329_v17 = vld [vmem:[#allocation3 + $0x18] sm:$0xff] }
 0x26e   : > { %26865 = vmatmul.mubr.msk.f32.gmra.mrb[28].mxu0 %vm602_vm2, %v32713_v51 }
 0x26f   : > { %26867 = vmatprep.mubr.msk.f32.mxu0 %vm602_vm2, %v3051_v8 }
 0x272   : > { %26868 = vmatmul.mubr.msk.f32.gmra.mrb[30].mxu0 %vm602_vm2, %v3052_v3 }
 0x273   : > { %26872 = vmatprep.mubr.msk.f32.mxu0 %vm602_vm2, %v3411_v36 }
 0x276   : > { %26873 = vmatmul.mubr.msk.f32.vlgmr.msra.gmra.mrb[0].mxu0 %vm602_vm2, %v3412_v31 }
 0x277   : > { %26921 = vmatpush3.msk.msra.mxu0 %vm907_vm1, %v23065_v21  ;;  %26875 = vmatprep.mubr.msk.f32.mxu0 %vm602_vm2, %v3413_v35 }
 0x27a   : > { %26876 = vmatmul.mubr.msk.f32.gmra.mrb[2].mxu0 %vm602_vm2, %v3414_v6 }
 0x27b   : > { %26878 = vmatprep.mubr.msk.f32.mxu0 %vm602_vm2, %v3415_v9 }
 0x27e   : > { %26879 = vmatmul.mubr.msk.f32.gmra.mrb[4].mxu0 %vm602_vm2, %v3416_v10 }
 0x27f   : > { %26881 = vmatprep.mubr.msk.f32.mxu0 %vm602_vm2, %v3417_v12 }
 0x282   : > { %26882 = vmatmul.mubr.msk.f32.gmra.mrb[6].mxu0 %vm602_vm2, %v3418_v13 }
 0x283   : > { %26884 = vmatprep.mubr.msk.f32.mxu0 %vm602_vm2, %v3419_v14 }
 0x286   : > { %26885 = vmatmul.mubr.msk.f32.gmra.mrb[8].mxu0 %vm602_vm2, %v3420_v18 }
 0x287   : > { %26887 = vmatprep.mubr.msk.f32.mxu0 %vm602_vm2, %v3421_v19 }
 0x28a   : > { %26888 = vmatmul.mubr.msk.f32.gmra.mrb[10].mxu0 %vm602_vm2, %v3422_v20 }
 0x28b   : > { %26890 = vmatprep.mubr.msk.f32.mxu0 %vm602_vm2, %v32309_v50  ;;  %v38911_v50 = vld [vmem:[#allocation62_spill] sm:$0xff] }
 0x28e   : > { %26891 = vmatmul.mubr.msk.f32.gmra.mrb[12].mxu0 %vm602_vm2, %v32315_v54  ;;  %v38912_v54 = vld [vmem:[#allocation63_spill] sm:$0xff] }
 0x28f   : > { %26893 = vmatprep.mubr.msk.f32.mxu0 %vm602_vm2, %v32317_v55  ;;  %v38913_v55 = vld [vmem:[#allocation64_spill] sm:$0xff] }
 0x292   : > { %26894 = vmatmul.mubr.msk.f32.gmra.mrb[14].mxu0 %vm602_vm2, %v32323_v56  ;;  %v38914_v56 = vld [vmem:[#allocation66_spill] sm:$0xff] }
 0x293   : > { %26896 = vmatprep.mubr.msk.f32.mxu0 %vm602_vm2, %v32325_v57  ;;  %v38915_v57 = vld [vmem:[#allocation68_spill] sm:$0xff] }
 0x296   : > { %26897 = vmatmul.mubr.msk.f32.gmra.mrb[16].mxu0 %vm602_vm2, %v32331_v59  ;;  %v38916_v59 = vld [vmem:[#allocation71_spill] sm:$0xff] }
 0x297   : > { %26899 = vmatprep.mubr.msk.f32.mxu0 %vm602_vm2, %v32333_v60  ;;  %v38917_v60 = vld [vmem:[#allocation73_spill] sm:$0xff] }
 0x29a   : > { %26900 = vmatmul.mubr.msk.f32.gmra.mrb[18].mxu0 %vm602_vm2, %v32339_v61  ;;  %v38918_v61 = vld [vmem:[#allocation75_spill] sm:$0xff] }
 0x29b   : > { %26902 = vmatprep.mubr.msk.f32.mxu0 %vm602_vm2, %v32341_v62  ;;  %v4363_v62 = vld [vmem:[#allocation3 + $0x20] sm:$0xff] }
 0x29e   : > { %26903 = vmatmul.mubr.msk.f32.gmra.mrb[20].mxu0 %vm602_vm2, %v32347_v4  ;;  %v4364_v4 = vld [vmem:[#allocation3 + $0x28] sm:$0xff] }
 0x29f   : > { %26905 = vmatprep.mubr.msk.f32.mxu0 %vm602_vm2, %v32349_v5  ;;  %v29436_v5 = vpack.c.bf16 %v4364_v4, %v4363_v62 }
 0x2a1   : > { %29437 = vmatprep.subr.bf16.mxu1 %v29436_v5 }
 0x2a2   : > { %26906 = vmatmul.mubr.msk.f32.gmra.mrb[22].mxu0 %vm602_vm2, %v32355_v7  ;;  %29439 = vmatpush3.bf16.msra.mxu1 %v29436_v5  ;;  %v4365_v7 = vld [vmem:[#allocation3 + $0x30] sm:$0xff] }
 0x2a3   : > { %26908 = vmatprep.mubr.msk.f32.mxu0 %vm602_vm2, %v32357_v11  ;;  %v4366_v11 = vld [vmem:[#allocation3 + $0x38] sm:$0xff] }
 0x2a4   : > { %v29440_v30 = vpack.c.bf16 %v4366_v11, %v4365_v7 }
 0x2a6   : > { %26909 = vmatmul.mubr.msk.f32.gmra.mrb[24].mxu0 %vm602_vm2, %v38875_v63  ;;  %29441 = vmatprep.subr.bf16.mxu1 %v29440_v30  ;;  %v5042_v63 = vld [vmem:[#allocation3 + $0x40] sm:$0xff] }
 0x2a7   : > { %26911 = vmatprep.mubr.msk.f32.mxu0 %vm602_vm2, %v38876_v1  ;;  %29443 = vmatpush3.bf16.msra.mxu1 %v29440_v30  ;;  %v5043_v1 = vld [vmem:[#allocation3 + $0x48] sm:$0xff] }
 0x2aa   : > { %26912 = vmatmul.mubr.msk.f32.gmra.mrb[26].mxu0 %vm602_vm2, %v38877_v15  ;;  %26979 = vmatmul.mubr.msk.f32.vlgmr.msra.gmra.mrb[0].mxu1 %vm496_vm0, %v4331_v23  ;;  %v33051_v15 = vld [vmem:[%s38338_s2] ss:$0 sm:$0xff] }
 0x2ab   : > { %26914 = vmatprep.mubr.msk.f32.mxu0 %vm602_vm2, %v32780_v2  ;;  %v33045_v2 = vpack.c.bf16 %v5043_v1, %v5042_v63 }
 0x2ae   : > { %26915 = vmatmul.mubr.msk.f32.gmra.mrb[28].mxu0 %vm602_vm2, %v32786_v24 }
 0x2af   : > { %26917 = vmatprep.mubr.msk.f32.mxu0 %vm602_vm2, %v3441_v25 }
 0x2b2   : > { %26918 = vmatmul.mubr.msk.f32.gmra.mrb[30].mxu0 %vm602_vm2, %v3442_v26 }
 0x2b3   : > { %26922 = vmatprep.mubr.msk.f32.mxu0 %vm602_vm2, %v38880_v43 }
 0x2b6   : > { %26923 = vmatmul.mubr.msk.f32.vlgmr.msra.gmra.mrb[0].mxu0 %vm602_vm2, %v38881_v44 }
 0x2b7   : > { %26925 = vmatprep.mubr.msk.f32.mxu0 %vm602_vm2, %v38903_v27 }
 0x2ba   : > { %26926 = vmatmul.mubr.msk.f32.gmra.mrb[2].mxu0 %vm602_vm2, %v38904_v32 }
 0x2bb   : > { %26928 = vmatprep.mubr.msk.f32.mxu0 %vm602_vm2, %v38905_v33 }
 0x2be   : > { %26929 = vmatmul.mubr.msk.f32.gmra.mrb[4].mxu0 %vm602_vm2, %v38906_v34 }
 0x2bf   : > { %26931 = vmatprep.mubr.msk.f32.mxu0 %vm602_vm2, %v38907_v39 }
 0x2c2   : > { %26932 = vmatmul.mubr.msk.f32.gmra.mrb[6].mxu0 %vm602_vm2, %v38908_v40 }
 0x2c3   : > { %26934 = vmatprep.mubr.msk.f32.mxu0 %vm602_vm2, %v38909_v41 }
 0x2c6   : > { %26935 = vmatmul.mubr.msk.f32.gmra.mrb[8].mxu0 %vm602_vm2, %v38910_v46 }
 0x2c7   : > { %26937 = vmatprep.mubr.msk.f32.mxu0 %vm602_vm2, %v38911_v50 }
 0x2ca   : > { %26938 = vmatmul.mubr.msk.f32.gmra.mrb[10].mxu0 %vm602_vm2, %v38912_v54 }
 0x2cb   : > { %26940 = vmatprep.mubr.msk.f32.mxu0 %vm602_vm2, %v38913_v55 }
 0x2ce   : > { %26941 = vmatmul.mubr.msk.f32.gmra.mrb[12].mxu0 %vm602_vm2, %v38893_v49 }
 0x2cf   : > { %26943 = vmatprep.mubr.msk.f32.mxu0 %vm602_vm2, %v38914_v56 }
 0x2d2   : > { %26944 = vmatmul.mubr.msk.f32.gmra.mrb[14].mxu0 %vm602_vm2, %v38895_v53 }
 0x2d3   : > { %26946 = vmatprep.mubr.msk.f32.mxu0 %vm602_vm2, %v38915_v57 }
 0x2d6   : > { %26947 = vmatmul.mubr.msk.f32.gmra.mrb[16].mxu0 %vm602_vm2, %v38897_v42 }
 0x2d7   : > { %26949 = vmatprep.mubr.msk.f32.mxu0 %vm602_vm2, %v38898_v45 }
 0x2da   : > { %26950 = vmatmul.mubr.msk.f32.gmra.mrb[18].mxu0 %vm602_vm2, %v38916_v59 }
 0x2db   : > { %26952 = vmatprep.mubr.msk.f32.mxu0 %vm602_vm2, %v38900_v48 }
 0x2de   : > { %26953 = vmatmul.mubr.msk.f32.gmra.mrb[20].mxu0 %vm602_vm2, %v32615_v22  ;;  %v3831_v22 = vld [vmem:[#allocation2 + $0x229] sm:$0xff] }
 0x2df   : > { %26955 = vmatprep.mubr.msk.f32.mxu0 %vm602_vm2, %v38917_v60 }
 0x2e2   : > { %26956 = vmatmul.mubr.msk.f32.gmra.mrb[22].mxu0 %vm602_vm2, %v32623_v0  ;;  %v3832_v0 = vld [vmem:[#allocation2 + $0x231] sm:$0xff] }
 0x2e3   : > { %26958 = vmatprep.mubr.msk.f32.mxu0 %vm602_vm2, %v38902_v29 }
 0x2e6   : > { %26959 = vmatmul.mubr.msk.f32.gmra.mrb[24].mxu0 %vm602_vm2, %v32631_v37  ;;  %v4327_v37 = vld [vmem:[#allocation3 + $0x8] sm:$0xff] }
 0x2e7   : > { %26961 = vmatprep.mubr.msk.f32.mxu0 %vm602_vm2, %v38918_v61  ;;  %v29444_v21 = vpack.c.bf16 %v4327_v37, %v4326_v28 }
 0x2e9   : > { %29445 = vmatprep.subr.bf16.mxu1 %v29444_v21 }
 0x2ea   : > { %26962 = vmatmul.mubr.msk.f32.gmra.mrb[26].mxu0 %vm602_vm2, %v32639_v52  ;;  %29447 = vmatpush3.bf16.msra.mxu1 %v29444_v21  ;;  %v4328_v52 = vld [vmem:[#allocation3 + $0x10] sm:$0xff] }
 0x2eb   : > { %26964 = vmatprep.mubr.msk.f32.mxu0 %vm602_vm2, %v32853_v47  ;;  %v29448_v51 = vpack.c.bf16 %v4329_v17, %v4328_v52 }
 0x2ed   : > { %29449 = vmatprep.subr.bf16.mxu1 %v29448_v51 }
 0x2ee   : > { %26965 = vmatmul.mubr.msk.f32.gmra.mrb[28].mxu0 %vm602_vm2, %v32859_v16  ;;  %29451 = vmatpush3.bf16.msra.mxu1 %v29448_v51 }
 0x2ef   : > { %26967 = vmatprep.mubr.msk.f32.mxu0 %vm602_vm2, %v3831_v22  ;;  %29453 = vmatprep.subr.bf16.mxu1 %v33045_v2 }
 0x2f2   : > { %26968 = vmatmul.mubr.msk.f32.gmra.mrb[30].mxu0 %vm602_vm2, %v3832_v0 }
 0x389   : > { %v26924_v24 = vpop.f32.mrb[0].mxu0 }
 0x38a   : > { %v4199_v38 = vadd.f32 %v26924_v24, %v33051_v15  ;;  %v4000_v43 = vpop.f32.mrb[1].mxu0 }
 0x38b   : > { %v4198_v44 = vadd.f32 %v33051_v15, %v4000_v43 }
 0x38c   : > { %v4231_v45 = vmax.f32 %v4199_v38, 0.0 }
 0x38d   : > { %v4230_v47 = vmax.f32 %v4198_v44, 0.0  ;;  %v26927_v48 = vpop.f32.mrb[2].mxu0 }
 0x38e   : > { %4263 = vst.msk [vmem:[#allocation2 + $0x30] sm:$0xff] %vm496_vm0, %v4231_v45  ;;  %v4201_v49 = vadd.f32 %v26927_v48, %v33051_v15  ;;  %v4010_v16 = vpop.f32.mrb[3].mxu0 }
 0x38f   : > { %4262 = vst.msk [vmem:[#allocation2 + $0x28] sm:$0xff] %vm496_vm0, %v4230_v47  ;;  %v4200_v53 = vadd.f32 %v33051_v15, %v4010_v16 }
 0x390   : > { %v4233_v29 = vmax.f32 %v4201_v49, 0.0 }
 0x391   : > { %v4232_v42 = vmax.f32 %v4200_v53, 0.0  ;;  %v26930_v8 = vpop.f32.mrb[4].mxu0 }
 0x392   : > { %4265 = vst.msk [vmem:[#allocation2 + $0x50] sm:$0xff] %vm496_vm0, %v4233_v29  ;;  %v4203_v3 = vadd.f32 %v26930_v8, %v33051_v15  ;;  %v4020_v36 = vpop.f32.mrb[5].mxu0 }
 0x393   : > { %4264 = vst.msk [vmem:[#allocation2 + $0x48] sm:$0xff] %vm496_vm0, %v4232_v42  ;;  %v4202_v31 = vadd.f32 %v33051_v15, %v4020_v36 }
 0x394   : > { %v4235_v35 = vmax.f32 %v4203_v3, 0.0 }
 0x395   : > { %v4234_v6 = vmax.f32 %v4202_v31, 0.0  ;;  %v26933_v9 = vpop.f32.mrb[6].mxu0  ;;  %v33071_v18 = vld [vmem:[#allocation2 + $0x30] sm:$0xff] }
 0x396   : > { %4267 = vst.msk [vmem:[#allocation2 + $0x70] sm:$0xff] %vm496_vm0, %v4235_v35  ;;  %v4205_v10 = vadd.f32 %v26933_v9, %v33051_v15  ;;  %v4030_v12 = vpop.f32.mrb[7].mxu0  ;;  %v33065_v13 = vld [vmem:[#allocation2 + $0x28] sm:$0xff] }
 0x397   : > { %4266 = vst.msk [vmem:[#allocation2 + $0x68] sm:$0xff] %vm496_vm0, %v4234_v6  ;;  %v4204_v14 = vadd.f32 %v33051_v15, %v4030_v12  ;;  %26981 = vmatprep.mubr.msk.f32.mxu1 %vm496_vm0, %v33065_v13 }
 0x398   : > { %v4237_v19 = vmax.f32 %v4205_v10, 0.0  ;;  %26982 = vmatmul.mubr.msk.f32.gmra.mrb[2].mxu1 %vm496_vm0, %v33071_v18 }
 0x399   : > { %v4236_v20 = vmax.f32 %v4204_v14, 0.0  ;;  %v26936_v25 = vpop.f32.mrb[8].mxu0  ;;  %v33083_v34 = vld [vmem:[#allocation2 + $0x50] sm:$0xff] }
 0x39a   : > { %4269 = vst.msk [vmem:[#allocation2 + $0x90] sm:$0xff] %vm496_vm0, %v4237_v19  ;;  %v4207_v26 = vadd.f32 %v26936_v25, %v33051_v15  ;;  %v4040_v27 = vpop.f32.mrb[9].mxu0  ;;  %v33077_v32 = vld [vmem:[#allocation2 + $0x48] sm:$0xff] }
 0x39b   : > { %4268 = vst.msk [vmem:[#allocation2 + $0x88] sm:$0xff] %vm496_vm0, %v4236_v20  ;;  %v4206_v33 = vadd.f32 %v33051_v15, %v4040_v27  ;;  %26984 = vmatprep.mubr.msk.f32.mxu1 %vm496_vm0, %v33077_v32 }
 0x39c   : > { %v4239_v39 = vmax.f32 %v4207_v26, 0.0  ;;  %26985 = vmatmul.mubr.msk.f32.gmra.mrb[4].mxu1 %vm496_vm0, %v33083_v34 }
 0x39d   : > { %v4238_v40 = vmax.f32 %v4206_v33, 0.0  ;;  %v26939_v41 = vpop.f32.mrb[10].mxu0  ;;  %v33095_v56 = vld [vmem:[#allocation2 + $0x70] sm:$0xff] }
 0x39e   : > { %4271 = vst.msk [vmem:[#allocation2 + $0xb0] sm:$0xff] %vm496_vm0, %v4239_v39  ;;  %v4209_v46 = vadd.f32 %v26939_v41, %v33051_v15  ;;  %v4050_v50 = vpop.f32.mrb[11].mxu0  ;;  %v33089_v54 = vld [vmem:[#allocation2 + $0x68] sm:$0xff] }
 0x39f   : > { %4270 = vst.msk [vmem:[#allocation2 + $0xa8] sm:$0xff] %vm496_vm0, %v4238_v40  ;;  %v4208_v55 = vadd.f32 %v33051_v15, %v4050_v50  ;;  %26987 = vmatprep.mubr.msk.f32.mxu1 %vm496_vm0, %v33089_v54 }
 0x3a0   : > { %v4241_v57 = vmax.f32 %v4209_v46, 0.0  ;;  %26988 = vmatmul.mubr.msk.f32.gmra.mrb[6].mxu1 %vm496_vm0, %v33095_v56 }
 0x3a1   : > { %v4240_v59 = vmax.f32 %v4208_v55, 0.0  ;;  %v26942_v60 = vpop.f32.mrb[12].mxu0  ;;  %v33107_v4 = vld [vmem:[#allocation2 + $0x90] sm:$0xff] }
 0x3a2   : > { %4273 = vst.msk [vmem:[#allocation2 + $0xd0] sm:$0xff] %vm496_vm0, %v4241_v57  ;;  %v4211_v61 = vadd.f32 %v26942_v60, %v33051_v15  ;;  %v4060_v22 = vpop.f32.mrb[13].mxu0  ;;  %v33101_v0 = vld [vmem:[#allocation2 + $0x88] sm:$0xff] }
 0x3a3   : > { %4272 = vst.msk [vmem:[#allocation2 + $0xc8] sm:$0xff] %vm496_vm0, %v4240_v59  ;;  %v4210_v62 = vadd.f32 %v33051_v15, %v4060_v22  ;;  %26990 = vmatprep.mubr.msk.f32.mxu1 %vm496_vm0, %v33101_v0 }
 0x3a4   : > { %v4243_v5 = vmax.f32 %v4211_v61, 0.0  ;;  %26991 = vmatmul.mubr.msk.f32.gmra.mrb[8].mxu1 %vm496_vm0, %v33107_v4 }
 0x3a5   : > { %v4242_v7 = vmax.f32 %v4210_v62, 0.0  ;;  %v26945_v11 = vpop.f32.mrb[14].mxu0  ;;  %v33119_v37 = vld [vmem:[#allocation2 + $0xb0] sm:$0xff] }
 0x3a6   : > { %4275 = vst.msk [vmem:[#allocation2 + $0xf0] sm:$0xff] %vm496_vm0, %v4243_v5  ;;  %v4213_v30 = vadd.f32 %v26945_v11, %v33051_v15  ;;  %v4070_v58 = vpop.f32.mrb[15].mxu0  ;;  %v33113_v23 = vld [vmem:[#allocation2 + $0xa8] sm:$0xff] }
 0x3a7   : > { %4274 = vst.msk [vmem:[#allocation2 + $0xe8] sm:$0xff] %vm496_vm0, %v4242_v7  ;;  %v4212_v28 = vadd.f32 %v33051_v15, %v4070_v58  ;;  %26993 = vmatprep.mubr.msk.f32.mxu1 %vm496_vm0, %v33113_v23 }
 0x3a8   : > { %v4245_v21 = vmax.f32 %v4213_v30, 0.0  ;;  %26994 = vmatmul.mubr.msk.f32.gmra.mrb[10].mxu1 %vm496_vm0, %v33119_v37 }
 0x3a9   : > { %v4244_v52 = vmax.f32 %v4212_v28, 0.0  ;;  %v26948_v17 = vpop.f32.mrb[16].mxu0  ;;  %v33131_v38 = vld [vmem:[#allocation2 + $0xd0] sm:$0xff] }
 0x3aa   : > { %4277 = vst.msk [vmem:[#allocation2 + $0x110] sm:$0xff] %vm496_vm0, %v4245_v21  ;;  %v4215_v51 = vadd.f32 %v26948_v17, %v33051_v15  ;;  %v4080_v63 = vpop.f32.mrb[17].mxu0  ;;  %v33125_v1 = vld [vmem:[#allocation2 + $0xc8] sm:$0xff] }
 0x3ab   : > { %4276 = vst.msk [vmem:[#allocation2 + $0x108] sm:$0xff] %vm496_vm0, %v4244_v52  ;;  %v4214_v24 = vadd.f32 %v33051_v15, %v4080_v63  ;;  %26996 = vmatprep.mubr.msk.f32.mxu1 %vm496_vm0, %v33125_v1 }
 0x3ac   : > { %v4247_v43 = vmax.f32 %v4215_v51, 0.0  ;;  %26997 = vmatmul.mubr.msk.f32.gmra.mrb[12].mxu1 %vm496_vm0, %v33131_v38 }
 0x3ad   : > { %v4246_v44 = vmax.f32 %v4214_v24, 0.0  ;;  %v26951_v45 = vpop.f32.mrb[18].mxu0  ;;  %v33143_v53 = vld [vmem:[#allocation2 + $0xf0] sm:$0xff] }
 0x3ae   : > { %4279 = vst.msk [vmem:[#allocation2 + $0x130] sm:$0xff] %vm496_vm0, %v4247_v43  ;;  %v4217_v47 = vadd.f32 %v26951_v45, %v33051_v15  ;;  %v4090_v48 = vpop.f32.mrb[19].mxu0  ;;  %v33137_v49 = vld [vmem:[#allocation2 + $0xe8] sm:$0xff] }
 0x3af   : > { %4278 = vst.msk [vmem:[#allocation2 + $0x128] sm:$0xff] %vm496_vm0, %v4246_v44  ;;  %v4216_v16 = vadd.f32 %v33051_v15, %v4090_v48  ;;  %26999 = vmatprep.mubr.msk.f32.mxu1 %vm496_vm0, %v33137_v49 }
 0x3b0   : > { %v4249_v29 = vmax.f32 %v4217_v47, 0.0  ;;  %27000 = vmatmul.mubr.msk.f32.gmra.mrb[14].mxu1 %vm496_vm0, %v33143_v53 }
 0x3b1   : > { %v4248_v42 = vmax.f32 %v4216_v16, 0.0  ;;  %v26954_v8 = vpop.f32.mrb[20].mxu0  ;;  %v33155_v6 = vld [vmem:[#allocation2 + $0x110] sm:$0xff] }
 0x3b2   : > { %4281 = vst.msk [vmem:[#allocation2 + $0x150] sm:$0xff] %vm496_vm0, %v4249_v29  ;;  %v4219_v3 = vadd.f32 %v26954_v8, %v33051_v15  ;;  %v4100_v36 = vpop.f32.mrb[21].mxu0  ;;  %v33149_v31 = vld [vmem:[#allocation2 + $0x108] sm:$0xff] }
 0x3b3   : > { %4280 = vst.msk [vmem:[#allocation2 + $0x148] sm:$0xff] %vm496_vm0, %v4248_v42  ;;  %v4218_v35 = vadd.f32 %v33051_v15, %v4100_v36  ;;  %27002 = vmatprep.mubr.msk.f32.mxu1 %vm496_vm0, %v33149_v31  ;;  %v4294_v36 = vld [vmem:[#allocation2 + $0x7] sm:$0xff] }
 0x3b4   : > { %v4251_v9 = vmax.f32 %v4219_v3, 0.0  ;;  %27003 = vmatmul.mubr.msk.f32.gmra.mrb[16].mxu1 %vm496_vm0, %v33155_v6 }
 0x3b5   : > { %v4250_v10 = vmax.f32 %v4218_v35, 0.0  ;;  %v26957_v12 = vpop.f32.mrb[22].mxu0  ;;  %v33167_v26 = vld [vmem:[#allocation2 + $0x130] sm:$0xff] }
 0x3b6   : > { %4283 = vst.msk [vmem:[#allocation2 + $0x170] sm:$0xff] %vm496_vm0, %v4251_v9  ;;  %v4221_v14 = vadd.f32 %v26957_v12, %v33051_v15  ;;  %v4110_v19 = vpop.f32.mrb[23].mxu0  ;;  %v33161_v20 = vld [vmem:[#allocation2 + $0x128] sm:$0xff]  ;;  %v5044_v9 = vld [vmem:[#allocation3 + $0x50] sm:$0xff] }
 0x3b7   : > { %4282 = vst.msk [vmem:[#allocation2 + $0x168] sm:$0xff] %vm496_vm0, %v4250_v10  ;;  %v4220_v25 = vadd.f32 %v33051_v15, %v4110_v19  ;;  %27005 = vmatprep.mubr.msk.f32.mxu1 %vm496_vm0, %v33161_v20  ;;  %v5045_v10 = vld [vmem:[#allocation3 + $0x58] sm:$0xff]  ;;  %v4295_v12 = vld [vmem:[#allocation2 + $0xf] sm:$0xff]  ;;  %v5432_v19 = vld [vmem:[#allocation3 + $0x60] sm:$0xff] }
 0x3b8   : > { %v4253_v27 = vmax.f32 %v4221_v14, 0.0  ;;  %27006 = vmatmul.mubr.msk.f32.gmra.mrb[18].mxu1 %vm496_vm0, %v33167_v26  ;;  %v29456_v14 = vpack.c.bf16 %v5045_v10, %v5044_v9 }
 0x3b9   : > { %v4252_v33 = vmax.f32 %v4220_v25, 0.0  ;;  %v26960_v39 = vpop.f32.mrb[24].mxu0  ;;  %v33179_v55 = vld [vmem:[#allocation2 + $0x150] sm:$0xff]  ;;  %v5433_v25 = vld [vmem:[#allocation3 + $0x68] sm:$0xff] }
 0x3ba   : > { %4285 = vst.msk [vmem:[#allocation2 + $0x190] sm:$0xff] %vm496_vm0, %v4253_v27  ;;  %v4223_v40 = vadd.f32 %v26960_v39, %v33051_v15  ;;  %v4120_v41 = vpop.f32.mrb[25].mxu0  ;;  %v33173_v46 = vld [vmem:[#allocation2 + $0x148] sm:$0xff] }
 0x3bb   : > { %4284 = vst.msk [vmem:[#allocation2 + $0x188] sm:$0xff] %vm496_vm0, %v4252_v33  ;;  %v4222_v50 = vadd.f32 %v33051_v15, %v4120_v41  ;;  %27008 = vmatprep.mubr.msk.f32.mxu1 %vm496_vm0, %v33173_v46  ;;  %v33239_v27 = vld [vmem:[#allocation2 + $0x27] sm:$0xff]  ;;  %v33244_v33 = vpack.c.bf16 %v5433_v25, %v5432_v19  ;;  %v33246_v39 = vld [vmem:[#allocation2 + $0x2f] sm:$0xff]  ;;  %v5435_v25 = vld [vmem:[#allocation3 + $0x78] sm:$0xff] }
 0x3bc   : > { %v4255_v57 = vmax.f32 %v4223_v40, 0.0  ;;  %27009 = vmatmul.mubr.msk.f32.gmra.mrb[20].mxu1 %vm496_vm0, %v33179_v55  ;;  %v33250_v40 = vld [vmem:[#allocation2 + $0x47] sm:$0xff]  ;;  %v5434_v19 = vld [vmem:[#allocation3 + $0x70] sm:$0xff] }
 0x3bd   : > { %v4254_v59 = vmax.f32 %v4222_v50, 0.0  ;;  %v26963_v60 = vpop.f32.mrb[26].mxu0  ;;  %v33191_v7 = vld [vmem:[#allocation2 + $0x170] sm:$0xff]  ;;  %v33259_v41 = vld [vmem:[#allocation2 + $0x67] sm:$0xff] }
 0x3be   : > { %4287 = vst.msk [vmem:[#allocation2 + $0x1b0] sm:$0xff] %vm496_vm0, %v4255_v57  ;;  %v4225_v61 = vadd.f32 %v26963_v60, %v33051_v15  ;;  %v4130_v22 = vpop.f32.mrb[27].mxu0  ;;  %v33185_v62 = vld [vmem:[#allocation2 + $0x168] sm:$0xff] }
 0x3bf   : > { %4286 = vst.msk [vmem:[#allocation2 + $0x1a8] sm:$0xff] %vm496_vm0, %v4254_v59  ;;  %v4224_v5 = vadd.f32 %v33051_v15, %v4130_v22  ;;  %27011 = vmatprep.mubr.msk.f32.mxu1 %vm496_vm0, %v33185_v62  ;;  %v33263_v50 = vld [vmem:[#allocation2 + $0x6f] sm:$0xff]  ;;  %v33267_v57 = vld [vmem:[#allocation2 + $0x87] sm:$0xff] }
 0x3c0   : > { %v4257_v11 = vmax.f32 %v4225_v61, 0.0  ;;  %27012 = vmatmul.mubr.msk.f32.gmra.mrb[22].mxu1 %vm496_vm0, %v33191_v7  ;;  %v33271_v59 = vld [vmem:[#allocation2 + $0x8f] sm:$0xff]  ;;  %v33275_v60 = vld [vmem:[#allocation2 + $0xa7] sm:$0xff] }
 0x3c1   : > { %v4256_v30 = vmax.f32 %v4224_v5, 0.0  ;;  %v26966_v58 = vpop.f32.mrb[28].mxu0  ;;  %v33203_v51 = vld [vmem:[#allocation2 + $0x190] sm:$0xff]  ;;  %v33283_v22 = vld [vmem:[#allocation2 + $0xc7] sm:$0xff] }
 0x3c2   : > { %4289 = vst.msk [vmem:[#allocation2 + $0x1d0] sm:$0xff] %vm496_vm0, %v4257_v11  ;;  %v4227_v28 = vadd.f32 %v26966_v58, %v33051_v15  ;;  %v4140_v21 = vpop.f32.mrb[29].mxu0  ;;  %v33197_v52 = vld [vmem:[#allocation2 + $0x188] sm:$0xff]  ;;  %38919 = vst [vmem:[#allocation46_spill] sm:$0xff] %v33203_v51 }
 0x3c3   : > { %4288 = vst.msk [vmem:[#allocation2 + $0x1c8] sm:$0xff] %vm496_vm0, %v4256_v30  ;;  %v4226_v17 = vadd.f32 %v33051_v15, %v4140_v21  ;;  %27014 = vmatprep.mubr.msk.f32.mxu1 %vm496_vm0, %v33197_v52  ;;  %v33279_v61 = vld [vmem:[#allocation2 + $0xaf] sm:$0xff]  ;;  %v33291_v11 = vld [vmem:[#allocation2 + $0xe7] sm:$0xff] }
 0x3c4   : > { %v4259_v63 = vmax.f32 %v4227_v28, 0.0  ;;  %27015 = vmatmul.mubr.msk.f32.gmra.mrb[24].mxu1 %vm496_vm0, %v33203_v51  ;;  %v33287_v5 = vld [vmem:[#allocation2 + $0xcf] sm:$0xff]  ;;  %v33299_v58 = vld [vmem:[#allocation2 + $0x107] sm:$0xff] }
 0x3c5   : > { %v4258_v24 = vmax.f32 %v4226_v17, 0.0  ;;  %v26969_v43 = vpop.f32.mrb[30].mxu0  ;;  %v33215_v16 = vld [vmem:[#allocation2 + $0x1b0] sm:$0xff]  ;;  %v33307_v21 = vld [vmem:[#allocation2 + $0x127] sm:$0xff] }
 0x3c6   : > { %4291 = vst.msk [vmem:[#allocation2 + $0x1f0] sm:$0xff] %vm496_vm0, %v4259_v63  ;;  %v4229_v44 = vadd.f32 %v26969_v43, %v33051_v15  ;;  %v4150_v45 = vpop.f32.mrb[31].mxu0  ;;  %v33209_v47 = vld [vmem:[#allocation2 + $0x1a8] sm:$0xff]  ;;  %38921 = vst [vmem:[#allocation48_spill] sm:$0xff] %v33215_v16  ;;  %v33372_v51 = vld [vmem:[#allocation2 + $0x31] sm:$0xff] }
 0x3c7   : > { %38920 = vst [vmem:[#allocation47_spill] sm:$0xff] %v33209_v47  ;;  %4290 = vst.msk [vmem:[#allocation2 + $0x1e8] sm:$0xff] %vm496_vm0, %v4258_v24  ;;  %v4228_v48 = vadd.f32 %v33051_v15, %v4150_v45  ;;  %27017 = vmatprep.mubr.msk.f32.mxu1 %vm496_vm0, %v33209_v47  ;;  %v33295_v30 = vld [vmem:[#allocation2 + $0xef] sm:$0xff]  ;;  %v33315_v63 = vld [vmem:[#allocation2 + $0x147] sm:$0xff] }
 0x3c8   : > { %v4261_v29 = vmax.f32 %v4229_v44, 0.0  ;;  %27018 = vmatmul.mubr.msk.f32.gmra.mrb[26].mxu1 %vm496_vm0, %v33215_v16  ;;  %v33303_v28 = vld [vmem:[#allocation2 + $0x10f] sm:$0xff]  ;;  %v33323_v43 = vld [vmem:[#allocation2 + $0x167] sm:$0xff] }
 0x3c9   : > { %v4260_v42 = vmax.f32 %v4228_v48, 0.0  ;;  %v33225_v15 = vld [vmem:[#allocation2 + $0x1d0] sm:$0xff]  ;;  %v33331_v45 = vld [vmem:[#allocation2 + $0x187] sm:$0xff] }
 0x3ca   : > { %4293 = vst.msk [vmem:[#allocation2 + $0x210] sm:$0xff] %vm496_vm0, %v4261_v29  ;;  %v33220_v8 = vld [vmem:[#allocation2 + $0x1c8] sm:$0xff]  ;;  %38923 = vst [vmem:[#allocation51_spill] sm:$0xff] %v33225_v15 }
 0x3cb   : > { %38922 = vst [vmem:[#allocation50_spill] sm:$0xff] %v33220_v8  ;;  %4292 = vst.msk [vmem:[#allocation2 + $0x208] sm:$0xff] %vm496_vm0, %v4260_v42  ;;  %27020 = vmatprep.mubr.msk.f32.mxu1 %vm496_vm0, %v33220_v8  ;;  %v33311_v17 = vld [vmem:[#allocation2 + $0x12f] sm:$0xff]  ;;  %v33339_v29 = vld [vmem:[#allocation2 + $0x1a7] sm:$0xff] }
 0x3cc   : > { %27021 = vmatmul.mubr.msk.f32.gmra.mrb[28].mxu1 %vm496_vm0, %v33225_v15  ;;  %v33319_v24 = vld [vmem:[#allocation2 + $0x14f] sm:$0xff]  ;;  %v5822_v15 = vld [vmem:[#allocation3 + $0x80] sm:$0xff] }
 0x3cd   : > { %v33233_v35 = vld [vmem:[#allocation2 + $0x1f0] sm:$0xff]  ;;  %v5823_v8 = vld [vmem:[#allocation3 + $0x88] sm:$0xff] }
 0x3ce   : > { %v33229_v3 = vld [vmem:[#allocation2 + $0x1e8] sm:$0xff]  ;;  %38925 = vst [vmem:[#allocation53_spill] sm:$0xff] %v33233_v35  ;;  %v33370_v47 = vpack.c.bf16 %v5823_v8, %v5822_v15  ;;  %v33389_v15 = vld [vmem:[#allocation2 + $0x71] sm:$0xff] }
 0x3cf   : > { %38924 = vst [vmem:[#allocation52_spill] sm:$0xff] %v33229_v3  ;;  %27023 = vmatprep.mubr.msk.f32.mxu1 %vm496_vm0, %v33229_v3  ;;  %v33327_v44 = vld [vmem:[#allocation2 + $0x16f] sm:$0xff]  ;;  %v33355_v10 = vld [vmem:[#allocation2 + $0x1e7] sm:$0xff]  ;;  %v29464_v3 = vpack.c.bf16 %v5435_v25, %v5434_v19  ;;  %38929 = vst [vmem:[#allocation70_spill] sm:$0xff] %v33389_v15 }
 0x3d0   : > { %27024 = vmatmul.mubr.msk.f32.gmra.mrb[30].mxu1 %vm496_vm0, %v33233_v35  ;;  %v33335_v48 = vld [vmem:[#allocation2 + $0x18f] sm:$0xff] }
 0x3d1   : > { %27034 = vmatprep.mubr.msk.f32.mxu1 %vm496_vm0, %v4294_v36  ;;  %v33343_v42 = vld [vmem:[#allocation2 + $0x1af] sm:$0xff]  ;;  %v33347_v36 = vld [vmem:[#allocation2 + $0x1c7] sm:$0xff] }
 0x3d2   : > { %v33351_v9 = vld [vmem:[#allocation2 + $0x1cf] sm:$0xff] }
 0x3d3   : > { %v5010_v35 = vld [vmem:[#allocation2 + $0x11] sm:$0xff]  ;;  %v33365_v16 = vld [vmem:[#allocation2 + $0x29] sm:$0xff] }
 0x3d4   : > { %27035 = vmatmul.mubr.msk.f32.vlgmr.msra.gmra.mrb[0].mxu1 %vm496_vm0, %v4295_v12  ;;  %v5009_v12 = vld [vmem:[#allocation2 + $0x9] sm:$0xff]  ;;  %v33405_v25 = vld [vmem:[#allocation2 + $0xb1] sm:$0xff] }
 0x3d5   : > { %29455 = vmatpush3.bf16.msra.mxu1 %v33045_v2  ;;  %27037 = vmatprep.mubr.msk.f32.mxu1 %vm496_vm0, %v33239_v27  ;;  %v33255_v2 = vld [vmem:[#allocation2 + $0x4f] sm:$0xff]  ;;  %38933 = vst [vmem:[#allocation55_spill] sm:$0xff] %v33405_v25 }
 0x3d6   : > { %29457 = vmatprep.subr.bf16.mxu1 %v29456_v14  ;;  %v33385_v8 = vld [vmem:[#allocation2 + $0x69] sm:$0xff] }
 0x3d7   : > { %38928 = vst [vmem:[#allocation69_spill] sm:$0xff] %v33385_v8  ;;  %v33401_v19 = vld [vmem:[#allocation2 + $0xa9] sm:$0xff] }
 0x3d8   : > { %27038 = vmatmul.mubr.msk.f32.gmra.mrb[2].mxu1 %vm496_vm0, %v33246_v39  ;;  %38932 = vst [vmem:[#allocation54_spill] sm:$0xff] %v33401_v19 }
 0x3d9   : > { %27040 = vmatprep.mubr.msk.f32.mxu1 %vm496_vm0, %v33250_v40  ;;  %29459 = vmatpush3.bf16.msra.mxu1 %v29456_v14  ;;  %v33359_v14 = vld [vmem:[#allocation2 + $0x1ef] sm:$0xff] }
 0x3da   : > { %29461 = vmatprep.subr.bf16.mxu1 %v33244_v33 }
 0x3dc   : > { %27041 = vmatmul.mubr.msk.f32.gmra.mrb[4].mxu1 %vm496_vm0, %v33255_v2 }
 0x3dd   : > { %27043 = vmatprep.mubr.msk.f32.mxu1 %vm496_vm0, %v33259_v41 }
 0x3e0   : > { %27044 = vmatmul.mubr.msk.f32.gmra.mrb[6].mxu1 %vm496_vm0, %v33263_v50 }
 0x3e1   : > { %27046 = vmatprep.mubr.msk.f32.mxu1 %vm496_vm0, %v33267_v57 }
 0x3e4   : > { %27047 = vmatmul.mubr.msk.f32.gmra.mrb[8].mxu1 %vm496_vm0, %v33271_v59 }
 0x3e5   : > { %27049 = vmatprep.mubr.msk.f32.mxu1 %vm496_vm0, %v33275_v60 }
 0x3e8   : > { %27050 = vmatmul.mubr.msk.f32.gmra.mrb[10].mxu1 %vm496_vm0, %v33279_v61 }
 0x3e9   : > { %27052 = vmatprep.mubr.msk.f32.mxu1 %vm496_vm0, %v33283_v22 }
 0x3ec   : > { %27053 = vmatmul.mubr.msk.f32.gmra.mrb[12].mxu1 %vm496_vm0, %v33287_v5 }
 0x3ed   : > { %27055 = vmatprep.mubr.msk.f32.mxu1 %vm496_vm0, %v33291_v11 }
 0x3f0   : > { %27056 = vmatmul.mubr.msk.f32.gmra.mrb[14].mxu1 %vm496_vm0, %v33295_v30 }
 0x3f1   : > { %27058 = vmatprep.mubr.msk.f32.mxu1 %vm496_vm0, %v33299_v58 }
 0x3f4   : > { %27059 = vmatmul.mubr.msk.f32.gmra.mrb[16].mxu1 %vm496_vm0, %v33303_v28 }
 0x3f5   : > { %27061 = vmatprep.mubr.msk.f32.mxu1 %vm496_vm0, %v33307_v21 }
 0x3f8   : > { %27062 = vmatmul.mubr.msk.f32.gmra.mrb[18].mxu1 %vm496_vm0, %v33311_v17 }
 0x3f9   : > { %27064 = vmatprep.mubr.msk.f32.mxu1 %vm496_vm0, %v33315_v63 }
 0x3fc   : > { %27065 = vmatmul.mubr.msk.f32.gmra.mrb[20].mxu1 %vm496_vm0, %v33319_v24 }
 0x3fd   : > { %27067 = vmatprep.mubr.msk.f32.mxu1 %vm496_vm0, %v33323_v43 }
 0x400   : > { %27068 = vmatmul.mubr.msk.f32.gmra.mrb[22].mxu1 %vm496_vm0, %v33327_v44 }
 0x401   : > { %27070 = vmatprep.mubr.msk.f32.mxu1 %vm496_vm0, %v33331_v45 }
 0x404   : > { %27071 = vmatmul.mubr.msk.f32.gmra.mrb[24].mxu1 %vm496_vm0, %v33335_v48 }
 0x405   : > { %27073 = vmatprep.mubr.msk.f32.mxu1 %vm496_vm0, %v33339_v29 }
 0x408   : > { %27074 = vmatmul.mubr.msk.f32.gmra.mrb[26].mxu1 %vm496_vm0, %v33343_v42 }
 0x409   : > { %27076 = vmatprep.mubr.msk.f32.mxu1 %vm496_vm0, %v33347_v36 }
 0x40c   : > { %27077 = vmatmul.mubr.msk.f32.gmra.mrb[28].mxu1 %vm496_vm0, %v33351_v9 }
 0x40d   : > { %27079 = vmatprep.mubr.msk.f32.mxu1 %vm496_vm0, %v33355_v10 }
 0x410   : > { %27080 = vmatmul.mubr.msk.f32.gmra.mrb[30].mxu1 %vm496_vm0, %v33359_v14 }
 0x411   : > { %27090 = vmatprep.mubr.msk.f32.mxu1 %vm496_vm0, %v5009_v12  ;;  %v33376_v12 = vld [vmem:[#allocation2 + $0x49] sm:$0xff] }
 0x412   : > { %38926 = vst [vmem:[#allocation65_spill] sm:$0xff] %v33376_v12 }
 0x414   : > { %27091 = vmatmul.mubr.msk.f32.vlgmr.msra.gmra.mrb[0].mxu1 %vm496_vm0, %v5010_v35  ;;  %v33381_v35 = vld [vmem:[#allocation2 + $0x51] sm:$0xff] }
 0x415   : > { %29463 = vmatpush3.bf16.msra.mxu1 %v33244_v33  ;;  %27093 = vmatprep.mubr.msk.f32.mxu1 %vm496_vm0, %v33365_v16  ;;  %38927 = vst [vmem:[#allocation67_spill] sm:$0xff] %v33381_v35  ;;  %v33393_v33 = vld [vmem:[#allocation2 + $0x89] sm:$0xff] }
 0x416   : > { %29465 = vmatprep.subr.bf16.mxu1 %v29464_v3  ;;  %38930 = vst [vmem:[#allocation72_spill] sm:$0xff] %v33393_v33 }
 0x418   : > { %27094 = vmatmul.mubr.msk.f32.gmra.mrb[2].mxu1 %vm496_vm0, %v33372_v51 }
 0x419   : > { %27096 = vmatprep.mubr.msk.f32.mxu1 %vm496_vm0, %v33376_v12  ;;  %29467 = vmatpush3.bf16.msra.mxu1 %v29464_v3  ;;  %v33397_v3 = vld [vmem:[#allocation2 + $0x91] sm:$0xff]  ;;  %v6213_v12 = vld [vmem:[#allocation3 + $0xa8] sm:$0xff] }
 0x41a   : > { %29469 = vmatprep.subr.bf16.mxu1 %v33370_v47  ;;  %38931 = vst [vmem:[#allocation74_spill] sm:$0xff] %v33397_v3 }
 0x41c   : > { %27097 = vmatmul.mubr.msk.f32.gmra.mrb[4].mxu1 %vm496_vm0, %v33381_v35  ;;  %v5825_v35 = vld [vmem:[#allocation3 + $0x98] sm:$0xff] }
 0x41d   : > { %27099 = vmatprep.mubr.msk.f32.mxu1 %vm496_vm0, %v33385_v8  ;;  %v5824_v8 = vld [vmem:[#allocation3 + $0x90] sm:$0xff] }
 0x420   : > { %27100 = vmatmul.mubr.msk.f32.gmra.mrb[6].mxu1 %vm496_vm0, %v33389_v15  ;;  %v33409_v15 = vld [vmem:[#allocation2 + $0xc9] sm:$0xff] }
 0x421   : > { %27102 = vmatprep.mubr.msk.f32.mxu1 %vm496_vm0, %v33393_v33  ;;  %38934 = vst [vmem:[#allocation56_spill] sm:$0xff] %v33409_v15  ;;  %v33413_v33 = vld [vmem:[#allocation2 + $0xd1] sm:$0xff] }
 0x422   : > { %38935 = vst [vmem:[#allocation57_spill] sm:$0xff] %v33413_v33 }
 0x424   : > { %27103 = vmatmul.mubr.msk.f32.gmra.mrb[8].mxu1 %vm496_vm0, %v33397_v3  ;;  %v33417_v3 = vld [vmem:[#allocation2 + $0xe9] sm:$0xff] }
 0x425   : > { %27105 = vmatprep.mubr.msk.f32.mxu1 %vm496_vm0, %v33401_v19  ;;  %38936 = vst [vmem:[#allocation58_spill] sm:$0xff] %v33417_v3  ;;  %v33421_v19 = vld [vmem:[#allocation2 + $0xf1] sm:$0xff] }
 0x426   : > { %38937 = vst [vmem:[#allocation59_spill] sm:$0xff] %v33421_v19 }
 0x428   : > { %27106 = vmatmul.mubr.msk.f32.gmra.mrb[10].mxu1 %vm496_vm0, %v33405_v25  ;;  %v33425_v25 = vld [vmem:[#allocation2 + $0x109] sm:$0xff] }
 0x429   : > { %27108 = vmatprep.mubr.msk.f32.mxu1 %vm496_vm0, %v33409_v15  ;;  %38938 = vst [vmem:[#allocation60_spill] sm:$0xff] %v33425_v25  ;;  %v33429_v15 = vld [vmem:[#allocation2 + $0x111] sm:$0xff] }
 0x42a   : > { %38939 = vst [vmem:[#allocation61_spill] sm:$0xff] %v33429_v15 }
 0x42c   : > { %27109 = vmatmul.mubr.msk.f32.gmra.mrb[12].mxu1 %vm496_vm0, %v33413_v33  ;;  %v33433_v33 = vld [vmem:[#allocation2 + $0x129] sm:$0xff] }
 0x42d   : > { %27111 = vmatprep.mubr.msk.f32.mxu1 %vm496_vm0, %v33417_v3  ;;  %38940 = vst [vmem:[#allocation62_spill] sm:$0xff] %v33433_v33  ;;  %v33437_v3 = vld [vmem:[#allocation2 + $0x131] sm:$0xff] }
 0x42e   : > { %38941 = vst [vmem:[#allocation63_spill] sm:$0xff] %v33437_v3 }
 0x430   : > { %27112 = vmatmul.mubr.msk.f32.gmra.mrb[14].mxu1 %vm496_vm0, %v33421_v19  ;;  %v33441_v19 = vld [vmem:[#allocation2 + $0x149] sm:$0xff] }
 0x431   : > { %27114 = vmatprep.mubr.msk.f32.mxu1 %vm496_vm0, %v33425_v25  ;;  %38942 = vst [vmem:[#allocation64_spill] sm:$0xff] %v33441_v19  ;;  %v33445_v25 = vld [vmem:[#allocation2 + $0x151] sm:$0xff] }
 0x432   : > { %38943 = vst [vmem:[#allocation66_spill] sm:$0xff] %v33445_v25 }
 0x434   : > { %27115 = vmatmul.mubr.msk.f32.gmra.mrb[16].mxu1 %vm496_vm0, %v33429_v15  ;;  %v33449_v15 = vld [vmem:[#allocation2 + $0x169] sm:$0xff] }
 0x435   : > { %27117 = vmatprep.mubr.msk.f32.mxu1 %vm496_vm0, %v33433_v33  ;;  %38944 = vst [vmem:[#allocation68_spill] sm:$0xff] %v33449_v15  ;;  %v33453_v33 = vld [vmem:[#allocation2 + $0x171] sm:$0xff] }
 0x436   : > { %38945 = vst [vmem:[#allocation71_spill] sm:$0xff] %v33453_v33 }
 0x438   : > { %27118 = vmatmul.mubr.msk.f32.gmra.mrb[18].mxu1 %vm496_vm0, %v33437_v3  ;;  %v33457_v3 = vld [vmem:[#allocation2 + $0x189] sm:$0xff] }
 0x439   : > { %27120 = vmatprep.mubr.msk.f32.mxu1 %vm496_vm0, %v33441_v19  ;;  %38946 = vst [vmem:[#allocation73_spill] sm:$0xff] %v33457_v3  ;;  %v33461_v19 = vld [vmem:[#allocation2 + $0x191] sm:$0xff] }
 0x43a   : > { %38947 = vst [vmem:[#allocation75_spill] sm:$0xff] %v33461_v19 }
 0x43c   : > { %27121 = vmatmul.mubr.msk.f32.gmra.mrb[20].mxu1 %vm496_vm0, %v33445_v25  ;;  %v33465_v25 = vld [vmem:[#allocation2 + $0x1a9] sm:$0xff] }
 0x43d   : > { %27123 = vmatprep.mubr.msk.f32.mxu1 %vm496_vm0, %v33449_v15  ;;  %38948 = vst [vmem:[#allocation76_spill] sm:$0xff] %v33465_v25  ;;  %v33469_v15 = vld [vmem:[#allocation2 + $0x1b1] sm:$0xff] }
 0x43e   : > { %38949 = vst [vmem:[#allocation77_spill] sm:$0xff] %v33469_v15 }
 0x440   : > { %27124 = vmatmul.mubr.msk.f32.gmra.mrb[22].mxu1 %vm496_vm0, %v33453_v33  ;;  %v33473_v33 = vld [vmem:[#allocation2 + $0x1c9] sm:$0xff] }
 0x441   : > { %27126 = vmatprep.mubr.msk.f32.mxu1 %vm496_vm0, %v33457_v3  ;;  %38950 = vst [vmem:[#allocation78_spill] sm:$0xff] %v33473_v33  ;;  %v33477_v3 = vld [vmem:[#allocation2 + $0x1d1] sm:$0xff] }
 0x442   : > { %38951 = vst [vmem:[#allocation79_spill] sm:$0xff] %v33477_v3 }
 0x444   : > { %27127 = vmatmul.mubr.msk.f32.gmra.mrb[24].mxu1 %vm496_vm0, %v33461_v19  ;;  %v33481_v19 = vld [vmem:[#allocation2 + $0x1e9] sm:$0xff] }
 0x445   : > { %27129 = vmatprep.mubr.msk.f32.mxu1 %vm496_vm0, %v33465_v25  ;;  %38952 = vst [vmem:[#allocation80_spill] sm:$0xff] %v33481_v19  ;;  %v33485_v25 = vld [vmem:[#allocation2 + $0x1f1] sm:$0xff] }
 0x448   : > { %27130 = vmatmul.mubr.msk.f32.gmra.mrb[26].mxu1 %vm496_vm0, %v33469_v15  ;;  %v6212_v15 = vld [vmem:[#allocation3 + $0xa0] sm:$0xff] }
 0x449   : > { %27132 = vmatprep.mubr.msk.f32.mxu1 %vm496_vm0, %v33473_v33  ;;  %v29472_v33 = vpack.c.bf16 %v5825_v35, %v5824_v8  ;;  %v6602_v8 = vld [vmem:[#allocation3 + $0xc0] sm:$0xff] }
 0x44c   : > { %27133 = vmatmul.mubr.msk.f32.gmra.mrb[28].mxu1 %vm496_vm0, %v33477_v3 }
 0x44d   : > { %27135 = vmatprep.mubr.msk.f32.mxu1 %vm496_vm0, %v33481_v19  ;;  %v29476_v19 = vpack.c.bf16 %v6213_v12, %v6212_v15  ;;  %v6215_v12 = vld [vmem:[#allocation3 + $0xb8] sm:$0xff]  ;;  %v6603_v15 = vld [vmem:[#allocation3 + $0xc8] sm:$0xff] }
 0x450   : > { %27136 = vmatmul.mubr.msk.f32.gmra.mrb[30].mxu1 %vm496_vm0, %v33485_v25 }
 0x451   : > { %27146 = vmatprep.mubr.msk.f32.mxu1 %vm496_vm0, %v33239_v27  ;;  %v33554_v27 = vld [vmem:[#allocation2 + $0x20f] sm:$0xff] }
 0x454   : > { %27147 = vmatmul.mubr.msk.f32.vlgmr.msra.gmra.mrb[0].mxu1 %vm496_vm0, %v33246_v39  ;;  %v6214_v39 = vld [vmem:[#allocation3 + $0xb0] sm:$0xff] }
 0x455   : > { %29471 = vmatpush3.bf16.msra.mxu1 %v33370_v47  ;;  %27149 = vmatprep.mubr.msk.f32.mxu1 %vm496_vm0, %v33250_v40  ;;  %v33550_v47 = vld [vmem:[#allocation2 + $0x207] sm:$0xff]  ;;  %v29480_v35 = vpack.c.bf16 %v6215_v12, %v6214_v39  ;;  %v38972_v12 = vld [vmem:[#allocation60_spill] sm:$0xff] }
 0x456   : > { %29473 = vmatprep.subr.bf16.mxu1 %v29472_v33  ;;  %v38971_v39 = vld [vmem:[#allocation59_spill] sm:$0xff] }
 0x458   : > { %27150 = vmatmul.mubr.msk.f32.gmra.mrb[2].mxu1 %vm496_vm0, %v33255_v2 }
 0x459   : > { %27152 = vmatprep.mubr.msk.f32.mxu1 %vm496_vm0, %v33259_v41  ;;  %29475 = vmatpush3.bf16.msra.mxu1 %v29472_v33  ;;  %v29484_v33 = vpack.c.bf16 %v6603_v15, %v6602_v8  ;;  %v38974_v8 = vld [vmem:[#allocation62_spill] sm:$0xff]  ;;  %v38975_v15 = vld [vmem:[#allocation63_spill] sm:$0xff] }
 0x45a   : > { %29477 = vmatprep.subr.bf16.mxu1 %v29476_v19 }
 0x45c   : > { %27153 = vmatmul.mubr.msk.f32.gmra.mrb[4].mxu1 %vm496_vm0, %v33263_v50 }
 0x45d   : > { %27155 = vmatprep.mubr.msk.f32.mxu1 %vm496_vm0, %v33267_v57 }
 0x460   : > { %27156 = vmatmul.mubr.msk.f32.gmra.mrb[6].mxu1 %vm496_vm0, %v33271_v59 }
 0x461   : > { %27158 = vmatprep.mubr.msk.f32.mxu1 %vm496_vm0, %v33275_v60 }
 0x464   : > { %27159 = vmatmul.mubr.msk.f32.gmra.mrb[8].mxu1 %vm496_vm0, %v33279_v61 }
 0x465   : > { %27161 = vmatprep.mubr.msk.f32.mxu1 %vm496_vm0, %v33283_v22 }
 0x468   : > { %27162 = vmatmul.mubr.msk.f32.gmra.mrb[10].mxu1 %vm496_vm0, %v33287_v5 }
 0x469   : > { %27164 = vmatprep.mubr.msk.f32.mxu1 %vm496_vm0, %v33291_v11 }
 0x46c   : > { %27165 = vmatmul.mubr.msk.f32.gmra.mrb[12].mxu1 %vm496_vm0, %v33295_v30 }
 0x46d   : > { %27167 = vmatprep.mubr.msk.f32.mxu1 %vm496_vm0, %v33299_v58 }
 0x470   : > { %27168 = vmatmul.mubr.msk.f32.gmra.mrb[14].mxu1 %vm496_vm0, %v33303_v28 }
 0x471   : > { %27170 = vmatprep.mubr.msk.f32.mxu1 %vm496_vm0, %v33307_v21 }
 0x474   : > { %27171 = vmatmul.mubr.msk.f32.gmra.mrb[16].mxu1 %vm496_vm0, %v33311_v17 }
 0x475   : > { %27173 = vmatprep.mubr.msk.f32.mxu1 %vm496_vm0, %v33315_v63 }
 0x478   : > { %27174 = vmatmul.mubr.msk.f32.gmra.mrb[18].mxu1 %vm496_vm0, %v33319_v24 }
 0x479   : > { %27176 = vmatprep.mubr.msk.f32.mxu1 %vm496_vm0, %v33323_v43 }
 0x47c   : > { %27177 = vmatmul.mubr.msk.f32.gmra.mrb[20].mxu1 %vm496_vm0, %v33327_v44 }
 0x47d   : > { %27179 = vmatprep.mubr.msk.f32.mxu1 %vm496_vm0, %v33331_v45 }
 0x480   : > { %27180 = vmatmul.mubr.msk.f32.gmra.mrb[22].mxu1 %vm496_vm0, %v33335_v48 }
 0x481   : > { %27182 = vmatprep.mubr.msk.f32.mxu1 %vm496_vm0, %v33339_v29 }
 0x484   : > { %27183 = vmatmul.mubr.msk.f32.gmra.mrb[24].mxu1 %vm496_vm0, %v33343_v42 }
 0x485   : > { %27185 = vmatprep.mubr.msk.f32.mxu1 %vm496_vm0, %v33347_v36 }
 0x488   : > { %27186 = vmatmul.mubr.msk.f32.gmra.mrb[26].mxu1 %vm496_vm0, %v33351_v9 }
 0x489   : > { %27188 = vmatprep.mubr.msk.f32.mxu1 %vm496_vm0, %v33355_v10 }
 0x48c   : > { %27189 = vmatmul.mubr.msk.f32.gmra.mrb[28].mxu1 %vm496_vm0, %v33359_v14 }
 0x48d   : > { %27191 = vmatprep.mubr.msk.f32.mxu1 %vm496_vm0, %v33550_v47 }
 0x490   : > { %27192 = vmatmul.mubr.msk.f32.gmra.mrb[30].mxu1 %vm496_vm0, %v33554_v27 }
 0x491   : > { %27202 = vmatprep.mubr.msk.f32.mxu1 %vm496_vm0, %v33065_v13  ;;  %v38953_v13 = vld [vmem:[#allocation46_spill] sm:$0xff] }
 0x494   : > { %27203 = vmatmul.mubr.msk.f32.vlgmr.msra.gmra.mrb[0].mxu1 %vm496_vm0, %v33071_v18  ;;  %v38954_v18 = vld [vmem:[#allocation47_spill] sm:$0xff] }
 0x495   : > { %29479 = vmatpush3.bf16.msra.mxu1 %v29476_v19  ;;  %27205 = vmatprep.mubr.msk.f32.mxu1 %vm496_vm0, %v33077_v32  ;;  %v38955_v32 = vld [vmem:[#allocation48_spill] sm:$0xff]  ;;  %v38970_v19 = vld [vmem:[#allocation58_spill] sm:$0xff] }
 0x496   : > { %29481 = vmatprep.subr.bf16.mxu1 %v29480_v35 }
 0x498   : > { %27206 = vmatmul.mubr.msk.f32.gmra.mrb[2].mxu1 %vm496_vm0, %v33083_v34  ;;  %v38956_v34 = vld [vmem:[#allocation50_spill] sm:$0xff] }
 0x499   : > { %27208 = vmatprep.mubr.msk.f32.mxu1 %vm496_vm0, %v33089_v54  ;;  %29483 = vmatpush3.bf16.msra.mxu1 %v29480_v35  ;;  %v38957_v54 = vld [vmem:[#allocation51_spill] sm:$0xff]  ;;  %v38973_v35 = vld [vmem:[#allocation61_spill] sm:$0xff] }
 0x49a   : > { %29485 = vmatprep.subr.bf16.mxu1 %v29484_v33 }
 0x49c   : > { %27209 = vmatmul.mubr.msk.f32.gmra.mrb[4].mxu1 %vm496_vm0, %v33095_v56  ;;  %v38958_v56 = vld [vmem:[#allocation52_spill] sm:$0xff] }
 0x49d   : > { %27211 = vmatprep.mubr.msk.f32.mxu1 %vm496_vm0, %v33101_v0  ;;  %v38959_v0 = vld [vmem:[#allocation53_spill] sm:$0xff] }
 0x4a0   : > { %27212 = vmatmul.mubr.msk.f32.gmra.mrb[6].mxu1 %vm496_vm0, %v33107_v4  ;;  %v33618_v4 = vld [vmem:[#allocation2 + $0x208] sm:$0xff] }
 0x4a1   : > { %27214 = vmatprep.mubr.msk.f32.mxu1 %vm496_vm0, %v33113_v23  ;;  %v33622_v23 = vld [vmem:[#allocation2 + $0x210] sm:$0xff] }
 0x4a4   : > { %27215 = vmatmul.mubr.msk.f32.gmra.mrb[8].mxu1 %vm496_vm0, %v33119_v37  ;;  %v6604_v37 = vld [vmem:[#allocation3 + $0xd0] sm:$0xff] }
 0x4a5   : > { %27217 = vmatprep.mubr.msk.f32.mxu1 %vm496_vm0, %v33125_v1  ;;  %v6605_v1 = vld [vmem:[#allocation3 + $0xd8] sm:$0xff] }
 0x4a8   : > { %27218 = vmatmul.mubr.msk.f32.gmra.mrb[10].mxu1 %vm496_vm0, %v33131_v38  ;;  %v29488_v38 = vpack.c.bf16 %v6605_v1, %v6604_v37  ;;  %v38978_v37 = vld [vmem:[#allocation68_spill] sm:$0xff]  ;;  %v38979_v1 = vld [vmem:[#allocation71_spill] sm:$0xff] }
 0x4a9   : > { %27220 = vmatprep.mubr.msk.f32.mxu1 %vm496_vm0, %v33137_v49  ;;  %v6992_v49 = vld [vmem:[#allocation3 + $0xe0] sm:$0xff] }
 0x4ac   : > { %27221 = vmatmul.mubr.msk.f32.gmra.mrb[12].mxu1 %vm496_vm0, %v33143_v53  ;;  %v6993_v53 = vld [vmem:[#allocation3 + $0xe8] sm:$0xff] }
 0x4ad   : > { %27223 = vmatprep.mubr.msk.f32.mxu1 %vm496_vm0, %v33149_v31  ;;  %v38960_v31 = vld [vmem:[#allocation65_spill] sm:$0xff] }
 0x4b0   : > { %27224 = vmatmul.mubr.msk.f32.gmra.mrb[14].mxu1 %vm496_vm0, %v33155_v6  ;;  %v29492_v6 = vpack.c.bf16 %v6993_v53, %v6992_v49  ;;  %v38981_v49 = vld [vmem:[#allocation75_spill] sm:$0xff]  ;;  %v38982_v53 = vld [vmem:[#allocation76_spill] sm:$0xff] }
 0x4b1   : > { %27226 = vmatprep.mubr.msk.f32.mxu1 %vm496_vm0, %v33161_v20  ;;  %v38961_v20 = vld [vmem:[#allocation67_spill] sm:$0xff] }
 0x4b4   : > { %27227 = vmatmul.mubr.msk.f32.gmra.mrb[16].mxu1 %vm496_vm0, %v33167_v26  ;;  %v38962_v26 = vld [vmem:[#allocation69_spill] sm:$0xff] }
 0x4b5   : > { %27229 = vmatprep.mubr.msk.f32.mxu1 %vm496_vm0, %v33173_v46  ;;  %v38963_v46 = vld [vmem:[#allocation70_spill] sm:$0xff] }
 0x4b8   : > { %27230 = vmatmul.mubr.msk.f32.gmra.mrb[18].mxu1 %vm496_vm0, %v33179_v55  ;;  %v38964_v55 = vld [vmem:[#allocation72_spill] sm:$0xff] }
 0x4b9   : > { %27232 = vmatprep.mubr.msk.f32.mxu1 %vm496_vm0, %v33185_v62  ;;  %v38965_v62 = vld [vmem:[#allocation74_spill] sm:$0xff] }
 0x4bc   : > { %27233 = vmatmul.mubr.msk.f32.gmra.mrb[20].mxu1 %vm496_vm0, %v33191_v7  ;;  %v38966_v7 = vld [vmem:[#allocation54_spill] sm:$0xff] }
 0x4bd   : > { %27235 = vmatprep.mubr.msk.f32.mxu1 %vm496_vm0, %v33197_v52  ;;  %v38967_v52 = vld [vmem:[#allocation55_spill] sm:$0xff] }
 0x4c0   : > { %27236 = vmatmul.mubr.msk.f32.gmra.mrb[22].mxu1 %vm496_vm0, %v38953_v13  ;;  %v38977_v13 = vld [vmem:[#allocation66_spill] sm:$0xff] }
 0x4c1   : > { %27238 = vmatprep.mubr.msk.f32.mxu1 %vm496_vm0, %v38954_v18 }
 0x4c4   : > { %27239 = vmatmul.mubr.msk.f32.gmra.mrb[24].mxu1 %vm496_vm0, %v38955_v32 }
 0x4c5   : > { %27241 = vmatprep.mubr.msk.f32.mxu1 %vm496_vm0, %v38956_v34 }
 0x4c8   : > { %27242 = vmatmul.mubr.msk.f32.gmra.mrb[26].mxu1 %vm496_vm0, %v38957_v54 }
 0x4c9   : > { %27244 = vmatprep.mubr.msk.f32.mxu1 %vm496_vm0, %v38958_v56 }
 0x4cc   : > { %27245 = vmatmul.mubr.msk.f32.gmra.mrb[28].mxu1 %vm496_vm0, %v38959_v0 }
 0x4cd   : > { %27247 = vmatprep.mubr.msk.f32.mxu1 %vm496_vm0, %v33618_v4 }
 0x4d0   : > { %27248 = vmatmul.mubr.msk.f32.gmra.mrb[30].mxu1 %vm496_vm0, %v33622_v23 }
 0x4d1   : > { %27258 = vmatprep.mubr.msk.f32.mxu1 %vm496_vm0, %v33365_v16  ;;  %v38969_v16 = vld [vmem:[#allocation57_spill] sm:$0xff] }
 0x4d4   : > { %27259 = vmatmul.mubr.msk.f32.vlgmr.msra.gmra.mrb[0].mxu1 %vm496_vm0, %v33372_v51  ;;  %v38968_v51 = vld [vmem:[#allocation56_spill] sm:$0xff] }
 0x4d5   : > { %29487 = vmatpush3.bf16.msra.mxu1 %v29484_v33  ;;  %27261 = vmatprep.mubr.msk.f32.mxu1 %vm496_vm0, %v38960_v31  ;;  %v38976_v33 = vld [vmem:[#allocation64_spill] sm:$0xff] }
 0x4d6   : > { %29489 = vmatprep.subr.bf16.mxu1 %v29488_v38 }
 0x4d8   : > { %27262 = vmatmul.mubr.msk.f32.gmra.mrb[2].mxu1 %vm496_vm0, %v38961_v20 }
 0x4d9   : > { %27264 = vmatprep.mubr.msk.f32.mxu1 %vm496_vm0, %v38962_v26  ;;  %29491 = vmatpush3.bf16.msra.mxu1 %v29488_v38  ;;  %v38980_v38 = vld [vmem:[#allocation73_spill] sm:$0xff] }
 0x4da   : > { %29493 = vmatprep.subr.bf16.mxu1 %v29492_v6 }
 0x4dc   : > { %27265 = vmatmul.mubr.msk.f32.gmra.mrb[4].mxu1 %vm496_vm0, %v38963_v46 }
 0x4dd   : > { %27267 = vmatprep.mubr.msk.f32.mxu1 %vm496_vm0, %v38964_v55 }
 0x4e0   : > { %27268 = vmatmul.mubr.msk.f32.gmra.mrb[6].mxu1 %vm496_vm0, %v38965_v62 }
 0x4e1   : > { %27270 = vmatprep.mubr.msk.f32.mxu1 %vm496_vm0, %v38966_v7 }
 0x4e4   : > { %27271 = vmatmul.mubr.msk.f32.gmra.mrb[8].mxu1 %vm496_vm0, %v38967_v52 }
 0x4e5   : > { %27273 = vmatprep.mubr.msk.f32.mxu1 %vm496_vm0, %v38968_v51 }
 0x4e8   : > { %27274 = vmatmul.mubr.msk.f32.gmra.mrb[10].mxu1 %vm496_vm0, %v38969_v16 }
 0x4e9   : > { %27276 = vmatprep.mubr.msk.f32.mxu1 %vm496_vm0, %v38970_v19 }
 0x4ec   : > { %27277 = vmatmul.mubr.msk.f32.gmra.mrb[12].mxu1 %vm496_vm0, %v38971_v39 }
 0x4ed   : > { %27279 = vmatprep.mubr.msk.f32.mxu1 %vm496_vm0, %v38972_v12 }
 0x4f0   : > { %27280 = vmatmul.mubr.msk.f32.gmra.mrb[14].mxu1 %vm496_vm0, %v38973_v35 }
 0x4f1   : > { %27282 = vmatprep.mubr.msk.f32.mxu1 %vm496_vm0, %v38974_v8 }
 0x4f4   : > { %27283 = vmatmul.mubr.msk.f32.gmra.mrb[16].mxu1 %vm496_vm0, %v38975_v15  ;;  %v38983_v15 = vld [vmem:[#allocation77_spill] sm:$0xff] }
 0x4f5   : > { %27285 = vmatprep.mubr.msk.f32.mxu1 %vm496_vm0, %v38976_v33  ;;  %v38984_v33 = vld [vmem:[#allocation78_spill] sm:$0xff] }
 0x4f8   : > { %27286 = vmatmul.mubr.msk.f32.gmra.mrb[18].mxu1 %vm496_vm0, %v38977_v13 }
 0x4f9   : > { %27288 = vmatprep.mubr.msk.f32.mxu1 %vm496_vm0, %v38978_v37  ;;  %v38985_v37 = vld [vmem:[#allocation80_spill] sm:$0xff] }
 0x4fc   : > { %27289 = vmatmul.mubr.msk.f32.gmra.mrb[20].mxu1 %vm496_vm0, %v38979_v1 }
 0x4fd   : > { %27291 = vmatprep.mubr.msk.f32.mxu1 %vm496_vm0, %v38980_v38  ;;  %v33686_v38 = vld [vmem:[#allocation2 + $0x209] sm:$0xff] }
 0x4fe   : > { %38986 = vst [vmem:[#allocation46_spill] sm:$0xff] %v33686_v38 }
 0x500   : > { %27292 = vmatmul.mubr.msk.f32.gmra.mrb[22].mxu1 %vm496_vm0, %v38981_v49  ;;  %v6995_v49 = vld [vmem:[#allocation3 + $0xf8] sm:$0xff] }
 0x501   : > { %27294 = vmatprep.mubr.msk.f32.mxu1 %vm496_vm0, %v38982_v53  ;;  %v33690_v53 = vld [vmem:[#allocation2 + $0x211] sm:$0xff] }
 0x504   : > { %27295 = vmatmul.mubr.msk.f32.gmra.mrb[24].mxu1 %vm496_vm0, %v38983_v15  ;;  %v6994_v15 = vld [vmem:[#allocation3 + $0xf0] sm:$0xff] }
 0x505   : > { %27297 = vmatprep.mubr.msk.f32.mxu1 %vm496_vm0, %v38984_v33  ;;  %v7383_v33 = vld [vmem:[#allocation3 + $0x108] sm:$0xff] }
 0x508   : > { %27298 = vmatmul.mubr.msk.f32.gmra.mrb[26].mxu1 %vm496_vm0, %v33477_v3  ;;  %v29496_v3 = vpack.c.bf16 %v6995_v49, %v6994_v15  ;;  %v6980_v15 = vld [vmem:[#allocation2 + $0x190] sm:$0xff] }
 0x509   : > { %27300 = vmatprep.mubr.msk.f32.mxu1 %vm496_vm0, %v38985_v37  ;;  %v7382_v37 = vld [vmem:[#allocation3 + $0x100] sm:$0xff] }
 0x50c   : > { %27301 = vmatmul.mubr.msk.f32.gmra.mrb[28].mxu1 %vm496_vm0, %v33485_v25 }
 0x50d   : > { %27303 = vmatprep.mubr.msk.f32.mxu1 %vm496_vm0, %v33686_v38  ;;  %v29500_v38 = vpack.c.bf16 %v7383_v33, %v7382_v37  ;;  %v6989_v33 = vld [vmem:[#allocation2 + $0x228] sm:$0xff]  ;;  %v33866_v37 = vld [vmem:[%s38340_s4] ss:$0 sm:$0xff] }
 0x510   : > { %27304 = vmatmul.mubr.msk.f32.gmra.mrb[30].mxu1 %vm496_vm0, %v33690_v53 }
 0x511   : > { %27314 = vmatprep.mubr.msk.f32.mxu1 %vm496_vm0, %v33250_v40  ;;  %v6599_v40 = vld [vmem:[#allocation2 + $0x227] sm:$0xff] }
 0x514   : > { %27315 = vmatmul.mubr.msk.f32.vlgmr.msra.gmra.mrb[0].mxu1 %vm496_vm0, %v33255_v2  ;;  %v6600_v2 = vld [vmem:[#allocation2 + $0x22f] sm:$0xff] }
 0x515   : > { %29495 = vmatpush3.bf16.msra.mxu1 %v29492_v6  ;;  %27317 = vmatprep.mubr.msk.f32.mxu1 %vm496_vm0, %v33259_v41  ;;  %v6959_v41 = vld [vmem:[#allocation2 + $0x48] sm:$0xff] }
 0x516   : > { %29497 = vmatprep.subr.bf16.mxu1 %v29496_v3  ;;  %v6979_v6 = vld [vmem:[#allocation2 + $0x188] sm:$0xff] }
 0x518   : > { %27318 = vmatmul.mubr.msk.f32.gmra.mrb[2].mxu1 %vm496_vm0, %v33263_v50  ;;  %v7384_v50 = vld [vmem:[#allocation3 + $0x110] sm:$0xff] }
 0x519   : > { %27320 = vmatprep.mubr.msk.f32.mxu1 %vm496_vm0, %v33267_v57  ;;  %29499 = vmatpush3.bf16.msra.mxu1 %v29496_v3  ;;  %v7385_v57 = vld [vmem:[#allocation3 + $0x118] sm:$0xff]  ;;  %v6976_v3 = vld [vmem:[#allocation2 + $0x150] sm:$0xff] }
 0x51a   : > { %29501 = vmatprep.subr.bf16.mxu1 %v29500_v38 }
 0x51c   : > { %27321 = vmatmul.mubr.msk.f32.gmra.mrb[4].mxu1 %vm496_vm0, %v33271_v59  ;;  %v7911_v59 = vld [vmem:[#allocation5 + $0x20] sm:$0xff] }
 0x51d   : > { %27323 = vmatprep.mubr.msk.f32.mxu1 %vm496_vm0, %v33275_v60  ;;  %v7912_v60 = vld [vmem:[#allocation5 + $0x28] sm:$0xff] }
 0x520   : > { %27324 = vmatmul.mubr.msk.f32.gmra.mrb[6].mxu1 %vm496_vm0, %v33279_v61  ;;  %v7913_v61 = vld [vmem:[#allocation5 + $0x30] sm:$0xff] }
 0x521   : > { %27326 = vmatprep.mubr.msk.f32.mxu1 %vm496_vm0, %v33283_v22  ;;  %v29508_v22 = vpack.c.bf16 %v7912_v60, %v7911_v59 }
 0x523   : > { %29509 = vmatprep.subr.bf16.mxu0 %v29508_v22 }
 0x524   : > { %27327 = vmatmul.mubr.msk.f32.gmra.mrb[8].mxu1 %vm496_vm0, %v33287_v5  ;;  %v7914_v5 = vld [vmem:[#allocation5 + $0x38] sm:$0xff]  ;;  %29511 = vmatpush3.bf16.msra.mxu0 %v29508_v22 }
 0x525   : > { %27329 = vmatprep.mubr.msk.f32.mxu1 %vm496_vm0, %v33291_v11  ;;  %v29504_v11 = vpack.c.bf16 %v7385_v57, %v7384_v50 }
 0x528   : > { %27330 = vmatmul.mubr.msk.f32.gmra.mrb[10].mxu1 %vm496_vm0, %v33295_v30  ;;  %v29512_v30 = vpack.c.bf16 %v7914_v5, %v7913_v61 }
 0x529   : > { %27332 = vmatprep.mubr.msk.f32.mxu1 %vm496_vm0, %v33299_v58  ;;  %v6960_v58 = vld [vmem:[#allocation2 + $0x50] sm:$0xff] }
 0x52a   : > { %29513 = vmatprep.subr.bf16.mxu0 %v29512_v30 }
 0x52b   : > { %29515 = vmatpush3.bf16.msra.mxu0 %v29512_v30 }
 0x52c   : > { %27333 = vmatmul.mubr.msk.f32.gmra.mrb[12].mxu1 %vm496_vm0, %v33303_v28  ;;  %v6961_v28 = vld [vmem:[#allocation2 + $0x68] sm:$0xff] }
 0x52d   : > { %27335 = vmatprep.mubr.msk.f32.mxu1 %vm496_vm0, %v33307_v21  ;;  %v6962_v21 = vld [vmem:[#allocation2 + $0x70] sm:$0xff] }
 0x530   : > { %27336 = vmatmul.mubr.msk.f32.gmra.mrb[14].mxu1 %vm496_vm0, %v33311_v17  ;;  %v6963_v17 = vld [vmem:[#allocation2 + $0x88] sm:$0xff] }
 0x531   : > { %27338 = vmatprep.mubr.msk.f32.mxu1 %vm496_vm0, %v33315_v63  ;;  %v6964_v63 = vld [vmem:[#allocation2 + $0x90] sm:$0xff] }
 0x534   : > { %27339 = vmatmul.mubr.msk.f32.gmra.mrb[16].mxu1 %vm496_vm0, %v33319_v24  ;;  %v6965_v24 = vld [vmem:[#allocation2 + $0xa8] sm:$0xff] }
 0x535   : > { %27341 = vmatprep.mubr.msk.f32.mxu1 %vm496_vm0, %v33323_v43  ;;  %v6966_v43 = vld [vmem:[#allocation2 + $0xb0] sm:$0xff] }
 0x538   : > { %27342 = vmatmul.mubr.msk.f32.gmra.mrb[18].mxu1 %vm496_vm0, %v33327_v44  ;;  %v6967_v44 = vld [vmem:[#allocation2 + $0xc8] sm:$0xff] }
 0x539   : > { %27344 = vmatprep.mubr.msk.f32.mxu1 %vm496_vm0, %v33331_v45  ;;  %v6968_v45 = vld [vmem:[#allocation2 + $0xd0] sm:$0xff] }
 0x53c   : > { %27345 = vmatmul.mubr.msk.f32.gmra.mrb[20].mxu1 %vm496_vm0, %v33335_v48  ;;  %v6969_v48 = vld [vmem:[#allocation2 + $0xe8] sm:$0xff] }
 0x53d   : > { %27347 = vmatprep.mubr.msk.f32.mxu1 %vm496_vm0, %v33339_v29  ;;  %v6970_v29 = vld [vmem:[#allocation2 + $0xf0] sm:$0xff] }
 0x540   : > { %27348 = vmatmul.mubr.msk.f32.gmra.mrb[22].mxu1 %vm496_vm0, %v33343_v42  ;;  %v6971_v42 = vld [vmem:[#allocation2 + $0x108] sm:$0xff] }
 0x541   : > { %27350 = vmatprep.mubr.msk.f32.mxu1 %vm496_vm0, %v33347_v36  ;;  %v6972_v36 = vld [vmem:[#allocation2 + $0x110] sm:$0xff] }
 0x544   : > { %27351 = vmatmul.mubr.msk.f32.gmra.mrb[24].mxu1 %vm496_vm0, %v33351_v9  ;;  %v6973_v9 = vld [vmem:[#allocation2 + $0x128] sm:$0xff] }
 0x545   : > { %27353 = vmatprep.mubr.msk.f32.mxu1 %vm496_vm0, %v33355_v10  ;;  %v6974_v10 = vld [vmem:[#allocation2 + $0x130] sm:$0xff] }
 0x548   : > { %27354 = vmatmul.mubr.msk.f32.gmra.mrb[26].mxu1 %vm496_vm0, %v33359_v14  ;;  %v6975_v14 = vld [vmem:[#allocation2 + $0x148] sm:$0xff] }
 0x549   : > { %27356 = vmatprep.mubr.msk.f32.mxu1 %vm496_vm0, %v33550_v47  ;;  %v6977_v47 = vld [vmem:[#allocation2 + $0x168] sm:$0xff] }
 0x54c   : > { %27357 = vmatmul.mubr.msk.f32.gmra.mrb[28].mxu1 %vm496_vm0, %v33554_v27  ;;  %v6978_v27 = vld [vmem:[#allocation2 + $0x170] sm:$0xff] }
 0x54d   : > { %27359 = vmatprep.mubr.msk.f32.mxu1 %vm496_vm0, %v6599_v40 }
 0x550   : > { %27360 = vmatmul.mubr.msk.f32.gmra.mrb[30].mxu1 %vm496_vm0, %v6600_v2 }
 0x551   : > { %27370 = vmatprep.mubr.msk.f32.mxu1 %vm496_vm0, %v6959_v41 }
 0x554   : > { %27371 = vmatmul.mubr.msk.f32.vlgmr.msra.gmra.mrb[0].mxu1 %vm496_vm0, %v6960_v58 }
 0x555   : > { %29503 = vmatpush3.bf16.msra.mxu1 %v29500_v38  ;;  %27373 = vmatprep.mubr.msk.f32.mxu1 %vm496_vm0, %v6961_v28 }
 0x556   : > { %29505 = vmatprep.subr.bf16.mxu1 %v29504_v11 }
 0x558   : > { %27374 = vmatmul.mubr.msk.f32.gmra.mrb[2].mxu1 %vm496_vm0, %v6962_v21 }
 0x559   : > { %27376 = vmatprep.mubr.msk.f32.mxu1 %vm496_vm0, %v6963_v17  ;;  %29507 = vmatpush3.bf16.msra.mxu1 %v29504_v11 }
 0x55c   : > { %27377 = vmatmul.mubr.msk.f32.gmra.mrb[4].mxu1 %vm496_vm0, %v6964_v63 }
 0x55d   : > { %27379 = vmatprep.mubr.msk.f32.mxu1 %vm496_vm0, %v6965_v24 }
 0x560   : > { %27380 = vmatmul.mubr.msk.f32.gmra.mrb[6].mxu1 %vm496_vm0, %v6966_v43 }
 0x561   : > { %27382 = vmatprep.mubr.msk.f32.mxu1 %vm496_vm0, %v6967_v44 }
 0x564   : > { %27383 = vmatmul.mubr.msk.f32.gmra.mrb[8].mxu1 %vm496_vm0, %v6968_v45 }
 0x565   : > { %27385 = vmatprep.mubr.msk.f32.mxu1 %vm496_vm0, %v6969_v48 }
 0x568   : > { %27386 = vmatmul.mubr.msk.f32.gmra.mrb[10].mxu1 %vm496_vm0, %v6970_v29 }
 0x569   : > { %27388 = vmatprep.mubr.msk.f32.mxu1 %vm496_vm0, %v6971_v42 }
 0x56c   : > { %27389 = vmatmul.mubr.msk.f32.gmra.mrb[12].mxu1 %vm496_vm0, %v6972_v36 }
 0x56d   : > { %27391 = vmatprep.mubr.msk.f32.mxu1 %vm496_vm0, %v6973_v9 }
 0x570   : > { %27392 = vmatmul.mubr.msk.f32.gmra.mrb[14].mxu1 %vm496_vm0, %v6974_v10 }
 0x571   : > { %27394 = vmatprep.mubr.msk.f32.mxu1 %vm496_vm0, %v6975_v14 }
 0x574   : > { %27395 = vmatmul.mubr.msk.f32.gmra.mrb[16].mxu1 %vm496_vm0, %v6976_v3 }
 0x575   : > { %27397 = vmatprep.mubr.msk.f32.mxu1 %vm496_vm0, %v6977_v47 }
 0x578   : > { %27398 = vmatmul.mubr.msk.f32.gmra.mrb[18].mxu1 %vm496_vm0, %v6978_v27 }
 0x579   : > { %27400 = vmatprep.mubr.msk.f32.mxu1 %vm496_vm0, %v6979_v6 }
 0x57c   : > { %27401 = vmatmul.mubr.msk.f32.gmra.mrb[20].mxu1 %vm496_vm0, %v6980_v15 }
 0x57d   : > { %27403 = vmatprep.mubr.msk.f32.mxu1 %vm496_vm0, %v38954_v18  ;;  %v6990_v18 = vld [vmem:[#allocation2 + $0x230] sm:$0xff] }
 0x580   : > { %27404 = vmatmul.mubr.msk.f32.gmra.mrb[22].mxu1 %vm496_vm0, %v38955_v32  ;;  %v38987_v32 = vld [vmem:[#allocation63_spill] sm:$0xff] }
 0x581   : > { %27406 = vmatprep.mubr.msk.f32.mxu1 %vm496_vm0, %v38956_v34  ;;  %v38988_v34 = vld [vmem:[#allocation64_spill] sm:$0xff] }
 0x584   : > { %27407 = vmatmul.mubr.msk.f32.gmra.mrb[24].mxu1 %vm496_vm0, %v38957_v54  ;;  %v38989_v54 = vld [vmem:[#allocation68_spill] sm:$0xff] }
 0x585   : > { %27409 = vmatprep.mubr.msk.f32.mxu1 %vm496_vm0, %v38958_v56  ;;  %v38990_v56 = vld [vmem:[#allocation73_spill] sm:$0xff] }
 0x588   : > { %27410 = vmatmul.mubr.msk.f32.gmra.mrb[26].mxu1 %vm496_vm0, %v38959_v0  ;;  %v38991_v0 = vld [vmem:[#allocation75_spill] sm:$0xff] }
 0x589   : > { %27412 = vmatprep.mubr.msk.f32.mxu1 %vm496_vm0, %v33618_v4  ;;  %v38992_v4 = vld [vmem:[#allocation76_spill] sm:$0xff] }
 0x58c   : > { %27413 = vmatmul.mubr.msk.f32.gmra.mrb[28].mxu1 %vm496_vm0, %v33622_v23  ;;  %v38993_v23 = vld [vmem:[#allocation77_spill] sm:$0xff] }
 0x58d   : > { %27415 = vmatprep.mubr.msk.f32.mxu1 %vm496_vm0, %v6989_v33 }
 0x590   : > { %27416 = vmatmul.mubr.msk.f32.gmra.mrb[30].mxu1 %vm496_vm0, %v6990_v18 }
 0x591   : > { %27426 = vmatprep.mubr.msk.f32.mxu1 %vm496_vm0, %v38960_v31  ;;  %v38994_v31 = vld [vmem:[#allocation78_spill] sm:$0xff] }
 0x594   : > { %27427 = vmatmul.mubr.msk.f32.vlgmr.msra.gmra.mrb[0].mxu1 %vm496_vm0, %v38961_v20  ;;  %v38995_v20 = vld [vmem:[#allocation79_spill] sm:$0xff] }
 0x595   : > { %27429 = vmatprep.mubr.msk.f32.mxu1 %vm496_vm0, %v38962_v26  ;;  %v38996_v26 = vld [vmem:[#allocation80_spill] sm:$0xff] }
 0x598   : > { %27430 = vmatmul.mubr.msk.f32.gmra.mrb[2].mxu1 %vm496_vm0, %v38963_v46  ;;  %v38997_v46 = vld [vmem:[#allocation46_spill] sm:$0xff] }
 0x599   : > { %27432 = vmatprep.mubr.msk.f32.mxu1 %vm496_vm0, %v38964_v55  ;;  %v7379_v55 = vld [vmem:[#allocation2 + $0x229] sm:$0xff] }
 0x59c   : > { %27433 = vmatmul.mubr.msk.f32.gmra.mrb[4].mxu1 %vm496_vm0, %v38965_v62  ;;  %v7380_v62 = vld [vmem:[#allocation2 + $0x231] sm:$0xff] }
 0x59d   : > { %27435 = vmatprep.mubr.msk.f32.mxu1 %vm496_vm0, %v38966_v7  ;;  %v7878_v7 = vld [vmem:[#allocation2 + $0x8] sm:$0xff] }
 0x59e   : > { %27482 = vmatprep.mubr.msk.f32.mxu0 %vm496_vm0, %v7878_v7 }
 0x5a0   : > { %27436 = vmatmul.mubr.msk.f32.gmra.mrb[6].mxu1 %vm496_vm0, %v38967_v52  ;;  %v7879_v52 = vld [vmem:[#allocation2 + $0x10] sm:$0xff] }
 0x5a1   : > { %27438 = vmatprep.mubr.msk.f32.mxu1 %vm496_vm0, %v38968_v51  ;;  %v7874_v51 = vld [vmem:[#allocation5] sm:$0xff]  ;;  %27483 = vmatmul.mubr.msk.f32.vlgmr.msra.gmra.mrb[32].mxu0 %vm496_vm0, %v7879_v52 }
 0x5a4   : > { %27439 = vmatmul.mubr.msk.f32.gmra.mrb[8].mxu1 %vm496_vm0, %v38969_v16  ;;  %v7875_v16 = vld [vmem:[#allocation5 + $0x8] sm:$0xff] }
 0x5a5   : > { %27441 = vmatprep.mubr.msk.f32.mxu1 %vm496_vm0, %v38970_v19  ;;  %v7876_v19 = vld [vmem:[#allocation5 + $0x10] sm:$0xff] }
 0x5a8   : > { %27442 = vmatmul.mubr.msk.f32.gmra.mrb[10].mxu1 %vm496_vm0, %v38971_v39  ;;  %v7877_v39 = vld [vmem:[#allocation5 + $0x18] sm:$0xff] }
 0x5a9   : > { %27444 = vmatprep.mubr.msk.f32.mxu1 %vm496_vm0, %v38972_v12  ;;  %v29520_v12 = vpack.c.bf16 %v7877_v39, %v7876_v19 }
 0x5ac   : > { %27445 = vmatmul.mubr.msk.f32.gmra.mrb[12].mxu1 %vm496_vm0, %v38973_v35  ;;  %v8590_v35 = vld [vmem:[#allocation5 + $0x40] sm:$0xff] }
 0x5ad   : > { %27447 = vmatprep.mubr.msk.f32.mxu1 %vm496_vm0, %v38974_v8  ;;  %v8591_v8 = vld [vmem:[#allocation5 + $0x48] sm:$0xff] }
 0x5b0   : > { %27448 = vmatmul.mubr.msk.f32.gmra.mrb[14].mxu1 %vm496_vm0, %v38987_v32 }
 0x5b1   : > { %27450 = vmatprep.mubr.msk.f32.mxu1 %vm496_vm0, %v38988_v34 }
 0x5b4   : > { %27451 = vmatmul.mubr.msk.f32.gmra.mrb[16].mxu1 %vm496_vm0, %v38977_v13  ;;  %v33860_v13 = vpack.c.bf16 %v8591_v8, %v8590_v35 }
 0x5b5   : > { %27453 = vmatprep.mubr.msk.f32.mxu1 %vm496_vm0, %v38989_v54 }
 0x5b8   : > { %27454 = vmatmul.mubr.msk.f32.gmra.mrb[18].mxu1 %vm496_vm0, %v38979_v1 }
 0x5b9   : > { %27456 = vmatprep.mubr.msk.f32.mxu1 %vm496_vm0, %v38990_v56 }
 0x5bc   : > { %27457 = vmatmul.mubr.msk.f32.gmra.mrb[20].mxu1 %vm496_vm0, %v38991_v0 }
 0x5bd   : > { %27459 = vmatprep.mubr.msk.f32.mxu1 %vm496_vm0, %v38992_v4 }
 0x5c0   : > { %27460 = vmatmul.mubr.msk.f32.gmra.mrb[22].mxu1 %vm496_vm0, %v38993_v23 }
 0x5c1   : > { %27462 = vmatprep.mubr.msk.f32.mxu1 %vm496_vm0, %v38994_v31 }
 0x5c4   : > { %27463 = vmatmul.mubr.msk.f32.gmra.mrb[24].mxu1 %vm496_vm0, %v38995_v20 }
 0x5c5   : > { %27465 = vmatprep.mubr.msk.f32.mxu1 %vm496_vm0, %v38996_v26 }
 0x5c8   : > { %27466 = vmatmul.mubr.msk.f32.gmra.mrb[26].mxu1 %vm496_vm0, %v33485_v25  ;;  %v29516_v25 = vpack.c.bf16 %v7875_v16, %v7874_v51 }
 0x5c9   : > { %27468 = vmatprep.mubr.msk.f32.mxu1 %vm496_vm0, %v38997_v46 }
 0x5ca   : > { %29517 = vmatprep.subr.bf16.mxu0 %v29516_v25 }
 0x5cb   : > { %29519 = vmatpush3.bf16.msra.mxu0 %v29516_v25 }
 0x5cc   : > { %27469 = vmatmul.mubr.msk.f32.gmra.mrb[28].mxu1 %vm496_vm0, %v33690_v53  ;;  %29521 = vmatprep.subr.bf16.mxu0 %v29520_v12 }
 0x5cd   : > { %27471 = vmatprep.mubr.msk.f32.mxu1 %vm496_vm0, %v7379_v55 }
 0x5cf   : > { %29523 = vmatpush3.bf16.msra.mxu0 %v29520_v12 }
 0x5d0   : > { %27472 = vmatmul.mubr.msk.f32.gmra.mrb[30].mxu1 %vm496_vm0, %v7380_v62  ;;  %29525 = vmatprep.subr.bf16.mxu0 %v33860_v13 }
 0x667   : > { %v27428_v1 = vpop.f32.mrb[0].mxu1 }
 0x668   : > { %v7747_v38 = vadd.f32 %v27428_v1, %v33866_v37  ;;  %v7548_v49 = vpop.f32.mrb[1].mxu1 }
 0x669   : > { %v7746_v53 = vadd.f32 %v33866_v37, %v7548_v49 }
 0x66a   : > { %v7779_v40 = vmax.f32 %v7747_v38, 0.0 }
 0x66b   : > { %v7778_v2 = vmax.f32 %v7746_v53, 0.0  ;;  %v27431_v41 = vpop.f32.mrb[2].mxu1 }
 0x66c   : > { %7811 = vst.msk [vmem:[#allocation2 + $0x30] sm:$0xff] %vm496_vm0, %v7779_v40  ;;  %v7749_v50 = vadd.f32 %v27431_v41, %v33866_v37  ;;  %v7558_v57 = vpop.f32.mrb[3].mxu1 }
 0x66d   : > { %7810 = vst.msk [vmem:[#allocation2 + $0x28] sm:$0xff] %vm496_vm0, %v7778_v2  ;;  %v7748_v59 = vadd.f32 %v33866_v37, %v7558_v57 }
 0x66e   : > { %v7781_v60 = vmax.f32 %v7749_v50, 0.0 }
 0x66f   : > { %v7780_v61 = vmax.f32 %v7748_v59, 0.0  ;;  %v27434_v22 = vpop.f32.mrb[4].mxu1 }
 0x670   : > { %7813 = vst.msk [vmem:[#allocation2 + $0x50] sm:$0xff] %vm496_vm0, %v7781_v60  ;;  %v7751_v5 = vadd.f32 %v27434_v22, %v33866_v37  ;;  %v7568_v11 = vpop.f32.mrb[5].mxu1 }
 0x671   : > { %7812 = vst.msk [vmem:[#allocation2 + $0x48] sm:$0xff] %vm496_vm0, %v7780_v61  ;;  %v7750_v30 = vadd.f32 %v33866_v37, %v7568_v11 }
 0x672   : > { %v7783_v58 = vmax.f32 %v7751_v5, 0.0 }
 0x673   : > { %v7782_v28 = vmax.f32 %v7750_v30, 0.0  ;;  %v27437_v21 = vpop.f32.mrb[6].mxu1  ;;  %v33886_v44 = vld [vmem:[#allocation2 + $0x30] sm:$0xff] }
 0x674   : > { %7815 = vst.msk [vmem:[#allocation2 + $0x70] sm:$0xff] %vm496_vm0, %v7783_v58  ;;  %v7753_v17 = vadd.f32 %v27437_v21, %v33866_v37  ;;  %v7578_v63 = vpop.f32.mrb[7].mxu1  ;;  %v33880_v24 = vld [vmem:[#allocation2 + $0x28] sm:$0xff] }
 0x675   : > { %7814 = vst.msk [vmem:[#allocation2 + $0x68] sm:$0xff] %vm496_vm0, %v7782_v28  ;;  %v7752_v43 = vadd.f32 %v33866_v37, %v7578_v63  ;;  %27485 = vmatprep.mubr.msk.f32.mxu0 %vm496_vm0, %v33880_v24 }
 0x676   : > { %v7785_v45 = vmax.f32 %v7753_v17, 0.0  ;;  %27486 = vmatmul.mubr.msk.f32.gmra.mrb[34].mxu0 %vm496_vm0, %v33886_v44 }
 0x677   : > { %v7784_v48 = vmax.f32 %v7752_v43, 0.0  ;;  %v27440_v29 = vpop.f32.mrb[8].mxu1  ;;  %v33898_v14 = vld [vmem:[#allocation2 + $0x50] sm:$0xff] }
 0x678   : > { %7817 = vst.msk [vmem:[#allocation2 + $0x90] sm:$0xff] %vm496_vm0, %v7785_v45  ;;  %v7755_v42 = vadd.f32 %v27440_v29, %v33866_v37  ;;  %v7588_v36 = vpop.f32.mrb[9].mxu1  ;;  %v33892_v9 = vld [vmem:[#allocation2 + $0x48] sm:$0xff] }
 0x679   : > { %7816 = vst.msk [vmem:[#allocation2 + $0x88] sm:$0xff] %vm496_vm0, %v7784_v48  ;;  %v7754_v10 = vadd.f32 %v33866_v37, %v7588_v36  ;;  %27488 = vmatprep.mubr.msk.f32.mxu0 %vm496_vm0, %v33892_v9 }
 0x67a   : > { %v7787_v3 = vmax.f32 %v7755_v42, 0.0  ;;  %27489 = vmatmul.mubr.msk.f32.gmra.mrb[36].mxu0 %vm496_vm0, %v33898_v14 }
 0x67b   : > { %v7786_v47 = vmax.f32 %v7754_v10, 0.0  ;;  %v27443_v27 = vpop.f32.mrb[10].mxu1  ;;  %v33910_v32 = vld [vmem:[#allocation2 + $0x70] sm:$0xff] }
 0x67c   : > { %7819 = vst.msk [vmem:[#allocation2 + $0xb0] sm:$0xff] %vm496_vm0, %v7787_v3  ;;  %v7757_v6 = vadd.f32 %v27443_v27, %v33866_v37  ;;  %v7598_v15 = vpop.f32.mrb[11].mxu1  ;;  %v33904_v33 = vld [vmem:[#allocation2 + $0x68] sm:$0xff] }
 0x67d   : > { %7818 = vst.msk [vmem:[#allocation2 + $0xa8] sm:$0xff] %vm496_vm0, %v7786_v47  ;;  %v7756_v18 = vadd.f32 %v33866_v37, %v7598_v15  ;;  %27491 = vmatprep.mubr.msk.f32.mxu0 %vm496_vm0, %v33904_v33 }
 0x67e   : > { %v7789_v34 = vmax.f32 %v7757_v6, 0.0  ;;  %27492 = vmatmul.mubr.msk.f32.gmra.mrb[38].mxu0 %vm496_vm0, %v33910_v32 }
 0x67f   : > { %v7788_v54 = vmax.f32 %v7756_v18, 0.0  ;;  %v27446_v56 = vpop.f32.mrb[12].mxu1  ;;  %v33922_v20 = vld [vmem:[#allocation2 + $0x90] sm:$0xff] }
 0x680   : > { %7821 = vst.msk [vmem:[#allocation2 + $0xd0] sm:$0xff] %vm496_vm0, %v7789_v34  ;;  %v7759_v0 = vadd.f32 %v27446_v56, %v33866_v37  ;;  %v7608_v4 = vpop.f32.mrb[13].mxu1  ;;  %v33916_v23 = vld [vmem:[#allocation2 + $0x88] sm:$0xff] }
 0x681   : > { %7820 = vst.msk [vmem:[#allocation2 + $0xc8] sm:$0xff] %vm496_vm0, %v7788_v54  ;;  %v7758_v31 = vadd.f32 %v33866_v37, %v7608_v4  ;;  %27494 = vmatprep.mubr.msk.f32.mxu0 %vm496_vm0, %v33916_v23 }
 0x682   : > { %v7791_v26 = vmax.f32 %v7759_v0, 0.0  ;;  %27495 = vmatmul.mubr.msk.f32.gmra.mrb[40].mxu0 %vm496_vm0, %v33922_v20 }
 0x683   : > { %v7790_v46 = vmax.f32 %v7758_v31, 0.0  ;;  %v27449_v55 = vpop.f32.mrb[14].mxu1  ;;  %v33934_v16 = vld [vmem:[#allocation2 + $0xb0] sm:$0xff] }
 0x684   : > { %7823 = vst.msk [vmem:[#allocation2 + $0xf0] sm:$0xff] %vm496_vm0, %v7791_v26  ;;  %v7761_v62 = vadd.f32 %v27449_v55, %v33866_v37  ;;  %v7618_v7 = vpop.f32.mrb[15].mxu1  ;;  %v33928_v52 = vld [vmem:[#allocation2 + $0xa8] sm:$0xff] }
 0x685   : > { %7822 = vst.msk [vmem:[#allocation2 + $0xe8] sm:$0xff] %vm496_vm0, %v7790_v46  ;;  %v7760_v51 = vadd.f32 %v33866_v37, %v7618_v7  ;;  %27497 = vmatprep.mubr.msk.f32.mxu0 %vm496_vm0, %v33928_v52 }
 0x686   : > { %v7793_v25 = vmax.f32 %v7761_v62, 0.0  ;;  %27498 = vmatmul.mubr.msk.f32.gmra.mrb[42].mxu0 %vm496_vm0, %v33934_v16 }
 0x687   : > { %v7792_v19 = vmax.f32 %v7760_v51, 0.0  ;;  %v27452_v39 = vpop.f32.mrb[16].mxu1  ;;  %v33946_v38 = vld [vmem:[#allocation2 + $0xd0] sm:$0xff] }
 0x688   : > { %7825 = vst.msk [vmem:[#allocation2 + $0x110] sm:$0xff] %vm496_vm0, %v7793_v25  ;;  %v7763_v12 = vadd.f32 %v27452_v39, %v33866_v37  ;;  %v7628_v35 = vpop.f32.mrb[17].mxu1  ;;  %v33940_v8 = vld [vmem:[#allocation2 + $0xc8] sm:$0xff] }
 0x689   : > { %7824 = vst.msk [vmem:[#allocation2 + $0x108] sm:$0xff] %vm496_vm0, %v7792_v19  ;;  %v7762_v1 = vadd.f32 %v33866_v37, %v7628_v35  ;;  %27500 = vmatprep.mubr.msk.f32.mxu0 %vm496_vm0, %v33940_v8 }
 0x68a   : > { %v7795_v49 = vmax.f32 %v7763_v12, 0.0  ;;  %27501 = vmatmul.mubr.msk.f32.gmra.mrb[44].mxu0 %vm496_vm0, %v33946_v38 }
 0x68b   : > { %v7794_v53 = vmax.f32 %v7762_v1, 0.0  ;;  %v27455_v40 = vpop.f32.mrb[18].mxu1  ;;  %v33958_v59 = vld [vmem:[#allocation2 + $0xf0] sm:$0xff] }
 0x68c   : > { %7827 = vst.msk [vmem:[#allocation2 + $0x130] sm:$0xff] %vm496_vm0, %v7795_v49  ;;  %v7765_v2 = vadd.f32 %v27455_v40, %v33866_v37  ;;  %v7638_v41 = vpop.f32.mrb[19].mxu1  ;;  %v33952_v50 = vld [vmem:[#allocation2 + $0xe8] sm:$0xff] }
 0x68d   : > { %7826 = vst.msk [vmem:[#allocation2 + $0x128] sm:$0xff] %vm496_vm0, %v7794_v53  ;;  %v7764_v57 = vadd.f32 %v33866_v37, %v7638_v41  ;;  %27503 = vmatprep.mubr.msk.f32.mxu0 %vm496_vm0, %v33952_v50 }
 0x68e   : > { %v7797_v60 = vmax.f32 %v7765_v2, 0.0  ;;  %27504 = vmatmul.mubr.msk.f32.gmra.mrb[46].mxu0 %vm496_vm0, %v33958_v59 }
 0x68f   : > { %v7796_v61 = vmax.f32 %v7764_v57, 0.0  ;;  %v27458_v22 = vpop.f32.mrb[20].mxu1  ;;  %v33970_v28 = vld [vmem:[#allocation2 + $0x110] sm:$0xff] }
 0x690   : > { %7829 = vst.msk [vmem:[#allocation2 + $0x150] sm:$0xff] %vm496_vm0, %v7797_v60  ;;  %v7767_v5 = vadd.f32 %v27458_v22, %v33866_v37  ;;  %v7648_v11 = vpop.f32.mrb[21].mxu1  ;;  %v33964_v30 = vld [vmem:[#allocation2 + $0x108] sm:$0xff] }
 0x691   : > { %7828 = vst.msk [vmem:[#allocation2 + $0x148] sm:$0xff] %vm496_vm0, %v7796_v61  ;;  %v7766_v58 = vadd.f32 %v33866_v37, %v7648_v11  ;;  %27506 = vmatprep.mubr.msk.f32.mxu0 %vm496_vm0, %v33964_v30  ;;  %v7842_v11 = vld [vmem:[#allocation2 + $0x7] sm:$0xff] }
 0x692   : > { %v7799_v21 = vmax.f32 %v7767_v5, 0.0  ;;  %27507 = vmatmul.mubr.msk.f32.gmra.mrb[48].mxu0 %vm496_vm0, %v33970_v28 }
 0x693   : > { %v7798_v17 = vmax.f32 %v7766_v58, 0.0  ;;  %v27461_v63 = vpop.f32.mrb[22].mxu1  ;;  %v33982_v42 = vld [vmem:[#allocation2 + $0x130] sm:$0xff] }
 0x694   : > { %7831 = vst.msk [vmem:[#allocation2 + $0x170] sm:$0xff] %vm496_vm0, %v7799_v21  ;;  %v7769_v43 = vadd.f32 %v27461_v63, %v33866_v37  ;;  %v7658_v45 = vpop.f32.mrb[23].mxu1  ;;  %v33976_v48 = vld [vmem:[#allocation2 + $0x128] sm:$0xff]  ;;  %v8592_v21 = vld [vmem:[#allocation5 + $0x50] sm:$0xff] }
 0x695   : > { %7830 = vst.msk [vmem:[#allocation2 + $0x168] sm:$0xff] %vm496_vm0, %v7798_v17  ;;  %v7768_v29 = vadd.f32 %v33866_v37, %v7658_v45  ;;  %27509 = vmatprep.mubr.msk.f32.mxu0 %vm496_vm0, %v33976_v48  ;;  %v8593_v17 = vld [vmem:[#allocation5 + $0x58] sm:$0xff]  ;;  %v7843_v63 = vld [vmem:[#allocation2 + $0xf] sm:$0xff]  ;;  %v8980_v45 = vld [vmem:[#allocation5 + $0x60] sm:$0xff] }
 0x696   : > { %v7801_v36 = vmax.f32 %v7769_v43, 0.0  ;;  %27510 = vmatmul.mubr.msk.f32.gmra.mrb[50].mxu0 %vm496_vm0, %v33982_v42  ;;  %v29528_v43 = vpack.c.bf16 %v8593_v17, %v8592_v21 }
 0x697   : > { %v7800_v10 = vmax.f32 %v7768_v29, 0.0  ;;  %v27464_v3 = vpop.f32.mrb[24].mxu1  ;;  %v33994_v18 = vld [vmem:[#allocation2 + $0x150] sm:$0xff]  ;;  %v8981_v29 = vld [vmem:[#allocation5 + $0x68] sm:$0xff] }
 0x698   : > { %7833 = vst.msk [vmem:[#allocation2 + $0x190] sm:$0xff] %vm496_vm0, %v7801_v36  ;;  %v7771_v47 = vadd.f32 %v27464_v3, %v33866_v37  ;;  %v7668_v27 = vpop.f32.mrb[25].mxu1  ;;  %v33988_v6 = vld [vmem:[#allocation2 + $0x148] sm:$0xff] }
 0x699   : > { %7832 = vst.msk [vmem:[#allocation2 + $0x188] sm:$0xff] %vm496_vm0, %v7800_v10  ;;  %v7770_v15 = vadd.f32 %v33866_v37, %v7668_v27  ;;  %27512 = vmatprep.mubr.msk.f32.mxu0 %vm496_vm0, %v33988_v6  ;;  %v34054_v36 = vld [vmem:[#allocation2 + $0x27] sm:$0xff]  ;;  %v34059_v10 = vpack.c.bf16 %v8981_v29, %v8980_v45  ;;  %v34061_v3 = vld [vmem:[#allocation2 + $0x2f] sm:$0xff]  ;;  %v8983_v29 = vld [vmem:[#allocation5 + $0x78] sm:$0xff] }
 0x69a   : > { %v7803_v34 = vmax.f32 %v7771_v47, 0.0  ;;  %27513 = vmatmul.mubr.msk.f32.gmra.mrb[52].mxu0 %vm496_vm0, %v33994_v18  ;;  %v34065_v47 = vld [vmem:[#allocation2 + $0x47] sm:$0xff]  ;;  %v8982_v45 = vld [vmem:[#allocation5 + $0x70] sm:$0xff] }
 0x69b   : > { %v7802_v54 = vmax.f32 %v7770_v15, 0.0  ;;  %v27467_v56 = vpop.f32.mrb[26].mxu1  ;;  %v34006_v46 = vld [vmem:[#allocation2 + $0x170] sm:$0xff]  ;;  %v34074_v27 = vld [vmem:[#allocation2 + $0x67] sm:$0xff] }
 0x69c   : > { %7835 = vst.msk [vmem:[#allocation2 + $0x1b0] sm:$0xff] %vm496_vm0, %v7803_v34  ;;  %v7773_v0 = vadd.f32 %v27467_v56, %v33866_v37  ;;  %v7678_v4 = vpop.f32.mrb[27].mxu1  ;;  %v34000_v31 = vld [vmem:[#allocation2 + $0x168] sm:$0xff] }
 0x69d   : > { %7834 = vst.msk [vmem:[#allocation2 + $0x1a8] sm:$0xff] %vm496_vm0, %v7802_v54  ;;  %v7772_v26 = vadd.f32 %v33866_v37, %v7678_v4  ;;  %27515 = vmatprep.mubr.msk.f32.mxu0 %vm496_vm0, %v34000_v31  ;;  %v34078_v15 = vld [vmem:[#allocation2 + $0x6f] sm:$0xff]  ;;  %v34082_v34 = vld [vmem:[#allocation2 + $0x87] sm:$0xff] }
 0x69e   : > { %v7805_v55 = vmax.f32 %v7773_v0, 0.0  ;;  %27516 = vmatmul.mubr.msk.f32.gmra.mrb[54].mxu0 %vm496_vm0, %v34006_v46  ;;  %v34086_v54 = vld [vmem:[#allocation2 + $0x8f] sm:$0xff]  ;;  %v34090_v56 = vld [vmem:[#allocation2 + $0xa7] sm:$0xff] }
 0x69f   : > { %v7804_v62 = vmax.f32 %v7772_v26, 0.0  ;;  %v27470_v7 = vpop.f32.mrb[28].mxu1  ;;  %v34018_v12 = vld [vmem:[#allocation2 + $0x190] sm:$0xff]  ;;  %v34098_v4 = vld [vmem:[#allocation2 + $0xc7] sm:$0xff] }
 0x6a0   : > { %7837 = vst.msk [vmem:[#allocation2 + $0x1d0] sm:$0xff] %vm496_vm0, %v7805_v55  ;;  %v7775_v51 = vadd.f32 %v27470_v7, %v33866_v37  ;;  %v7688_v25 = vpop.f32.mrb[29].mxu1  ;;  %v34012_v19 = vld [vmem:[#allocation2 + $0x188] sm:$0xff]  ;;  %38998 = vst [vmem:[#allocation47_spill] sm:$0xff] %v34018_v12 }
 0x6a1   : > { %7836 = vst.msk [vmem:[#allocation2 + $0x1c8] sm:$0xff] %vm496_vm0, %v7804_v62  ;;  %v7774_v39 = vadd.f32 %v33866_v37, %v7688_v25  ;;  %27518 = vmatprep.mubr.msk.f32.mxu0 %vm496_vm0, %v34012_v19  ;;  %v34094_v0 = vld [vmem:[#allocation2 + $0xaf] sm:$0xff]  ;;  %v34106_v55 = vld [vmem:[#allocation2 + $0xe7] sm:$0xff] }
 0x6a2   : > { %v7807_v35 = vmax.f32 %v7775_v51, 0.0  ;;  %27519 = vmatmul.mubr.msk.f32.gmra.mrb[56].mxu0 %vm496_vm0, %v34018_v12  ;;  %v34102_v26 = vld [vmem:[#allocation2 + $0xcf] sm:$0xff]  ;;  %v34114_v7 = vld [vmem:[#allocation2 + $0x107] sm:$0xff] }
 0x6a3   : > { %v7806_v1 = vmax.f32 %v7774_v39, 0.0  ;;  %v27473_v49 = vpop.f32.mrb[30].mxu1  ;;  %v34030_v57 = vld [vmem:[#allocation2 + $0x1b0] sm:$0xff]  ;;  %v34122_v25 = vld [vmem:[#allocation2 + $0x127] sm:$0xff] }
 0x6a4   : > { %7839 = vst.msk [vmem:[#allocation2 + $0x1f0] sm:$0xff] %vm496_vm0, %v7807_v35  ;;  %v7777_v53 = vadd.f32 %v27473_v49, %v33866_v37  ;;  %v7698_v40 = vpop.f32.mrb[31].mxu1  ;;  %v34024_v2 = vld [vmem:[#allocation2 + $0x1a8] sm:$0xff]  ;;  %39000 = vst [vmem:[#allocation50_spill] sm:$0xff] %v34030_v57  ;;  %v34187_v12 = vld [vmem:[#allocation2 + $0x31] sm:$0xff] }
 0x6a5   : > { %38999 = vst [vmem:[#allocation48_spill] sm:$0xff] %v34024_v2  ;;  %7838 = vst.msk [vmem:[#allocation2 + $0x1e8] sm:$0xff] %vm496_vm0, %v7806_v1  ;;  %v7776_v41 = vadd.f32 %v33866_v37, %v7698_v40  ;;  %27521 = vmatprep.mubr.msk.f32.mxu0 %vm496_vm0, %v34024_v2  ;;  %v34110_v62 = vld [vmem:[#allocation2 + $0xef] sm:$0xff]  ;;  %v34130_v35 = vld [vmem:[#allocation2 + $0x147] sm:$0xff] }
 0x6a6   : > { %v7809_v60 = vmax.f32 %v7777_v53, 0.0  ;;  %27522 = vmatmul.mubr.msk.f32.gmra.mrb[58].mxu0 %vm496_vm0, %v34030_v57  ;;  %v34118_v51 = vld [vmem:[#allocation2 + $0x10f] sm:$0xff]  ;;  %v34138_v49 = vld [vmem:[#allocation2 + $0x167] sm:$0xff] }
 0x6a7   : > { %v7808_v61 = vmax.f32 %v7776_v41, 0.0  ;;  %v34040_v37 = vld [vmem:[#allocation2 + $0x1d0] sm:$0xff]  ;;  %v34146_v40 = vld [vmem:[#allocation2 + $0x187] sm:$0xff] }
 0x6a8   : > { %7841 = vst.msk [vmem:[#allocation2 + $0x210] sm:$0xff] %vm496_vm0, %v7809_v60  ;;  %v34035_v22 = vld [vmem:[#allocation2 + $0x1c8] sm:$0xff]  ;;  %39002 = vst [vmem:[#allocation52_spill] sm:$0xff] %v34040_v37 }
 0x6a9   : > { %39001 = vst [vmem:[#allocation51_spill] sm:$0xff] %v34035_v22  ;;  %7840 = vst.msk [vmem:[#allocation2 + $0x208] sm:$0xff] %vm496_vm0, %v7808_v61  ;;  %27524 = vmatprep.mubr.msk.f32.mxu0 %vm496_vm0, %v34035_v22  ;;  %v34126_v39 = vld [vmem:[#allocation2 + $0x12f] sm:$0xff]  ;;  %v34154_v60 = vld [vmem:[#allocation2 + $0x1a7] sm:$0xff] }
 0x6aa   : > { %27525 = vmatmul.mubr.msk.f32.gmra.mrb[60].mxu0 %vm496_vm0, %v34040_v37  ;;  %v34134_v1 = vld [vmem:[#allocation2 + $0x14f] sm:$0xff]  ;;  %v9370_v37 = vld [vmem:[#allocation5 + $0x80] sm:$0xff] }
 0x6ab   : > { %v34048_v58 = vld [vmem:[#allocation2 + $0x1f0] sm:$0xff]  ;;  %v9371_v22 = vld [vmem:[#allocation5 + $0x88] sm:$0xff] }
 0x6ac   : > { %v34044_v5 = vld [vmem:[#allocation2 + $0x1e8] sm:$0xff]  ;;  %39004 = vst [vmem:[#allocation65_spill] sm:$0xff] %v34048_v58  ;;  %v34185_v2 = vpack.c.bf16 %v9371_v22, %v9370_v37  ;;  %v34204_v37 = vld [vmem:[#allocation2 + $0x71] sm:$0xff] }
 0x6ad   : > { %39003 = vst [vmem:[#allocation53_spill] sm:$0xff] %v34044_v5  ;;  %27527 = vmatprep.mubr.msk.f32.mxu0 %vm496_vm0, %v34044_v5  ;;  %v34142_v53 = vld [vmem:[#allocation2 + $0x16f] sm:$0xff]  ;;  %v34170_v17 = vld [vmem:[#allocation2 + $0x1e7] sm:$0xff]  ;;  %v29536_v5 = vpack.c.bf16 %v8983_v29, %v8982_v45  ;;  %39008 = vst [vmem:[#allocation72_spill] sm:$0xff] %v34204_v37 }
 0x6ae   : > { %27528 = vmatmul.mubr.msk.f32.gmra.mrb[62].mxu0 %vm496_vm0, %v34048_v58  ;;  %v34150_v41 = vld [vmem:[#allocation2 + $0x18f] sm:$0xff] }
 0x6af   : > { %27538 = vmatprep.mubr.msk.f32.mxu0 %vm496_vm0, %v7842_v11  ;;  %v34158_v61 = vld [vmem:[#allocation2 + $0x1af] sm:$0xff]  ;;  %v34162_v11 = vld [vmem:[#allocation2 + $0x1c7] sm:$0xff] }
 0x6b0   : > { %v34166_v21 = vld [vmem:[#allocation2 + $0x1cf] sm:$0xff] }
 0x6b1   : > { %v8558_v58 = vld [vmem:[#allocation2 + $0x11] sm:$0xff]  ;;  %v34180_v57 = vld [vmem:[#allocation2 + $0x29] sm:$0xff] }
 0x6b2   : > { %27539 = vmatmul.mubr.msk.f32.vlgmr.msra.gmra.mrb[32].mxu0 %vm496_vm0, %v7843_v63  ;;  %v8557_v63 = vld [vmem:[#allocation2 + $0x9] sm:$0xff]  ;;  %v34220_v29 = vld [vmem:[#allocation2 + $0xb1] sm:$0xff] }
 0x6b3   : > { %29527 = vmatpush3.bf16.msra.mxu0 %v33860_v13  ;;  %27541 = vmatprep.mubr.msk.f32.mxu0 %vm496_vm0, %v34054_v36  ;;  %v34070_v13 = vld [vmem:[#allocation2 + $0x4f] sm:$0xff]  ;;  %39012 = vst [vmem:[#allocation56_spill] sm:$0xff] %v34220_v29 }
 0x6b4   : > { %29529 = vmatprep.subr.bf16.mxu0 %v29528_v43  ;;  %v34200_v22 = vld [vmem:[#allocation2 + $0x69] sm:$0xff] }
 0x6b5   : > { %39007 = vst [vmem:[#allocation70_spill] sm:$0xff] %v34200_v22  ;;  %v34216_v45 = vld [vmem:[#allocation2 + $0xa9] sm:$0xff] }
 0x6b6   : > { %27542 = vmatmul.mubr.msk.f32.gmra.mrb[34].mxu0 %vm496_vm0, %v34061_v3  ;;  %39011 = vst [vmem:[#allocation55_spill] sm:$0xff] %v34216_v45 }
 0x6b7   : > { %27544 = vmatprep.mubr.msk.f32.mxu0 %vm496_vm0, %v34065_v47  ;;  %29531 = vmatpush3.bf16.msra.mxu0 %v29528_v43  ;;  %v34174_v43 = vld [vmem:[#allocation2 + $0x1ef] sm:$0xff] }
 0x6b8   : > { %29533 = vmatprep.subr.bf16.mxu0 %v34059_v10 }
 0x6ba   : > { %27545 = vmatmul.mubr.msk.f32.gmra.mrb[36].mxu0 %vm496_vm0, %v34070_v13 }
 0x6bb   : > { %27547 = vmatprep.mubr.msk.f32.mxu0 %vm496_vm0, %v34074_v27 }
 0x6be   : > { %27548 = vmatmul.mubr.msk.f32.gmra.mrb[38].mxu0 %vm496_vm0, %v34078_v15 }
 0x6bf   : > { %27550 = vmatprep.mubr.msk.f32.mxu0 %vm496_vm0, %v34082_v34 }
 0x6c2   : > { %27551 = vmatmul.mubr.msk.f32.gmra.mrb[40].mxu0 %vm496_vm0, %v34086_v54 }
 0x6c3   : > { %27553 = vmatprep.mubr.msk.f32.mxu0 %vm496_vm0, %v34090_v56 }
 0x6c6   : > { %27554 = vmatmul.mubr.msk.f32.gmra.mrb[42].mxu0 %vm496_vm0, %v34094_v0 }
 0x6c7   : > { %27556 = vmatprep.mubr.msk.f32.mxu0 %vm496_vm0, %v34098_v4 }
 0x6ca   : > { %27557 = vmatmul.mubr.msk.f32.gmra.mrb[44].mxu0 %vm496_vm0, %v34102_v26 }
 0x6cb   : > { %27559 = vmatprep.mubr.msk.f32.mxu0 %vm496_vm0, %v34106_v55 }
 0x6ce   : > { %27560 = vmatmul.mubr.msk.f32.gmra.mrb[46].mxu0 %vm496_vm0, %v34110_v62 }
 0x6cf   : > { %27562 = vmatprep.mubr.msk.f32.mxu0 %vm496_vm0, %v34114_v7 }
 0x6d2   : > { %27563 = vmatmul.mubr.msk.f32.gmra.mrb[48].mxu0 %vm496_vm0, %v34118_v51 }
 0x6d3   : > { %27565 = vmatprep.mubr.msk.f32.mxu0 %vm496_vm0, %v34122_v25 }
 0x6d6   : > { %27566 = vmatmul.mubr.msk.f32.gmra.mrb[50].mxu0 %vm496_vm0, %v34126_v39 }
 0x6d7   : > { %27568 = vmatprep.mubr.msk.f32.mxu0 %vm496_vm0, %v34130_v35 }
 0x6da   : > { %27569 = vmatmul.mubr.msk.f32.gmra.mrb[52].mxu0 %vm496_vm0, %v34134_v1 }
 0x6db   : > { %27571 = vmatprep.mubr.msk.f32.mxu0 %vm496_vm0, %v34138_v49 }
 0x6de   : > { %27572 = vmatmul.mubr.msk.f32.gmra.mrb[54].mxu0 %vm496_vm0, %v34142_v53 }
 0x6df   : > { %27574 = vmatprep.mubr.msk.f32.mxu0 %vm496_vm0, %v34146_v40 }
 0x6e2   : > { %27575 = vmatmul.mubr.msk.f32.gmra.mrb[56].mxu0 %vm496_vm0, %v34150_v41 }
 0x6e3   : > { %27577 = vmatprep.mubr.msk.f32.mxu0 %vm496_vm0, %v34154_v60 }
 0x6e6   : > { %27578 = vmatmul.mubr.msk.f32.gmra.mrb[58].mxu0 %vm496_vm0, %v34158_v61 }
 0x6e7   : > { %27580 = vmatprep.mubr.msk.f32.mxu0 %vm496_vm0, %v34162_v11 }
 0x6ea   : > { %27581 = vmatmul.mubr.msk.f32.gmra.mrb[60].mxu0 %vm496_vm0, %v34166_v21 }
 0x6eb   : > { %27583 = vmatprep.mubr.msk.f32.mxu0 %vm496_vm0, %v34170_v17 }
 0x6ee   : > { %27584 = vmatmul.mubr.msk.f32.gmra.mrb[62].mxu0 %vm496_vm0, %v34174_v43 }
 0x6ef   : > { %27594 = vmatprep.mubr.msk.f32.mxu0 %vm496_vm0, %v8557_v63  ;;  %v34191_v63 = vld [vmem:[#allocation2 + $0x49] sm:$0xff] }
 0x6f0   : > { %39005 = vst [vmem:[#allocation67_spill] sm:$0xff] %v34191_v63 }
 0x6f2   : > { %27595 = vmatmul.mubr.msk.f32.vlgmr.msra.gmra.mrb[32].mxu0 %vm496_vm0, %v8558_v58  ;;  %v34196_v58 = vld [vmem:[#allocation2 + $0x51] sm:$0xff] }
 0x6f3   : > { %29535 = vmatpush3.bf16.msra.mxu0 %v34059_v10  ;;  %27597 = vmatprep.mubr.msk.f32.mxu0 %vm496_vm0, %v34180_v57  ;;  %39006 = vst [vmem:[#allocation69_spill] sm:$0xff] %v34196_v58  ;;  %v34208_v10 = vld [vmem:[#allocation2 + $0x89] sm:$0xff] }
 0x6f4   : > { %29537 = vmatprep.subr.bf16.mxu0 %v29536_v5  ;;  %39009 = vst [vmem:[#allocation74_spill] sm:$0xff] %v34208_v10 }
 0x6f6   : > { %27598 = vmatmul.mubr.msk.f32.gmra.mrb[34].mxu0 %vm496_vm0, %v34187_v12 }
 0x6f7   : > { %27600 = vmatprep.mubr.msk.f32.mxu0 %vm496_vm0, %v34191_v63  ;;  %29539 = vmatpush3.bf16.msra.mxu0 %v29536_v5  ;;  %v34212_v5 = vld [vmem:[#allocation2 + $0x91] sm:$0xff]  ;;  %v9761_v63 = vld [vmem:[#allocation5 + $0xa8] sm:$0xff] }
 0x6f8   : > { %29541 = vmatprep.subr.bf16.mxu0 %v34185_v2  ;;  %39010 = vst [vmem:[#allocation54_spill] sm:$0xff] %v34212_v5 }
 0x6fa   : > { %27601 = vmatmul.mubr.msk.f32.gmra.mrb[36].mxu0 %vm496_vm0, %v34196_v58  ;;  %v9373_v58 = vld [vmem:[#allocation5 + $0x98] sm:$0xff] }
 0x6fb   : > { %27603 = vmatprep.mubr.msk.f32.mxu0 %vm496_vm0, %v34200_v22  ;;  %v9372_v22 = vld [vmem:[#allocation5 + $0x90] sm:$0xff] }
 0x6fe   : > { %27604 = vmatmul.mubr.msk.f32.gmra.mrb[38].mxu0 %vm496_vm0, %v34204_v37  ;;  %v34224_v37 = vld [vmem:[#allocation2 + $0xc9] sm:$0xff] }
 0x6ff   : > { %27606 = vmatprep.mubr.msk.f32.mxu0 %vm496_vm0, %v34208_v10  ;;  %39013 = vst [vmem:[#allocation57_spill] sm:$0xff] %v34224_v37  ;;  %v34228_v10 = vld [vmem:[#allocation2 + $0xd1] sm:$0xff] }
 0x700   : > { %39014 = vst [vmem:[#allocation58_spill] sm:$0xff] %v34228_v10 }
 0x702   : > { %27607 = vmatmul.mubr.msk.f32.gmra.mrb[40].mxu0 %vm496_vm0, %v34212_v5  ;;  %v34232_v5 = vld [vmem:[#allocation2 + $0xe9] sm:$0xff] }
 0x703   : > { %27609 = vmatprep.mubr.msk.f32.mxu0 %vm496_vm0, %v34216_v45  ;;  %39015 = vst [vmem:[#allocation59_spill] sm:$0xff] %v34232_v5  ;;  %v34236_v45 = vld [vmem:[#allocation2 + $0xf1] sm:$0xff] }
 0x704   : > { %39016 = vst [vmem:[#allocation60_spill] sm:$0xff] %v34236_v45 }
 0x706   : > { %27610 = vmatmul.mubr.msk.f32.gmra.mrb[42].mxu0 %vm496_vm0, %v34220_v29  ;;  %v34240_v29 = vld [vmem:[#allocation2 + $0x109] sm:$0xff] }
 0x707   : > { %27612 = vmatprep.mubr.msk.f32.mxu0 %vm496_vm0, %v34224_v37  ;;  %39017 = vst [vmem:[#allocation61_spill] sm:$0xff] %v34240_v29  ;;  %v34244_v37 = vld [vmem:[#allocation2 + $0x111] sm:$0xff] }
 0x708   : > { %39018 = vst [vmem:[#allocation62_spill] sm:$0xff] %v34244_v37 }
 0x70a   : > { %27613 = vmatmul.mubr.msk.f32.gmra.mrb[44].mxu0 %vm496_vm0, %v34228_v10  ;;  %v34248_v10 = vld [vmem:[#allocation2 + $0x129] sm:$0xff] }
 0x70b   : > { %27615 = vmatprep.mubr.msk.f32.mxu0 %vm496_vm0, %v34232_v5  ;;  %39019 = vst [vmem:[#allocation66_spill] sm:$0xff] %v34248_v10  ;;  %v34252_v5 = vld [vmem:[#allocation2 + $0x131] sm:$0xff] }
 0x70c   : > { %39020 = vst [vmem:[#allocation71_spill] sm:$0xff] %v34252_v5 }
 0x70e   : > { %27616 = vmatmul.mubr.msk.f32.gmra.mrb[46].mxu0 %vm496_vm0, %v34236_v45  ;;  %v34256_v45 = vld [vmem:[#allocation2 + $0x149] sm:$0xff] }
 0x70f   : > { %27618 = vmatprep.mubr.msk.f32.mxu0 %vm496_vm0, %v34240_v29  ;;  %39021 = vst [vmem:[#allocation63_spill] sm:$0xff] %v34256_v45  ;;  %v34260_v29 = vld [vmem:[#allocation2 + $0x151] sm:$0xff] }
 0x710   : > { %39022 = vst [vmem:[#allocation64_spill] sm:$0xff] %v34260_v29 }
 0x712   : > { %27619 = vmatmul.mubr.msk.f32.gmra.mrb[48].mxu0 %vm496_vm0, %v34244_v37  ;;  %v34264_v37 = vld [vmem:[#allocation2 + $0x169] sm:$0xff] }
 0x713   : > { %27621 = vmatprep.mubr.msk.f32.mxu0 %vm496_vm0, %v34248_v10  ;;  %39023 = vst [vmem:[#allocation68_spill] sm:$0xff] %v34264_v37  ;;  %v34268_v10 = vld [vmem:[#allocation2 + $0x171] sm:$0xff] }
 0x714   : > { %39024 = vst [vmem:[#allocation73_spill] sm:$0xff] %v34268_v10 }
 0x716   : > { %27622 = vmatmul.mubr.msk.f32.gmra.mrb[50].mxu0 %vm496_vm0, %v34252_v5  ;;  %v34272_v5 = vld [vmem:[#allocation2 + $0x189] sm:$0xff] }
 0x717   : > { %27624 = vmatprep.mubr.msk.f32.mxu0 %vm496_vm0, %v34256_v45  ;;  %39025 = vst [vmem:[#allocation75_spill] sm:$0xff] %v34272_v5  ;;  %v34276_v45 = vld [vmem:[#allocation2 + $0x191] sm:$0xff] }
 0x718   : > { %39026 = vst [vmem:[#allocation76_spill] sm:$0xff] %v34276_v45 }
 0x71a   : > { %27625 = vmatmul.mubr.msk.f32.gmra.mrb[52].mxu0 %vm496_vm0, %v34260_v29  ;;  %v34280_v29 = vld [vmem:[#allocation2 + $0x1a9] sm:$0xff] }
 0x71b   : > { %27627 = vmatprep.mubr.msk.f32.mxu0 %vm496_vm0, %v34264_v37  ;;  %39027 = vst [vmem:[#allocation77_spill] sm:$0xff] %v34280_v29  ;;  %v34284_v37 = vld [vmem:[#allocation2 + $0x1b1] sm:$0xff] }
 0x71c   : > { %39028 = vst [vmem:[#allocation78_spill] sm:$0xff] %v34284_v37 }
 0x71e   : > { %27628 = vmatmul.mubr.msk.f32.gmra.mrb[54].mxu0 %vm496_vm0, %v34268_v10  ;;  %v34288_v10 = vld [vmem:[#allocation2 + $0x1c9] sm:$0xff] }
 0x71f   : > { %27630 = vmatprep.mubr.msk.f32.mxu0 %vm496_vm0, %v34272_v5  ;;  %39029 = vst [vmem:[#allocation79_spill] sm:$0xff] %v34288_v10  ;;  %v34292_v5 = vld [vmem:[#allocation2 + $0x1d1] sm:$0xff] }
 0x720   : > { %39030 = vst [vmem:[#allocation80_spill] sm:$0xff] %v34292_v5 }
 0x722   : > { %27631 = vmatmul.mubr.msk.f32.gmra.mrb[56].mxu0 %vm496_vm0, %v34276_v45  ;;  %v34296_v45 = vld [vmem:[#allocation2 + $0x1e9] sm:$0xff] }
 0x723   : > { %27633 = vmatprep.mubr.msk.f32.mxu0 %vm496_vm0, %v34280_v29  ;;  %39031 = vst [vmem:[#allocation46_spill] sm:$0xff] %v34296_v45  ;;  %v34300_v29 = vld [vmem:[#allocation2 + $0x1f1] sm:$0xff] }
 0x726   : > { %27634 = vmatmul.mubr.msk.f32.gmra.mrb[58].mxu0 %vm496_vm0, %v34284_v37  ;;  %v9760_v37 = vld [vmem:[#allocation5 + $0xa0] sm:$0xff] }
 0x727   : > { %27636 = vmatprep.mubr.msk.f32.mxu0 %vm496_vm0, %v34288_v10  ;;  %v29544_v10 = vpack.c.bf16 %v9373_v58, %v9372_v22  ;;  %v10150_v22 = vld [vmem:[#allocation5 + $0xc0] sm:$0xff] }
 0x72a   : > { %27637 = vmatmul.mubr.msk.f32.gmra.mrb[60].mxu0 %vm496_vm0, %v34292_v5 }
 0x72b   : > { %27639 = vmatprep.mubr.msk.f32.mxu0 %vm496_vm0, %v34296_v45  ;;  %v29548_v45 = vpack.c.bf16 %v9761_v63, %v9760_v37  ;;  %v9763_v63 = vld [vmem:[#allocation5 + $0xb8] sm:$0xff]  ;;  %v10151_v37 = vld [vmem:[#allocation5 + $0xc8] sm:$0xff] }
 0x72e   : > { %27640 = vmatmul.mubr.msk.f32.gmra.mrb[62].mxu0 %vm496_vm0, %v34300_v29 }
 0x72f   : > { %27650 = vmatprep.mubr.msk.f32.mxu0 %vm496_vm0, %v34054_v36  ;;  %v34369_v36 = vld [vmem:[#allocation2 + $0x20f] sm:$0xff] }
 0x732   : > { %27651 = vmatmul.mubr.msk.f32.vlgmr.msra.gmra.mrb[32].mxu0 %vm496_vm0, %v34061_v3  ;;  %v9762_v3 = vld [vmem:[#allocation5 + $0xb0] sm:$0xff] }
 0x733   : > { %29543 = vmatpush3.bf16.msra.mxu0 %v34185_v2  ;;  %27653 = vmatprep.mubr.msk.f32.mxu0 %vm496_vm0, %v34065_v47  ;;  %v34365_v2 = vld [vmem:[#allocation2 + $0x207] sm:$0xff]  ;;  %v29552_v58 = vpack.c.bf16 %v9763_v63, %v9762_v3  ;;  %v39050_v3 = vld [vmem:[#allocation60_spill] sm:$0xff]  ;;  %v39051_v63 = vld [vmem:[#allocation61_spill] sm:$0xff] }
 0x734   : > { %29545 = vmatprep.subr.bf16.mxu0 %v29544_v10 }
 0x736   : > { %27654 = vmatmul.mubr.msk.f32.gmra.mrb[34].mxu0 %vm496_vm0, %v34070_v13 }
 0x737   : > { %27656 = vmatprep.mubr.msk.f32.mxu0 %vm496_vm0, %v34074_v27  ;;  %29547 = vmatpush3.bf16.msra.mxu0 %v29544_v10  ;;  %v29556_v10 = vpack.c.bf16 %v10151_v37, %v10150_v22  ;;  %v39053_v22 = vld [vmem:[#allocation66_spill] sm:$0xff]  ;;  %v39054_v37 = vld [vmem:[#allocation71_spill] sm:$0xff] }
 0x738   : > { %29549 = vmatprep.subr.bf16.mxu0 %v29548_v45 }
 0x73a   : > { %27657 = vmatmul.mubr.msk.f32.gmra.mrb[36].mxu0 %vm496_vm0, %v34078_v15 }
 0x73b   : > { %27659 = vmatprep.mubr.msk.f32.mxu0 %vm496_vm0, %v34082_v34 }
 0x73e   : > { %27660 = vmatmul.mubr.msk.f32.gmra.mrb[38].mxu0 %vm496_vm0, %v34086_v54 }
 0x73f   : > { %27662 = vmatprep.mubr.msk.f32.mxu0 %vm496_vm0, %v34090_v56 }
 0x742   : > { %27663 = vmatmul.mubr.msk.f32.gmra.mrb[40].mxu0 %vm496_vm0, %v34094_v0 }
 0x743   : > { %27665 = vmatprep.mubr.msk.f32.mxu0 %vm496_vm0, %v34098_v4 }
 0x746   : > { %27666 = vmatmul.mubr.msk.f32.gmra.mrb[42].mxu0 %vm496_vm0, %v34102_v26 }
 0x747   : > { %27668 = vmatprep.mubr.msk.f32.mxu0 %vm496_vm0, %v34106_v55 }
 0x74a   : > { %27669 = vmatmul.mubr.msk.f32.gmra.mrb[44].mxu0 %vm496_vm0, %v34110_v62 }
 0x74b   : > { %27671 = vmatprep.mubr.msk.f32.mxu0 %vm496_vm0, %v34114_v7 }
 0x74e   : > { %27672 = vmatmul.mubr.msk.f32.gmra.mrb[46].mxu0 %vm496_vm0, %v34118_v51 }
 0x74f   : > { %27674 = vmatprep.mubr.msk.f32.mxu0 %vm496_vm0, %v34122_v25 }
 0x752   : > { %27675 = vmatmul.mubr.msk.f32.gmra.mrb[48].mxu0 %vm496_vm0, %v34126_v39 }
 0x753   : > { %27677 = vmatprep.mubr.msk.f32.mxu0 %vm496_vm0, %v34130_v35 }
 0x756   : > { %27678 = vmatmul.mubr.msk.f32.gmra.mrb[50].mxu0 %vm496_vm0, %v34134_v1 }
 0x757   : > { %27680 = vmatprep.mubr.msk.f32.mxu0 %vm496_vm0, %v34138_v49 }
 0x75a   : > { %27681 = vmatmul.mubr.msk.f32.gmra.mrb[52].mxu0 %vm496_vm0, %v34142_v53 }
 0x75b   : > { %27683 = vmatprep.mubr.msk.f32.mxu0 %vm496_vm0, %v34146_v40 }
 0x75e   : > { %27684 = vmatmul.mubr.msk.f32.gmra.mrb[54].mxu0 %vm496_vm0, %v34150_v41 }
 0x75f   : > { %27686 = vmatprep.mubr.msk.f32.mxu0 %vm496_vm0, %v34154_v60 }
 0x762   : > { %27687 = vmatmul.mubr.msk.f32.gmra.mrb[56].mxu0 %vm496_vm0, %v34158_v61 }
 0x763   : > { %27689 = vmatprep.mubr.msk.f32.mxu0 %vm496_vm0, %v34162_v11 }
 0x766   : > { %27690 = vmatmul.mubr.msk.f32.gmra.mrb[58].mxu0 %vm496_vm0, %v34166_v21 }
 0x767   : > { %27692 = vmatprep.mubr.msk.f32.mxu0 %vm496_vm0, %v34170_v17 }
 0x76a   : > { %27693 = vmatmul.mubr.msk.f32.gmra.mrb[60].mxu0 %vm496_vm0, %v34174_v43 }
 0x76b   : > { %27695 = vmatprep.mubr.msk.f32.mxu0 %vm496_vm0, %v34365_v2 }
 0x76e   : > { %27696 = vmatmul.mubr.msk.f32.gmra.mrb[62].mxu0 %vm496_vm0, %v34369_v36 }
 0x76f   : > { %27706 = vmatprep.mubr.msk.f32.mxu0 %vm496_vm0, %v33880_v24  ;;  %v39032_v24 = vld [vmem:[#allocation47_spill] sm:$0xff] }
 0x772   : > { %27707 = vmatmul.mubr.msk.f32.vlgmr.msra.gmra.mrb[32].mxu0 %vm496_vm0, %v33886_v44  ;;  %v39033_v44 = vld [vmem:[#allocation48_spill] sm:$0xff] }
 0x773   : > { %29551 = vmatpush3.bf16.msra.mxu0 %v29548_v45  ;;  %27709 = vmatprep.mubr.msk.f32.mxu0 %vm496_vm0, %v33892_v9  ;;  %v39034_v9 = vld [vmem:[#allocation50_spill] sm:$0xff]  ;;  %v39049_v45 = vld [vmem:[#allocation59_spill] sm:$0xff] }
 0x774   : > { %29553 = vmatprep.subr.bf16.mxu0 %v29552_v58 }
 0x776   : > { %27710 = vmatmul.mubr.msk.f32.gmra.mrb[34].mxu0 %vm496_vm0, %v33898_v14  ;;  %v39035_v14 = vld [vmem:[#allocation51_spill] sm:$0xff] }
 0x777   : > { %27712 = vmatprep.mubr.msk.f32.mxu0 %vm496_vm0, %v33904_v33  ;;  %29555 = vmatpush3.bf16.msra.mxu0 %v29552_v58  ;;  %v39036_v33 = vld [vmem:[#allocation52_spill] sm:$0xff]  ;;  %v39052_v58 = vld [vmem:[#allocation62_spill] sm:$0xff] }
 0x778   : > { %29557 = vmatprep.subr.bf16.mxu0 %v29556_v10 }
 0x77a   : > { %27713 = vmatmul.mubr.msk.f32.gmra.mrb[36].mxu0 %vm496_vm0, %v33910_v32  ;;  %v39037_v32 = vld [vmem:[#allocation53_spill] sm:$0xff] }
 0x77b   : > { %27715 = vmatprep.mubr.msk.f32.mxu0 %vm496_vm0, %v33916_v23  ;;  %v39038_v23 = vld [vmem:[#allocation65_spill] sm:$0xff] }
 0x77e   : > { %27716 = vmatmul.mubr.msk.f32.gmra.mrb[38].mxu0 %vm496_vm0, %v33922_v20  ;;  %v34433_v20 = vld [vmem:[#allocation2 + $0x208] sm:$0xff] }
 0x77f   : > { %27718 = vmatprep.mubr.msk.f32.mxu0 %vm496_vm0, %v33928_v52  ;;  %v34437_v52 = vld [vmem:[#allocation2 + $0x210] sm:$0xff] }
 0x782   : > { %27719 = vmatmul.mubr.msk.f32.gmra.mrb[40].mxu0 %vm496_vm0, %v33934_v16  ;;  %v10152_v16 = vld [vmem:[#allocation5 + $0xd0] sm:$0xff] }
 0x783   : > { %27721 = vmatprep.mubr.msk.f32.mxu0 %vm496_vm0, %v33940_v8  ;;  %v10153_v8 = vld [vmem:[#allocation5 + $0xd8] sm:$0xff] }
 0x786   : > { %27722 = vmatmul.mubr.msk.f32.gmra.mrb[42].mxu0 %vm496_vm0, %v33946_v38  ;;  %v29560_v38 = vpack.c.bf16 %v10153_v8, %v10152_v16  ;;  %v39057_v16 = vld [vmem:[#allocation68_spill] sm:$0xff]  ;;  %v39058_v8 = vld [vmem:[#allocation73_spill] sm:$0xff] }
 0x787   : > { %27724 = vmatprep.mubr.msk.f32.mxu0 %vm496_vm0, %v33952_v50  ;;  %v10540_v50 = vld [vmem:[#allocation5 + $0xe0] sm:$0xff] }
 0x78a   : > { %27725 = vmatmul.mubr.msk.f32.gmra.mrb[44].mxu0 %vm496_vm0, %v33958_v59  ;;  %v10541_v59 = vld [vmem:[#allocation5 + $0xe8] sm:$0xff] }
 0x78b   : > { %27727 = vmatprep.mubr.msk.f32.mxu0 %vm496_vm0, %v33964_v30  ;;  %v39039_v30 = vld [vmem:[#allocation67_spill] sm:$0xff] }
 0x78e   : > { %27728 = vmatmul.mubr.msk.f32.gmra.mrb[46].mxu0 %vm496_vm0, %v33970_v28  ;;  %v29564_v28 = vpack.c.bf16 %v10541_v59, %v10540_v50  ;;  %v39060_v50 = vld [vmem:[#allocation76_spill] sm:$0xff]  ;;  %v39061_v59 = vld [vmem:[#allocation77_spill] sm:$0xff] }
 0x78f   : > { %27730 = vmatprep.mubr.msk.f32.mxu0 %vm496_vm0, %v33976_v48  ;;  %v39040_v48 = vld [vmem:[#allocation69_spill] sm:$0xff] }
 0x792   : > { %27731 = vmatmul.mubr.msk.f32.gmra.mrb[48].mxu0 %vm496_vm0, %v33982_v42  ;;  %v39041_v42 = vld [vmem:[#allocation70_spill] sm:$0xff] }
 0x793   : > { %27733 = vmatprep.mubr.msk.f32.mxu0 %vm496_vm0, %v33988_v6  ;;  %v39042_v6 = vld [vmem:[#allocation72_spill] sm:$0xff] }
 0x796   : > { %27734 = vmatmul.mubr.msk.f32.gmra.mrb[50].mxu0 %vm496_vm0, %v33994_v18  ;;  %v39043_v18 = vld [vmem:[#allocation74_spill] sm:$0xff] }
 0x797   : > { %27736 = vmatprep.mubr.msk.f32.mxu0 %vm496_vm0, %v34000_v31  ;;  %v39044_v31 = vld [vmem:[#allocation54_spill] sm:$0xff] }
 0x79a   : > { %27737 = vmatmul.mubr.msk.f32.gmra.mrb[52].mxu0 %vm496_vm0, %v34006_v46  ;;  %v39045_v46 = vld [vmem:[#allocation55_spill] sm:$0xff] }
 0x79b   : > { %27739 = vmatprep.mubr.msk.f32.mxu0 %vm496_vm0, %v34012_v19  ;;  %v39046_v19 = vld [vmem:[#allocation56_spill] sm:$0xff] }
 0x79e   : > { %27740 = vmatmul.mubr.msk.f32.gmra.mrb[54].mxu0 %vm496_vm0, %v39032_v24  ;;  %v39056_v24 = vld [vmem:[#allocation64_spill] sm:$0xff] }
 0x79f   : > { %27742 = vmatprep.mubr.msk.f32.mxu0 %vm496_vm0, %v39033_v44 }
 0x7a2   : > { %27743 = vmatmul.mubr.msk.f32.gmra.mrb[56].mxu0 %vm496_vm0, %v39034_v9 }
 0x7a3   : > { %27745 = vmatprep.mubr.msk.f32.mxu0 %vm496_vm0, %v39035_v14 }
 0x7a6   : > { %27746 = vmatmul.mubr.msk.f32.gmra.mrb[58].mxu0 %vm496_vm0, %v39036_v33 }
 0x7a7   : > { %27748 = vmatprep.mubr.msk.f32.mxu0 %vm496_vm0, %v39037_v32 }
 0x7aa   : > { %27749 = vmatmul.mubr.msk.f32.gmra.mrb[60].mxu0 %vm496_vm0, %v39038_v23 }
 0x7ab   : > { %27751 = vmatprep.mubr.msk.f32.mxu0 %vm496_vm0, %v34433_v20 }
 0x7ae   : > { %27752 = vmatmul.mubr.msk.f32.gmra.mrb[62].mxu0 %vm496_vm0, %v34437_v52 }
 0x7af   : > { %27762 = vmatprep.mubr.msk.f32.mxu0 %vm496_vm0, %v34180_v57  ;;  %v39048_v57 = vld [vmem:[#allocation58_spill] sm:$0xff] }
 0x7b2   : > { %27763 = vmatmul.mubr.msk.f32.vlgmr.msra.gmra.mrb[32].mxu0 %vm496_vm0, %v34187_v12  ;;  %v39047_v12 = vld [vmem:[#allocation57_spill] sm:$0xff] }
 0x7b3   : > { %29559 = vmatpush3.bf16.msra.mxu0 %v29556_v10  ;;  %27765 = vmatprep.mubr.msk.f32.mxu0 %vm496_vm0, %v39039_v30  ;;  %v39055_v10 = vld [vmem:[#allocation63_spill] sm:$0xff] }
 0x7b4   : > { %29561 = vmatprep.subr.bf16.mxu0 %v29560_v38 }
 0x7b6   : > { %27766 = vmatmul.mubr.msk.f32.gmra.mrb[34].mxu0 %vm496_vm0, %v39040_v48 }
 0x7b7   : > { %27768 = vmatprep.mubr.msk.f32.mxu0 %vm496_vm0, %v39041_v42  ;;  %29563 = vmatpush3.bf16.msra.mxu0 %v29560_v38  ;;  %v39059_v38 = vld [vmem:[#allocation75_spill] sm:$0xff] }
 0x7b8   : > { %29565 = vmatprep.subr.bf16.mxu0 %v29564_v28 }
 0x7ba   : > { %27769 = vmatmul.mubr.msk.f32.gmra.mrb[36].mxu0 %vm496_vm0, %v39042_v6 }
 0x7bb   : > { %27771 = vmatprep.mubr.msk.f32.mxu0 %vm496_vm0, %v39043_v18 }
 0x7be   : > { %27772 = vmatmul.mubr.msk.f32.gmra.mrb[38].mxu0 %vm496_vm0, %v39044_v31 }
 0x7bf   : > { %27774 = vmatprep.mubr.msk.f32.mxu0 %vm496_vm0, %v39045_v46 }
 0x7c2   : > { %27775 = vmatmul.mubr.msk.f32.gmra.mrb[40].mxu0 %vm496_vm0, %v39046_v19 }
 0x7c3   : > { %27777 = vmatprep.mubr.msk.f32.mxu0 %vm496_vm0, %v39047_v12 }
 0x7c6   : > { %27778 = vmatmul.mubr.msk.f32.gmra.mrb[42].mxu0 %vm496_vm0, %v39048_v57 }
 0x7c7   : > { %27780 = vmatprep.mubr.msk.f32.mxu0 %vm496_vm0, %v39049_v45 }
 0x7ca   : > { %27781 = vmatmul.mubr.msk.f32.gmra.mrb[44].mxu0 %vm496_vm0, %v39050_v3 }
 0x7cb   : > { %27783 = vmatprep.mubr.msk.f32.mxu0 %vm496_vm0, %v39051_v63 }
 0x7ce   : > { %27784 = vmatmul.mubr.msk.f32.gmra.mrb[46].mxu0 %vm496_vm0, %v39052_v58 }
 0x7cf   : > { %27786 = vmatprep.mubr.msk.f32.mxu0 %vm496_vm0, %v39053_v22 }
 0x7d2   : > { %27787 = vmatmul.mubr.msk.f32.gmra.mrb[48].mxu0 %vm496_vm0, %v39054_v37  ;;  %v39062_v37 = vld [vmem:[#allocation78_spill] sm:$0xff] }
 0x7d3   : > { %27789 = vmatprep.mubr.msk.f32.mxu0 %vm496_vm0, %v39055_v10  ;;  %v39063_v10 = vld [vmem:[#allocation79_spill] sm:$0xff] }
 0x7d6   : > { %27790 = vmatmul.mubr.msk.f32.gmra.mrb[50].mxu0 %vm496_vm0, %v39056_v24 }
 0x7d7   : > { %27792 = vmatprep.mubr.msk.f32.mxu0 %vm496_vm0, %v39057_v16  ;;  %v39064_v16 = vld [vmem:[#allocation46_spill] sm:$0xff] }
 0x7da   : > { %27793 = vmatmul.mubr.msk.f32.gmra.mrb[52].mxu0 %vm496_vm0, %v39058_v8 }
 0x7db   : > { %27795 = vmatprep.mubr.msk.f32.mxu0 %vm496_vm0, %v39059_v38  ;;  %v34501_v38 = vld [vmem:[#allocation2 + $0x209] sm:$0xff] }
 0x7dc   : > { %39065 = vst [vmem:[#allocation47_spill] sm:$0xff] %v34501_v38 }
 0x7de   : > { %27796 = vmatmul.mubr.msk.f32.gmra.mrb[54].mxu0 %vm496_vm0, %v39060_v50  ;;  %v10543_v50 = vld [vmem:[#allocation5 + $0xf8] sm:$0xff] }
 0x7df   : > { %27798 = vmatprep.mubr.msk.f32.mxu0 %vm496_vm0, %v39061_v59  ;;  %v34505_v59 = vld [vmem:[#allocation2 + $0x211] sm:$0xff] }
 0x7e2   : > { %27799 = vmatmul.mubr.msk.f32.gmra.mrb[56].mxu0 %vm496_vm0, %v39062_v37  ;;  %v10542_v37 = vld [vmem:[#allocation5 + $0xf0] sm:$0xff] }
 0x7e3   : > { %27801 = vmatprep.mubr.msk.f32.mxu0 %vm496_vm0, %v39063_v10  ;;  %v10931_v10 = vld [vmem:[#allocation5 + $0x108] sm:$0xff] }
 0x7e6   : > { %27802 = vmatmul.mubr.msk.f32.gmra.mrb[58].mxu0 %vm496_vm0, %v34292_v5  ;;  %v29568_v5 = vpack.c.bf16 %v10543_v50, %v10542_v37  ;;  %v39088_v37 = vld [vmem:[#allocation38_spill] sm:$0xff] }
 0x7e7   : > { %27804 = vmatprep.mubr.msk.f32.mxu0 %vm496_vm0, %v39064_v16  ;;  %v10930_v16 = vld [vmem:[#allocation5 + $0x100] sm:$0xff]  ;;  %v10511_v50 = vld [vmem:[#allocation2 + $0x88] sm:$0xff] }
 0x7ea   : > { %27805 = vmatmul.mubr.msk.f32.gmra.mrb[60].mxu0 %vm496_vm0, %v34300_v29 }
 0x7eb   : > { %27807 = vmatprep.mubr.msk.f32.mxu0 %vm496_vm0, %v34501_v38  ;;  %v34515_v38 = vpack.c.bf16 %v10931_v10, %v10930_v16  ;;  %v10510_v10 = vld [vmem:[#allocation2 + $0x70] sm:$0xff] }
 0x7ec   : > { %v39089_v16 = vld [vmem:[#allocation39_spill] sm:$0xff] }
 0x7ee   : > { %27808 = vmatmul.mubr.msk.f32.gmra.mrb[62].mxu0 %vm496_vm0, %v34505_v59 }
 0x7ef   : > { %27818 = vmatprep.mubr.msk.f32.mxu0 %vm496_vm0, %v34065_v47  ;;  %v31521_v47 = vmov 0  }
 0x7f0   : > { %31314 = vset.pattern.permute.xlu0 %v31521_v47  ;;  %31315 = vset.pattern.permute.xlu1 %v31521_v47  ;;  %v39090_v47 = vld [vmem:[#allocation40_spill] sm:$0xff] }
 0x7f2   : > { %27819 = vmatmul.mubr.msk.f32.vlgmr.msra.gmra.mrb[32].mxu0 %vm496_vm0, %v34070_v13  ;;  %v39066_v13 = vld [vmem:[#allocation15_spill] sm:$0xff] }
 0x7f3   : > { %29567 = vmatpush3.bf16.msra.mxu0 %v29564_v28  ;;  %27821 = vmatprep.mubr.msk.f32.mxu0 %vm496_vm0, %v34074_v27  ;;  %v39067_v27 = vld [vmem:[#allocation18_spill] sm:$0xff] }
 0x7f4   : > { %29569 = vmatprep.subr.bf16.mxu0 %v29568_v5  ;;  %11328 = vperm.xlu0 %31314, %v39066_v13   ;;  %v10509_v28 = vld [vmem:[#allocation2 + $0x68] sm:$0xff]  ;;  %v10512_v13 = vld [vmem:[#allocation2 + $0x90] sm:$0xff] }
 0x7f5   : > { %11338 = vperm.xlu1 %31315, %v39067_v27   ;;  %v39091_v27 = vld [vmem:[#allocation41_spill] sm:$0xff] }
 0x7f6   : > { %27822 = vmatmul.mubr.msk.f32.gmra.mrb[34].mxu0 %vm496_vm0, %v34078_v15  ;;  %v39068_v15 = vld [vmem:[#allocation17_spill] sm:$0xff] }
 0x7f7   : > { %27824 = vmatprep.mubr.msk.f32.mxu0 %vm496_vm0, %v34082_v34  ;;  %29571 = vmatpush3.bf16.msra.mxu0 %v29568_v5  ;;  %v39069_v34 = vld [vmem:[#allocation19_spill] sm:$0xff]  ;;  %v39086_v5 = vld [vmem:[#allocation36_spill] sm:$0xff] }
 0x7f8   : > { %29573 = vmatprep.subr.bf16.mxu0 %v34515_v38  ;;  %11333 = vperm.xlu0 %31314, %v39068_v15   ;;  %v39092_v15 = vld [vmem:[#allocation42_spill] sm:$0xff] }
 0x7f9   : > { %11343 = vperm.xlu1 %31315, %v39069_v34   ;;  %v10514_v34 = vld [vmem:[#allocation2 + $0xb0] sm:$0xff] }
 0x7fa   : > { %27825 = vmatmul.mubr.msk.f32.gmra.mrb[36].mxu0 %vm496_vm0, %v34086_v54  ;;  %v39070_v54 = vld [vmem:[#allocation20_spill] sm:$0xff] }
 0x7fb   : > { %27827 = vmatprep.mubr.msk.f32.mxu0 %vm496_vm0, %v34090_v56  ;;  %v39071_v56 = vld [vmem:[#allocation21_spill] sm:$0xff] }
 0x7fc   : > { %11348 = vperm.xlu0 %31314, %v39070_v54   ;;  %v39093_v54 = vld [vmem:[#allocation43_spill] sm:$0xff] }
 0x7fd   : > { %11353 = vperm.xlu1 %31315, %v39071_v56   ;;  %v10515_v56 = vld [vmem:[#allocation2 + $0xc8] sm:$0xff] }
 0x7fe   : > { %27828 = vmatmul.mubr.msk.f32.gmra.mrb[38].mxu0 %vm496_vm0, %v34094_v0  ;;  %v39072_v0 = vld [vmem:[#allocation22_spill] sm:$0xff] }
 0x7ff   : > { %27830 = vmatprep.mubr.msk.f32.mxu0 %vm496_vm0, %v34098_v4  ;;  %v39073_v4 = vld [vmem:[#allocation23_spill] sm:$0xff] }
 0x800   : > { %11358 = vperm.xlu0 %31314, %v39072_v0   ;;  %v39094_v0 = vld [vmem:[#allocation44_spill] sm:$0xff] }
 0x801   : > { %11363 = vperm.xlu1 %31315, %v39073_v4   ;;  %v10516_v4 = vld [vmem:[#allocation2 + $0xd0] sm:$0xff] }
 0x802   : > { %27831 = vmatmul.mubr.msk.f32.gmra.mrb[40].mxu0 %vm496_vm0, %v34102_v26  ;;  %v39074_v26 = vld [vmem:[#allocation24_spill] sm:$0xff] }
 0x803   : > { %27833 = vmatprep.mubr.msk.f32.mxu0 %vm496_vm0, %v34106_v55  ;;  %v39075_v55 = vld [vmem:[#allocation25_spill] sm:$0xff] }
 0x804   : > { %11368 = vperm.xlu0 %31314, %v39074_v26   ;;  %v39095_v26 = vld [vmem:[#allocation45_spill] sm:$0xff] }
 0x805   : > { %11373 = vperm.xlu1 %31315, %v39075_v55   ;;  %v10517_v55 = vld [vmem:[#allocation2 + $0xe8] sm:$0xff] }
 0x806   : > { %27834 = vmatmul.mubr.msk.f32.gmra.mrb[42].mxu0 %vm496_vm0, %v34110_v62  ;;  %v39076_v62 = vld [vmem:[#allocation26_spill] sm:$0xff] }
 0x807   : > { %27836 = vmatprep.mubr.msk.f32.mxu0 %vm496_vm0, %v34114_v7  ;;  %v39077_v7 = vld [vmem:[#allocation27_spill] sm:$0xff] }
 0x808   : > { %11378 = vperm.xlu0 %31314, %v39076_v62   ;;  %v39096_v62 = vld [vmem:[#allocation49_spill] sm:$0xff] }
 0x809   : > { %11383 = vperm.xlu1 %31315, %v39077_v7   ;;  %v10518_v7 = vld [vmem:[#allocation2 + $0xf0] sm:$0xff] }
 0x80a   : > { %27837 = vmatmul.mubr.msk.f32.gmra.mrb[44].mxu0 %vm496_vm0, %v34118_v51  ;;  %v39078_v51 = vld [vmem:[#allocation28_spill] sm:$0xff] }
 0x80b   : > { %27839 = vmatprep.mubr.msk.f32.mxu0 %vm496_vm0, %v34122_v25  ;;  %v39079_v25 = vld [vmem:[#allocation29_spill] sm:$0xff] }
 0x80c   : > { %11388 = vperm.xlu0 %31314, %v39078_v51   ;;  %v39097_v51 = vld [vmem:[#allocation16_spill] sm:$0xff] }
 0x80d   : > { %11393 = vperm.xlu1 %31315, %v39079_v25   ;;  %v10519_v25 = vld [vmem:[#allocation2 + $0x108] sm:$0xff] }
 0x80e   : > { %27840 = vmatmul.mubr.msk.f32.gmra.mrb[46].mxu0 %vm496_vm0, %v34126_v39  ;;  %v39080_v39 = vld [vmem:[#allocation30_spill] sm:$0xff] }
 0x80f   : > { %27842 = vmatprep.mubr.msk.f32.mxu0 %vm496_vm0, %v34130_v35  ;;  %v39081_v35 = vld [vmem:[#allocation31_spill] sm:$0xff] }
 0x810   : > { %11398 = vperm.xlu0 %31314, %v39080_v39   ;;  %v10520_v39 = vld [vmem:[#allocation2 + $0x110] sm:$0xff] }
 0x811   : > { %11403 = vperm.xlu1 %31315, %v39081_v35   ;;  %v10521_v35 = vld [vmem:[#allocation2 + $0x128] sm:$0xff] }
 0x812   : > { %27843 = vmatmul.mubr.msk.f32.gmra.mrb[48].mxu0 %vm496_vm0, %v34134_v1  ;;  %v10147_v1 = vld [vmem:[#allocation2 + $0x227] sm:$0xff] }
 0x813   : > { %27845 = vmatprep.mubr.msk.f32.mxu0 %vm496_vm0, %v34138_v49  ;;  %v39082_v49 = vld [vmem:[#allocation32_spill] sm:$0xff] }
 0x814   : > { %11408 = vperm.xlu0 %31314, %v39082_v49   ;;  %v10523_v49 = vld [vmem:[#allocation2 + $0x148] sm:$0xff] }
 0x816   : > { %27846 = vmatmul.mubr.msk.f32.gmra.mrb[50].mxu0 %vm496_vm0, %v34142_v53  ;;  %v39083_v53 = vld [vmem:[#allocation33_spill] sm:$0xff] }
 0x817   : > { %27848 = vmatprep.mubr.msk.f32.mxu0 %vm496_vm0, %v34146_v40  ;;  %11413 = vperm.xlu1 %31315, %v39083_v53   ;;  %v10148_v40 = vld [vmem:[#allocation2 + $0x22f] sm:$0xff] }
 0x818   : > { %v10524_v53 = vld [vmem:[#allocation2 + $0x150] sm:$0xff] }
 0x81a   : > { %27849 = vmatmul.mubr.msk.f32.gmra.mrb[52].mxu0 %vm496_vm0, %v34150_v41  ;;  %v39084_v41 = vld [vmem:[#allocation34_spill] sm:$0xff] }
 0x81b   : > { %27851 = vmatprep.mubr.msk.f32.mxu0 %vm496_vm0, %v34154_v60  ;;  %11418 = vperm.xlu0 %31314, %v39084_v41   ;;  %v10932_v60 = vld [vmem:[#allocation5 + $0x110] sm:$0xff] }
 0x81c   : > { %v10526_v41 = vld [vmem:[#allocation2 + $0x170] sm:$0xff] }
 0x81e   : > { %27852 = vmatmul.mubr.msk.f32.gmra.mrb[54].mxu0 %vm496_vm0, %v34158_v61  ;;  %v10933_v61 = vld [vmem:[#allocation5 + $0x118] sm:$0xff] }
 0x81f   : > { %27854 = vmatprep.mubr.msk.f32.mxu0 %vm496_vm0, %v34162_v11  ;;  %v39085_v11 = vld [vmem:[#allocation35_spill] sm:$0xff]  ;;  %11428 = vperm.xlu0 %31314, %v39086_v5   ;;  %v39109_v5 = vmov 0.0  }
 0x820   : > { %11423 = vperm.xlu1 %31315, %v39085_v11   ;;  %v10537_v11 = vld [vmem:[#allocation2 + $0x228] sm:$0xff] }
 0x822   : > { %27855 = vmatmul.mubr.msk.f32.gmra.mrb[56].mxu0 %vm496_vm0, %v34166_v21  ;;  %v10507_v21 = vld [vmem:[#allocation2 + $0x48] sm:$0xff] }
 0x823   : > { %27857 = vmatprep.mubr.msk.f32.mxu0 %vm496_vm0, %v34170_v17  ;;  %v23678_v17 = vld [vmem:[%s38343_s7 + $0x4] sm:$0xf]  ;;  %11438 = vperm.xlu0 %31314, %v39088_v37  }
 0x824   : > { %27978 = vmatprep.subr.msk.mxu1 %vm907_vm1, %v23678_v17 }
 0x825   : > { %27979 = vmatpush3.msk.msra.mxu1 %vm907_vm1, %v23678_v17 }
 0x826   : > { %27858 = vmatmul.mubr.msk.f32.gmra.mrb[58].mxu0 %vm496_vm0, %v34174_v43  ;;  %v29576_v43 = vpack.c.bf16 %v10933_v61, %v10932_v60  ;;  %v10527_v60 = vld [vmem:[#allocation2 + $0x188] sm:$0xff]  ;;  %v10528_v61 = vld [vmem:[#allocation2 + $0x190] sm:$0xff] }
 0x827   : > { %27860 = vmatprep.mubr.msk.f32.mxu0 %vm496_vm0, %v34365_v2  ;;  %v10508_v2 = vld [vmem:[#allocation2 + $0x50] sm:$0xff]  ;;  %11448 = vperm.xlu0 %31314, %v39090_v47  }
 0x82a   : > { %27861 = vmatmul.mubr.msk.f32.gmra.mrb[60].mxu0 %vm496_vm0, %v34369_v36  ;;  %v39087_v36 = vld [vmem:[#allocation37_spill] sm:$0xff] }
 0x82b   : > { %27863 = vmatprep.mubr.msk.f32.mxu0 %vm496_vm0, %v10147_v1  ;;  %11433 = vperm.xlu1 %31315, %v39087_v36   ;;  %v10522_v1 = vld [vmem:[#allocation2 + $0x130] sm:$0xff] }
 0x82c   : > { %11458 = vperm.xlu0 %31314, %v39092_v15  }
 0x82e   : > { %27864 = vmatmul.mubr.msk.f32.gmra.mrb[62].mxu0 %vm496_vm0, %v10148_v40  ;;  %v10525_v40 = vld [vmem:[#allocation2 + $0x168] sm:$0xff] }
 0x82f   : > { %27874 = vmatprep.mubr.msk.f32.mxu0 %vm496_vm0, %v10507_v21  ;;  %11443 = vperm.xlu1 %31315, %v39089_v16  }
 0x830   : > { %11468 = vperm.xlu0 %31314, %v39094_v0  }
 0x832   : > { %27875 = vmatmul.mubr.msk.f32.vlgmr.msra.gmra.mrb[32].mxu0 %vm496_vm0, %v10508_v2 }
 0x833   : > { %29575 = vmatpush3.bf16.msra.mxu0 %v34515_v38  ;;  %27877 = vmatprep.mubr.msk.f32.mxu0 %vm496_vm0, %v10509_v28  ;;  %v10513_v38 = vld [vmem:[#allocation2 + $0xa8] sm:$0xff]  ;;  %v34736_v28 = vld [vmem:[%s38342_s6] ss:$0 sm:$0xff] }
 0x834   : > { %29577 = vmatprep.subr.bf16.mxu0 %v29576_v43  ;;  %11453 = vperm.xlu1 %31315, %v39091_v27  }
 0x835   : > { %11478 = vperm.xlu0 %31314, %v39096_v62  }
 0x836   : > { %27878 = vmatmul.mubr.msk.f32.gmra.mrb[34].mxu0 %vm496_vm0, %v10510_v10 }
 0x837   : > { %27880 = vmatprep.mubr.msk.f32.mxu0 %vm496_vm0, %v10511_v50  ;;  %29579 = vmatpush3.bf16.msra.mxu0 %v29576_v43 }
 0x838   : > { %11463 = vperm.xlu1 %31315, %v39093_v54  }
 0x83a   : > { %27881 = vmatmul.mubr.msk.f32.gmra.mrb[36].mxu0 %vm496_vm0, %v10512_v13 }
 0x83b   : > { %27883 = vmatprep.mubr.msk.f32.mxu0 %vm496_vm0, %v10513_v38 }
 0x83c   : > { %11473 = vperm.xlu1 %31315, %v39095_v26  }
 0x83e   : > { %27884 = vmatmul.mubr.msk.f32.gmra.mrb[38].mxu0 %vm496_vm0, %v10514_v34 }
 0x83f   : > { %27886 = vmatprep.mubr.msk.f32.mxu0 %vm496_vm0, %v10515_v56 }
 0x840   : > { %11483 = vperm.xlu1 %31315, %v39097_v51  }
 0x842   : > { %27887 = vmatmul.mubr.msk.f32.gmra.mrb[40].mxu0 %vm496_vm0, %v10516_v4 }
 0x843   : > { %27889 = vmatprep.mubr.msk.f32.mxu0 %vm496_vm0, %v10517_v55 }
 0x846   : > { %27890 = vmatmul.mubr.msk.f32.gmra.mrb[42].mxu0 %vm496_vm0, %v10518_v7 }
 0x847   : > { %27892 = vmatprep.mubr.msk.f32.mxu0 %vm496_vm0, %v10519_v25 }
 0x84a   : > { %27893 = vmatmul.mubr.msk.f32.gmra.mrb[44].mxu0 %vm496_vm0, %v10520_v39 }
 0x84b   : > { %27895 = vmatprep.mubr.msk.f32.mxu0 %vm496_vm0, %v10521_v35 }
 0x84e   : > { %27896 = vmatmul.mubr.msk.f32.gmra.mrb[46].mxu0 %vm496_vm0, %v10522_v1 }
 0x84f   : > { %27898 = vmatprep.mubr.msk.f32.mxu0 %vm496_vm0, %v10523_v49 }
 0x852   : > { %27899 = vmatmul.mubr.msk.f32.gmra.mrb[48].mxu0 %vm496_vm0, %v10524_v53 }
 0x853   : > { %27901 = vmatprep.mubr.msk.f32.mxu0 %vm496_vm0, %v10525_v40 }
 0x856   : > { %27902 = vmatmul.mubr.msk.f32.gmra.mrb[50].mxu0 %vm496_vm0, %v10526_v41 }
 0x857   : > { %27904 = vmatprep.mubr.msk.f32.mxu0 %vm496_vm0, %v10527_v60 }
 0x85a   : > { %27905 = vmatmul.mubr.msk.f32.gmra.mrb[52].mxu0 %vm496_vm0, %v10528_v61 }
 0x85b   : > { %27907 = vmatprep.mubr.msk.f32.mxu0 %vm496_vm0, %v39033_v44  ;;  %v10538_v44 = vld [vmem:[#allocation2 + $0x230] sm:$0xff] }
 0x85e   : > { %27908 = vmatmul.mubr.msk.f32.gmra.mrb[54].mxu0 %vm496_vm0, %v39034_v9  ;;  %v39098_v9 = vld [vmem:[#allocation71_spill] sm:$0xff] }
 0x85f   : > { %27910 = vmatprep.mubr.msk.f32.mxu0 %vm496_vm0, %v39035_v14  ;;  %v39099_v14 = vld [vmem:[#allocation63_spill] sm:$0xff] }
 0x862   : > { %27911 = vmatmul.mubr.msk.f32.gmra.mrb[56].mxu0 %vm496_vm0, %v39036_v33  ;;  %v39100_v33 = vld [vmem:[#allocation68_spill] sm:$0xff] }
 0x863   : > { %27913 = vmatprep.mubr.msk.f32.mxu0 %vm496_vm0, %v39037_v32  ;;  %v39101_v32 = vld [vmem:[#allocation75_spill] sm:$0xff] }
 0x866   : > { %27914 = vmatmul.mubr.msk.f32.gmra.mrb[58].mxu0 %vm496_vm0, %v39038_v23  ;;  %v39102_v23 = vld [vmem:[#allocation76_spill] sm:$0xff] }
 0x867   : > { %27916 = vmatprep.mubr.msk.f32.mxu0 %vm496_vm0, %v34433_v20  ;;  %v39103_v20 = vld [vmem:[#allocation77_spill] sm:$0xff] }
 0x86a   : > { %27917 = vmatmul.mubr.msk.f32.gmra.mrb[60].mxu0 %vm496_vm0, %v34437_v52  ;;  %v39104_v52 = vld [vmem:[#allocation78_spill] sm:$0xff] }
 0x86b   : > { %27919 = vmatprep.mubr.msk.f32.mxu0 %vm496_vm0, %v10537_v11 }
 0x86e   : > { %27920 = vmatmul.mubr.msk.f32.gmra.mrb[62].mxu0 %vm496_vm0, %v10538_v44 }
 0x86f   : > { %27930 = vmatprep.mubr.msk.f32.mxu0 %vm496_vm0, %v39039_v30  ;;  %v39105_v30 = vld [vmem:[#allocation79_spill] sm:$0xff] }
 0x872   : > { %27931 = vmatmul.mubr.msk.f32.vlgmr.msra.gmra.mrb[32].mxu0 %vm496_vm0, %v39040_v48  ;;  %v39106_v48 = vld [vmem:[#allocation80_spill] sm:$0xff] }
 0x873   : > { %27933 = vmatprep.mubr.msk.f32.mxu0 %vm496_vm0, %v39041_v42  ;;  %v39107_v42 = vld [vmem:[#allocation46_spill] sm:$0xff] }
 0x876   : > { %27934 = vmatmul.mubr.msk.f32.gmra.mrb[34].mxu0 %vm496_vm0, %v39042_v6  ;;  %v39108_v6 = vld [vmem:[#allocation47_spill] sm:$0xff] }
 0x877   : > { %27936 = vmatprep.mubr.msk.f32.mxu0 %vm496_vm0, %v39043_v18  ;;  %v10927_v18 = vld [vmem:[#allocation2 + $0x229] sm:$0xff] }
 0x87a   : > { %27937 = vmatmul.mubr.msk.f32.gmra.mrb[36].mxu0 %vm496_vm0, %v39044_v31  ;;  %v10928_v31 = vld [vmem:[#allocation2 + $0x231] sm:$0xff] }
 0x87b   : > { %27939 = vmatprep.mubr.msk.f32.mxu0 %vm496_vm0, %v39045_v46  ;;  %v11615_v46 = vld [vmem:[#allocation2 + $0x8] sm:$0xff] }
 0x87c   : > { %27980 = vmatprep.mubr.msk.f32.mxu1 %vm602_vm2, %v11615_v46 }
 0x87e   : > { %27940 = vmatmul.mubr.msk.f32.gmra.mrb[38].mxu0 %vm496_vm0, %v39046_v19  ;;  %v11616_v19 = vld [vmem:[#allocation2 + $0x10] sm:$0xff] }
 0x87f   : > { %27942 = vmatprep.mubr.msk.f32.mxu0 %vm496_vm0, %v39047_v12  ;;  %27981 = vmatmul.mubr.msk.f32.vlgmr.msra.gmra.mrb[32].mxu1 %vm602_vm2, %v11616_v19  ;;  %v34724_v12 = vld [vmem:[%s38343_s7 + $0x8] sm:$0xf] }
 0x882   : > { %27943 = vmatmul.mubr.msk.f32.gmra.mrb[40].mxu0 %vm496_vm0, %v39048_v57  ;;  %v11339_v57 = vpop.permute.xlu1 %11338 }
 0x883   : > { %27945 = vmatprep.mubr.msk.f32.mxu0 %vm496_vm0, %v39049_v45  ;;  %v11329_v45 = vpop.permute.xlu0 %11328 }
 0x886   : > { %27946 = vmatmul.mubr.msk.f32.gmra.mrb[42].mxu0 %vm496_vm0, %v39050_v3  ;;  %v11344_v3 = vpop.permute.xlu1 %11343 }
 0x887   : > { %27948 = vmatprep.mubr.msk.f32.mxu0 %vm496_vm0, %v39051_v63  ;;  %v11334_v63 = vpop.permute.xlu0 %11333 }
 0x88a   : > { %27949 = vmatmul.mubr.msk.f32.gmra.mrb[44].mxu0 %vm496_vm0, %v39052_v58  ;;  %v11354_v58 = vpop.permute.xlu1 %11353 }
 0x88b   : > { %27951 = vmatprep.mubr.msk.f32.mxu0 %vm496_vm0, %v39053_v22  ;;  %v11349_v22 = vpop.permute.xlu0 %11348 }
 0x88e   : > { %27952 = vmatmul.mubr.msk.f32.gmra.mrb[46].mxu0 %vm496_vm0, %v39098_v9 }
 0x88f   : > { %27954 = vmatprep.mubr.msk.f32.mxu0 %vm496_vm0, %v39099_v14 }
 0x892   : > { %27955 = vmatmul.mubr.msk.f32.gmra.mrb[48].mxu0 %vm496_vm0, %v39056_v24  ;;  %v11364_v24 = vpop.permute.xlu1 %11363 }
 0x893   : > { %27957 = vmatprep.mubr.msk.f32.mxu0 %vm496_vm0, %v39100_v33 }
 0x896   : > { %27958 = vmatmul.mubr.msk.f32.gmra.mrb[50].mxu0 %vm496_vm0, %v39058_v8  ;;  %v706_v8 = vlaneseq  ;;  %v11374_v17 = vpop.permute.xlu1 %11373 }
 0x897   : > { %27960 = vmatprep.mubr.msk.f32.mxu0 %vm496_vm0, %v39101_v32 }
 0x898   : > { %v707_v21 = vand.u32 127, %v706_v8 }
 0x89a   : > { %27961 = vmatmul.mubr.msk.f32.gmra.mrb[52].mxu0 %vm496_vm0, %v39102_v23  ;;  %vm708_vm4 = vcmp.lt.s32.totalorder %v707_v21, 2  ;;  %v34731_v36 = vpop.permute.xlu1 %11383 }
 0x89b   : > { %27963 = vmatprep.mubr.msk.f32.mxu0 %vm496_vm0, %v39103_v20  ;;  %v34729_v2 = vsel %vm708_vm4, 1.0, %v39109_v5 }
 0x89c   : > { %v34741_v16 = vmul.f32 %v34729_v2, %v11334_v63  ;;  %v34745_v13 = vmul.f32 %v34729_v2, %v11329_v45  ;;  %v34753_v56 = vmul.f32 %v34729_v2, %v11344_v3  ;;  %v34760_v55 = vmul.f32 %v34729_v2, %v11339_v57 }
 0x89d   : > { %v34767_v39 = vmul.f32 %v34729_v2, %v11354_v58  ;;  %v34772_v49 = vmul.f32 %v34729_v2, %v11349_v22  ;;  %v34783_v44 = vmul.f32 %v34729_v2, %v11364_v24  ;;  %v34828_v22 = vmul.f32 %v34729_v2, %v34731_v36 }
 0x89e   : > { %27964 = vmatmul.mubr.msk.f32.gmra.mrb[54].mxu0 %vm496_vm0, %v39104_v52  ;;  %39110 = vst [vmem:[#allocation48_spill] sm:$0xff] %v34741_v16  ;;  %39111 = vst [vmem:[#allocation50_spill] sm:$0xff] %v34745_v13  ;;  %v34749_v15 = vpop.permute.xlu1 %11393 }
 0x89f   : > { %27966 = vmatprep.mubr.msk.f32.mxu0 %vm496_vm0, %v39105_v30  ;;  %39112 = vst [vmem:[#allocation51_spill] sm:$0xff] %v34753_v56  ;;  %39113 = vst [vmem:[#allocation52_spill] sm:$0xff] %v34760_v55 }
 0x8a0   : > { %39114 = vst [vmem:[#allocation53_spill] sm:$0xff] %v34767_v39  ;;  %39115 = vst [vmem:[#allocation65_spill] sm:$0xff] %v34772_v49 }
 0x8a1   : > { %39116 = vst [vmem:[#allocation67_spill] sm:$0xff] %v34783_v44  ;;  %39120 = vst [vmem:[#allocation74_spill] sm:$0xff] %v34828_v22 }
 0x8a2   : > { %27967 = vmatmul.mubr.msk.f32.gmra.mrb[56].mxu0 %vm496_vm0, %v39106_v48  ;;  %v34774_v53 = vpop.permute.xlu1 %11403 }
 0x8a3   : > { %27969 = vmatprep.mubr.msk.f32.mxu0 %vm496_vm0, %v39107_v42 }
 0x8a6   : > { %27970 = vmatmul.mubr.msk.f32.gmra.mrb[58].mxu0 %vm496_vm0, %v34300_v29  ;;  %v11614_v29 = vld [vmem:[%s38343_s7] sm:$0xf]  ;;  %v34801_v30 = vpop.permute.xlu1 %11413 }
 0x8a7   : > { %27972 = vmatprep.mubr.msk.f32.mxu0 %vm496_vm0, %v39108_v6  ;;  %28028 = vmatprep.subr.msk.mxu1 %vm907_vm1, %v11614_v29  ;;  %v34805_v6 = vmul.f32 %v34729_v2, %v11374_v17 }
 0x8a8   : > { %28029 = vmatpush3.msk.msra.mxu1 %vm907_vm1, %v11614_v29 }
 0x8a9   : > { %28078 = vmatprep.subr.msk.mxu1 %vm907_vm1, %v34724_v12  ;;  %39118 = vst [vmem:[#allocation70_spill] sm:$0xff] %v34805_v6 }
 0x8aa   : > { %27973 = vmatmul.mubr.msk.f32.gmra.mrb[60].mxu0 %vm496_vm0, %v34505_v59  ;;  %v11359_v59 = vpop.permute.xlu0 %11358  ;;  %v11424_v17 = vpop.permute.xlu1 %11423 }
 0x8ab   : > { %27975 = vmatprep.mubr.msk.f32.mxu0 %vm496_vm0, %v10927_v18  ;;  %v34790_v32 = vmul.f32 %v34729_v2, %v11359_v59 }
 0x8ad   : > { %39117 = vst [vmem:[#allocation69_spill] sm:$0xff] %v34790_v32 }
 0x8ae   : > { %27976 = vmatmul.mubr.msk.f32.gmra.mrb[62].mxu0 %vm496_vm0, %v10928_v31  ;;  %v11369_v43 = vpop.permute.xlu0 %11368 }
 0x8af   : > { %v34814_v29 = vmul.f32 %v34729_v2, %v11369_v43 }
 0x8b1   : > { %39119 = vst [vmem:[#allocation72_spill] sm:$0xff] %v34814_v29 }
 0x8b2   : > { %v34738_v37 = vpop.permute.xlu0 %11378 }
 0x8b3   : > { %v34836_v21 = vmul.f32 %v34729_v2, %v34738_v37 }
 0x8b5   : > { %39121 = vst [vmem:[#allocation54_spill] sm:$0xff] %v34836_v21 }
 0x8b6   : > { %v34755_v0 = vpop.permute.xlu0 %11388 }
 0x8ba   : > { %v34778_v41 = vpop.permute.xlu0 %11398 }
 0x8be   : > { %v34807_v18 = vpop.permute.xlu0 %11408 }
 0x8c2   : > { %v11419_v36 = vpop.permute.xlu0 %11418 }
 0x945   : > { %v27932_v10 = vpop.f32.mrb[32].mxu0 }
 0x946   : > { %v11295_v50 = vadd.f32 %v27932_v10, %v34736_v28  ;;  %v11096_v47 = vpop.f32.mrb[33].mxu0 }
 0x947   : > { %v11294_v27 = vadd.f32 %v34736_v28, %v11096_v47  ;;  %v34850_v47 = vmul.f32 %v34729_v2, %v34749_v15 }
 0x948   : > { %v11519_v38 = vadd.f32 %v34741_v16, %v11295_v50  ;;  %v35207_v16 = vld [vmem:[%s38343_s7 + $0x10] sm:$0xf] }
 0x949   : > { %v11518_v34 = vadd.f32 %v34745_v13, %v11294_v27  ;;  %v27935_v54 = vpop.f32.mrb[34].mxu0  ;;  %39122 = vst [vmem:[#allocation55_spill] sm:$0xff] %v34850_v47  ;;  %v12298_v13 = vld [vmem:[#allocation2 + $0x11] sm:$0xff] }
 0x94a   : > { %11551 = vst.msk [vmem:[#allocation2 + $0x30] sm:$0xff] %vm602_vm2, %v11519_v38  ;;  %v11297_v4 = vadd.f32 %v27935_v54, %v34736_v28  ;;  %v11106_v26 = vpop.f32.mrb[35].mxu0  ;;  %v34858_v54 = vmul.f32 %v34729_v2, %v34755_v0  ;;  %v34872_v0 = vmul.f32 %v34729_v2, %v34774_v53 }
 0x94b   : > { %11550 = vst.msk [vmem:[#allocation2 + $0x28] sm:$0xff] %vm602_vm2, %v11518_v34  ;;  %v11296_v62 = vadd.f32 %v34736_v28, %v11106_v26 }
 0x94c   : > { %v11521_v7 = vadd.f32 %v34753_v56, %v11297_v4  ;;  %39123 = vst [vmem:[#allocation56_spill] sm:$0xff] %v34858_v54  ;;  %39124 = vst [vmem:[#allocation57_spill] sm:$0xff] %v34872_v0 }
 0x94d   : > { %v11520_v51 = vadd.f32 %v34760_v55, %v11296_v62  ;;  %v27938_v25 = vpop.f32.mrb[36].mxu0  ;;  %v11434_v62 = vpop.permute.xlu1 %11433  ;;  %v12297_v55 = vld [vmem:[#allocation2 + $0x9] sm:$0xff] }
 0x94e   : > { %11553 = vst.msk [vmem:[#allocation2 + $0x50] sm:$0xff] %vm602_vm2, %v11521_v7  ;;  %v11299_v35 = vadd.f32 %v27938_v25, %v34736_v28  ;;  %v11116_v1 = vpop.f32.mrb[37].mxu0  ;;  %v11429_v25 = vpop.permute.xlu0 %11428 }
 0x94f   : > { %11552 = vst.msk [vmem:[#allocation2 + $0x48] sm:$0xff] %vm602_vm2, %v11520_v51  ;;  %v11298_v40 = vadd.f32 %v34736_v28, %v11116_v1 }
 0x950   : > { %v11523_v60 = vadd.f32 %v34767_v39, %v11299_v35 }
 0x951   : > { %v11522_v61 = vadd.f32 %v34772_v49, %v11298_v40  ;;  %v27941_v11 = vpop.f32.mrb[38].mxu0  ;;  %v34796_v20 = vld [vmem:[#allocation2 + $0x30] sm:$0xff] }
 0x952   : > { %11555 = vst.msk [vmem:[#allocation2 + $0x70] sm:$0xff] %vm602_vm2, %v11523_v60  ;;  %v11301_v9 = vadd.f32 %v27941_v11, %v34736_v28  ;;  %v11126_v14 = vpop.f32.mrb[39].mxu0  ;;  %v34787_v33 = vld [vmem:[#allocation2 + $0x28] sm:$0xff]  ;;  %v34880_v60 = vmul.f32 %v34729_v2, %v34778_v41  ;;  %v34894_v41 = vmul.f32 %v34729_v2, %v34801_v30 }
 0x953   : > { %11554 = vst.msk [vmem:[#allocation2 + $0x68] sm:$0xff] %vm602_vm2, %v11522_v61  ;;  %v11300_v23 = vadd.f32 %v34736_v28, %v11126_v14  ;;  %27983 = vmatprep.mubr.msk.f32.mxu1 %vm602_vm2, %v34787_v33 }
 0x954   : > { %v11525_v52 = vadd.f32 %v34783_v44, %v11301_v9  ;;  %27984 = vmatmul.mubr.msk.f32.gmra.mrb[34].mxu1 %vm602_vm2, %v34796_v20  ;;  %39125 = vst [vmem:[#allocation58_spill] sm:$0xff] %v34880_v60  ;;  %39126 = vst [vmem:[#allocation59_spill] sm:$0xff] %v34894_v41 }
 0x955   : > { %v11524_v48 = vadd.f32 %v34790_v32, %v11300_v23  ;;  %v27944_v42 = vpop.f32.mrb[40].mxu0  ;;  %v34820_v45 = vld [vmem:[#allocation2 + $0x50] sm:$0xff] }
 0x956   : > { %11557 = vst.msk [vmem:[#allocation2 + $0x90] sm:$0xff] %vm602_vm2, %v11525_v52  ;;  %v11303_v31 = vadd.f32 %v27944_v42, %v34736_v28  ;;  %v11136_v46 = vpop.f32.mrb[41].mxu0  ;;  %v34811_v19 = vld [vmem:[#allocation2 + $0x48] sm:$0xff]  ;;  %v34902_v42 = vmul.f32 %v34729_v2, %v34807_v18 }
 0x957   : > { %11556 = vst.msk [vmem:[#allocation2 + $0x88] sm:$0xff] %vm602_vm2, %v11524_v48  ;;  %v11302_v57 = vadd.f32 %v34736_v28, %v11136_v46  ;;  %27986 = vmatprep.mubr.msk.f32.mxu1 %vm602_vm2, %v34811_v19 }
 0x958   : > { %v11527_v3 = vadd.f32 %v34805_v6, %v11303_v31  ;;  %27987 = vmatmul.mubr.msk.f32.gmra.mrb[36].mxu1 %vm602_vm2, %v34820_v45  ;;  %39127 = vst [vmem:[#allocation60_spill] sm:$0xff] %v34902_v42  ;;  %v11444_v31 = vpop.permute.xlu1 %11443 }
 0x959   : > { %v11526_v63 = vadd.f32 %v34814_v29, %v11302_v57  ;;  %v27947_v58 = vpop.f32.mrb[42].mxu0  ;;  %v34842_v5 = vld [vmem:[#allocation2 + $0x70] sm:$0xff]  ;;  %v11439_v57 = vpop.permute.xlu0 %11438 }
 0x95a   : > { %11559 = vst.msk [vmem:[#allocation2 + $0xb0] sm:$0xff] %vm602_vm2, %v11527_v3  ;;  %v11305_v24 = vadd.f32 %v27947_v58, %v34736_v28  ;;  %v11146_v8 = vpop.f32.mrb[43].mxu0  ;;  %v34832_v59 = vld [vmem:[#allocation2 + $0x68] sm:$0xff]  ;;  %v34915_v58 = vmul.f32 %v34729_v2, %v11424_v17 }
 0x95b   : > { %11558 = vst.msk [vmem:[#allocation2 + $0xa8] sm:$0xff] %vm602_vm2, %v11526_v63  ;;  %v11304_v43 = vadd.f32 %v34736_v28, %v11146_v8  ;;  %27989 = vmatprep.mubr.msk.f32.mxu1 %vm602_vm2, %v34832_v59 }
 0x95c   : > { %v11529_v10 = vadd.f32 %v34828_v22, %v11305_v24  ;;  %27990 = vmatmul.mubr.msk.f32.gmra.mrb[38].mxu1 %vm602_vm2, %v34842_v5  ;;  %39128 = vst [vmem:[#allocation61_spill] sm:$0xff] %v34915_v58 }
 0x95d   : > { %v11528_v50 = vadd.f32 %v34836_v21, %v11304_v43  ;;  %v27950_v37 = vpop.f32.mrb[44].mxu0  ;;  %v34864_v15 = vld [vmem:[#allocation2 + $0x90] sm:$0xff] }
 0x95e   : > { %11561 = vst.msk [vmem:[#allocation2 + $0xd0] sm:$0xff] %vm602_vm2, %v11529_v10  ;;  %v11307_v27 = vadd.f32 %v27950_v37, %v34736_v28  ;;  %v11156_v38 = vpop.f32.mrb[45].mxu0  ;;  %v34854_v34 = vld [vmem:[#allocation2 + $0x88] sm:$0xff]  ;;  %v34922_v10 = vmul.f32 %v34729_v2, %v11419_v36  ;;  %v34935_v36 = vmul.f32 %v34729_v2, %v11434_v62 }
 0x95f   : > { %11560 = vst.msk [vmem:[#allocation2 + $0xc8] sm:$0xff] %vm602_vm2, %v11528_v50  ;;  %v11306_v4 = vadd.f32 %v34736_v28, %v11156_v38  ;;  %27992 = vmatprep.mubr.msk.f32.mxu1 %vm602_vm2, %v34854_v34 }
 0x960   : > { %v11531_v26 = vadd.f32 %v34850_v47, %v11307_v27  ;;  %27993 = vmatmul.mubr.msk.f32.gmra.mrb[40].mxu1 %vm602_vm2, %v34864_v15  ;;  %39129 = vst [vmem:[#allocation62_spill] sm:$0xff] %v34922_v10  ;;  %v11454_v27 = vpop.permute.xlu1 %11453  ;;  %39130 = vst [vmem:[#allocation66_spill] sm:$0xff] %v34935_v36 }
 0x961   : > { %v11530_v7 = vadd.f32 %v34858_v54, %v11306_v4  ;;  %v27953_v51 = vpop.f32.mrb[46].mxu0  ;;  %v34886_v53 = vld [vmem:[#allocation2 + $0xb0] sm:$0xff] }
 0x962   : > { %11563 = vst.msk [vmem:[#allocation2 + $0xf0] sm:$0xff] %vm602_vm2, %v11531_v26  ;;  %v11309_v35 = vadd.f32 %v27953_v51, %v34736_v28  ;;  %v11166_v1 = vpop.f32.mrb[47].mxu0  ;;  %v34876_v40 = vld [vmem:[#allocation2 + $0xa8] sm:$0xff]  ;;  %v11449_v26 = vpop.permute.xlu0 %11448 }
 0x963   : > { %11562 = vst.msk [vmem:[#allocation2 + $0xe8] sm:$0xff] %vm602_vm2, %v11530_v7  ;;  %v11308_v61 = vadd.f32 %v34736_v28, %v11166_v1  ;;  %27995 = vmatprep.mubr.msk.f32.mxu1 %vm602_vm2, %v34876_v40  ;;  %v34942_v1 = vmul.f32 %v34729_v2, %v11429_v25  ;;  %v34955_v25 = vmul.f32 %v34729_v2, %v11444_v31 }
 0x964   : > { %v11533_v11 = vadd.f32 %v34872_v0, %v11309_v35  ;;  %27996 = vmatmul.mubr.msk.f32.gmra.mrb[42].mxu1 %vm602_vm2, %v34886_v53 }
 0x965   : > { %v11532_v9 = vadd.f32 %v34880_v60, %v11308_v61  ;;  %v27956_v14 = vpop.f32.mrb[48].mxu0  ;;  %v34908_v30 = vld [vmem:[#allocation2 + $0xd0] sm:$0xff]  ;;  %39131 = vst [vmem:[#allocation64_spill] sm:$0xff] %v34942_v1  ;;  %39132 = vst [vmem:[#allocation73_spill] sm:$0xff] %v34955_v25 }
 0x966   : > { %11565 = vst.msk [vmem:[#allocation2 + $0x110] sm:$0xff] %vm602_vm2, %v11533_v11  ;;  %v11311_v23 = vadd.f32 %v27956_v14, %v34736_v28  ;;  %v11176_v52 = vpop.f32.mrb[49].mxu0  ;;  %v34898_v48 = vld [vmem:[#allocation2 + $0xc8] sm:$0xff] }
 0x967   : > { %11564 = vst.msk [vmem:[#allocation2 + $0x108] sm:$0xff] %vm602_vm2, %v11532_v9  ;;  %v11310_v46 = vadd.f32 %v34736_v28, %v11176_v52  ;;  %27998 = vmatprep.mubr.msk.f32.mxu1 %vm602_vm2, %v34898_v48 }
 0x968   : > { %v11535_v3 = vadd.f32 %v34894_v41, %v11311_v23  ;;  %27999 = vmatmul.mubr.msk.f32.gmra.mrb[44].mxu1 %vm602_vm2, %v34908_v30 }
 0x969   : > { %v11534_v63 = vadd.f32 %v34902_v42, %v11310_v46  ;;  %v27959_v18 = vpop.f32.mrb[50].mxu0  ;;  %v34928_v37 = vld [vmem:[#allocation2 + $0xf0] sm:$0xff] }
 0x96a   : > { %11567 = vst.msk [vmem:[#allocation2 + $0x130] sm:$0xff] %vm602_vm2, %v11535_v3  ;;  %v11313_v24 = vadd.f32 %v27959_v18, %v34736_v28  ;;  %v11186_v8 = vpop.f32.mrb[51].mxu0  ;;  %v34919_v43 = vld [vmem:[#allocation2 + $0xe8] sm:$0xff]  ;;  %v34962_v3 = vmul.f32 %v34729_v2, %v11439_v57 }
 0x96b   : > { %11566 = vst.msk [vmem:[#allocation2 + $0x128] sm:$0xff] %vm602_vm2, %v11534_v63  ;;  %v11312_v50 = vadd.f32 %v34736_v28, %v11186_v8  ;;  %28001 = vmatprep.mubr.msk.f32.mxu1 %vm602_vm2, %v34919_v43  ;;  %v11464_v63 = vpop.permute.xlu1 %11463 }
 0x96c   : > { %v11537_v17 = vadd.f32 %v34915_v58, %v11313_v24  ;;  %28002 = vmatmul.mubr.msk.f32.gmra.mrb[46].mxu1 %vm602_vm2, %v34928_v37  ;;  %39133 = vst [vmem:[#allocation15_spill] sm:$0xff] %v34962_v3  ;;  %v11459_v24 = vpop.permute.xlu0 %11458 }
 0x96d   : > { %v11536_v38 = vadd.f32 %v34922_v10, %v11312_v50  ;;  %v27962_v4 = vpop.f32.mrb[52].mxu0  ;;  %v34948_v62 = vld [vmem:[#allocation2 + $0x110] sm:$0xff] }
 0x96e   : > { %11569 = vst.msk [vmem:[#allocation2 + $0x150] sm:$0xff] %vm602_vm2, %v11537_v17  ;;  %v11315_v7 = vadd.f32 %v27962_v4, %v34736_v28  ;;  %v11196_v51 = vpop.f32.mrb[53].mxu0  ;;  %v34939_v35 = vld [vmem:[#allocation2 + $0x108] sm:$0xff]  ;;  %v34975_v17 = vmul.f32 %v34729_v2, %v11454_v27 }
 0x96f   : > { %11568 = vst.msk [vmem:[#allocation2 + $0x148] sm:$0xff] %vm602_vm2, %v11536_v38  ;;  %v11314_v61 = vadd.f32 %v34736_v28, %v11196_v51  ;;  %28004 = vmatprep.mubr.msk.f32.mxu1 %vm602_vm2, %v34939_v35  ;;  %v34982_v51 = vmul.f32 %v34729_v2, %v11449_v26  ;;  %v34995_v26 = vmul.f32 %v34729_v2, %v11464_v63  ;;  %v35135_v10 = vld [vmem:[#allocation2 + $0xef] sm:$0xff]  ;;  %v35139_v58 = vld [vmem:[#allocation2 + $0x107] sm:$0xff] }
 0x970   : > { %v11539_v11 = vadd.f32 %v34935_v36, %v11315_v7  ;;  %28005 = vmatmul.mubr.msk.f32.gmra.mrb[48].mxu1 %vm602_vm2, %v34948_v62  ;;  %39134 = vst [vmem:[#allocation18_spill] sm:$0xff] %v34975_v17  ;;  %v35131_v36 = vld [vmem:[#allocation2 + $0xe7] sm:$0xff]  ;;  %v35143_v42 = vld [vmem:[#allocation2 + $0x10f] sm:$0xff] }
 0x971   : > { %v11538_v9 = vadd.f32 %v34942_v1, %v11314_v61  ;;  %v27965_v14 = vpop.f32.mrb[54].mxu0  ;;  %v34968_v31 = vld [vmem:[#allocation2 + $0x130] sm:$0xff]  ;;  %39135 = vst [vmem:[#allocation17_spill] sm:$0xff] %v34982_v51  ;;  %39136 = vst [vmem:[#allocation19_spill] sm:$0xff] %v34995_v26 }
 0x972   : > { %11571 = vst.msk [vmem:[#allocation2 + $0x170] sm:$0xff] %vm602_vm2, %v11539_v11  ;;  %v11317_v23 = vadd.f32 %v27965_v14, %v34736_v28  ;;  %v11206_v52 = vpop.f32.mrb[55].mxu0  ;;  %v34959_v46 = vld [vmem:[#allocation2 + $0x128] sm:$0xff] }
 0x973   : > { %11570 = vst.msk [vmem:[#allocation2 + $0x168] sm:$0xff] %vm602_vm2, %v11538_v9  ;;  %v11316_v18 = vadd.f32 %v34736_v28, %v11206_v52  ;;  %28007 = vmatprep.mubr.msk.f32.mxu1 %vm602_vm2, %v34959_v46  ;;  %v11474_v9 = vpop.permute.xlu1 %11473  ;;  %v11469_v52 = vpop.permute.xlu0 %11468  ;;  %v35127_v1 = vld [vmem:[#allocation2 + $0xcf] sm:$0xff]  ;;  %v35147_v41 = vld [vmem:[#allocation2 + $0x127] sm:$0xff] }
 0x974   : > { %v11541_v8 = vadd.f32 %v34955_v25, %v11317_v23  ;;  %28008 = vmatmul.mubr.msk.f32.gmra.mrb[50].mxu1 %vm602_vm2, %v34968_v31  ;;  %v35123_v25 = vld [vmem:[#allocation2 + $0xc7] sm:$0xff]  ;;  %v35151_v60 = vld [vmem:[#allocation2 + $0x12f] sm:$0xff] }
 0x975   : > { %v11540_v50 = vadd.f32 %v34962_v3, %v11316_v18  ;;  %v27968_v57 = vpop.f32.mrb[56].mxu0  ;;  %v34988_v11 = vld [vmem:[#allocation2 + $0x150] sm:$0xff] }
 0x976   : > { %11573 = vst.msk [vmem:[#allocation2 + $0x190] sm:$0xff] %vm602_vm2, %v11541_v8  ;;  %v11319_v38 = vadd.f32 %v27968_v57, %v34736_v28  ;;  %v11216_v4 = vpop.f32.mrb[57].mxu0  ;;  %v34979_v7 = vld [vmem:[#allocation2 + $0x148] sm:$0xff]  ;;  %v35002_v57 = vmul.f32 %v34729_v2, %v11459_v24  ;;  %v35015_v24 = vmul.f32 %v34729_v2, %v11474_v9 }
 0x977   : > { %11572 = vst.msk [vmem:[#allocation2 + $0x188] sm:$0xff] %vm602_vm2, %v11540_v50  ;;  %v11318_v61 = vadd.f32 %v34736_v28, %v11216_v4  ;;  %28010 = vmatprep.mubr.msk.f32.mxu1 %vm602_vm2, %v34979_v7  ;;  %v35155_v0 = vld [vmem:[#allocation2 + $0x147] sm:$0xff]  ;;  %v35159_v54 = vld [vmem:[#allocation2 + $0x14f] sm:$0xff] }
 0x978   : > { %v11543_v27 = vadd.f32 %v34975_v17, %v11319_v38  ;;  %28011 = vmatmul.mubr.msk.f32.gmra.mrb[52].mxu1 %vm602_vm2, %v34988_v11  ;;  %39137 = vst [vmem:[#allocation20_spill] sm:$0xff] %v35002_v57  ;;  %39138 = vst [vmem:[#allocation21_spill] sm:$0xff] %v35015_v24 }
 0x979   : > { %v11542_v14 = vadd.f32 %v34982_v51, %v11318_v61  ;;  %v27971_v23 = vpop.f32.mrb[58].mxu0  ;;  %v35008_v63 = vld [vmem:[#allocation2 + $0x170] sm:$0xff]  ;;  %v35022_v51 = vmul.f32 %v34729_v2, %v11469_v52 }
 0x97a   : > { %11575 = vst.msk [vmem:[#allocation2 + $0x1b0] sm:$0xff] %vm602_vm2, %v11543_v27  ;;  %v11321_v18 = vadd.f32 %v27971_v23, %v34736_v28  ;;  %v11226_v8 = vpop.f32.mrb[59].mxu0  ;;  %v34999_v50 = vld [vmem:[#allocation2 + $0x168] sm:$0xff] }
 0x97b   : > { %11574 = vst.msk [vmem:[#allocation2 + $0x1a8] sm:$0xff] %vm602_vm2, %v11542_v14  ;;  %v11320_v38 = vadd.f32 %v34736_v28, %v11226_v8  ;;  %28013 = vmatprep.mubr.msk.f32.mxu1 %vm602_vm2, %v34999_v50  ;;  %39139 = vst [vmem:[#allocation22_spill] sm:$0xff] %v35022_v51  ;;  %v35163_v47 = vld [vmem:[#allocation2 + $0x167] sm:$0xff]  ;;  %v35167_v21 = vld [vmem:[#allocation2 + $0x16f] sm:$0xff] }
 0x97c   : > { %v11545_v4 = vadd.f32 %v34995_v26, %v11321_v18  ;;  %28014 = vmatmul.mubr.msk.f32.gmra.mrb[54].mxu1 %vm602_vm2, %v35008_v63  ;;  %v11484_v18 = vpop.permute.xlu1 %11483 }
 0x97d   : > { %v11544_v61 = vadd.f32 %v35002_v57, %v11320_v38  ;;  %v27974_v27 = vpop.f32.mrb[60].mxu0  ;;  %v35028_v9 = vld [vmem:[#allocation2 + $0x190] sm:$0xff]  ;;  %v11479_v38 = vpop.permute.xlu0 %11478  ;;  %v35035_v57 = vmul.f32 %v34729_v2, %v11484_v18 }
 0x97e   : > { %11577 = vst.msk [vmem:[#allocation2 + $0x1d0] sm:$0xff] %vm602_vm2, %v11545_v4  ;;  %v11323_v14 = vadd.f32 %v27974_v27, %v34736_v28  ;;  %v11236_v23 = vpop.f32.mrb[61].mxu0  ;;  %v35019_v8 = vld [vmem:[#allocation2 + $0x188] sm:$0xff]  ;;  %v35042_v3 = vmul.f32 %v34729_v2, %v11479_v38 }
 0x97f   : > { %11576 = vst.msk [vmem:[#allocation2 + $0x1c8] sm:$0xff] %vm602_vm2, %v11544_v61  ;;  %v11322_v26 = vadd.f32 %v34736_v28, %v11236_v23  ;;  %28016 = vmatprep.mubr.msk.f32.mxu1 %vm602_vm2, %v35019_v8  ;;  %39140 = vst [vmem:[#allocation23_spill] sm:$0xff] %v35035_v57  ;;  %v35171_v22 = vld [vmem:[#allocation2 + $0x187] sm:$0xff]  ;;  %v35175_v29 = vld [vmem:[#allocation2 + $0x18f] sm:$0xff] }
 0x980   : > { %v11547_v4 = vadd.f32 %v35015_v24, %v11323_v14  ;;  %28017 = vmatmul.mubr.msk.f32.gmra.mrb[56].mxu1 %vm602_vm2, %v35028_v9  ;;  %39141 = vst [vmem:[#allocation24_spill] sm:$0xff] %v35042_v3  ;;  %v35119_v24 = vld [vmem:[#allocation2 + $0xaf] sm:$0xff] }
 0x981   : > { %v11546_v27 = vadd.f32 %v35022_v51, %v11322_v26  ;;  %v27977_v52 = vpop.f32.mrb[62].mxu0  ;;  %v35048_v26 = vld [vmem:[#allocation2 + $0x1b0] sm:$0xff]  ;;  %v35115_v51 = vld [vmem:[#allocation2 + $0xa7] sm:$0xff] }
 0x982   : > { %11579 = vst.msk [vmem:[#allocation2 + $0x1f0] sm:$0xff] %vm602_vm2, %v11547_v4  ;;  %v11325_v61 = vadd.f32 %v27977_v52, %v34736_v28  ;;  %v11246_v23 = vpop.f32.mrb[63].mxu0  ;;  %v35039_v17 = vld [vmem:[#allocation2 + $0x1a8] sm:$0xff] }
 0x983   : > { %11578 = vst.msk [vmem:[#allocation2 + $0x1e8] sm:$0xff] %vm602_vm2, %v11546_v27  ;;  %v11324_v14 = vadd.f32 %v34736_v28, %v11246_v23  ;;  %28019 = vmatprep.mubr.msk.f32.mxu1 %vm602_vm2, %v35039_v17  ;;  %v11582_v27 = vld [vmem:[#allocation2 + $0x7] sm:$0xff]  ;;  %v35183_v32 = vld [vmem:[#allocation2 + $0x1af] sm:$0xff] }
 0x984   : > { %v11549_v18 = vadd.f32 %v35035_v57, %v11325_v61  ;;  %28020 = vmatmul.mubr.msk.f32.gmra.mrb[58].mxu1 %vm602_vm2, %v35048_v26  ;;  %v11583_v61 = vld [vmem:[#allocation2 + $0xf] sm:$0xff]  ;;  %v35179_v6 = vld [vmem:[#allocation2 + $0x1a7] sm:$0xff] }
 0x985   : > { %v11548_v4 = vadd.f32 %v35042_v3, %v11324_v14  ;;  %v35060_v28 = vld [vmem:[#allocation2 + $0x1d0] sm:$0xff]  ;;  %v35076_v23 = vld [vmem:[%s38343_s7 + $0xc] sm:$0xf] }
 0x986   : > { %11581 = vst.msk [vmem:[#allocation2 + $0x210] sm:$0xff] %vm602_vm2, %v11549_v18  ;;  %v35055_v2 = vld [vmem:[#allocation2 + $0x1c8] sm:$0xff] }
 0x987   : > { %11580 = vst.msk [vmem:[#allocation2 + $0x208] sm:$0xff] %vm602_vm2, %v11548_v4  ;;  %28022 = vmatprep.mubr.msk.f32.mxu1 %vm602_vm2, %v35055_v2  ;;  %v35079_v14 = vld [vmem:[#allocation2 + $0x27] sm:$0xff]  ;;  %v35087_v18 = vld [vmem:[#allocation2 + $0x2f] sm:$0xff] }
 0x988   : > { %28023 = vmatmul.mubr.msk.f32.gmra.mrb[60].mxu1 %vm602_vm2, %v35060_v28  ;;  %v35091_v4 = vld [vmem:[#allocation2 + $0x47] sm:$0xff]  ;;  %v35111_v57 = vld [vmem:[#allocation2 + $0x8f] sm:$0xff] }
 0x989   : > { %v35068_v52 = vld [vmem:[#allocation2 + $0x1f0] sm:$0xff]  ;;  %v35107_v3 = vld [vmem:[#allocation2 + $0x87] sm:$0xff] }
 0x98a   : > { %v35064_v38 = vld [vmem:[#allocation2 + $0x1e8] sm:$0xff]  ;;  %39143 = vst [vmem:[#allocation26_spill] sm:$0xff] %v35068_v52 }
 0x98b   : > { %39142 = vst [vmem:[#allocation25_spill] sm:$0xff] %v35064_v38  ;;  %28025 = vmatprep.mubr.msk.f32.mxu1 %vm602_vm2, %v35064_v38  ;;  %v35187_v44 = vld [vmem:[#allocation2 + $0x1c7] sm:$0xff]  ;;  %v35191_v49 = vld [vmem:[#allocation2 + $0x1cf] sm:$0xff] }
 0x98c   : > { %28026 = vmatmul.mubr.msk.f32.gmra.mrb[62].mxu1 %vm602_vm2, %v35068_v52  ;;  %v35195_v39 = vld [vmem:[#allocation2 + $0x1e7] sm:$0xff]  ;;  %v35199_v56 = vld [vmem:[#allocation2 + $0x1ef] sm:$0xff] }
 0x98d   : > { %28030 = vmatprep.mubr.msk.f32.mxu1 %vm602_vm2, %v11582_v27  ;;  %v35095_v27 = vld [vmem:[#allocation2 + $0x4f] sm:$0xff] }
 0x98e   : > { %v35210_v52 = vld [vmem:[#allocation2 + $0x29] sm:$0xff] }
 0x98f   : > { %39144 = vst [vmem:[#allocation27_spill] sm:$0xff] %v35210_v52  ;;  %v35222_v38 = vld [vmem:[#allocation2 + $0x49] sm:$0xff] }
 0x990   : > { %28031 = vmatmul.mubr.msk.f32.vlgmr.msra.gmra.mrb[32].mxu1 %vm602_vm2, %v11583_v61  ;;  %v35103_v61 = vld [vmem:[#allocation2 + $0x6f] sm:$0xff]  ;;  %39146 = vst [vmem:[#allocation29_spill] sm:$0xff] %v35222_v38 }
 0x991   : > { %28079 = vmatpush3.msk.msra.mxu1 %vm907_vm1, %v34724_v12  ;;  %28033 = vmatprep.mubr.msk.f32.mxu1 %vm602_vm2, %v35079_v14  ;;  %v35099_v12 = vld [vmem:[#allocation2 + $0x67] sm:$0xff] }
 0x992   : > { %28128 = vmatprep.subr.msk.mxu1 %vm907_vm1, %v35076_v23 }
 0x994   : > { %28034 = vmatmul.mubr.msk.f32.gmra.mrb[34].mxu1 %vm602_vm2, %v35087_v18 }
 0x995   : > { %28036 = vmatprep.mubr.msk.f32.mxu1 %vm602_vm2, %v35091_v4 }
 0x998   : > { %28037 = vmatmul.mubr.msk.f32.gmra.mrb[36].mxu1 %vm602_vm2, %v35095_v27 }
 0x999   : > { %28039 = vmatprep.mubr.msk.f32.mxu1 %vm602_vm2, %v35099_v12 }
 0x99c   : > { %28040 = vmatmul.mubr.msk.f32.gmra.mrb[38].mxu1 %vm602_vm2, %v35103_v61 }
 0x99d   : > { %28042 = vmatprep.mubr.msk.f32.mxu1 %vm602_vm2, %v35107_v3 }
 0x9a0   : > { %28043 = vmatmul.mubr.msk.f32.gmra.mrb[40].mxu1 %vm602_vm2, %v35111_v57 }
 0x9a1   : > { %28045 = vmatprep.mubr.msk.f32.mxu1 %vm602_vm2, %v35115_v51 }
 0x9a4   : > { %28046 = vmatmul.mubr.msk.f32.gmra.mrb[42].mxu1 %vm602_vm2, %v35119_v24 }
 0x9a5   : > { %28048 = vmatprep.mubr.msk.f32.mxu1 %vm602_vm2, %v35123_v25 }
 0x9a8   : > { %28049 = vmatmul.mubr.msk.f32.gmra.mrb[44].mxu1 %vm602_vm2, %v35127_v1 }
 0x9a9   : > { %28051 = vmatprep.mubr.msk.f32.mxu1 %vm602_vm2, %v35131_v36 }
 0x9ac   : > { %28052 = vmatmul.mubr.msk.f32.gmra.mrb[46].mxu1 %vm602_vm2, %v35135_v10 }
 0x9ad   : > { %28054 = vmatprep.mubr.msk.f32.mxu1 %vm602_vm2, %v35139_v58 }
 0x9b0   : > { %28055 = vmatmul.mubr.msk.f32.gmra.mrb[48].mxu1 %vm602_vm2, %v35143_v42 }
 0x9b1   : > { %28057 = vmatprep.mubr.msk.f32.mxu1 %vm602_vm2, %v35147_v41 }
 0x9b4   : > { %28058 = vmatmul.mubr.msk.f32.gmra.mrb[50].mxu1 %vm602_vm2, %v35151_v60 }
 0x9b5   : > { %28060 = vmatprep.mubr.msk.f32.mxu1 %vm602_vm2, %v35155_v0 }
 0x9b8   : > { %28061 = vmatmul.mubr.msk.f32.gmra.mrb[52].mxu1 %vm602_vm2, %v35159_v54 }
 0x9b9   : > { %28063 = vmatprep.mubr.msk.f32.mxu1 %vm602_vm2, %v35163_v47 }
 0x9bc   : > { %28064 = vmatmul.mubr.msk.f32.gmra.mrb[54].mxu1 %vm602_vm2, %v35167_v21 }
 0x9bd   : > { %28066 = vmatprep.mubr.msk.f32.mxu1 %vm602_vm2, %v35171_v22 }
 0x9c0   : > { %28067 = vmatmul.mubr.msk.f32.gmra.mrb[56].mxu1 %vm602_vm2, %v35175_v29 }
 0x9c1   : > { %28069 = vmatprep.mubr.msk.f32.mxu1 %vm602_vm2, %v35179_v6 }
 0x9c4   : > { %28070 = vmatmul.mubr.msk.f32.gmra.mrb[58].mxu1 %vm602_vm2, %v35183_v32 }
 0x9c5   : > { %28072 = vmatprep.mubr.msk.f32.mxu1 %vm602_vm2, %v35187_v44 }
 0x9c8   : > { %28073 = vmatmul.mubr.msk.f32.gmra.mrb[60].mxu1 %vm602_vm2, %v35191_v49 }
 0x9c9   : > { %28075 = vmatprep.mubr.msk.f32.mxu1 %vm602_vm2, %v35195_v39 }
 0x9cc   : > { %28076 = vmatmul.mubr.msk.f32.gmra.mrb[62].mxu1 %vm602_vm2, %v35199_v56 }
 0x9cd   : > { %28080 = vmatprep.mubr.msk.f32.mxu1 %vm602_vm2, %v12297_v55  ;;  %v35218_v55 = vld [vmem:[#allocation2 + $0x31] sm:$0xff] }
 0x9ce   : > { %39145 = vst [vmem:[#allocation28_spill] sm:$0xff] %v35218_v55 }
 0x9d0   : > { %28081 = vmatmul.mubr.msk.f32.vlgmr.msra.gmra.mrb[32].mxu1 %vm602_vm2, %v12298_v13  ;;  %v35226_v13 = vld [vmem:[#allocation2 + $0x51] sm:$0xff] }
 0x9d1   : > { %28129 = vmatpush3.msk.msra.mxu1 %vm907_vm1, %v35076_v23  ;;  %28083 = vmatprep.mubr.msk.f32.mxu1 %vm602_vm2, %v35210_v52  ;;  %39147 = vst [vmem:[#allocation30_spill] sm:$0xff] %v35226_v13  ;;  %v35230_v23 = vld [vmem:[#allocation2 + $0x69] sm:$0xff]  ;;  %v35234_v52 = vld [vmem:[#allocation2 + $0x71] sm:$0xff] }
 0x9d2   : > { %28178 = vmatprep.subr.msk.mxu1 %vm907_vm1, %v35207_v16  ;;  %39148 = vst [vmem:[#allocation31_spill] sm:$0xff] %v35230_v23  ;;  %39149 = vst [vmem:[#allocation32_spill] sm:$0xff] %v35234_v52 }
 0x9d4   : > { %28084 = vmatmul.mubr.msk.f32.gmra.mrb[34].mxu1 %vm602_vm2, %v35218_v55  ;;  %v35238_v55 = vld [vmem:[#allocation2 + $0x89] sm:$0xff] }
 0x9d5   : > { %28086 = vmatprep.mubr.msk.f32.mxu1 %vm602_vm2, %v35222_v38  ;;  %39150 = vst [vmem:[#allocation33_spill] sm:$0xff] %v35238_v55  ;;  %v35242_v38 = vld [vmem:[#allocation2 + $0x91] sm:$0xff] }
 0x9d6   : > { %39151 = vst [vmem:[#allocation34_spill] sm:$0xff] %v35242_v38 }
 0x9d8   : > { %28087 = vmatmul.mubr.msk.f32.gmra.mrb[36].mxu1 %vm602_vm2, %v35226_v13  ;;  %v35246_v13 = vld [vmem:[#allocation2 + $0xa9] sm:$0xff] }
 0x9d9   : > { %28089 = vmatprep.mubr.msk.f32.mxu1 %vm602_vm2, %v35230_v23  ;;  %39152 = vst [vmem:[#allocation35_spill] sm:$0xff] %v35246_v13  ;;  %v35250_v23 = vld [vmem:[#allocation2 + $0xb1] sm:$0xff] }
 0x9da   : > { %39153 = vst [vmem:[#allocation36_spill] sm:$0xff] %v35250_v23 }
 0x9dc   : > { %28090 = vmatmul.mubr.msk.f32.gmra.mrb[38].mxu1 %vm602_vm2, %v35234_v52  ;;  %v35254_v52 = vld [vmem:[#allocation2 + $0xc9] sm:$0xff] }
 0x9dd   : > { %28092 = vmatprep.mubr.msk.f32.mxu1 %vm602_vm2, %v35238_v55  ;;  %39154 = vst [vmem:[#allocation37_spill] sm:$0xff] %v35254_v52  ;;  %v35258_v55 = vld [vmem:[#allocation2 + $0xd1] sm:$0xff] }
 0x9de   : > { %39155 = vst [vmem:[#allocation38_spill] sm:$0xff] %v35258_v55 }
 0x9e0   : > { %28093 = vmatmul.mubr.msk.f32.gmra.mrb[40].mxu1 %vm602_vm2, %v35242_v38  ;;  %v35262_v38 = vld [vmem:[#allocation2 + $0xe9] sm:$0xff] }
 0x9e1   : > { %28095 = vmatprep.mubr.msk.f32.mxu1 %vm602_vm2, %v35246_v13  ;;  %39156 = vst [vmem:[#allocation39_spill] sm:$0xff] %v35262_v38  ;;  %v35266_v13 = vld [vmem:[#allocation2 + $0xf1] sm:$0xff] }
 0x9e2   : > { %39157 = vst [vmem:[#allocation40_spill] sm:$0xff] %v35266_v13 }
 0x9e4   : > { %28096 = vmatmul.mubr.msk.f32.gmra.mrb[42].mxu1 %vm602_vm2, %v35250_v23  ;;  %v35270_v23 = vld [vmem:[#allocation2 + $0x109] sm:$0xff] }
 0x9e5   : > { %28098 = vmatprep.mubr.msk.f32.mxu1 %vm602_vm2, %v35254_v52  ;;  %39158 = vst [vmem:[#allocation41_spill] sm:$0xff] %v35270_v23  ;;  %v35274_v52 = vld [vmem:[#allocation2 + $0x111] sm:$0xff] }
 0x9e6   : > { %39159 = vst [vmem:[#allocation42_spill] sm:$0xff] %v35274_v52 }
 0x9e8   : > { %28099 = vmatmul.mubr.msk.f32.gmra.mrb[44].mxu1 %vm602_vm2, %v35258_v55  ;;  %v35278_v55 = vld [vmem:[#allocation2 + $0x129] sm:$0xff] }
 0x9e9   : > { %28101 = vmatprep.mubr.msk.f32.mxu1 %vm602_vm2, %v35262_v38  ;;  %39160 = vst [vmem:[#allocation43_spill] sm:$0xff] %v35278_v55  ;;  %v35282_v38 = vld [vmem:[#allocation2 + $0x131] sm:$0xff] }
 0x9ea   : > { %39161 = vst [vmem:[#allocation44_spill] sm:$0xff] %v35282_v38 }
 0x9ec   : > { %28102 = vmatmul.mubr.msk.f32.gmra.mrb[46].mxu1 %vm602_vm2, %v35266_v13  ;;  %v35286_v13 = vld [vmem:[#allocation2 + $0x149] sm:$0xff] }
 0x9ed   : > { %28104 = vmatprep.mubr.msk.f32.mxu1 %vm602_vm2, %v35270_v23  ;;  %39162 = vst [vmem:[#allocation45_spill] sm:$0xff] %v35286_v13  ;;  %v35290_v23 = vld [vmem:[#allocation2 + $0x151] sm:$0xff] }
 0x9ee   : > { %39163 = vst [vmem:[#allocation49_spill] sm:$0xff] %v35290_v23 }
 0x9f0   : > { %28105 = vmatmul.mubr.msk.f32.gmra.mrb[48].mxu1 %vm602_vm2, %v35274_v52  ;;  %v35294_v52 = vld [vmem:[#allocation2 + $0x169] sm:$0xff] }
 0x9f1   : > { %28107 = vmatprep.mubr.msk.f32.mxu1 %vm602_vm2, %v35278_v55  ;;  %39164 = vst [vmem:[#allocation16_spill] sm:$0xff] %v35294_v52  ;;  %v35298_v55 = vld [vmem:[#allocation2 + $0x171] sm:$0xff] }
 0x9f2   : > { %39165 = vst [vmem:[#allocation71_spill] sm:$0xff] %v35298_v55 }
 0x9f4   : > { %28108 = vmatmul.mubr.msk.f32.gmra.mrb[50].mxu1 %vm602_vm2, %v35282_v38  ;;  %v35302_v38 = vld [vmem:[#allocation2 + $0x189] sm:$0xff] }
 0x9f5   : > { %28110 = vmatprep.mubr.msk.f32.mxu1 %vm602_vm2, %v35286_v13  ;;  %39166 = vst [vmem:[#allocation63_spill] sm:$0xff] %v35302_v38  ;;  %v35306_v13 = vld [vmem:[#allocation2 + $0x191] sm:$0xff] }
 0x9f6   : > { %39167 = vst [vmem:[#allocation68_spill] sm:$0xff] %v35306_v13 }
 0x9f8   : > { %28111 = vmatmul.mubr.msk.f32.gmra.mrb[52].mxu1 %vm602_vm2, %v35290_v23  ;;  %v35310_v23 = vld [vmem:[#allocation2 + $0x1a9] sm:$0xff] }
 0x9f9   : > { %28113 = vmatprep.mubr.msk.f32.mxu1 %vm602_vm2, %v35294_v52  ;;  %39168 = vst [vmem:[#allocation75_spill] sm:$0xff] %v35310_v23  ;;  %v35314_v52 = vld [vmem:[#allocation2 + $0x1b1] sm:$0xff] }
 0x9fc   : > { %28114 = vmatmul.mubr.msk.f32.gmra.mrb[54].mxu1 %vm602_vm2, %v35298_v55  ;;  %v35318_v55 = vld [vmem:[#allocation2 + $0x1c9] sm:$0xff] }
 0x9fd   : > { %28116 = vmatprep.mubr.msk.f32.mxu1 %vm602_vm2, %v35302_v38  ;;  %39169 = vst [vmem:[#allocation76_spill] sm:$0xff] %v35318_v55  ;;  %v35322_v38 = vld [vmem:[#allocation2 + $0x1d1] sm:$0xff] }
 0xa00   : > { %28117 = vmatmul.mubr.msk.f32.gmra.mrb[56].mxu1 %vm602_vm2, %v35306_v13  ;;  %v35326_v13 = vld [vmem:[#allocation2 + $0x1e9] sm:$0xff] }
 0xa01   : > { %28119 = vmatprep.mubr.msk.f32.mxu1 %vm602_vm2, %v35310_v23  ;;  %39170 = vst [vmem:[#allocation77_spill] sm:$0xff] %v35326_v13  ;;  %v35330_v23 = vld [vmem:[#allocation2 + $0x1f1] sm:$0xff] }
 0xa04   : > { %28120 = vmatmul.mubr.msk.f32.gmra.mrb[58].mxu1 %vm602_vm2, %v35314_v52 }
 0xa05   : > { %28122 = vmatprep.mubr.msk.f32.mxu1 %vm602_vm2, %v35318_v55  ;;  %v23847_v55 = vld [vmem:[%s38343_s7 + $0x14] sm:$0xf] }
 0xa08   : > { %28123 = vmatmul.mubr.msk.f32.gmra.mrb[60].mxu1 %vm602_vm2, %v35322_v38 }
 0xa09   : > { %28125 = vmatprep.mubr.msk.f32.mxu1 %vm602_vm2, %v35326_v13 }
 0xa0c   : > { %28126 = vmatmul.mubr.msk.f32.gmra.mrb[62].mxu1 %vm602_vm2, %v35330_v23 }
 0xa0d   : > { %28130 = vmatprep.mubr.msk.f32.mxu1 %vm602_vm2, %v35079_v14  ;;  %v35404_v14 = vld [vmem:[#allocation2 + $0x20f] sm:$0xff] }
 0xa10   : > { %28131 = vmatmul.mubr.msk.f32.vlgmr.msra.gmra.mrb[32].mxu1 %vm602_vm2, %v35087_v18  ;;  %v23881_v18 = vld [vmem:[%s38343_s7 + $0x18] sm:$0xf] }
 0xa11   : > { %28179 = vmatpush3.msk.msra.mxu1 %vm907_vm1, %v35207_v16  ;;  %28133 = vmatprep.mubr.msk.f32.mxu1 %vm602_vm2, %v35091_v4  ;;  %v35400_v16 = vld [vmem:[#allocation2 + $0x207] sm:$0xff] }
 0xa12   : > { %28228 = vmatprep.subr.msk.mxu1 %vm907_vm1, %v23847_v55 }
 0xa14   : > { %28134 = vmatmul.mubr.msk.f32.gmra.mrb[34].mxu1 %vm602_vm2, %v35095_v27 }
 0xa15   : > { %28136 = vmatprep.mubr.msk.f32.mxu1 %vm602_vm2, %v35099_v12 }
 0xa18   : > { %28137 = vmatmul.mubr.msk.f32.gmra.mrb[36].mxu1 %vm602_vm2, %v35103_v61 }
 0xa19   : > { %28139 = vmatprep.mubr.msk.f32.mxu1 %vm602_vm2, %v35107_v3 }
 0xa1c   : > { %28140 = vmatmul.mubr.msk.f32.gmra.mrb[38].mxu1 %vm602_vm2, %v35111_v57 }
 0xa1d   : > { %28142 = vmatprep.mubr.msk.f32.mxu1 %vm602_vm2, %v35115_v51 }
 0xa20   : > { %28143 = vmatmul.mubr.msk.f32.gmra.mrb[40].mxu1 %vm602_vm2, %v35119_v24 }
 0xa21   : > { %28145 = vmatprep.mubr.msk.f32.mxu1 %vm602_vm2, %v35123_v25 }
 0xa24   : > { %28146 = vmatmul.mubr.msk.f32.gmra.mrb[42].mxu1 %vm602_vm2, %v35127_v1 }
 0xa25   : > { %28148 = vmatprep.mubr.msk.f32.mxu1 %vm602_vm2, %v35131_v36 }
 0xa28   : > { %28149 = vmatmul.mubr.msk.f32.gmra.mrb[44].mxu1 %vm602_vm2, %v35135_v10 }
 0xa29   : > { %28151 = vmatprep.mubr.msk.f32.mxu1 %vm602_vm2, %v35139_v58 }
 0xa2c   : > { %28152 = vmatmul.mubr.msk.f32.gmra.mrb[46].mxu1 %vm602_vm2, %v35143_v42 }
 0xa2d   : > { %28154 = vmatprep.mubr.msk.f32.mxu1 %vm602_vm2, %v35147_v41 }
 0xa30   : > { %28155 = vmatmul.mubr.msk.f32.gmra.mrb[48].mxu1 %vm602_vm2, %v35151_v60 }
 0xa31   : > { %28157 = vmatprep.mubr.msk.f32.mxu1 %vm602_vm2, %v35155_v0 }
 0xa34   : > { %28158 = vmatmul.mubr.msk.f32.gmra.mrb[50].mxu1 %vm602_vm2, %v35159_v54 }
 0xa35   : > { %28160 = vmatprep.mubr.msk.f32.mxu1 %vm602_vm2, %v35163_v47 }
 0xa38   : > { %28161 = vmatmul.mubr.msk.f32.gmra.mrb[52].mxu1 %vm602_vm2, %v35167_v21 }
 0xa39   : > { %28163 = vmatprep.mubr.msk.f32.mxu1 %vm602_vm2, %v35171_v22 }
 0xa3c   : > { %28164 = vmatmul.mubr.msk.f32.gmra.mrb[54].mxu1 %vm602_vm2, %v35175_v29 }
 0xa3d   : > { %28166 = vmatprep.mubr.msk.f32.mxu1 %vm602_vm2, %v35179_v6 }
 0xa40   : > { %28167 = vmatmul.mubr.msk.f32.gmra.mrb[56].mxu1 %vm602_vm2, %v35183_v32 }
 0xa41   : > { %28169 = vmatprep.mubr.msk.f32.mxu1 %vm602_vm2, %v35187_v44 }
 0xa44   : > { %28170 = vmatmul.mubr.msk.f32.gmra.mrb[58].mxu1 %vm602_vm2, %v35191_v49 }
 0xa45   : > { %28172 = vmatprep.mubr.msk.f32.mxu1 %vm602_vm2, %v35195_v39 }
 0xa48   : > { %28173 = vmatmul.mubr.msk.f32.gmra.mrb[60].mxu1 %vm602_vm2, %v35199_v56 }
 0xa49   : > { %28175 = vmatprep.mubr.msk.f32.mxu1 %vm602_vm2, %v35400_v16 }
 0xa4c   : > { %28176 = vmatmul.mubr.msk.f32.gmra.mrb[62].mxu1 %vm602_vm2, %v35404_v14 }
 0xa4d   : > { %28180 = vmatprep.mubr.msk.f32.mxu1 %vm602_vm2, %v34787_v33  ;;  %v39171_v33 = vld [vmem:[#allocation25_spill] sm:$0xff] }
 0xa50   : > { %28181 = vmatmul.mubr.msk.f32.vlgmr.msra.gmra.mrb[32].mxu1 %vm602_vm2, %v34796_v20  ;;  %v39172_v20 = vld [vmem:[#allocation26_spill] sm:$0xff] }
 0xa51   : > { %28229 = vmatpush3.msk.msra.mxu1 %vm907_vm1, %v23847_v55  ;;  %28183 = vmatprep.mubr.msk.f32.mxu1 %vm602_vm2, %v34811_v19  ;;  %v35473_v19 = vld [vmem:[#allocation2 + $0x208] sm:$0xff] }
 0xa52   : > { %28278 = vmatprep.subr.msk.mxu1 %vm907_vm1, %v23881_v18  ;;  %v39180_v55 = vld [vmem:[#allocation34_spill] sm:$0xff] }
 0xa54   : > { %28184 = vmatmul.mubr.msk.f32.gmra.mrb[34].mxu1 %vm602_vm2, %v34820_v45  ;;  %v35477_v45 = vld [vmem:[#allocation2 + $0x210] sm:$0xff] }
 0xa55   : > { %28186 = vmatprep.mubr.msk.f32.mxu1 %vm602_vm2, %v34832_v59  ;;  %v39173_v59 = vld [vmem:[#allocation27_spill] sm:$0xff] }
 0xa58   : > { %28187 = vmatmul.mubr.msk.f32.gmra.mrb[36].mxu1 %vm602_vm2, %v34842_v5  ;;  %v23915_v5 = vld [vmem:[%s38343_s7 + $0x1c] sm:$0xf] }
 0xa59   : > { %28189 = vmatprep.mubr.msk.f32.mxu1 %vm602_vm2, %v34854_v34  ;;  %v39174_v34 = vld [vmem:[#allocation28_spill] sm:$0xff] }
 0xa5c   : > { %28190 = vmatmul.mubr.msk.f32.gmra.mrb[38].mxu1 %vm602_vm2, %v34864_v15  ;;  %v39175_v15 = vld [vmem:[#allocation29_spill] sm:$0xff] }
 0xa5d   : > { %28192 = vmatprep.mubr.msk.f32.mxu1 %vm602_vm2, %v34876_v40  ;;  %v39176_v40 = vld [vmem:[#allocation30_spill] sm:$0xff] }
 0xa60   : > { %28193 = vmatmul.mubr.msk.f32.gmra.mrb[40].mxu1 %vm602_vm2, %v34886_v53  ;;  %v39177_v53 = vld [vmem:[#allocation31_spill] sm:$0xff] }
 0xa61   : > { %28195 = vmatprep.mubr.msk.f32.mxu1 %vm602_vm2, %v34898_v48  ;;  %v39178_v48 = vld [vmem:[#allocation32_spill] sm:$0xff] }
 0xa64   : > { %28196 = vmatmul.mubr.msk.f32.gmra.mrb[42].mxu1 %vm602_vm2, %v34908_v30  ;;  %v39179_v30 = vld [vmem:[#allocation33_spill] sm:$0xff] }
 0xa65   : > { %28198 = vmatprep.mubr.msk.f32.mxu1 %vm602_vm2, %v34919_v43 }
 0xa68   : > { %28199 = vmatmul.mubr.msk.f32.gmra.mrb[44].mxu1 %vm602_vm2, %v34928_v37 }
 0xa69   : > { %28201 = vmatprep.mubr.msk.f32.mxu1 %vm602_vm2, %v34939_v35 }
 0xa6c   : > { %28202 = vmatmul.mubr.msk.f32.gmra.mrb[46].mxu1 %vm602_vm2, %v34948_v62 }
 0xa6d   : > { %28204 = vmatprep.mubr.msk.f32.mxu1 %vm602_vm2, %v34959_v46 }
 0xa70   : > { %28205 = vmatmul.mubr.msk.f32.gmra.mrb[48].mxu1 %vm602_vm2, %v34968_v31 }
 0xa71   : > { %28207 = vmatprep.mubr.msk.f32.mxu1 %vm602_vm2, %v34979_v7 }
 0xa74   : > { %28208 = vmatmul.mubr.msk.f32.gmra.mrb[50].mxu1 %vm602_vm2, %v34988_v11 }
 0xa75   : > { %28210 = vmatprep.mubr.msk.f32.mxu1 %vm602_vm2, %v34999_v50 }
 0xa78   : > { %28211 = vmatmul.mubr.msk.f32.gmra.mrb[52].mxu1 %vm602_vm2, %v35008_v63 }
 0xa79   : > { %28213 = vmatprep.mubr.msk.f32.mxu1 %vm602_vm2, %v35019_v8 }
 0xa7c   : > { %28214 = vmatmul.mubr.msk.f32.gmra.mrb[54].mxu1 %vm602_vm2, %v35028_v9 }
 0xa7d   : > { %28216 = vmatprep.mubr.msk.f32.mxu1 %vm602_vm2, %v35039_v17 }
 0xa80   : > { %28217 = vmatmul.mubr.msk.f32.gmra.mrb[56].mxu1 %vm602_vm2, %v35048_v26 }
 0xa81   : > { %28219 = vmatprep.mubr.msk.f32.mxu1 %vm602_vm2, %v35055_v2 }
 0xa84   : > { %28220 = vmatmul.mubr.msk.f32.gmra.mrb[58].mxu1 %vm602_vm2, %v35060_v28 }
 0xa85   : > { %28222 = vmatprep.mubr.msk.f32.mxu1 %vm602_vm2, %v39171_v33 }
 0xa88   : > { %28223 = vmatmul.mubr.msk.f32.gmra.mrb[60].mxu1 %vm602_vm2, %v39172_v20 }
 0xa89   : > { %28225 = vmatprep.mubr.msk.f32.mxu1 %vm602_vm2, %v35473_v19 }
 0xa8c   : > { %28226 = vmatmul.mubr.msk.f32.gmra.mrb[62].mxu1 %vm602_vm2, %v35477_v45 }
 0xa8d   : > { %28230 = vmatprep.mubr.msk.f32.mxu1 %vm602_vm2, %v39173_v59  ;;  %v39182_v59 = vld [vmem:[#allocation36_spill] sm:$0xff] }
 0xa90   : > { %28231 = vmatmul.mubr.msk.f32.vlgmr.msra.gmra.mrb[32].mxu1 %vm602_vm2, %v39174_v34  ;;  %v39183_v34 = vld [vmem:[#allocation37_spill] sm:$0xff] }
 0xa91   : > { %28279 = vmatpush3.msk.msra.mxu1 %vm907_vm1, %v23881_v18  ;;  %28233 = vmatprep.mubr.msk.f32.mxu1 %vm602_vm2, %v39175_v15  ;;  %v39181_v18 = vld [vmem:[#allocation35_spill] sm:$0xff] }
 0xa92   : > { %28328 = vmatprep.subr.msk.mxu1 %vm907_vm1, %v23915_v5 }
 0xa94   : > { %28234 = vmatmul.mubr.msk.f32.gmra.mrb[34].mxu1 %vm602_vm2, %v39176_v40  ;;  %v39184_v40 = vld [vmem:[#allocation38_spill] sm:$0xff] }
 0xa95   : > { %28236 = vmatprep.mubr.msk.f32.mxu1 %vm602_vm2, %v39177_v53  ;;  %v39185_v53 = vld [vmem:[#allocation39_spill] sm:$0xff] }
 0xa98   : > { %28237 = vmatmul.mubr.msk.f32.gmra.mrb[36].mxu1 %vm602_vm2, %v39178_v48  ;;  %v39186_v48 = vld [vmem:[#allocation40_spill] sm:$0xff] }
 0xa99   : > { %28239 = vmatprep.mubr.msk.f32.mxu1 %vm602_vm2, %v39179_v30  ;;  %v39187_v30 = vld [vmem:[#allocation41_spill] sm:$0xff] }
 0xa9c   : > { %28240 = vmatmul.mubr.msk.f32.gmra.mrb[38].mxu1 %vm602_vm2, %v39180_v55  ;;  %v39188_v55 = vld [vmem:[#allocation42_spill] sm:$0xff] }
 0xa9d   : > { %28242 = vmatprep.mubr.msk.f32.mxu1 %vm602_vm2, %v39181_v18  ;;  %v39189_v18 = vld [vmem:[#allocation43_spill] sm:$0xff] }
 0xaa0   : > { %28243 = vmatmul.mubr.msk.f32.gmra.mrb[40].mxu1 %vm602_vm2, %v39182_v59  ;;  %v39190_v59 = vld [vmem:[#allocation44_spill] sm:$0xff] }
 0xaa1   : > { %28245 = vmatprep.mubr.msk.f32.mxu1 %vm602_vm2, %v39183_v34  ;;  %v39191_v34 = vld [vmem:[#allocation45_spill] sm:$0xff] }
 0xaa4   : > { %28246 = vmatmul.mubr.msk.f32.gmra.mrb[42].mxu1 %vm602_vm2, %v39184_v40  ;;  %v39192_v40 = vld [vmem:[#allocation49_spill] sm:$0xff] }
 0xaa5   : > { %28248 = vmatprep.mubr.msk.f32.mxu1 %vm602_vm2, %v39185_v53  ;;  %v39193_v53 = vld [vmem:[#allocation16_spill] sm:$0xff] }
 0xaa8   : > { %28249 = vmatmul.mubr.msk.f32.gmra.mrb[44].mxu1 %vm602_vm2, %v39186_v48  ;;  %v39194_v48 = vld [vmem:[#allocation71_spill] sm:$0xff] }
 0xaa9   : > { %28251 = vmatprep.mubr.msk.f32.mxu1 %vm602_vm2, %v39187_v30  ;;  %v39195_v30 = vld [vmem:[#allocation63_spill] sm:$0xff] }
 0xaac   : > { %28252 = vmatmul.mubr.msk.f32.gmra.mrb[46].mxu1 %vm602_vm2, %v39188_v55  ;;  %v39196_v55 = vld [vmem:[#allocation68_spill] sm:$0xff] }
 0xaad   : > { %28254 = vmatprep.mubr.msk.f32.mxu1 %vm602_vm2, %v39189_v18  ;;  %v39197_v18 = vld [vmem:[#allocation75_spill] sm:$0xff] }
 0xab0   : > { %28255 = vmatmul.mubr.msk.f32.gmra.mrb[48].mxu1 %vm602_vm2, %v39190_v59 }
 0xab1   : > { %28257 = vmatprep.mubr.msk.f32.mxu1 %vm602_vm2, %v39191_v34  ;;  %v39198_v34 = vld [vmem:[#allocation76_spill] sm:$0xff] }
 0xab4   : > { %28258 = vmatmul.mubr.msk.f32.gmra.mrb[50].mxu1 %vm602_vm2, %v39192_v40 }
 0xab5   : > { %28260 = vmatprep.mubr.msk.f32.mxu1 %vm602_vm2, %v39193_v53 }
 0xab8   : > { %28261 = vmatmul.mubr.msk.f32.gmra.mrb[52].mxu1 %vm602_vm2, %v39194_v48 }
 0xab9   : > { %28263 = vmatprep.mubr.msk.f32.mxu1 %vm602_vm2, %v39195_v30  ;;  %v35546_v30 = vld [vmem:[#allocation2 + $0x209] sm:$0xff] }
 0xabc   : > { %28264 = vmatmul.mubr.msk.f32.gmra.mrb[54].mxu1 %vm602_vm2, %v39196_v55 }
 0xabd   : > { %28266 = vmatprep.mubr.msk.f32.mxu1 %vm602_vm2, %v39197_v18  ;;  %v35550_v18 = vld [vmem:[#allocation2 + $0x211] sm:$0xff] }
 0xac0   : > { %28267 = vmatmul.mubr.msk.f32.gmra.mrb[56].mxu1 %vm602_vm2, %v35314_v52 }
 0xac1   : > { %28269 = vmatprep.mubr.msk.f32.mxu1 %vm602_vm2, %v39198_v34 }
 0xac4   : > { %28270 = vmatmul.mubr.msk.f32.gmra.mrb[58].mxu1 %vm602_vm2, %v35322_v38 }
 0xac5   : > { %28272 = vmatprep.mubr.msk.f32.mxu1 %vm602_vm2, %v35326_v13  ;;  %v23949_v13 = vld [vmem:[%s38343_s7 + $0x20] sm:$0xf] }
 0xac8   : > { %28273 = vmatmul.mubr.msk.f32.gmra.mrb[60].mxu1 %vm602_vm2, %v35330_v23 }
 0xac9   : > { %28275 = vmatprep.mubr.msk.f32.mxu1 %vm602_vm2, %v35546_v30 }
 0xacc   : > { %28276 = vmatmul.mubr.msk.f32.gmra.mrb[62].mxu1 %vm602_vm2, %v35550_v18 }
 0xacd   : > { %28280 = vmatprep.mubr.msk.f32.mxu1 %vm602_vm2, %v35091_v4  ;;  %v15162_v4 = vld [vmem:[%s38345_s9] sm:$0xff] }
 0xad0   : > { %28281 = vmatmul.mubr.msk.f32.vlgmr.msra.gmra.mrb[32].mxu1 %vm602_vm2, %v35095_v27  ;;  %v15163_v27 = vld [vmem:[%s38345_s9 + $0x8] sm:$0xff] }
 0xad1   : > { %28329 = vmatpush3.msk.msra.mxu1 %vm907_vm1, %v23915_v5  ;;  %28283 = vmatprep.mubr.msk.f32.mxu1 %vm602_vm2, %v35099_v12  ;;  %v29588_v12 = vpack.c.bf16 %v15163_v27, %v15162_v4 }
 0xad2   : > { %28378 = vmatprep.subr.msk.mxu1 %vm907_vm1, %v23949_v13 }
 0xad4   : > { %28284 = vmatmul.mubr.msk.f32.gmra.mrb[34].mxu1 %vm602_vm2, %v35103_v61  ;;  %v15164_v61 = vld [vmem:[%s38345_s9 + $0x10] sm:$0xff] }
 0xad5   : > { %28286 = vmatprep.mubr.msk.f32.mxu1 %vm602_vm2, %v35107_v3  ;;  %v39204_v3 = vld [vmem:[#allocation35_spill] sm:$0xff] }
 0xad8   : > { %28287 = vmatmul.mubr.msk.f32.gmra.mrb[36].mxu1 %vm602_vm2, %v35111_v57  ;;  %v39211_v57 = vld [vmem:[#allocation42_spill] sm:$0xff] }
 0xad9   : > { %28289 = vmatprep.mubr.msk.f32.mxu1 %vm602_vm2, %v35115_v51  ;;  %v39208_v51 = vld [vmem:[#allocation39_spill] sm:$0xff] }
 0xadc   : > { %28290 = vmatmul.mubr.msk.f32.gmra.mrb[38].mxu1 %vm602_vm2, %v35119_v24  ;;  %v39213_v24 = vld [vmem:[#allocation45_spill] sm:$0xff] }
 0xadd   : > { %28292 = vmatprep.mubr.msk.f32.mxu1 %vm602_vm2, %v35123_v25  ;;  %v39202_v25 = vld [vmem:[#allocation33_spill] sm:$0xff] }
 0xae0   : > { %28293 = vmatmul.mubr.msk.f32.gmra.mrb[40].mxu1 %vm602_vm2, %v35127_v1  ;;  %v39200_v1 = vld [vmem:[#allocation31_spill] sm:$0xff] }
 0xae1   : > { %28295 = vmatprep.mubr.msk.f32.mxu1 %vm602_vm2, %v35131_v36  ;;  %v14256_v36 = vld [vmem:[#allocation2 + $0xd0] sm:$0xff] }
 0xae4   : > { %28296 = vmatmul.mubr.msk.f32.gmra.mrb[42].mxu1 %vm602_vm2, %v35135_v10  ;;  %v14255_v10 = vld [vmem:[#allocation2 + $0xc8] sm:$0xff] }
 0xae5   : > { %28298 = vmatprep.mubr.msk.f32.mxu1 %vm602_vm2, %v35139_v58  ;;  %v14254_v58 = vld [vmem:[#allocation2 + $0xb0] sm:$0xff] }
 0xae8   : > { %28299 = vmatmul.mubr.msk.f32.gmra.mrb[44].mxu1 %vm602_vm2, %v35143_v42  ;;  %v14253_v42 = vld [vmem:[#allocation2 + $0xa8] sm:$0xff] }
 0xae9   : > { %28301 = vmatprep.mubr.msk.f32.mxu1 %vm602_vm2, %v35147_v41  ;;  %v14252_v41 = vld [vmem:[#allocation2 + $0x90] sm:$0xff] }
 0xaec   : > { %28302 = vmatmul.mubr.msk.f32.gmra.mrb[46].mxu1 %vm602_vm2, %v35151_v60  ;;  %v14251_v60 = vld [vmem:[#allocation2 + $0x88] sm:$0xff] }
 0xaed   : > { %28304 = vmatprep.mubr.msk.f32.mxu1 %vm602_vm2, %v35155_v0  ;;  %v14250_v0 = vld [vmem:[#allocation2 + $0x70] sm:$0xff] }
 0xaf0   : > { %28305 = vmatmul.mubr.msk.f32.gmra.mrb[48].mxu1 %vm602_vm2, %v35159_v54  ;;  %v14249_v54 = vld [vmem:[#allocation2 + $0x68] sm:$0xff] }
 0xaf1   : > { %28307 = vmatprep.mubr.msk.f32.mxu1 %vm602_vm2, %v35163_v47  ;;  %v14248_v47 = vld [vmem:[#allocation2 + $0x50] sm:$0xff] }
 0xaf4   : > { %28308 = vmatmul.mubr.msk.f32.gmra.mrb[50].mxu1 %vm602_vm2, %v35167_v21 }
 0xaf5   : > { %28310 = vmatprep.mubr.msk.f32.mxu1 %vm602_vm2, %v35171_v22  ;;  %v23987_v22 = vld [vmem:[%s38345_s9 + $0x38] sm:$0xff] }
 0xaf8   : > { %28311 = vmatmul.mubr.msk.f32.gmra.mrb[52].mxu1 %vm602_vm2, %v35175_v29  ;;  %v13887_v29 = vld [vmem:[#allocation2 + $0x227] sm:$0xff] }
 0xaf9   : > { %28313 = vmatprep.mubr.msk.f32.mxu1 %vm602_vm2, %v35179_v6 }
 0xafc   : > { %28314 = vmatmul.mubr.msk.f32.gmra.mrb[54].mxu1 %vm602_vm2, %v35183_v32  ;;  %v13888_v32 = vld [vmem:[#allocation2 + $0x22f] sm:$0xff] }
 0xafd   : > { %28316 = vmatprep.mubr.msk.f32.mxu1 %vm602_vm2, %v35187_v44  ;;  %v14247_v44 = vld [vmem:[#allocation2 + $0x48] sm:$0xff] }
 0xb00   : > { %28317 = vmatmul.mubr.msk.f32.gmra.mrb[56].mxu1 %vm602_vm2, %v35191_v49  ;;  %v23986_v49 = vld [vmem:[%s38345_s9 + $0x30] sm:$0xff] }
 0xb01   : > { %28319 = vmatprep.mubr.msk.f32.mxu1 %vm602_vm2, %v35195_v39  ;;  %v23984_v39 = vld [vmem:[%s38345_s9 + $0x20] sm:$0xff]  ;;  %v29584_v21 = vpack.c.bf16 %v23987_v22, %v23986_v49 }
 0xb04   : > { %28320 = vmatmul.mubr.msk.f32.gmra.mrb[58].mxu1 %vm602_vm2, %v35199_v56  ;;  %v23985_v56 = vld [vmem:[%s38345_s9 + $0x28] sm:$0xff] }
 0xb05   : > { %28322 = vmatprep.mubr.msk.f32.mxu1 %vm602_vm2, %v35400_v16  ;;  %v29580_v6 = vpack.c.bf16 %v23985_v56, %v23984_v39  ;;  %v24052_v16 = vld [vmem:[%s38345_s9 + $0x40] sm:$0xff] }
 0xb07   : > { %29581 = vmatprep.subr.bf16.mxu0 %v29580_v6 }
 0xb08   : > { %28323 = vmatmul.mubr.msk.f32.gmra.mrb[60].mxu1 %vm602_vm2, %v35404_v14  ;;  %29583 = vmatpush3.bf16.msra.mxu0 %v29580_v6  ;;  %v24053_v14 = vld [vmem:[%s38345_s9 + $0x48] sm:$0xff] }
 0xb09   : > { %28325 = vmatprep.mubr.msk.f32.mxu1 %vm602_vm2, %v13887_v29  ;;  %29585 = vmatprep.subr.bf16.mxu0 %v29584_v21 }
 0xb0c   : > { %28326 = vmatmul.mubr.msk.f32.gmra.mrb[62].mxu1 %vm602_vm2, %v13888_v32  ;;  %29587 = vmatpush3.bf16.msra.mxu0 %v29584_v21 }
 0xb0d   : > { %28330 = vmatprep.mubr.msk.f32.mxu1 %vm602_vm2, %v14247_v44  ;;  %29589 = vmatprep.subr.bf16.mxu0 %v29588_v12 }
 0xb10   : > { %28331 = vmatmul.mubr.msk.f32.vlgmr.msra.gmra.mrb[32].mxu1 %vm602_vm2, %v14248_v47 }
 0xb11   : > { %28379 = vmatpush3.msk.msra.mxu1 %vm907_vm1, %v23949_v13  ;;  %28333 = vmatprep.mubr.msk.f32.mxu1 %vm602_vm2, %v14249_v54  ;;  %v15165_v13 = vld [vmem:[%s38345_s9 + $0x18] sm:$0xff] }
 0xb14   : > { %28334 = vmatmul.mubr.msk.f32.gmra.mrb[34].mxu1 %vm602_vm2, %v14250_v0 }
 0xb15   : > { %28336 = vmatprep.mubr.msk.f32.mxu1 %vm602_vm2, %v14251_v60 }
 0xb18   : > { %28337 = vmatmul.mubr.msk.f32.gmra.mrb[36].mxu1 %vm602_vm2, %v14252_v41 }
 0xb19   : > { %28339 = vmatprep.mubr.msk.f32.mxu1 %vm602_vm2, %v14253_v42 }
 0xb1c   : > { %28340 = vmatmul.mubr.msk.f32.gmra.mrb[38].mxu1 %vm602_vm2, %v14254_v58 }
 0xb1d   : > { %28342 = vmatprep.mubr.msk.f32.mxu1 %vm602_vm2, %v14255_v10 }
 0xb20   : > { %28343 = vmatmul.mubr.msk.f32.gmra.mrb[40].mxu1 %vm602_vm2, %v14256_v36 }
 0xb21   : > { %28345 = vmatprep.mubr.msk.f32.mxu1 %vm602_vm2, %v34919_v43  ;;  %v14277_v43 = vld [vmem:[#allocation2 + $0x228] sm:$0xff] }
 0xb24   : > { %28346 = vmatmul.mubr.msk.f32.gmra.mrb[42].mxu1 %vm602_vm2, %v34928_v37  ;;  %v14278_v37 = vld [vmem:[#allocation2 + $0x230] sm:$0xff] }
 0xb25   : > { %28348 = vmatprep.mubr.msk.f32.mxu1 %vm602_vm2, %v34939_v35  ;;  %v39199_v35 = vld [vmem:[#allocation30_spill] sm:$0xff] }
 0xb28   : > { %28349 = vmatmul.mubr.msk.f32.gmra.mrb[44].mxu1 %vm602_vm2, %v34948_v62  ;;  %v39201_v62 = vld [vmem:[#allocation32_spill] sm:$0xff] }
 0xb29   : > { %28351 = vmatprep.mubr.msk.f32.mxu1 %vm602_vm2, %v34959_v46  ;;  %v39203_v46 = vld [vmem:[#allocation34_spill] sm:$0xff] }
 0xb2c   : > { %28352 = vmatmul.mubr.msk.f32.gmra.mrb[46].mxu1 %vm602_vm2, %v34968_v31  ;;  %v39205_v31 = vld [vmem:[#allocation36_spill] sm:$0xff] }
 0xb2d   : > { %28354 = vmatprep.mubr.msk.f32.mxu1 %vm602_vm2, %v34979_v7  ;;  %v39207_v7 = vld [vmem:[#allocation38_spill] sm:$0xff] }
 0xb30   : > { %28355 = vmatmul.mubr.msk.f32.gmra.mrb[48].mxu1 %vm602_vm2, %v34988_v11  ;;  %v39209_v11 = vld [vmem:[#allocation40_spill] sm:$0xff] }
 0xb31   : > { %28357 = vmatprep.mubr.msk.f32.mxu1 %vm602_vm2, %v34999_v50  ;;  %v39210_v50 = vld [vmem:[#allocation41_spill] sm:$0xff] }
 0xb34   : > { %28358 = vmatmul.mubr.msk.f32.gmra.mrb[50].mxu1 %vm602_vm2, %v35008_v63  ;;  %v39212_v63 = vld [vmem:[#allocation43_spill] sm:$0xff] }
 0xb35   : > { %28360 = vmatprep.mubr.msk.f32.mxu1 %vm602_vm2, %v35019_v8  ;;  %v39214_v8 = vld [vmem:[#allocation63_spill] sm:$0xff] }
 0xb38   : > { %28361 = vmatmul.mubr.msk.f32.gmra.mrb[52].mxu1 %vm602_vm2, %v35028_v9  ;;  %v39215_v9 = vld [vmem:[#allocation75_spill] sm:$0xff] }
 0xb39   : > { %28363 = vmatprep.mubr.msk.f32.mxu1 %vm602_vm2, %v35039_v17  ;;  %v39206_v17 = vld [vmem:[#allocation37_spill] sm:$0xff] }
 0xb3c   : > { %28364 = vmatmul.mubr.msk.f32.gmra.mrb[54].mxu1 %vm602_vm2, %v35048_v26  ;;  %v39216_v26 = vld [vmem:[#allocation77_spill] sm:$0xff] }
 0xb3d   : > { %28366 = vmatprep.mubr.msk.f32.mxu1 %vm602_vm2, %v35055_v2  ;;  %v14667_v2 = vld [vmem:[#allocation2 + $0x229] sm:$0xff] }
 0xb40   : > { %28367 = vmatmul.mubr.msk.f32.gmra.mrb[56].mxu1 %vm602_vm2, %v35060_v28  ;;  %v14668_v28 = vld [vmem:[#allocation2 + $0x231] sm:$0xff] }
 0xb41   : > { %28369 = vmatprep.mubr.msk.f32.mxu1 %vm602_vm2, %v39171_v33  ;;  %v35768_v33 = vpack.c.bf16 %v24053_v14, %v24052_v16 }
 0xb44   : > { %28370 = vmatmul.mubr.msk.f32.gmra.mrb[58].mxu1 %vm602_vm2, %v39172_v20  ;;  %v35774_v20 = vld [vmem:[%s38344_s8] ss:$0 sm:$0xff] }
 0xb45   : > { %28372 = vmatprep.mubr.msk.f32.mxu1 %vm602_vm2, %v35473_v19 }
 0xb48   : > { %28373 = vmatmul.mubr.msk.f32.gmra.mrb[60].mxu1 %vm602_vm2, %v35477_v45 }
 0xb49   : > { %28375 = vmatprep.mubr.msk.f32.mxu1 %vm602_vm2, %v14277_v43 }
 0xb4c   : > { %28376 = vmatmul.mubr.msk.f32.gmra.mrb[62].mxu1 %vm602_vm2, %v14278_v37 }
 0xb4d   : > { %28380 = vmatprep.mubr.msk.f32.mxu1 %vm602_vm2, %v39175_v15 }
 0xb50   : > { %28381 = vmatmul.mubr.msk.f32.vlgmr.msra.gmra.mrb[32].mxu1 %vm602_vm2, %v39199_v35 }
 0xb51   : > { %28383 = vmatprep.mubr.msk.f32.mxu1 %vm602_vm2, %v39200_v1 }
 0xb54   : > { %28384 = vmatmul.mubr.msk.f32.gmra.mrb[34].mxu1 %vm602_vm2, %v39201_v62 }
 0xb55   : > { %28386 = vmatprep.mubr.msk.f32.mxu1 %vm602_vm2, %v39202_v25 }
 0xb58   : > { %28387 = vmatmul.mubr.msk.f32.gmra.mrb[36].mxu1 %vm602_vm2, %v39203_v46 }
 0xb59   : > { %28389 = vmatprep.mubr.msk.f32.mxu1 %vm602_vm2, %v39204_v3 }
 0xb5c   : > { %28390 = vmatmul.mubr.msk.f32.gmra.mrb[38].mxu1 %vm602_vm2, %v39205_v31 }
 0xb5d   : > { %28392 = vmatprep.mubr.msk.f32.mxu1 %vm602_vm2, %v39206_v17 }
 0xb60   : > { %28393 = vmatmul.mubr.msk.f32.gmra.mrb[40].mxu1 %vm602_vm2, %v39207_v7 }
 0xb61   : > { %28395 = vmatprep.mubr.msk.f32.mxu1 %vm602_vm2, %v39208_v51 }
 0xb64   : > { %28396 = vmatmul.mubr.msk.f32.gmra.mrb[42].mxu1 %vm602_vm2, %v39209_v11 }
 0xb65   : > { %28398 = vmatprep.mubr.msk.f32.mxu1 %vm602_vm2, %v39210_v50 }
 0xb68   : > { %28399 = vmatmul.mubr.msk.f32.gmra.mrb[44].mxu1 %vm602_vm2, %v39211_v57 }
 0xb69   : > { %28401 = vmatprep.mubr.msk.f32.mxu1 %vm602_vm2, %v39212_v63 }
 0xb6c   : > { %28402 = vmatmul.mubr.msk.f32.gmra.mrb[46].mxu1 %vm602_vm2, %v39190_v59 }
 0xb6d   : > { %28404 = vmatprep.mubr.msk.f32.mxu1 %vm602_vm2, %v39213_v24 }
 0xb70   : > { %28405 = vmatmul.mubr.msk.f32.gmra.mrb[48].mxu1 %vm602_vm2, %v39192_v40 }
 0xb71   : > { %28407 = vmatprep.mubr.msk.f32.mxu1 %vm602_vm2, %v39193_v53 }
 0xb74   : > { %28408 = vmatmul.mubr.msk.f32.gmra.mrb[50].mxu1 %vm602_vm2, %v39194_v48 }
 0xb75   : > { %28410 = vmatprep.mubr.msk.f32.mxu1 %vm602_vm2, %v39214_v8 }
 0xb78   : > { %28411 = vmatmul.mubr.msk.f32.gmra.mrb[52].mxu1 %vm602_vm2, %v39196_v55 }
 0xb79   : > { %28413 = vmatprep.mubr.msk.f32.mxu1 %vm602_vm2, %v39215_v9 }
 0xb7c   : > { %28414 = vmatmul.mubr.msk.f32.gmra.mrb[54].mxu1 %vm602_vm2, %v35314_v52  ;;  %v15166_v52 = vld [vmem:[#allocation2 + $0x8] sm:$0xff] }
 0xb7d   : > { %28416 = vmatprep.mubr.msk.f32.mxu1 %vm602_vm2, %v39198_v34  ;;  %28436 = vmatprep.mubr.msk.f32.mxu0 %vm496_vm0, %v15166_v52 }
 0xb80   : > { %28417 = vmatmul.mubr.msk.f32.gmra.mrb[56].mxu1 %vm602_vm2, %v35322_v38  ;;  %v15167_v38 = vld [vmem:[#allocation2 + $0x10] sm:$0xff] }
 0xb81   : > { %28419 = vmatprep.mubr.msk.f32.mxu1 %vm602_vm2, %v39216_v26  ;;  %28437 = vmatmul.mubr.msk.f32.vlgmr.msra.gmra.mrb[64].mxu0 %vm496_vm0, %v15167_v38 }
 0xb82   : > { %29591 = vmatpush3.bf16.msra.mxu0 %v29588_v12 }
 0xb84   : > { %28420 = vmatmul.mubr.msk.f32.gmra.mrb[58].mxu1 %vm602_vm2, %v35330_v23  ;;  %v29592_v23 = vpack.c.bf16 %v15165_v13, %v15164_v61 }
 0xb85   : > { %28422 = vmatprep.mubr.msk.f32.mxu1 %vm602_vm2, %v35546_v30 }
 0xb86   : > { %29593 = vmatprep.subr.bf16.mxu0 %v29592_v23 }
 0xb87   : > { %29595 = vmatpush3.bf16.msra.mxu0 %v29592_v23 }
 0xb88   : > { %28423 = vmatmul.mubr.msk.f32.gmra.mrb[60].mxu1 %vm602_vm2, %v35550_v18  ;;  %29597 = vmatprep.subr.bf16.mxu0 %v35768_v33 }
 0xb89   : > { %28425 = vmatprep.mubr.msk.f32.mxu1 %vm602_vm2, %v14667_v2 }
 0xb8c   : > { %28426 = vmatmul.mubr.msk.f32.gmra.mrb[62].mxu1 %vm602_vm2, %v14668_v28 }
 0xc23   : > { %v28382_v19 = vpop.f32.mrb[32].mxu1 }
 0xc24   : > { %v15035_v45 = vadd.f32 %v28382_v19, %v35774_v20  ;;  %v14836_v5 = vpop.f32.mrb[33].mxu1 }
 0xc25   : > { %v15034_v15 = vadd.f32 %v35774_v20, %v14836_v5 }
 0xc26   : > { %v15067_v40 = vmax.f32 %v15035_v45, 0.0 }
 0xc27   : > { %v15066_v53 = vmax.f32 %v15034_v15, 0.0  ;;  %v28385_v48 = vpop.f32.mrb[34].mxu1 }
 0xc28   : > { %15099 = vst.msk [vmem:[#allocation2 + $0x30] sm:$0xff] %vm496_vm0, %v15067_v40  ;;  %v15037_v30 = vadd.f32 %v28385_v48, %v35774_v20  ;;  %v14846_v55 = vpop.f32.mrb[35].mxu1 }
 0xc29   : > { %15098 = vst.msk [vmem:[#allocation2 + $0x28] sm:$0xff] %vm496_vm0, %v15066_v53  ;;  %v15036_v18 = vadd.f32 %v35774_v20, %v14846_v55 }
 0xc2a   : > { %v15069_v59 = vmax.f32 %v15037_v30, 0.0 }
 0xc2b   : > { %v15068_v34 = vmax.f32 %v15036_v18, 0.0  ;;  %v28388_v29 = vpop.f32.mrb[36].mxu1 }
 0xc2c   : > { %15101 = vst.msk [vmem:[#allocation2 + $0x50] sm:$0xff] %vm496_vm0, %v15069_v59  ;;  %v15039_v32 = vadd.f32 %v28388_v29, %v35774_v20  ;;  %v14856_v44 = vpop.f32.mrb[37].mxu1 }
 0xc2d   : > { %15100 = vst.msk [vmem:[#allocation2 + $0x48] sm:$0xff] %vm496_vm0, %v15068_v34  ;;  %v15038_v39 = vadd.f32 %v35774_v20, %v14856_v44 }
 0xc2e   : > { %v15071_v56 = vmax.f32 %v15039_v32, 0.0 }
 0xc2f   : > { %v15070_v49 = vmax.f32 %v15038_v39, 0.0  ;;  %v28391_v6 = vpop.f32.mrb[38].mxu1  ;;  %v35794_v0 = vld [vmem:[#allocation2 + $0x30] sm:$0xff] }
 0xc30   : > { %15103 = vst.msk [vmem:[#allocation2 + $0x70] sm:$0xff] %vm496_vm0, %v15071_v56  ;;  %v15041_v22 = vadd.f32 %v28391_v6, %v35774_v20  ;;  %v14866_v21 = vpop.f32.mrb[39].mxu1  ;;  %v35788_v47 = vld [vmem:[#allocation2 + $0x28] sm:$0xff] }
 0xc31   : > { %15102 = vst.msk [vmem:[#allocation2 + $0x68] sm:$0xff] %vm496_vm0, %v15070_v49  ;;  %v15040_v54 = vadd.f32 %v35774_v20, %v14866_v21  ;;  %28439 = vmatprep.mubr.msk.f32.mxu0 %vm496_vm0, %v35788_v47 }
 0xc32   : > { %v15073_v60 = vmax.f32 %v15041_v22, 0.0  ;;  %28440 = vmatmul.mubr.msk.f32.gmra.mrb[66].mxu0 %vm496_vm0, %v35794_v0 }
 0xc33   : > { %v15072_v41 = vmax.f32 %v15040_v54, 0.0  ;;  %v28394_v42 = vpop.f32.mrb[40].mxu1  ;;  %v35806_v37 = vld [vmem:[#allocation2 + $0x50] sm:$0xff] }
 0xc34   : > { %15105 = vst.msk [vmem:[#allocation2 + $0x90] sm:$0xff] %vm496_vm0, %v15073_v60  ;;  %v15043_v58 = vadd.f32 %v28394_v42, %v35774_v20  ;;  %v14876_v10 = vpop.f32.mrb[41].mxu1  ;;  %v35800_v36 = vld [vmem:[#allocation2 + $0x48] sm:$0xff] }
 0xc35   : > { %15104 = vst.msk [vmem:[#allocation2 + $0x88] sm:$0xff] %vm496_vm0, %v15072_v41  ;;  %v15042_v43 = vadd.f32 %v35774_v20, %v14876_v10  ;;  %28442 = vmatprep.mubr.msk.f32.mxu0 %vm496_vm0, %v35800_v36 }
 0xc36   : > { %v15075_v35 = vmax.f32 %v15043_v58, 0.0  ;;  %28443 = vmatmul.mubr.msk.f32.gmra.mrb[68].mxu0 %vm496_vm0, %v35806_v37 }
 0xc37   : > { %v15074_v1 = vmax.f32 %v15042_v43, 0.0  ;;  %v28397_v62 = vpop.f32.mrb[42].mxu1  ;;  %v35818_v17 = vld [vmem:[#allocation2 + $0x70] sm:$0xff] }
 0xc38   : > { %15107 = vst.msk [vmem:[#allocation2 + $0xb0] sm:$0xff] %vm496_vm0, %v15075_v35  ;;  %v15045_v25 = vadd.f32 %v28397_v62, %v35774_v20  ;;  %v14886_v46 = vpop.f32.mrb[43].mxu1  ;;  %v35812_v3 = vld [vmem:[#allocation2 + $0x68] sm:$0xff] }
 0xc39   : > { %15106 = vst.msk [vmem:[#allocation2 + $0xa8] sm:$0xff] %vm496_vm0, %v15074_v1  ;;  %v15044_v31 = vadd.f32 %v35774_v20, %v14886_v46  ;;  %28445 = vmatprep.mubr.msk.f32.mxu0 %vm496_vm0, %v35812_v3 }
 0xc3a   : > { %v15077_v7 = vmax.f32 %v15045_v25, 0.0  ;;  %28446 = vmatmul.mubr.msk.f32.gmra.mrb[70].mxu0 %vm496_vm0, %v35818_v17 }
 0xc3b   : > { %v15076_v51 = vmax.f32 %v15044_v31, 0.0  ;;  %v28400_v11 = vpop.f32.mrb[44].mxu1  ;;  %v35830_v8 = vld [vmem:[#allocation2 + $0x90] sm:$0xff] }
 0xc3c   : > { %15109 = vst.msk [vmem:[#allocation2 + $0xd0] sm:$0xff] %vm496_vm0, %v15077_v7  ;;  %v15047_v50 = vadd.f32 %v28400_v11, %v35774_v20  ;;  %v14896_v57 = vpop.f32.mrb[45].mxu1  ;;  %v35824_v63 = vld [vmem:[#allocation2 + $0x88] sm:$0xff] }
 0xc3d   : > { %15108 = vst.msk [vmem:[#allocation2 + $0xc8] sm:$0xff] %vm496_vm0, %v15076_v51  ;;  %v15046_v24 = vadd.f32 %v35774_v20, %v14896_v57  ;;  %28448 = vmatprep.mubr.msk.f32.mxu0 %vm496_vm0, %v35824_v63 }
 0xc3e   : > { %v15079_v9 = vmax.f32 %v15047_v50, 0.0  ;;  %28449 = vmatmul.mubr.msk.f32.gmra.mrb[72].mxu0 %vm496_vm0, %v35830_v8 }
 0xc3f   : > { %v15078_v26 = vmax.f32 %v15046_v24, 0.0  ;;  %v28403_v2 = vpop.f32.mrb[46].mxu1  ;;  %v35842_v27 = vld [vmem:[#allocation2 + $0xb0] sm:$0xff] }
 0xc40   : > { %15111 = vst.msk [vmem:[#allocation2 + $0xf0] sm:$0xff] %vm496_vm0, %v15079_v9  ;;  %v15049_v28 = vadd.f32 %v28403_v2, %v35774_v20  ;;  %v14906_v52 = vpop.f32.mrb[47].mxu1  ;;  %v35836_v38 = vld [vmem:[#allocation2 + $0xa8] sm:$0xff] }
 0xc41   : > { %15110 = vst.msk [vmem:[#allocation2 + $0xe8] sm:$0xff] %vm496_vm0, %v15078_v26  ;;  %v15048_v4 = vadd.f32 %v35774_v20, %v14906_v52  ;;  %28451 = vmatprep.mubr.msk.f32.mxu0 %vm496_vm0, %v35836_v38 }
 0xc42   : > { %v15081_v12 = vmax.f32 %v15049_v28, 0.0  ;;  %28452 = vmatmul.mubr.msk.f32.gmra.mrb[74].mxu0 %vm496_vm0, %v35842_v27 }
 0xc43   : > { %v15080_v61 = vmax.f32 %v15048_v4, 0.0  ;;  %v28406_v13 = vpop.f32.mrb[48].mxu1  ;;  %v35854_v45 = vld [vmem:[#allocation2 + $0xd0] sm:$0xff] }
 0xc44   : > { %15113 = vst.msk [vmem:[#allocation2 + $0x110] sm:$0xff] %vm496_vm0, %v15081_v12  ;;  %v15051_v23 = vadd.f32 %v28406_v13, %v35774_v20  ;;  %v14916_v16 = vpop.f32.mrb[49].mxu1  ;;  %v35848_v14 = vld [vmem:[#allocation2 + $0xc8] sm:$0xff] }
 0xc45   : > { %15112 = vst.msk [vmem:[#allocation2 + $0x108] sm:$0xff] %vm496_vm0, %v15080_v61  ;;  %v15050_v19 = vadd.f32 %v35774_v20, %v14916_v16  ;;  %28454 = vmatprep.mubr.msk.f32.mxu0 %vm496_vm0, %v35848_v14 }
 0xc46   : > { %v15083_v5 = vmax.f32 %v15051_v23, 0.0  ;;  %28455 = vmatmul.mubr.msk.f32.gmra.mrb[76].mxu0 %vm496_vm0, %v35854_v45 }
 0xc47   : > { %v15082_v15 = vmax.f32 %v15050_v19, 0.0  ;;  %v28409_v40 = vpop.f32.mrb[50].mxu1  ;;  %v35866_v18 = vld [vmem:[#allocation2 + $0xf0] sm:$0xff] }
 0xc48   : > { %15115 = vst.msk [vmem:[#allocation2 + $0x130] sm:$0xff] %vm496_vm0, %v15083_v5  ;;  %v15053_v53 = vadd.f32 %v28409_v40, %v35774_v20  ;;  %v14926_v48 = vpop.f32.mrb[51].mxu1  ;;  %v35860_v30 = vld [vmem:[#allocation2 + $0xe8] sm:$0xff] }
 0xc49   : > { %15114 = vst.msk [vmem:[#allocation2 + $0x128] sm:$0xff] %vm496_vm0, %v15082_v15  ;;  %v15052_v55 = vadd.f32 %v35774_v20, %v14926_v48  ;;  %28457 = vmatprep.mubr.msk.f32.mxu0 %vm496_vm0, %v35860_v30 }
 0xc4a   : > { %v15085_v59 = vmax.f32 %v15053_v53, 0.0  ;;  %28458 = vmatmul.mubr.msk.f32.gmra.mrb[78].mxu0 %vm496_vm0, %v35866_v18 }
 0xc4b   : > { %v15084_v34 = vmax.f32 %v15052_v55, 0.0  ;;  %v28412_v29 = vpop.f32.mrb[52].mxu1  ;;  %v35878_v49 = vld [vmem:[#allocation2 + $0x110] sm:$0xff] }
 0xc4c   : > { %15117 = vst.msk [vmem:[#allocation2 + $0x150] sm:$0xff] %vm496_vm0, %v15085_v59  ;;  %v15055_v32 = vadd.f32 %v28412_v29, %v35774_v20  ;;  %v14936_v44 = vpop.f32.mrb[53].mxu1  ;;  %v35872_v39 = vld [vmem:[#allocation2 + $0x108] sm:$0xff] }
 0xc4d   : > { %15116 = vst.msk [vmem:[#allocation2 + $0x148] sm:$0xff] %vm496_vm0, %v15084_v34  ;;  %v15054_v56 = vadd.f32 %v35774_v20, %v14936_v44  ;;  %28460 = vmatprep.mubr.msk.f32.mxu0 %vm496_vm0, %v35872_v39  ;;  %v15130_v44 = vld [vmem:[#allocation2 + $0x7] sm:$0xff] }
 0xc4e   : > { %v15087_v6 = vmax.f32 %v15055_v32, 0.0  ;;  %28461 = vmatmul.mubr.msk.f32.gmra.mrb[80].mxu0 %vm496_vm0, %v35878_v49 }
 0xc4f   : > { %v15086_v22 = vmax.f32 %v15054_v56, 0.0  ;;  %v28415_v21 = vpop.f32.mrb[54].mxu1  ;;  %v35890_v58 = vld [vmem:[#allocation2 + $0x130] sm:$0xff] }
 0xc50   : > { %15119 = vst.msk [vmem:[#allocation2 + $0x170] sm:$0xff] %vm496_vm0, %v15087_v6  ;;  %v15057_v54 = vadd.f32 %v28415_v21, %v35774_v20  ;;  %v14946_v60 = vpop.f32.mrb[55].mxu1  ;;  %v35884_v41 = vld [vmem:[#allocation2 + $0x128] sm:$0xff]  ;;  %v24054_v6 = vld [vmem:[%s38345_s9 + $0x50] sm:$0xff] }
 0xc51   : > { %15118 = vst.msk [vmem:[#allocation2 + $0x168] sm:$0xff] %vm496_vm0, %v15086_v22  ;;  %v15056_v42 = vadd.f32 %v35774_v20, %v14946_v60  ;;  %28463 = vmatprep.mubr.msk.f32.mxu0 %vm496_vm0, %v35884_v41  ;;  %v24055_v22 = vld [vmem:[%s38345_s9 + $0x58] sm:$0xff]  ;;  %v15131_v21 = vld [vmem:[#allocation2 + $0xf] sm:$0xff]  ;;  %v24088_v60 = vld [vmem:[%s38345_s9 + $0x60] sm:$0xff] }
 0xc52   : > { %v15089_v10 = vmax.f32 %v15057_v54, 0.0  ;;  %28464 = vmatmul.mubr.msk.f32.gmra.mrb[82].mxu0 %vm496_vm0, %v35890_v58  ;;  %v29600_v54 = vpack.c.bf16 %v24055_v22, %v24054_v6 }
 0xc53   : > { %v15088_v43 = vmax.f32 %v15056_v42, 0.0  ;;  %v28418_v35 = vpop.f32.mrb[56].mxu1  ;;  %v35902_v31 = vld [vmem:[#allocation2 + $0x150] sm:$0xff]  ;;  %v24089_v42 = vld [vmem:[%s38345_s9 + $0x68] sm:$0xff] }
 0xc54   : > { %15121 = vst.msk [vmem:[#allocation2 + $0x190] sm:$0xff] %vm496_vm0, %v15089_v10  ;;  %v15059_v1 = vadd.f32 %v28418_v35, %v35774_v20  ;;  %v14956_v62 = vpop.f32.mrb[57].mxu1  ;;  %v35896_v25 = vld [vmem:[#allocation2 + $0x148] sm:$0xff] }
 0xc55   : > { %15120 = vst.msk [vmem:[#allocation2 + $0x188] sm:$0xff] %vm496_vm0, %v15088_v43  ;;  %v15058_v46 = vadd.f32 %v35774_v20, %v14956_v62  ;;  %28466 = vmatprep.mubr.msk.f32.mxu0 %vm496_vm0, %v35896_v25  ;;  %v35974_v10 = vld [vmem:[#allocation2 + $0x27] sm:$0xff]  ;;  %v35979_v43 = vpack.c.bf16 %v24089_v42, %v24088_v60  ;;  %v35981_v35 = vld [vmem:[#allocation2 + $0x2f] sm:$0xff]  ;;  %v24091_v42 = vld [vmem:[%s38345_s9 + $0x78] sm:$0xff] }
 0xc56   : > { %v15091_v7 = vmax.f32 %v15059_v1, 0.0  ;;  %28467 = vmatmul.mubr.msk.f32.gmra.mrb[84].mxu0 %vm496_vm0, %v35902_v31  ;;  %v35985_v1 = vld [vmem:[#allocation2 + $0x47] sm:$0xff]  ;;  %v24090_v60 = vld [vmem:[%s38345_s9 + $0x70] sm:$0xff] }
 0xc57   : > { %v15090_v51 = vmax.f32 %v15058_v46, 0.0  ;;  %v28421_v11 = vpop.f32.mrb[58].mxu1  ;;  %v35914_v26 = vld [vmem:[#allocation2 + $0x170] sm:$0xff]  ;;  %v35994_v62 = vld [vmem:[#allocation2 + $0x67] sm:$0xff] }
 0xc58   : > { %15123 = vst.msk [vmem:[#allocation2 + $0x1b0] sm:$0xff] %vm496_vm0, %v15091_v7  ;;  %v15061_v50 = vadd.f32 %v28421_v11, %v35774_v20  ;;  %v14966_v57 = vpop.f32.mrb[59].mxu1  ;;  %v35908_v24 = vld [vmem:[#allocation2 + $0x168] sm:$0xff] }
 0xc59   : > { %15122 = vst.msk [vmem:[#allocation2 + $0x1a8] sm:$0xff] %vm496_vm0, %v15090_v51  ;;  %v15060_v9 = vadd.f32 %v35774_v20, %v14966_v57  ;;  %28469 = vmatprep.mubr.msk.f32.mxu0 %vm496_vm0, %v35908_v24  ;;  %v35998_v46 = vld [vmem:[#allocation2 + $0x6f] sm:$0xff]  ;;  %v36002_v7 = vld [vmem:[#allocation2 + $0x87] sm:$0xff] }
 0xc5a   : > { %v15093_v2 = vmax.f32 %v15061_v50, 0.0  ;;  %28470 = vmatmul.mubr.msk.f32.gmra.mrb[86].mxu0 %vm496_vm0, %v35914_v26  ;;  %v36006_v51 = vld [vmem:[#allocation2 + $0x8f] sm:$0xff]  ;;  %v36010_v11 = vld [vmem:[#allocation2 + $0xa7] sm:$0xff] }
 0xc5b   : > { %v15092_v28 = vmax.f32 %v15060_v9, 0.0  ;;  %v28424_v52 = vpop.f32.mrb[60].mxu1  ;;  %v35926_v23 = vld [vmem:[#allocation2 + $0x190] sm:$0xff]  ;;  %v36018_v57 = vld [vmem:[#allocation2 + $0xc7] sm:$0xff] }
 0xc5c   : > { %15125 = vst.msk [vmem:[#allocation2 + $0x1d0] sm:$0xff] %vm496_vm0, %v15093_v2  ;;  %v15063_v4 = vadd.f32 %v28424_v52, %v35774_v20  ;;  %v14976_v12 = vpop.f32.mrb[61].mxu1  ;;  %v35920_v61 = vld [vmem:[#allocation2 + $0x188] sm:$0xff] }
 0xc5d   : > { %15124 = vst.msk [vmem:[#allocation2 + $0x1c8] sm:$0xff] %vm496_vm0, %v15092_v28  ;;  %v15062_v13 = vadd.f32 %v35774_v20, %v14976_v12  ;;  %28472 = vmatprep.mubr.msk.f32.mxu0 %vm496_vm0, %v35920_v61  ;;  %v36014_v50 = vld [vmem:[#allocation2 + $0xaf] sm:$0xff]  ;;  %v36026_v2 = vld [vmem:[#allocation2 + $0xe7] sm:$0xff] }
 0xc5e   : > { %v15095_v16 = vmax.f32 %v15063_v4, 0.0  ;;  %28473 = vmatmul.mubr.msk.f32.gmra.mrb[88].mxu0 %vm496_vm0, %v35926_v23  ;;  %v36022_v9 = vld [vmem:[#allocation2 + $0xcf] sm:$0xff]  ;;  %v36034_v52 = vld [vmem:[#allocation2 + $0x107] sm:$0xff] }
 0xc5f   : > { %v15094_v19 = vmax.f32 %v15062_v13, 0.0  ;;  %v28427_v5 = vpop.f32.mrb[62].mxu1  ;;  %v35938_v55 = vld [vmem:[#allocation2 + $0x1b0] sm:$0xff]  ;;  %v36042_v12 = vld [vmem:[#allocation2 + $0x127] sm:$0xff] }
 0xc60   : > { %15127 = vst.msk [vmem:[#allocation2 + $0x1f0] sm:$0xff] %vm496_vm0, %v15095_v16  ;;  %v15065_v15 = vadd.f32 %v28427_v5, %v35774_v20  ;;  %v14986_v40 = vpop.f32.mrb[63].mxu1  ;;  %v35932_v53 = vld [vmem:[#allocation2 + $0x1a8] sm:$0xff]  ;;  %39217 = vst [vmem:[#allocation78_spill] sm:$0xff] %v35938_v55 }
 0xc61   : > { %15126 = vst.msk [vmem:[#allocation2 + $0x1e8] sm:$0xff] %vm496_vm0, %v15094_v19  ;;  %v15064_v48 = vadd.f32 %v35774_v20, %v14986_v40  ;;  %28475 = vmatprep.mubr.msk.f32.mxu0 %vm496_vm0, %v35932_v53  ;;  %v36030_v28 = vld [vmem:[#allocation2 + $0xef] sm:$0xff]  ;;  %v36050_v16 = vld [vmem:[#allocation2 + $0x147] sm:$0xff] }
 0xc62   : > { %v15097_v59 = vmax.f32 %v15065_v15, 0.0  ;;  %28476 = vmatmul.mubr.msk.f32.gmra.mrb[90].mxu0 %vm496_vm0, %v35938_v55  ;;  %v36038_v4 = vld [vmem:[#allocation2 + $0x10f] sm:$0xff]  ;;  %v36058_v5 = vld [vmem:[#allocation2 + $0x167] sm:$0xff] }
 0xc63   : > { %v15096_v34 = vmax.f32 %v15064_v48, 0.0  ;;  %v35948_v20 = vld [vmem:[#allocation2 + $0x1d0] sm:$0xff]  ;;  %v36066_v40 = vld [vmem:[#allocation2 + $0x187] sm:$0xff] }
 0xc64   : > { %15129 = vst.msk [vmem:[#allocation2 + $0x210] sm:$0xff] %vm496_vm0, %v15097_v59  ;;  %v35943_v29 = vld [vmem:[#allocation2 + $0x1c8] sm:$0xff]  ;;  %39219 = vst [vmem:[#allocation80_spill] sm:$0xff] %v35948_v20 }
 0xc65   : > { %39218 = vst [vmem:[#allocation79_spill] sm:$0xff] %v35943_v29  ;;  %15128 = vst.msk [vmem:[#allocation2 + $0x208] sm:$0xff] %vm496_vm0, %v15096_v34  ;;  %28478 = vmatprep.mubr.msk.f32.mxu0 %vm496_vm0, %v35943_v29  ;;  %v36046_v13 = vld [vmem:[#allocation2 + $0x12f] sm:$0xff]  ;;  %v36074_v59 = vld [vmem:[#allocation2 + $0x1a7] sm:$0xff] }
 0xc66   : > { %28479 = vmatmul.mubr.msk.f32.gmra.mrb[92].mxu0 %vm496_vm0, %v35948_v20  ;;  %v36054_v19 = vld [vmem:[#allocation2 + $0x14f] sm:$0xff]  ;;  %v24124_v20 = vld [vmem:[%s38345_s9 + $0x80] sm:$0xff] }
 0xc67   : > { %v35956_v56 = vld [vmem:[#allocation2 + $0x1f0] sm:$0xff]  ;;  %v24125_v29 = vld [vmem:[%s38345_s9 + $0x88] sm:$0xff] }
 0xc68   : > { %v35952_v32 = vld [vmem:[#allocation2 + $0x1e8] sm:$0xff]  ;;  %39221 = vst [vmem:[#allocation47_spill] sm:$0xff] %v35956_v56 }
 0xc69   : > { %39220 = vst [vmem:[#allocation46_spill] sm:$0xff] %v35952_v32  ;;  %28481 = vmatprep.mubr.msk.f32.mxu0 %vm496_vm0, %v35952_v32  ;;  %v36062_v15 = vld [vmem:[#allocation2 + $0x16f] sm:$0xff]  ;;  %v36090_v22 = vld [vmem:[#allocation2 + $0x1e7] sm:$0xff]  ;;  %v29608_v32 = vpack.c.bf16 %v24091_v42, %v24090_v60 }
 0xc6a   : > { %28482 = vmatmul.mubr.msk.f32.gmra.mrb[94].mxu0 %vm496_vm0, %v35956_v56  ;;  %v36070_v48 = vld [vmem:[#allocation2 + $0x18f] sm:$0xff] }
 0xc6b   : > { %28492 = vmatprep.mubr.msk.f32.mxu0 %vm496_vm0, %v15130_v44  ;;  %v36078_v34 = vld [vmem:[#allocation2 + $0x1af] sm:$0xff]  ;;  %v36082_v44 = vld [vmem:[#allocation2 + $0x1c7] sm:$0xff] }
 0xc6c   : > { %v36086_v6 = vld [vmem:[#allocation2 + $0x1cf] sm:$0xff] }
 0xc6d   : > { %v15846_v56 = vld [vmem:[#allocation2 + $0x11] sm:$0xff]  ;;  %v36112_v55 = vld [vmem:[#allocation2 + $0x29] sm:$0xff] }
 0xc6e   : > { %28493 = vmatmul.mubr.msk.f32.vlgmr.msra.gmra.mrb[64].mxu0 %vm496_vm0, %v15131_v21  ;;  %v15845_v21 = vld [vmem:[#allocation2 + $0x9] sm:$0xff]  ;;  %v36119_v60 = vld [vmem:[#allocation2 + $0x31] sm:$0xff] }
 0xc6f   : > { %29599 = vmatpush3.bf16.msra.mxu0 %v35768_v33  ;;  %28495 = vmatprep.mubr.msk.f32.mxu0 %vm496_vm0, %v35974_v10  ;;  %v35990_v33 = vld [vmem:[#allocation2 + $0x4f] sm:$0xff] }
 0xc70   : > { %29601 = vmatprep.subr.bf16.mxu0 %v29600_v54  ;;  %v36123_v42 = vld [vmem:[#allocation2 + $0x49] sm:$0xff] }
 0xc71   : > { %39222 = vst [vmem:[#allocation25_spill] sm:$0xff] %v36123_v42 }
 0xc72   : > { %28496 = vmatmul.mubr.msk.f32.gmra.mrb[66].mxu0 %vm496_vm0, %v35981_v35 }
 0xc73   : > { %28498 = vmatprep.mubr.msk.f32.mxu0 %vm496_vm0, %v35985_v1  ;;  %29603 = vmatpush3.bf16.msra.mxu0 %v29600_v54  ;;  %v36094_v54 = vld [vmem:[#allocation2 + $0x1ef] sm:$0xff] }
 0xc74   : > { %29605 = vmatprep.subr.bf16.mxu0 %v35979_v43 }
 0xc76   : > { %28499 = vmatmul.mubr.msk.f32.gmra.mrb[68].mxu0 %vm496_vm0, %v35990_v33 }
 0xc77   : > { %28501 = vmatprep.mubr.msk.f32.mxu0 %vm496_vm0, %v35994_v62 }
 0xc7a   : > { %28502 = vmatmul.mubr.msk.f32.gmra.mrb[70].mxu0 %vm496_vm0, %v35998_v46 }
 0xc7b   : > { %28504 = vmatprep.mubr.msk.f32.mxu0 %vm496_vm0, %v36002_v7 }
 0xc7e   : > { %28505 = vmatmul.mubr.msk.f32.gmra.mrb[72].mxu0 %vm496_vm0, %v36006_v51 }
 0xc7f   : > { %28507 = vmatprep.mubr.msk.f32.mxu0 %vm496_vm0, %v36010_v11 }
 0xc82   : > { %28508 = vmatmul.mubr.msk.f32.gmra.mrb[74].mxu0 %vm496_vm0, %v36014_v50 }
 0xc83   : > { %28510 = vmatprep.mubr.msk.f32.mxu0 %vm496_vm0, %v36018_v57 }
 0xc86   : > { %28511 = vmatmul.mubr.msk.f32.gmra.mrb[76].mxu0 %vm496_vm0, %v36022_v9 }
 0xc87   : > { %28513 = vmatprep.mubr.msk.f32.mxu0 %vm496_vm0, %v36026_v2 }
 0xc8a   : > { %28514 = vmatmul.mubr.msk.f32.gmra.mrb[78].mxu0 %vm496_vm0, %v36030_v28 }
 0xc8b   : > { %28516 = vmatprep.mubr.msk.f32.mxu0 %vm496_vm0, %v36034_v52 }
 0xc8e   : > { %28517 = vmatmul.mubr.msk.f32.gmra.mrb[80].mxu0 %vm496_vm0, %v36038_v4 }
 0xc8f   : > { %28519 = vmatprep.mubr.msk.f32.mxu0 %vm496_vm0, %v36042_v12 }
 0xc92   : > { %28520 = vmatmul.mubr.msk.f32.gmra.mrb[82].mxu0 %vm496_vm0, %v36046_v13 }
 0xc93   : > { %28522 = vmatprep.mubr.msk.f32.mxu0 %vm496_vm0, %v36050_v16 }
 0xc96   : > { %28523 = vmatmul.mubr.msk.f32.gmra.mrb[84].mxu0 %vm496_vm0, %v36054_v19 }
 0xc97   : > { %28525 = vmatprep.mubr.msk.f32.mxu0 %vm496_vm0, %v36058_v5 }
 0xc9a   : > { %28526 = vmatmul.mubr.msk.f32.gmra.mrb[86].mxu0 %vm496_vm0, %v36062_v15 }
 0xc9b   : > { %28528 = vmatprep.mubr.msk.f32.mxu0 %vm496_vm0, %v36066_v40 }
 0xc9e   : > { %28529 = vmatmul.mubr.msk.f32.gmra.mrb[88].mxu0 %vm496_vm0, %v36070_v48 }
 0xc9f   : > { %28531 = vmatprep.mubr.msk.f32.mxu0 %vm496_vm0, %v36074_v59 }
 0xca2   : > { %28532 = vmatmul.mubr.msk.f32.gmra.mrb[90].mxu0 %vm496_vm0, %v36078_v34 }
 0xca3   : > { %28534 = vmatprep.mubr.msk.f32.mxu0 %vm496_vm0, %v36082_v44 }
 0xca6   : > { %28535 = vmatmul.mubr.msk.f32.gmra.mrb[92].mxu0 %vm496_vm0, %v36086_v6 }
 0xca7   : > { %28537 = vmatprep.mubr.msk.f32.mxu0 %vm496_vm0, %v36090_v22 }
 0xcaa   : > { %28538 = vmatmul.mubr.msk.f32.gmra.mrb[94].mxu0 %vm496_vm0, %v36094_v54 }
 0xcab   : > { %28548 = vmatprep.mubr.msk.f32.mxu0 %vm496_vm0, %v15845_v21  ;;  %v36117_v21 = vpack.c.bf16 %v24125_v29, %v24124_v20  ;;  %v36132_v29 = vld [vmem:[#allocation2 + $0x69] sm:$0xff]  ;;  %v36136_v20 = vld [vmem:[#allocation2 + $0x71] sm:$0xff] }
 0xcac   : > { %39224 = vst [vmem:[#allocation27_spill] sm:$0xff] %v36132_v29  ;;  %39225 = vst [vmem:[#allocation28_spill] sm:$0xff] %v36136_v20 }
 0xcae   : > { %28549 = vmatmul.mubr.msk.f32.vlgmr.msra.gmra.mrb[64].mxu0 %vm496_vm0, %v15846_v56  ;;  %v36128_v56 = vld [vmem:[#allocation2 + $0x51] sm:$0xff] }
 0xcaf   : > { %29607 = vmatpush3.bf16.msra.mxu0 %v35979_v43  ;;  %28551 = vmatprep.mubr.msk.f32.mxu0 %vm496_vm0, %v36112_v55  ;;  %39223 = vst [vmem:[#allocation26_spill] sm:$0xff] %v36128_v56  ;;  %v36140_v43 = vld [vmem:[#allocation2 + $0x89] sm:$0xff] }
 0xcb0   : > { %29609 = vmatprep.subr.bf16.mxu0 %v29608_v32  ;;  %39226 = vst [vmem:[#allocation29_spill] sm:$0xff] %v36140_v43 }
 0xcb2   : > { %28552 = vmatmul.mubr.msk.f32.gmra.mrb[66].mxu0 %vm496_vm0, %v36119_v60 }
 0xcb3   : > { %28554 = vmatprep.mubr.msk.f32.mxu0 %vm496_vm0, %v36123_v42  ;;  %29611 = vmatpush3.bf16.msra.mxu0 %v29608_v32  ;;  %v36144_v32 = vld [vmem:[#allocation2 + $0x91] sm:$0xff]  ;;  %v24161_v42 = vld [vmem:[%s38345_s9 + $0xa8] sm:$0xff] }
 0xcb4   : > { %29613 = vmatprep.subr.bf16.mxu0 %v36117_v21  ;;  %39227 = vst [vmem:[#allocation44_spill] sm:$0xff] %v36144_v32 }
 0xcb6   : > { %28555 = vmatmul.mubr.msk.f32.gmra.mrb[68].mxu0 %vm496_vm0, %v36128_v56  ;;  %v36148_v56 = vld [vmem:[#allocation2 + $0xa9] sm:$0xff] }
 0xcb7   : > { %28557 = vmatprep.mubr.msk.f32.mxu0 %vm496_vm0, %v36132_v29  ;;  %39228 = vst [vmem:[#allocation49_spill] sm:$0xff] %v36148_v56  ;;  %v36152_v29 = vld [vmem:[#allocation2 + $0xb1] sm:$0xff] }
 0xcb8   : > { %39229 = vst [vmem:[#allocation16_spill] sm:$0xff] %v36152_v29 }
 0xcba   : > { %28558 = vmatmul.mubr.msk.f32.gmra.mrb[70].mxu0 %vm496_vm0, %v36136_v20  ;;  %v36156_v20 = vld [vmem:[#allocation2 + $0xc9] sm:$0xff] }
 0xcbb   : > { %28560 = vmatprep.mubr.msk.f32.mxu0 %vm496_vm0, %v36140_v43  ;;  %39230 = vst [vmem:[#allocation71_spill] sm:$0xff] %v36156_v20  ;;  %v36160_v43 = vld [vmem:[#allocation2 + $0xd1] sm:$0xff] }
 0xcbc   : > { %39231 = vst [vmem:[#allocation68_spill] sm:$0xff] %v36160_v43 }
 0xcbe   : > { %28561 = vmatmul.mubr.msk.f32.gmra.mrb[72].mxu0 %vm496_vm0, %v36144_v32  ;;  %v36164_v32 = vld [vmem:[#allocation2 + $0xe9] sm:$0xff] }
 0xcbf   : > { %28563 = vmatprep.mubr.msk.f32.mxu0 %vm496_vm0, %v36148_v56  ;;  %39232 = vst [vmem:[#allocation76_spill] sm:$0xff] %v36164_v32  ;;  %v36168_v56 = vld [vmem:[#allocation2 + $0xf1] sm:$0xff] }
 0xcc0   : > { %39233 = vst [vmem:[#allocation30_spill] sm:$0xff] %v36168_v56 }
 0xcc2   : > { %28564 = vmatmul.mubr.msk.f32.gmra.mrb[74].mxu0 %vm496_vm0, %v36152_v29  ;;  %v36172_v29 = vld [vmem:[#allocation2 + $0x109] sm:$0xff] }
 0xcc3   : > { %28566 = vmatprep.mubr.msk.f32.mxu0 %vm496_vm0, %v36156_v20  ;;  %39234 = vst [vmem:[#allocation31_spill] sm:$0xff] %v36172_v29  ;;  %v36176_v20 = vld [vmem:[#allocation2 + $0x111] sm:$0xff] }
 0xcc4   : > { %39235 = vst [vmem:[#allocation32_spill] sm:$0xff] %v36176_v20 }
 0xcc6   : > { %28567 = vmatmul.mubr.msk.f32.gmra.mrb[76].mxu0 %vm496_vm0, %v36160_v43  ;;  %v36180_v43 = vld [vmem:[#allocation2 + $0x129] sm:$0xff] }
 0xcc7   : > { %28569 = vmatprep.mubr.msk.f32.mxu0 %vm496_vm0, %v36164_v32  ;;  %39236 = vst [vmem:[#allocation33_spill] sm:$0xff] %v36180_v43  ;;  %v36184_v32 = vld [vmem:[#allocation2 + $0x131] sm:$0xff] }
 0xcc8   : > { %39237 = vst [vmem:[#allocation34_spill] sm:$0xff] %v36184_v32 }
 0xcca   : > { %28570 = vmatmul.mubr.msk.f32.gmra.mrb[78].mxu0 %vm496_vm0, %v36168_v56  ;;  %v36188_v56 = vld [vmem:[#allocation2 + $0x149] sm:$0xff] }
 0xccb   : > { %28572 = vmatprep.mubr.msk.f32.mxu0 %vm496_vm0, %v36172_v29  ;;  %39238 = vst [vmem:[#allocation35_spill] sm:$0xff] %v36188_v56  ;;  %v36192_v29 = vld [vmem:[#allocation2 + $0x151] sm:$0xff] }
 0xccc   : > { %39239 = vst [vmem:[#allocation36_spill] sm:$0xff] %v36192_v29 }
 0xcce   : > { %28573 = vmatmul.mubr.msk.f32.gmra.mrb[80].mxu0 %vm496_vm0, %v36176_v20  ;;  %v36196_v20 = vld [vmem:[#allocation2 + $0x169] sm:$0xff] }
 0xccf   : > { %28575 = vmatprep.mubr.msk.f32.mxu0 %vm496_vm0, %v36180_v43  ;;  %39240 = vst [vmem:[#allocation37_spill] sm:$0xff] %v36196_v20  ;;  %v36200_v43 = vld [vmem:[#allocation2 + $0x171] sm:$0xff] }
 0xcd0   : > { %39241 = vst [vmem:[#allocation38_spill] sm:$0xff] %v36200_v43 }
 0xcd2   : > { %28576 = vmatmul.mubr.msk.f32.gmra.mrb[82].mxu0 %vm496_vm0, %v36184_v32  ;;  %v36204_v32 = vld [vmem:[#allocation2 + $0x189] sm:$0xff] }
 0xcd3   : > { %28578 = vmatprep.mubr.msk.f32.mxu0 %vm496_vm0, %v36188_v56  ;;  %39242 = vst [vmem:[#allocation39_spill] sm:$0xff] %v36204_v32  ;;  %v36208_v56 = vld [vmem:[#allocation2 + $0x191] sm:$0xff] }
 0xcd4   : > { %39243 = vst [vmem:[#allocation40_spill] sm:$0xff] %v36208_v56 }
 0xcd6   : > { %28579 = vmatmul.mubr.msk.f32.gmra.mrb[84].mxu0 %vm496_vm0, %v36192_v29  ;;  %v36212_v29 = vld [vmem:[#allocation2 + $0x1a9] sm:$0xff] }
 0xcd7   : > { %28581 = vmatprep.mubr.msk.f32.mxu0 %vm496_vm0, %v36196_v20  ;;  %39244 = vst [vmem:[#allocation41_spill] sm:$0xff] %v36212_v29  ;;  %v36216_v20 = vld [vmem:[#allocation2 + $0x1b1] sm:$0xff] }
 0xcd8   : > { %39245 = vst [vmem:[#allocation42_spill] sm:$0xff] %v36216_v20 }
 0xcda   : > { %28582 = vmatmul.mubr.msk.f32.gmra.mrb[86].mxu0 %vm496_vm0, %v36200_v43  ;;  %v36220_v43 = vld [vmem:[#allocation2 + $0x1c9] sm:$0xff] }
 0xcdb   : > { %28584 = vmatprep.mubr.msk.f32.mxu0 %vm496_vm0, %v36204_v32  ;;  %39246 = vst [vmem:[#allocation43_spill] sm:$0xff] %v36220_v43  ;;  %v36224_v32 = vld [vmem:[#allocation2 + $0x1d1] sm:$0xff] }
 0xcdc   : > { %39247 = vst [vmem:[#allocation45_spill] sm:$0xff] %v36224_v32 }
 0xcde   : > { %28585 = vmatmul.mubr.msk.f32.gmra.mrb[88].mxu0 %vm496_vm0, %v36208_v56  ;;  %v36228_v56 = vld [vmem:[#allocation2 + $0x1e9] sm:$0xff] }
 0xcdf   : > { %28587 = vmatprep.mubr.msk.f32.mxu0 %vm496_vm0, %v36212_v29  ;;  %39248 = vst [vmem:[#allocation63_spill] sm:$0xff] %v36228_v56  ;;  %v36232_v29 = vld [vmem:[#allocation2 + $0x1f1] sm:$0xff] }
 0xce0   : > { %39249 = vst [vmem:[#allocation75_spill] sm:$0xff] %v36232_v29 }
 0xce2   : > { %28588 = vmatmul.mubr.msk.f32.gmra.mrb[90].mxu0 %vm496_vm0, %v36216_v20  ;;  %v24126_v20 = vld [vmem:[%s38345_s9 + $0x90] sm:$0xff] }
 0xce3   : > { %28590 = vmatprep.mubr.msk.f32.mxu0 %vm496_vm0, %v36220_v43  ;;  %v24127_v43 = vld [vmem:[%s38345_s9 + $0x98] sm:$0xff] }
 0xce6   : > { %28591 = vmatmul.mubr.msk.f32.gmra.mrb[92].mxu0 %vm496_vm0, %v36224_v32  ;;  %v29616_v32 = vpack.c.bf16 %v24127_v43, %v24126_v20  ;;  %v24196_v20 = vld [vmem:[%s38345_s9 + $0xc0] sm:$0xff]  ;;  %v24197_v43 = vld [vmem:[%s38345_s9 + $0xc8] sm:$0xff] }
 0xce7   : > { %28593 = vmatprep.mubr.msk.f32.mxu0 %vm496_vm0, %v36228_v56  ;;  %v24160_v56 = vld [vmem:[%s38345_s9 + $0xa0] sm:$0xff] }
 0xcea   : > { %28594 = vmatmul.mubr.msk.f32.gmra.mrb[94].mxu0 %vm496_vm0, %v36232_v29  ;;  %v29620_v29 = vpack.c.bf16 %v24161_v42, %v24160_v56  ;;  %v24163_v42 = vld [vmem:[%s38345_s9 + $0xb8] sm:$0xff] }
 0xceb   : > { %28604 = vmatprep.mubr.msk.f32.mxu0 %vm496_vm0, %v35974_v10  ;;  %v36309_v10 = vld [vmem:[#allocation2 + $0x207] sm:$0xff] }
 0xcee   : > { %28605 = vmatmul.mubr.msk.f32.vlgmr.msra.gmra.mrb[64].mxu0 %vm496_vm0, %v35981_v35  ;;  %v36313_v35 = vld [vmem:[#allocation2 + $0x20f] sm:$0xff] }
 0xcef   : > { %29615 = vmatpush3.bf16.msra.mxu0 %v36117_v21  ;;  %28607 = vmatprep.mubr.msk.f32.mxu0 %vm496_vm0, %v35985_v1  ;;  %v24162_v21 = vld [vmem:[%s38345_s9 + $0xb0] sm:$0xff] }
 0xcf0   : > { %29617 = vmatprep.subr.bf16.mxu0 %v29616_v32  ;;  %v29624_v56 = vpack.c.bf16 %v24163_v42, %v24162_v21  ;;  %v39269_v21 = vld [vmem:[#allocation33_spill] sm:$0xff]  ;;  %v39270_v42 = vld [vmem:[#allocation34_spill] sm:$0xff] }
 0xcf2   : > { %28608 = vmatmul.mubr.msk.f32.gmra.mrb[66].mxu0 %vm496_vm0, %v35990_v33 }
 0xcf3   : > { %28610 = vmatprep.mubr.msk.f32.mxu0 %vm496_vm0, %v35994_v62  ;;  %29619 = vmatpush3.bf16.msra.mxu0 %v29616_v32  ;;  %v29628_v32 = vpack.c.bf16 %v24197_v43, %v24196_v20  ;;  %v39272_v20 = vld [vmem:[#allocation36_spill] sm:$0xff]  ;;  %v39273_v43 = vld [vmem:[#allocation37_spill] sm:$0xff] }
 0xcf4   : > { %29621 = vmatprep.subr.bf16.mxu0 %v29620_v29 }
 0xcf6   : > { %28611 = vmatmul.mubr.msk.f32.gmra.mrb[68].mxu0 %vm496_vm0, %v35998_v46 }
 0xcf7   : > { %28613 = vmatprep.mubr.msk.f32.mxu0 %vm496_vm0, %v36002_v7 }
 0xcfa   : > { %28614 = vmatmul.mubr.msk.f32.gmra.mrb[70].mxu0 %vm496_vm0, %v36006_v51 }
 0xcfb   : > { %28616 = vmatprep.mubr.msk.f32.mxu0 %vm496_vm0, %v36010_v11 }
 0xcfe   : > { %28617 = vmatmul.mubr.msk.f32.gmra.mrb[72].mxu0 %vm496_vm0, %v36014_v50 }
 0xcff   : > { %28619 = vmatprep.mubr.msk.f32.mxu0 %vm496_vm0, %v36018_v57 }
 0xd02   : > { %28620 = vmatmul.mubr.msk.f32.gmra.mrb[74].mxu0 %vm496_vm0, %v36022_v9 }
 0xd03   : > { %28622 = vmatprep.mubr.msk.f32.mxu0 %vm496_vm0, %v36026_v2 }
 0xd06   : > { %28623 = vmatmul.mubr.msk.f32.gmra.mrb[76].mxu0 %vm496_vm0, %v36030_v28 }
 0xd07   : > { %28625 = vmatprep.mubr.msk.f32.mxu0 %vm496_vm0, %v36034_v52 }
 0xd0a   : > { %28626 = vmatmul.mubr.msk.f32.gmra.mrb[78].mxu0 %vm496_vm0, %v36038_v4 }
 0xd0b   : > { %28628 = vmatprep.mubr.msk.f32.mxu0 %vm496_vm0, %v36042_v12 }
 0xd0e   : > { %28629 = vmatmul.mubr.msk.f32.gmra.mrb[80].mxu0 %vm496_vm0, %v36046_v13 }
 0xd0f   : > { %28631 = vmatprep.mubr.msk.f32.mxu0 %vm496_vm0, %v36050_v16 }
 0xd12   : > { %28632 = vmatmul.mubr.msk.f32.gmra.mrb[82].mxu0 %vm496_vm0, %v36054_v19 }
 0xd13   : > { %28634 = vmatprep.mubr.msk.f32.mxu0 %vm496_vm0, %v36058_v5 }
 0xd16   : > { %28635 = vmatmul.mubr.msk.f32.gmra.mrb[84].mxu0 %vm496_vm0, %v36062_v15 }
 0xd17   : > { %28637 = vmatprep.mubr.msk.f32.mxu0 %vm496_vm0, %v36066_v40 }
 0xd1a   : > { %28638 = vmatmul.mubr.msk.f32.gmra.mrb[86].mxu0 %vm496_vm0, %v36070_v48 }
 0xd1b   : > { %28640 = vmatprep.mubr.msk.f32.mxu0 %vm496_vm0, %v36074_v59 }
 0xd1e   : > { %28641 = vmatmul.mubr.msk.f32.gmra.mrb[88].mxu0 %vm496_vm0, %v36078_v34 }
 0xd1f   : > { %28643 = vmatprep.mubr.msk.f32.mxu0 %vm496_vm0, %v36082_v44 }
 0xd22   : > { %28644 = vmatmul.mubr.msk.f32.gmra.mrb[90].mxu0 %vm496_vm0, %v36086_v6 }
 0xd23   : > { %28646 = vmatprep.mubr.msk.f32.mxu0 %vm496_vm0, %v36090_v22 }
 0xd26   : > { %28647 = vmatmul.mubr.msk.f32.gmra.mrb[92].mxu0 %vm496_vm0, %v36094_v54 }
 0xd27   : > { %28649 = vmatprep.mubr.msk.f32.mxu0 %vm496_vm0, %v36309_v10 }
 0xd2a   : > { %28650 = vmatmul.mubr.msk.f32.gmra.mrb[94].mxu0 %vm496_vm0, %v36313_v35 }
 0xd2b   : > { %28660 = vmatprep.mubr.msk.f32.mxu0 %vm496_vm0, %v35788_v47  ;;  %v39250_v47 = vld [vmem:[#allocation78_spill] sm:$0xff] }
 0xd2e   : > { %28661 = vmatmul.mubr.msk.f32.vlgmr.msra.gmra.mrb[64].mxu0 %vm496_vm0, %v35794_v0  ;;  %v39251_v0 = vld [vmem:[#allocation79_spill] sm:$0xff] }
 0xd2f   : > { %29623 = vmatpush3.bf16.msra.mxu0 %v29620_v29  ;;  %28663 = vmatprep.mubr.msk.f32.mxu0 %vm496_vm0, %v35800_v36  ;;  %v39252_v36 = vld [vmem:[#allocation80_spill] sm:$0xff] }
 0xd30   : > { %29625 = vmatprep.subr.bf16.mxu0 %v29624_v56  ;;  %v39268_v29 = vld [vmem:[#allocation32_spill] sm:$0xff] }
 0xd32   : > { %28664 = vmatmul.mubr.msk.f32.gmra.mrb[66].mxu0 %vm496_vm0, %v35806_v37  ;;  %v39253_v37 = vld [vmem:[#allocation46_spill] sm:$0xff] }
 0xd33   : > { %28666 = vmatprep.mubr.msk.f32.mxu0 %vm496_vm0, %v35812_v3  ;;  %29627 = vmatpush3.bf16.msra.mxu0 %v29624_v56  ;;  %v39254_v3 = vld [vmem:[#allocation47_spill] sm:$0xff] }
 0xd34   : > { %29629 = vmatprep.subr.bf16.mxu0 %v29628_v32  ;;  %v39271_v56 = vld [vmem:[#allocation35_spill] sm:$0xff] }
 0xd36   : > { %28667 = vmatmul.mubr.msk.f32.gmra.mrb[68].mxu0 %vm496_vm0, %v35818_v17  ;;  %v36389_v17 = vld [vmem:[#allocation2 + $0x208] sm:$0xff] }
 0xd37   : > { %28669 = vmatprep.mubr.msk.f32.mxu0 %vm496_vm0, %v35824_v63  ;;  %v36393_v63 = vld [vmem:[#allocation2 + $0x210] sm:$0xff] }
 0xd3a   : > { %28670 = vmatmul.mubr.msk.f32.gmra.mrb[70].mxu0 %vm496_vm0, %v35830_v8  ;;  %v24198_v8 = vld [vmem:[%s38345_s9 + $0xd0] sm:$0xff] }
 0xd3b   : > { %28672 = vmatprep.mubr.msk.f32.mxu0 %vm496_vm0, %v35836_v38  ;;  %v24199_v38 = vld [vmem:[%s38345_s9 + $0xd8] sm:$0xff] }
 0xd3e   : > { %28673 = vmatmul.mubr.msk.f32.gmra.mrb[72].mxu0 %vm496_vm0, %v35842_v27  ;;  %v29632_v27 = vpack.c.bf16 %v24199_v38, %v24198_v8  ;;  %v39275_v8 = vld [vmem:[#allocation39_spill] sm:$0xff]  ;;  %v39276_v38 = vld [vmem:[#allocation40_spill] sm:$0xff] }
 0xd3f   : > { %28675 = vmatprep.mubr.msk.f32.mxu0 %vm496_vm0, %v35848_v14  ;;  %v24232_v14 = vld [vmem:[%s38345_s9 + $0xe0] sm:$0xff] }
 0xd42   : > { %28676 = vmatmul.mubr.msk.f32.gmra.mrb[74].mxu0 %vm496_vm0, %v35854_v45  ;;  %v24233_v45 = vld [vmem:[%s38345_s9 + $0xe8] sm:$0xff] }
 0xd43   : > { %28678 = vmatprep.mubr.msk.f32.mxu0 %vm496_vm0, %v35860_v30  ;;  %v39255_v30 = vld [vmem:[#allocation25_spill] sm:$0xff] }
 0xd46   : > { %28679 = vmatmul.mubr.msk.f32.gmra.mrb[76].mxu0 %vm496_vm0, %v35866_v18  ;;  %v29636_v18 = vpack.c.bf16 %v24233_v45, %v24232_v14  ;;  %v39278_v14 = vld [vmem:[#allocation42_spill] sm:$0xff]  ;;  %v39279_v45 = vld [vmem:[#allocation43_spill] sm:$0xff] }
 0xd47   : > { %28681 = vmatprep.mubr.msk.f32.mxu0 %vm496_vm0, %v35872_v39  ;;  %v39256_v39 = vld [vmem:[#allocation26_spill] sm:$0xff] }
 0xd4a   : > { %28682 = vmatmul.mubr.msk.f32.gmra.mrb[78].mxu0 %vm496_vm0, %v35878_v49  ;;  %v39257_v49 = vld [vmem:[#allocation27_spill] sm:$0xff] }
 0xd4b   : > { %28684 = vmatprep.mubr.msk.f32.mxu0 %vm496_vm0, %v35884_v41  ;;  %v39258_v41 = vld [vmem:[#allocation28_spill] sm:$0xff] }
 0xd4e   : > { %28685 = vmatmul.mubr.msk.f32.gmra.mrb[80].mxu0 %vm496_vm0, %v35890_v58  ;;  %v39259_v58 = vld [vmem:[#allocation29_spill] sm:$0xff] }
 0xd4f   : > { %28687 = vmatprep.mubr.msk.f32.mxu0 %vm496_vm0, %v35896_v25  ;;  %v39260_v25 = vld [vmem:[#allocation44_spill] sm:$0xff] }
 0xd52   : > { %28688 = vmatmul.mubr.msk.f32.gmra.mrb[82].mxu0 %vm496_vm0, %v35902_v31  ;;  %v39261_v31 = vld [vmem:[#allocation49_spill] sm:$0xff] }
 0xd53   : > { %28690 = vmatprep.mubr.msk.f32.mxu0 %vm496_vm0, %v35908_v24  ;;  %v39262_v24 = vld [vmem:[#allocation16_spill] sm:$0xff] }
 0xd56   : > { %28691 = vmatmul.mubr.msk.f32.gmra.mrb[84].mxu0 %vm496_vm0, %v35914_v26  ;;  %v39263_v26 = vld [vmem:[#allocation71_spill] sm:$0xff] }
 0xd57   : > { %28693 = vmatprep.mubr.msk.f32.mxu0 %vm496_vm0, %v35920_v61  ;;  %v39264_v61 = vld [vmem:[#allocation68_spill] sm:$0xff] }
 0xd5a   : > { %28694 = vmatmul.mubr.msk.f32.gmra.mrb[86].mxu0 %vm496_vm0, %v35926_v23  ;;  %v39265_v23 = vld [vmem:[#allocation76_spill] sm:$0xff] }
 0xd5b   : > { %28696 = vmatprep.mubr.msk.f32.mxu0 %vm496_vm0, %v35932_v53 }
 0xd5e   : > { %28697 = vmatmul.mubr.msk.f32.gmra.mrb[88].mxu0 %vm496_vm0, %v39250_v47 }
 0xd5f   : > { %28699 = vmatprep.mubr.msk.f32.mxu0 %vm496_vm0, %v39251_v0 }
 0xd62   : > { %28700 = vmatmul.mubr.msk.f32.gmra.mrb[90].mxu0 %vm496_vm0, %v39252_v36 }
 0xd63   : > { %28702 = vmatprep.mubr.msk.f32.mxu0 %vm496_vm0, %v39253_v37 }
 0xd66   : > { %28703 = vmatmul.mubr.msk.f32.gmra.mrb[92].mxu0 %vm496_vm0, %v39254_v3 }
 0xd67   : > { %28705 = vmatprep.mubr.msk.f32.mxu0 %vm496_vm0, %v36389_v17 }
 0xd6a   : > { %28706 = vmatmul.mubr.msk.f32.gmra.mrb[94].mxu0 %vm496_vm0, %v36393_v63 }
 0xd6b   : > { %28716 = vmatprep.mubr.msk.f32.mxu0 %vm496_vm0, %v36112_v55  ;;  %v39266_v55 = vld [vmem:[#allocation30_spill] sm:$0xff] }
 0xd6e   : > { %28717 = vmatmul.mubr.msk.f32.vlgmr.msra.gmra.mrb[64].mxu0 %vm496_vm0, %v36119_v60  ;;  %v39267_v60 = vld [vmem:[#allocation31_spill] sm:$0xff] }
 0xd6f   : > { %29631 = vmatpush3.bf16.msra.mxu0 %v29628_v32  ;;  %28719 = vmatprep.mubr.msk.f32.mxu0 %vm496_vm0, %v39255_v30  ;;  %v39274_v32 = vld [vmem:[#allocation38_spill] sm:$0xff] }
 0xd70   : > { %29633 = vmatprep.subr.bf16.mxu0 %v29632_v27 }
 0xd72   : > { %28720 = vmatmul.mubr.msk.f32.gmra.mrb[66].mxu0 %vm496_vm0, %v39256_v39 }
 0xd73   : > { %28722 = vmatprep.mubr.msk.f32.mxu0 %vm496_vm0, %v39257_v49  ;;  %29635 = vmatpush3.bf16.msra.mxu0 %v29632_v27  ;;  %v39277_v27 = vld [vmem:[#allocation41_spill] sm:$0xff] }
 0xd74   : > { %29637 = vmatprep.subr.bf16.mxu0 %v29636_v18 }
 0xd76   : > { %28723 = vmatmul.mubr.msk.f32.gmra.mrb[68].mxu0 %vm496_vm0, %v39258_v41 }
 0xd77   : > { %28725 = vmatprep.mubr.msk.f32.mxu0 %vm496_vm0, %v39259_v58 }
 0xd7a   : > { %28726 = vmatmul.mubr.msk.f32.gmra.mrb[70].mxu0 %vm496_vm0, %v39260_v25 }
 0xd7b   : > { %28728 = vmatprep.mubr.msk.f32.mxu0 %vm496_vm0, %v39261_v31 }
 0xd7e   : > { %28729 = vmatmul.mubr.msk.f32.gmra.mrb[72].mxu0 %vm496_vm0, %v39262_v24 }
 0xd7f   : > { %28731 = vmatprep.mubr.msk.f32.mxu0 %vm496_vm0, %v39263_v26 }
 0xd82   : > { %28732 = vmatmul.mubr.msk.f32.gmra.mrb[74].mxu0 %vm496_vm0, %v39264_v61 }
 0xd83   : > { %28734 = vmatprep.mubr.msk.f32.mxu0 %vm496_vm0, %v39265_v23 }
 0xd86   : > { %28735 = vmatmul.mubr.msk.f32.gmra.mrb[76].mxu0 %vm496_vm0, %v39266_v55 }
 0xd87   : > { %28737 = vmatprep.mubr.msk.f32.mxu0 %vm496_vm0, %v39267_v60 }
 0xd8a   : > { %28738 = vmatmul.mubr.msk.f32.gmra.mrb[78].mxu0 %vm496_vm0, %v39268_v29 }
 0xd8b   : > { %28740 = vmatprep.mubr.msk.f32.mxu0 %vm496_vm0, %v39269_v21 }
 0xd8e   : > { %28741 = vmatmul.mubr.msk.f32.gmra.mrb[80].mxu0 %vm496_vm0, %v39270_v42 }
 0xd8f   : > { %28743 = vmatprep.mubr.msk.f32.mxu0 %vm496_vm0, %v39271_v56 }
 0xd92   : > { %28744 = vmatmul.mubr.msk.f32.gmra.mrb[82].mxu0 %vm496_vm0, %v39272_v20  ;;  %v39280_v20 = vld [vmem:[#allocation45_spill] sm:$0xff] }
 0xd93   : > { %28746 = vmatprep.mubr.msk.f32.mxu0 %vm496_vm0, %v39273_v43  ;;  %v39281_v43 = vld [vmem:[#allocation63_spill] sm:$0xff] }
 0xd96   : > { %28747 = vmatmul.mubr.msk.f32.gmra.mrb[84].mxu0 %vm496_vm0, %v39274_v32  ;;  %v39282_v32 = vld [vmem:[#allocation75_spill] sm:$0xff] }
 0xd97   : > { %28749 = vmatprep.mubr.msk.f32.mxu0 %vm496_vm0, %v39275_v8  ;;  %v36469_v8 = vld [vmem:[#allocation2 + $0x209] sm:$0xff] }
 0xd98   : > { %39283 = vst [vmem:[#allocation77_spill] sm:$0xff] %v36469_v8 }
 0xd9a   : > { %28750 = vmatmul.mubr.msk.f32.gmra.mrb[86].mxu0 %vm496_vm0, %v39276_v38 }
 0xd9b   : > { %28752 = vmatprep.mubr.msk.f32.mxu0 %vm496_vm0, %v39277_v27  ;;  %v36473_v27 = vld [vmem:[#allocation2 + $0x211] sm:$0xff] }
 0xd9c   : > { %39284 = vst [vmem:[#allocation78_spill] sm:$0xff] %v36473_v27 }
 0xd9e   : > { %28753 = vmatmul.mubr.msk.f32.gmra.mrb[88].mxu0 %vm496_vm0, %v39278_v14 }
 0xd9f   : > { %28755 = vmatprep.mubr.msk.f32.mxu0 %vm496_vm0, %v39279_v45  ;;  %v24234_v45 = vld [vmem:[%s38345_s9 + $0xf0] sm:$0xff] }
 0xda2   : > { %28756 = vmatmul.mubr.msk.f32.gmra.mrb[90].mxu0 %vm496_vm0, %v39280_v20  ;;  %v24235_v20 = vld [vmem:[%s38345_s9 + $0xf8] sm:$0xff] }
 0xda3   : > { %28758 = vmatprep.mubr.msk.f32.mxu0 %vm496_vm0, %v39281_v43  ;;  %v24269_v43 = vld [vmem:[%s38345_s9 + $0x108] sm:$0xff] }
 0xda6   : > { %28759 = vmatmul.mubr.msk.f32.gmra.mrb[92].mxu0 %vm496_vm0, %v39282_v32  ;;  %v29640_v32 = vpack.c.bf16 %v24235_v20, %v24234_v45  ;;  %v17815_v20 = vld [vmem:[#allocation2 + $0x188] sm:$0xff] }
 0xda7   : > { %28761 = vmatprep.mubr.msk.f32.mxu0 %vm496_vm0, %v36469_v8  ;;  %v24268_v8 = vld [vmem:[%s38345_s9 + $0x100] sm:$0xff] }
 0xdaa   : > { %28762 = vmatmul.mubr.msk.f32.gmra.mrb[94].mxu0 %vm496_vm0, %v36473_v27  ;;  %v29644_v27 = vpack.c.bf16 %v24269_v43, %v24268_v8  ;;  %v17816_v43 = vld [vmem:[#allocation2 + $0x190] sm:$0xff]  ;;  %v36694_v8 = vld [vmem:[#allocation7] ss:$0 sm:$0xff] }
 0xdab   : > { %28772 = vmatprep.mubr.msk.f32.mxu0 %vm496_vm0, %v35985_v1  ;;  %v17435_v1 = vld [vmem:[#allocation2 + $0x227] sm:$0xff] }
 0xdae   : > { %28773 = vmatmul.mubr.msk.f32.vlgmr.msra.gmra.mrb[64].mxu0 %vm496_vm0, %v35990_v33  ;;  %v17436_v33 = vld [vmem:[#allocation2 + $0x22f] sm:$0xff] }
 0xdaf   : > { %29639 = vmatpush3.bf16.msra.mxu0 %v29636_v18  ;;  %28775 = vmatprep.mubr.msk.f32.mxu0 %vm496_vm0, %v35994_v62  ;;  %v17795_v62 = vld [vmem:[#allocation2 + $0x48] sm:$0xff]  ;;  %v17814_v18 = vld [vmem:[#allocation2 + $0x170] sm:$0xff] }
 0xdb0   : > { %29641 = vmatprep.subr.bf16.mxu0 %v29640_v32 }
 0xdb2   : > { %28776 = vmatmul.mubr.msk.f32.gmra.mrb[66].mxu0 %vm496_vm0, %v35998_v46  ;;  %v24270_v46 = vld [vmem:[%s38345_s9 + $0x110] sm:$0xff] }
 0xdb3   : > { %28778 = vmatprep.mubr.msk.f32.mxu0 %vm496_vm0, %v36002_v7  ;;  %29643 = vmatpush3.bf16.msra.mxu0 %v29640_v32  ;;  %v24271_v7 = vld [vmem:[%s38345_s9 + $0x118] sm:$0xff]  ;;  %v17825_v32 = vld [vmem:[#allocation2 + $0x228] sm:$0xff] }
 0xdb4   : > { %29645 = vmatprep.subr.bf16.mxu0 %v29644_v27 }
 0xdb6   : > { %28779 = vmatmul.mubr.msk.f32.gmra.mrb[68].mxu0 %vm496_vm0, %v36006_v51  ;;  %v24305_v51 = vld [vmem:[%s39285_s28 + $0x20] sm:$0xff] }
 0xdb7   : > { %28781 = vmatprep.mubr.msk.f32.mxu0 %vm496_vm0, %v36010_v11  ;;  %v24306_v11 = vld [vmem:[%s39285_s28 + $0x28] sm:$0xff] }
 0xdba   : > { %28782 = vmatmul.mubr.msk.f32.gmra.mrb[70].mxu0 %vm496_vm0, %v36014_v50  ;;  %v24307_v50 = vld [vmem:[%s39285_s28 + $0x30] sm:$0xff] }
 0xdbb   : > { %28784 = vmatprep.mubr.msk.f32.mxu0 %vm496_vm0, %v36018_v57  ;;  %v29652_v57 = vpack.c.bf16 %v24306_v11, %v24305_v51 }
 0xdbd   : > { %29653 = vmatprep.subr.bf16.mxu1 %v29652_v57 }
 0xdbe   : > { %28785 = vmatmul.mubr.msk.f32.gmra.mrb[72].mxu0 %vm496_vm0, %v36022_v9  ;;  %v24308_v9 = vld [vmem:[%s39285_s28 + $0x38] sm:$0xff]  ;;  %29655 = vmatpush3.bf16.msra.mxu1 %v29652_v57 }
 0xdbf   : > { %28787 = vmatprep.mubr.msk.f32.mxu0 %vm496_vm0, %v36026_v2  ;;  %v29648_v2 = vpack.c.bf16 %v24271_v7, %v24270_v46 }
 0xdc2   : > { %28788 = vmatmul.mubr.msk.f32.gmra.mrb[74].mxu0 %vm496_vm0, %v36030_v28  ;;  %v29656_v28 = vpack.c.bf16 %v24308_v9, %v24307_v50 }
 0xdc3   : > { %28790 = vmatprep.mubr.msk.f32.mxu0 %vm496_vm0, %v36034_v52  ;;  %v17796_v52 = vld [vmem:[#allocation2 + $0x50] sm:$0xff] }
 0xdc4   : > { %29657 = vmatprep.subr.bf16.mxu1 %v29656_v28 }
 0xdc5   : > { %29659 = vmatpush3.bf16.msra.mxu1 %v29656_v28 }
 0xdc6   : > { %28791 = vmatmul.mubr.msk.f32.gmra.mrb[76].mxu0 %vm496_vm0, %v36038_v4  ;;  %v17797_v4 = vld [vmem:[#allocation2 + $0x68] sm:$0xff] }
 0xdc7   : > { %28793 = vmatprep.mubr.msk.f32.mxu0 %vm496_vm0, %v36042_v12  ;;  %v17798_v12 = vld [vmem:[#allocation2 + $0x70] sm:$0xff] }
 0xdca   : > { %28794 = vmatmul.mubr.msk.f32.gmra.mrb[78].mxu0 %vm496_vm0, %v36046_v13  ;;  %v17799_v13 = vld [vmem:[#allocation2 + $0x88] sm:$0xff] }
 0xdcb   : > { %28796 = vmatprep.mubr.msk.f32.mxu0 %vm496_vm0, %v36050_v16  ;;  %v17800_v16 = vld [vmem:[#allocation2 + $0x90] sm:$0xff] }
 0xdce   : > { %28797 = vmatmul.mubr.msk.f32.gmra.mrb[80].mxu0 %vm496_vm0, %v36054_v19  ;;  %v17801_v19 = vld [vmem:[#allocation2 + $0xa8] sm:$0xff] }
 0xdcf   : > { %28799 = vmatprep.mubr.msk.f32.mxu0 %vm496_vm0, %v36058_v5  ;;  %v17802_v5 = vld [vmem:[#allocation2 + $0xb0] sm:$0xff] }
 0xdd2   : > { %28800 = vmatmul.mubr.msk.f32.gmra.mrb[82].mxu0 %vm496_vm0, %v36062_v15  ;;  %v17803_v15 = vld [vmem:[#allocation2 + $0xc8] sm:$0xff] }
 0xdd3   : > { %28802 = vmatprep.mubr.msk.f32.mxu0 %vm496_vm0, %v36066_v40  ;;  %v17804_v40 = vld [vmem:[#allocation2 + $0xd0] sm:$0xff] }
 0xdd6   : > { %28803 = vmatmul.mubr.msk.f32.gmra.mrb[84].mxu0 %vm496_vm0, %v36070_v48  ;;  %v17805_v48 = vld [vmem:[#allocation2 + $0xe8] sm:$0xff] }
 0xdd7   : > { %28805 = vmatprep.mubr.msk.f32.mxu0 %vm496_vm0, %v36074_v59  ;;  %v17806_v59 = vld [vmem:[#allocation2 + $0xf0] sm:$0xff] }
 0xdda   : > { %28806 = vmatmul.mubr.msk.f32.gmra.mrb[86].mxu0 %vm496_vm0, %v36078_v34  ;;  %v17807_v34 = vld [vmem:[#allocation2 + $0x108] sm:$0xff] }
 0xddb   : > { %28808 = vmatprep.mubr.msk.f32.mxu0 %vm496_vm0, %v36082_v44  ;;  %v17808_v44 = vld [vmem:[#allocation2 + $0x110] sm:$0xff] }
 0xdde   : > { %28809 = vmatmul.mubr.msk.f32.gmra.mrb[88].mxu0 %vm496_vm0, %v36086_v6  ;;  %v17809_v6 = vld [vmem:[#allocation2 + $0x128] sm:$0xff] }
 0xddf   : > { %28811 = vmatprep.mubr.msk.f32.mxu0 %vm496_vm0, %v36090_v22  ;;  %v17810_v22 = vld [vmem:[#allocation2 + $0x130] sm:$0xff] }
 0xde2   : > { %28812 = vmatmul.mubr.msk.f32.gmra.mrb[90].mxu0 %vm496_vm0, %v36094_v54  ;;  %v17811_v54 = vld [vmem:[#allocation2 + $0x148] sm:$0xff] }
 0xde3   : > { %28814 = vmatprep.mubr.msk.f32.mxu0 %vm496_vm0, %v36309_v10  ;;  %v17812_v10 = vld [vmem:[#allocation2 + $0x150] sm:$0xff] }
 0xde6   : > { %28815 = vmatmul.mubr.msk.f32.gmra.mrb[92].mxu0 %vm496_vm0, %v36313_v35  ;;  %v17813_v35 = vld [vmem:[#allocation2 + $0x168] sm:$0xff] }
 0xde7   : > { %28817 = vmatprep.mubr.msk.f32.mxu0 %vm496_vm0, %v17435_v1 }
 0xdea   : > { %28818 = vmatmul.mubr.msk.f32.gmra.mrb[94].mxu0 %vm496_vm0, %v17436_v33 }
 0xdeb   : > { %28828 = vmatprep.mubr.msk.f32.mxu0 %vm496_vm0, %v17795_v62 }
 0xdee   : > { %28829 = vmatmul.mubr.msk.f32.vlgmr.msra.gmra.mrb[64].mxu0 %vm496_vm0, %v17796_v52 }
 0xdef   : > { %29647 = vmatpush3.bf16.msra.mxu0 %v29644_v27  ;;  %28831 = vmatprep.mubr.msk.f32.mxu0 %vm496_vm0, %v17797_v4 }
 0xdf0   : > { %29649 = vmatprep.subr.bf16.mxu0 %v29648_v2 }
 0xdf2   : > { %28832 = vmatmul.mubr.msk.f32.gmra.mrb[66].mxu0 %vm496_vm0, %v17798_v12 }
 0xdf3   : > { %28834 = vmatprep.mubr.msk.f32.mxu0 %vm496_vm0, %v17799_v13  ;;  %29651 = vmatpush3.bf16.msra.mxu0 %v29648_v2 }
 0xdf6   : > { %28835 = vmatmul.mubr.msk.f32.gmra.mrb[68].mxu0 %vm496_vm0, %v17800_v16 }
 0xdf7   : > { %28837 = vmatprep.mubr.msk.f32.mxu0 %vm496_vm0, %v17801_v19 }
 0xdfa   : > { %28838 = vmatmul.mubr.msk.f32.gmra.mrb[70].mxu0 %vm496_vm0, %v17802_v5 }
 0xdfb   : > { %28840 = vmatprep.mubr.msk.f32.mxu0 %vm496_vm0, %v17803_v15 }
 0xdfe   : > { %28841 = vmatmul.mubr.msk.f32.gmra.mrb[72].mxu0 %vm496_vm0, %v17804_v40 }
 0xdff   : > { %28843 = vmatprep.mubr.msk.f32.mxu0 %vm496_vm0, %v17805_v48 }
 0xe02   : > { %28844 = vmatmul.mubr.msk.f32.gmra.mrb[74].mxu0 %vm496_vm0, %v17806_v59 }
 0xe03   : > { %28846 = vmatprep.mubr.msk.f32.mxu0 %vm496_vm0, %v17807_v34 }
 0xe06   : > { %28847 = vmatmul.mubr.msk.f32.gmra.mrb[76].mxu0 %vm496_vm0, %v17808_v44 }
 0xe07   : > { %28849 = vmatprep.mubr.msk.f32.mxu0 %vm496_vm0, %v17809_v6 }
 0xe0a   : > { %28850 = vmatmul.mubr.msk.f32.gmra.mrb[78].mxu0 %vm496_vm0, %v17810_v22 }
 0xe0b   : > { %28852 = vmatprep.mubr.msk.f32.mxu0 %vm496_vm0, %v17811_v54 }
 0xe0e   : > { %28853 = vmatmul.mubr.msk.f32.gmra.mrb[80].mxu0 %vm496_vm0, %v17812_v10 }
 0xe0f   : > { %28855 = vmatprep.mubr.msk.f32.mxu0 %vm496_vm0, %v17813_v35 }
 0xe12   : > { %28856 = vmatmul.mubr.msk.f32.gmra.mrb[82].mxu0 %vm496_vm0, %v17814_v18 }
 0xe13   : > { %28858 = vmatprep.mubr.msk.f32.mxu0 %vm496_vm0, %v17815_v20 }
 0xe16   : > { %28859 = vmatmul.mubr.msk.f32.gmra.mrb[84].mxu0 %vm496_vm0, %v17816_v43 }
 0xe17   : > { %28861 = vmatprep.mubr.msk.f32.mxu0 %vm496_vm0, %v35932_v53  ;;  %v17826_v53 = vld [vmem:[#allocation2 + $0x230] sm:$0xff] }
 0xe1a   : > { %28862 = vmatmul.mubr.msk.f32.gmra.mrb[86].mxu0 %vm496_vm0, %v39250_v47  ;;  %v39286_v47 = vld [vmem:[#allocation36_spill] sm:$0xff] }
 0xe1b   : > { %28864 = vmatprep.mubr.msk.f32.mxu0 %vm496_vm0, %v39251_v0  ;;  %v39287_v0 = vld [vmem:[#allocation37_spill] sm:$0xff] }
 0xe1e   : > { %28865 = vmatmul.mubr.msk.f32.gmra.mrb[88].mxu0 %vm496_vm0, %v39252_v36  ;;  %v39288_v36 = vld [vmem:[#allocation38_spill] sm:$0xff] }
 0xe1f   : > { %28867 = vmatprep.mubr.msk.f32.mxu0 %vm496_vm0, %v39253_v37  ;;  %v39289_v37 = vld [vmem:[#allocation39_spill] sm:$0xff] }
 0xe22   : > { %28868 = vmatmul.mubr.msk.f32.gmra.mrb[90].mxu0 %vm496_vm0, %v39254_v3  ;;  %v39290_v3 = vld [vmem:[#allocation41_spill] sm:$0xff] }
 0xe23   : > { %28870 = vmatprep.mubr.msk.f32.mxu0 %vm496_vm0, %v36389_v17  ;;  %v39291_v17 = vld [vmem:[#allocation43_spill] sm:$0xff] }
 0xe26   : > { %28871 = vmatmul.mubr.msk.f32.gmra.mrb[92].mxu0 %vm496_vm0, %v36393_v63  ;;  %v39292_v63 = vld [vmem:[#allocation45_spill] sm:$0xff] }
 0xe27   : > { %28873 = vmatprep.mubr.msk.f32.mxu0 %vm496_vm0, %v17825_v32 }
 0xe2a   : > { %28874 = vmatmul.mubr.msk.f32.gmra.mrb[94].mxu0 %vm496_vm0, %v17826_v53 }
 0xe2b   : > { %28884 = vmatprep.mubr.msk.f32.mxu0 %vm496_vm0, %v39255_v30  ;;  %v39293_v30 = vld [vmem:[#allocation63_spill] sm:$0xff] }
 0xe2e   : > { %28885 = vmatmul.mubr.msk.f32.vlgmr.msra.gmra.mrb[64].mxu0 %vm496_vm0, %v39256_v39  ;;  %v39294_v39 = vld [vmem:[#allocation75_spill] sm:$0xff] }
 0xe2f   : > { %28887 = vmatprep.mubr.msk.f32.mxu0 %vm496_vm0, %v39257_v49  ;;  %v39295_v49 = vld [vmem:[#allocation77_spill] sm:$0xff] }
 0xe32   : > { %28888 = vmatmul.mubr.msk.f32.gmra.mrb[66].mxu0 %vm496_vm0, %v39258_v41  ;;  %v18215_v41 = vld [vmem:[#allocation2 + $0x229] sm:$0xff] }
 0xe33   : > { %28890 = vmatprep.mubr.msk.f32.mxu0 %vm496_vm0, %v39259_v58  ;;  %v39296_v58 = vld [vmem:[#allocation78_spill] sm:$0xff] }
 0xe36   : > { %28891 = vmatmul.mubr.msk.f32.gmra.mrb[68].mxu0 %vm496_vm0, %v39260_v25  ;;  %v18216_v25 = vld [vmem:[#allocation2 + $0x231] sm:$0xff] }
 0xe37   : > { %28893 = vmatprep.mubr.msk.f32.mxu0 %vm496_vm0, %v39261_v31  ;;  %v18714_v31 = vld [vmem:[#allocation2 + $0x8] sm:$0xff] }
 0xe38   : > { %28940 = vmatprep.mubr.msk.f32.mxu1 %vm496_vm0, %v18714_v31 }
 0xe3a   : > { %28894 = vmatmul.mubr.msk.f32.gmra.mrb[70].mxu0 %vm496_vm0, %v39262_v24  ;;  %v18715_v24 = vld [vmem:[#allocation2 + $0x10] sm:$0xff] }
 0xe3b   : > { %28896 = vmatprep.mubr.msk.f32.mxu0 %vm496_vm0, %v39263_v26  ;;  %v18710_v26 = vld [vmem:[%s39285_s28] sm:$0xff]  ;;  %28941 = vmatmul.mubr.msk.f32.vlgmr.msra.gmra.mrb[64].mxu1 %vm496_vm0, %v18715_v24 }
 0xe3e   : > { %28897 = vmatmul.mubr.msk.f32.gmra.mrb[72].mxu0 %vm496_vm0, %v39264_v61  ;;  %v18711_v61 = vld [vmem:[%s39285_s28 + $0x8] sm:$0xff] }
 0xe3f   : > { %28899 = vmatprep.mubr.msk.f32.mxu0 %vm496_vm0, %v39265_v23  ;;  %v29660_v23 = vpack.c.bf16 %v18711_v61, %v18710_v26 }
 0xe41   : > { %29661 = vmatprep.subr.bf16.mxu1 %v29660_v23 }
 0xe42   : > { %28900 = vmatmul.mubr.msk.f32.gmra.mrb[74].mxu0 %vm496_vm0, %v39266_v55  ;;  %29663 = vmatpush3.bf16.msra.mxu1 %v29660_v23  ;;  %v18712_v55 = vld [vmem:[%s39285_s28 + $0x10] sm:$0xff] }
 0xe43   : > { %28902 = vmatprep.mubr.msk.f32.mxu0 %vm496_vm0, %v39267_v60  ;;  %v18713_v60 = vld [vmem:[%s39285_s28 + $0x18] sm:$0xff] }
 0xe46   : > { %28903 = vmatmul.mubr.msk.f32.gmra.mrb[76].mxu0 %vm496_vm0, %v39268_v29  ;;  %v29664_v29 = vpack.c.bf16 %v18713_v60, %v18712_v55 }
 0xe47   : > { %28905 = vmatprep.mubr.msk.f32.mxu0 %vm496_vm0, %v39269_v21  ;;  %v24373_v21 = vld [vmem:[%s39285_s28 + $0x40] sm:$0xff] }
 0xe48   : > { %29665 = vmatprep.subr.bf16.mxu1 %v29664_v29 }
 0xe49   : > { %29667 = vmatpush3.bf16.msra.mxu1 %v29664_v29 }
 0xe4a   : > { %28906 = vmatmul.mubr.msk.f32.gmra.mrb[78].mxu0 %vm496_vm0, %v39270_v42  ;;  %v24374_v42 = vld [vmem:[%s39285_s28 + $0x48] sm:$0xff] }
 0xe4b   : > { %28908 = vmatprep.mubr.msk.f32.mxu0 %vm496_vm0, %v39271_v56  ;;  %v36691_v56 = vpack.c.bf16 %v24374_v42, %v24373_v21 }
 0xe4d   : > { %29669 = vmatprep.subr.bf16.mxu1 %v36691_v56 }
 0xe4e   : > { %28909 = vmatmul.mubr.msk.f32.gmra.mrb[80].mxu0 %vm496_vm0, %v39286_v47 }
 0xe4f   : > { %28911 = vmatprep.mubr.msk.f32.mxu0 %vm496_vm0, %v39287_v0 }
 0xe52   : > { %28912 = vmatmul.mubr.msk.f32.gmra.mrb[82].mxu0 %vm496_vm0, %v39288_v36 }
 0xe53   : > { %28914 = vmatprep.mubr.msk.f32.mxu0 %vm496_vm0, %v39289_v37 }
 0xe56   : > { %28915 = vmatmul.mubr.msk.f32.gmra.mrb[84].mxu0 %vm496_vm0, %v39276_v38 }
 0xe57   : > { %28917 = vmatprep.mubr.msk.f32.mxu0 %vm496_vm0, %v39290_v3 }
 0xe5a   : > { %28918 = vmatmul.mubr.msk.f32.gmra.mrb[86].mxu0 %vm496_vm0, %v39278_v14 }
 0xe5b   : > { %28920 = vmatprep.mubr.msk.f32.mxu0 %vm496_vm0, %v39291_v17 }
 0xe5e   : > { %28921 = vmatmul.mubr.msk.f32.gmra.mrb[88].mxu0 %vm496_vm0, %v39292_v63 }
 0xe5f   : > { %28923 = vmatprep.mubr.msk.f32.mxu0 %vm496_vm0, %v39293_v30 }
 0xe62   : > { %28924 = vmatmul.mubr.msk.f32.gmra.mrb[90].mxu0 %vm496_vm0, %v39294_v39 }
 0xe63   : > { %28926 = vmatprep.mubr.msk.f32.mxu0 %vm496_vm0, %v39295_v49 }
 0xe66   : > { %28927 = vmatmul.mubr.msk.f32.gmra.mrb[92].mxu0 %vm496_vm0, %v39296_v58 }
 0xe67   : > { %28929 = vmatprep.mubr.msk.f32.mxu0 %vm496_vm0, %v18215_v41 }
 0xe6a   : > { %28930 = vmatmul.mubr.msk.f32.gmra.mrb[94].mxu0 %vm496_vm0, %v18216_v25 }
 0xf01   : > { %v28886_v38 = vpop.f32.mrb[64].mxu0 }
 0xf02   : > { %v18583_v27 = vadd.f32 %v28886_v38, %v36694_v8  ;;  %v18384_v14 = vpop.f32.mrb[65].mxu0 }
 0xf03   : > { %v18582_v45 = vadd.f32 %v36694_v8, %v18384_v14 }
 0xf04   : > { %v18615_v1 = vmax.f32 %v18583_v27, 0.0 }
 0xf05   : > { %v18614_v33 = vmax.f32 %v18582_v45, 0.0  ;;  %v28889_v62 = vpop.f32.mrb[66].mxu0 }
 0xf06   : > { %18647 = vst.msk [vmem:[#allocation2 + $0x30] sm:$0xff] %vm496_vm0, %v18615_v1  ;;  %v18585_v46 = vadd.f32 %v28889_v62, %v36694_v8  ;;  %v18394_v7 = vpop.f32.mrb[67].mxu0 }
 0xf07   : > { %18646 = vst.msk [vmem:[#allocation2 + $0x28] sm:$0xff] %vm496_vm0, %v18614_v33  ;;  %v18584_v51 = vadd.f32 %v36694_v8, %v18394_v7 }
 0xf08   : > { %v18617_v11 = vmax.f32 %v18585_v46, 0.0 }
 0xf09   : > { %v18616_v50 = vmax.f32 %v18584_v51, 0.0  ;;  %v28892_v57 = vpop.f32.mrb[68].mxu0 }
 0xf0a   : > { %18649 = vst.msk [vmem:[#allocation2 + $0x50] sm:$0xff] %vm496_vm0, %v18617_v11  ;;  %v18587_v9 = vadd.f32 %v28892_v57, %v36694_v8  ;;  %v18404_v2 = vpop.f32.mrb[69].mxu0 }
 0xf0b   : > { %18648 = vst.msk [vmem:[#allocation2 + $0x48] sm:$0xff] %vm496_vm0, %v18616_v50  ;;  %v18586_v28 = vadd.f32 %v36694_v8, %v18404_v2 }
 0xf0c   : > { %v18619_v52 = vmax.f32 %v18587_v9, 0.0 }
 0xf0d   : > { %v18618_v4 = vmax.f32 %v18586_v28, 0.0  ;;  %v28895_v12 = vpop.f32.mrb[70].mxu0  ;;  %v36714_v15 = vld [vmem:[#allocation2 + $0x30] sm:$0xff] }
 0xf0e   : > { %18651 = vst.msk [vmem:[#allocation2 + $0x70] sm:$0xff] %vm496_vm0, %v18619_v52  ;;  %v18589_v13 = vadd.f32 %v28895_v12, %v36694_v8  ;;  %v18414_v16 = vpop.f32.mrb[71].mxu0  ;;  %v36708_v19 = vld [vmem:[#allocation2 + $0x28] sm:$0xff] }
 0xf0f   : > { %18650 = vst.msk [vmem:[#allocation2 + $0x68] sm:$0xff] %vm496_vm0, %v18618_v4  ;;  %v18588_v5 = vadd.f32 %v36694_v8, %v18414_v16  ;;  %28943 = vmatprep.mubr.msk.f32.mxu1 %vm496_vm0, %v36708_v19 }
 0xf10   : > { %v18621_v40 = vmax.f32 %v18589_v13, 0.0  ;;  %28944 = vmatmul.mubr.msk.f32.gmra.mrb[66].mxu1 %vm496_vm0, %v36714_v15 }
 0xf11   : > { %v18620_v48 = vmax.f32 %v18588_v5, 0.0  ;;  %v28898_v59 = vpop.f32.mrb[72].mxu0  ;;  %v36726_v54 = vld [vmem:[#allocation2 + $0x50] sm:$0xff] }
 0xf12   : > { %18653 = vst.msk [vmem:[#allocation2 + $0x90] sm:$0xff] %vm496_vm0, %v18621_v40  ;;  %v18591_v34 = vadd.f32 %v28898_v59, %v36694_v8  ;;  %v18424_v44 = vpop.f32.mrb[73].mxu0  ;;  %v36720_v6 = vld [vmem:[#allocation2 + $0x48] sm:$0xff] }
 0xf13   : > { %18652 = vst.msk [vmem:[#allocation2 + $0x88] sm:$0xff] %vm496_vm0, %v18620_v48  ;;  %v18590_v22 = vadd.f32 %v36694_v8, %v18424_v44  ;;  %28946 = vmatprep.mubr.msk.f32.mxu1 %vm496_vm0, %v36720_v6 }
 0xf14   : > { %v18623_v10 = vmax.f32 %v18591_v34, 0.0  ;;  %28947 = vmatmul.mubr.msk.f32.gmra.mrb[68].mxu1 %vm496_vm0, %v36726_v54 }
 0xf15   : > { %v18622_v35 = vmax.f32 %v18590_v22, 0.0  ;;  %v28901_v18 = vpop.f32.mrb[74].mxu0  ;;  %v36738_v47 = vld [vmem:[#allocation2 + $0x70] sm:$0xff] }
 0xf16   : > { %18655 = vst.msk [vmem:[#allocation2 + $0xb0] sm:$0xff] %vm496_vm0, %v18623_v10  ;;  %v18593_v20 = vadd.f32 %v28901_v18, %v36694_v8  ;;  %v18434_v43 = vpop.f32.mrb[75].mxu0  ;;  %v36732_v32 = vld [vmem:[#allocation2 + $0x68] sm:$0xff] }
 0xf17   : > { %18654 = vst.msk [vmem:[#allocation2 + $0xa8] sm:$0xff] %vm496_vm0, %v18622_v35  ;;  %v18592_v53 = vadd.f32 %v36694_v8, %v18434_v43  ;;  %28949 = vmatprep.mubr.msk.f32.mxu1 %vm496_vm0, %v36732_v32 }
 0xf18   : > { %v18625_v0 = vmax.f32 %v18593_v20, 0.0  ;;  %28950 = vmatmul.mubr.msk.f32.gmra.mrb[70].mxu1 %vm496_vm0, %v36738_v47 }
 0xf19   : > { %v18624_v36 = vmax.f32 %v18592_v53, 0.0  ;;  %v28904_v37 = vpop.f32.mrb[76].mxu0  ;;  %v36750_v39 = vld [vmem:[#allocation2 + $0x90] sm:$0xff] }
 0xf1a   : > { %18657 = vst.msk [vmem:[#allocation2 + $0xd0] sm:$0xff] %vm496_vm0, %v18625_v0  ;;  %v18595_v3 = vadd.f32 %v28904_v37, %v36694_v8  ;;  %v18444_v17 = vpop.f32.mrb[77].mxu0  ;;  %v36744_v63 = vld [vmem:[#allocation2 + $0x88] sm:$0xff] }
 0xf1b   : > { %18656 = vst.msk [vmem:[#allocation2 + $0xc8] sm:$0xff] %vm496_vm0, %v18624_v36  ;;  %v18594_v30 = vadd.f32 %v36694_v8, %v18444_v17  ;;  %28952 = vmatprep.mubr.msk.f32.mxu1 %vm496_vm0, %v36744_v63 }
 0xf1c   : > { %v18627_v49 = vmax.f32 %v18595_v3, 0.0  ;;  %28953 = vmatmul.mubr.msk.f32.gmra.mrb[72].mxu1 %vm496_vm0, %v36750_v39 }
 0xf1d   : > { %v18626_v41 = vmax.f32 %v18594_v30, 0.0  ;;  %v28907_v58 = vpop.f32.mrb[78].mxu0  ;;  %v36762_v61 = vld [vmem:[#allocation2 + $0xb0] sm:$0xff] }
 0xf1e   : > { %18659 = vst.msk [vmem:[#allocation2 + $0xf0] sm:$0xff] %vm496_vm0, %v18627_v49  ;;  %v18597_v25 = vadd.f32 %v28907_v58, %v36694_v8  ;;  %v18454_v31 = vpop.f32.mrb[79].mxu0  ;;  %v36756_v24 = vld [vmem:[#allocation2 + $0xa8] sm:$0xff] }
 0xf1f   : > { %18658 = vst.msk [vmem:[#allocation2 + $0xe8] sm:$0xff] %vm496_vm0, %v18626_v41  ;;  %v18596_v26 = vadd.f32 %v36694_v8, %v18454_v31  ;;  %28955 = vmatprep.mubr.msk.f32.mxu1 %vm496_vm0, %v36756_v24 }
 0xf20   : > { %v18629_v23 = vmax.f32 %v18597_v25, 0.0  ;;  %28956 = vmatmul.mubr.msk.f32.gmra.mrb[74].mxu1 %vm496_vm0, %v36762_v61 }
 0xf21   : > { %v18628_v55 = vmax.f32 %v18596_v26, 0.0  ;;  %v28910_v60 = vpop.f32.mrb[80].mxu0  ;;  %v36774_v27 = vld [vmem:[#allocation2 + $0xd0] sm:$0xff] }
 0xf22   : > { %18661 = vst.msk [vmem:[#allocation2 + $0x110] sm:$0xff] %vm496_vm0, %v18629_v23  ;;  %v18599_v29 = vadd.f32 %v28910_v60, %v36694_v8  ;;  %v18464_v21 = vpop.f32.mrb[81].mxu0  ;;  %v36768_v42 = vld [vmem:[#allocation2 + $0xc8] sm:$0xff] }
 0xf23   : > { %18660 = vst.msk [vmem:[#allocation2 + $0x108] sm:$0xff] %vm496_vm0, %v18628_v55  ;;  %v18598_v38 = vadd.f32 %v36694_v8, %v18464_v21  ;;  %28958 = vmatprep.mubr.msk.f32.mxu1 %vm496_vm0, %v36768_v42 }
 0xf24   : > { %v18631_v14 = vmax.f32 %v18599_v29, 0.0  ;;  %28959 = vmatmul.mubr.msk.f32.gmra.mrb[76].mxu1 %vm496_vm0, %v36774_v27 }
 0xf25   : > { %v18630_v45 = vmax.f32 %v18598_v38, 0.0  ;;  %v28913_v1 = vpop.f32.mrb[82].mxu0  ;;  %v36786_v51 = vld [vmem:[#allocation2 + $0xf0] sm:$0xff] }
 0xf26   : > { %18663 = vst.msk [vmem:[#allocation2 + $0x130] sm:$0xff] %vm496_vm0, %v18631_v14  ;;  %v18601_v33 = vadd.f32 %v28913_v1, %v36694_v8  ;;  %v18474_v62 = vpop.f32.mrb[83].mxu0  ;;  %v36780_v46 = vld [vmem:[#allocation2 + $0xe8] sm:$0xff] }
 0xf27   : > { %18662 = vst.msk [vmem:[#allocation2 + $0x128] sm:$0xff] %vm496_vm0, %v18630_v45  ;;  %v18600_v7 = vadd.f32 %v36694_v8, %v18474_v62  ;;  %28961 = vmatprep.mubr.msk.f32.mxu1 %vm496_vm0, %v36780_v46 }
 0xf28   : > { %v18633_v11 = vmax.f32 %v18601_v33, 0.0  ;;  %28962 = vmatmul.mubr.msk.f32.gmra.mrb[78].mxu1 %vm496_vm0, %v36786_v51 }
 0xf29   : > { %v18632_v50 = vmax.f32 %v18600_v7, 0.0  ;;  %v28916_v57 = vpop.f32.mrb[84].mxu0  ;;  %v36798_v4 = vld [vmem:[#allocation2 + $0x110] sm:$0xff] }
 0xf2a   : > { %18665 = vst.msk [vmem:[#allocation2 + $0x150] sm:$0xff] %vm496_vm0, %v18633_v11  ;;  %v18603_v9 = vadd.f32 %v28916_v57, %v36694_v8  ;;  %v18484_v2 = vpop.f32.mrb[85].mxu0  ;;  %v36792_v28 = vld [vmem:[#allocation2 + $0x108] sm:$0xff] }
 0xf2b   : > { %18664 = vst.msk [vmem:[#allocation2 + $0x148] sm:$0xff] %vm496_vm0, %v18632_v50  ;;  %v18602_v52 = vadd.f32 %v36694_v8, %v18484_v2  ;;  %28964 = vmatprep.mubr.msk.f32.mxu1 %vm496_vm0, %v36792_v28  ;;  %v18678_v2 = vld [vmem:[#allocation2 + $0x7] sm:$0xff] }
 0xf2c   : > { %v18635_v12 = vmax.f32 %v18603_v9, 0.0  ;;  %28965 = vmatmul.mubr.msk.f32.gmra.mrb[80].mxu1 %vm496_vm0, %v36798_v4 }
 0xf2d   : > { %v18634_v13 = vmax.f32 %v18602_v52, 0.0  ;;  %v28919_v16 = vpop.f32.mrb[86].mxu0  ;;  %v36810_v34 = vld [vmem:[#allocation2 + $0x130] sm:$0xff] }
 0xf2e   : > { %18667 = vst.msk [vmem:[#allocation2 + $0x170] sm:$0xff] %vm496_vm0, %v18635_v12  ;;  %v18605_v5 = vadd.f32 %v28919_v16, %v36694_v8  ;;  %v18494_v40 = vpop.f32.mrb[87].mxu0  ;;  %v36804_v48 = vld [vmem:[#allocation2 + $0x128] sm:$0xff]  ;;  %v24375_v12 = vld [vmem:[%s39285_s28 + $0x50] sm:$0xff] }
 0xf2f   : > { %18666 = vst.msk [vmem:[#allocation2 + $0x168] sm:$0xff] %vm496_vm0, %v18634_v13  ;;  %v18604_v59 = vadd.f32 %v36694_v8, %v18494_v40  ;;  %28967 = vmatprep.mubr.msk.f32.mxu1 %vm496_vm0, %v36804_v48  ;;  %v24376_v13 = vld [vmem:[%s39285_s28 + $0x58] sm:$0xff]  ;;  %v18679_v16 = vld [vmem:[#allocation2 + $0xf] sm:$0xff]  ;;  %v24409_v40 = vld [vmem:[%s39285_s28 + $0x60] sm:$0xff] }
 0xf30   : > { %v18637_v44 = vmax.f32 %v18605_v5, 0.0  ;;  %28968 = vmatmul.mubr.msk.f32.gmra.mrb[82].mxu1 %vm496_vm0, %v36810_v34  ;;  %v29672_v5 = vpack.c.bf16 %v24376_v13, %v24375_v12 }
 0xf31   : > { %v18636_v22 = vmax.f32 %v18604_v59, 0.0  ;;  %v28922_v10 = vpop.f32.mrb[88].mxu0  ;;  %v36822_v53 = vld [vmem:[#allocation2 + $0x150] sm:$0xff]  ;;  %v24410_v59 = vld [vmem:[%s39285_s28 + $0x68] sm:$0xff] }
 0xf32   : > { %18669 = vst.msk [vmem:[#allocation2 + $0x190] sm:$0xff] %vm496_vm0, %v18637_v44  ;;  %v18607_v35 = vadd.f32 %v28922_v10, %v36694_v8  ;;  %v18504_v18 = vpop.f32.mrb[89].mxu0  ;;  %v36816_v20 = vld [vmem:[#allocation2 + $0x148] sm:$0xff] }
 0xf33   : > { %18668 = vst.msk [vmem:[#allocation2 + $0x188] sm:$0xff] %vm496_vm0, %v18636_v22  ;;  %v18606_v43 = vadd.f32 %v36694_v8, %v18504_v18  ;;  %28970 = vmatprep.mubr.msk.f32.mxu1 %vm496_vm0, %v36816_v20  ;;  %v36894_v44 = vld [vmem:[#allocation2 + $0x27] sm:$0xff]  ;;  %v36899_v22 = vpack.c.bf16 %v24410_v59, %v24409_v40  ;;  %v36901_v10 = vld [vmem:[#allocation2 + $0x2f] sm:$0xff]  ;;  %v24412_v59 = vld [vmem:[%s39285_s28 + $0x78] sm:$0xff] }
 0xf34   : > { %v18639_v0 = vmax.f32 %v18607_v35, 0.0  ;;  %28971 = vmatmul.mubr.msk.f32.gmra.mrb[84].mxu1 %vm496_vm0, %v36822_v53  ;;  %v36905_v35 = vld [vmem:[#allocation2 + $0x47] sm:$0xff]  ;;  %v24411_v40 = vld [vmem:[%s39285_s28 + $0x70] sm:$0xff] }
 0xf35   : > { %v18638_v36 = vmax.f32 %v18606_v43, 0.0  ;;  %v28925_v37 = vpop.f32.mrb[90].mxu0  ;;  %v36834_v41 = vld [vmem:[#allocation2 + $0x170] sm:$0xff]  ;;  %v36914_v18 = vld [vmem:[#allocation2 + $0x67] sm:$0xff] }
 0xf36   : > { %18671 = vst.msk [vmem:[#allocation2 + $0x1b0] sm:$0xff] %vm496_vm0, %v18639_v0  ;;  %v18609_v3 = vadd.f32 %v28925_v37, %v36694_v8  ;;  %v18514_v17 = vpop.f32.mrb[91].mxu0  ;;  %v36828_v30 = vld [vmem:[#allocation2 + $0x168] sm:$0xff] }
 0xf37   : > { %18670 = vst.msk [vmem:[#allocation2 + $0x1a8] sm:$0xff] %vm496_vm0, %v18638_v36  ;;  %v18608_v49 = vadd.f32 %v36694_v8, %v18514_v17  ;;  %28973 = vmatprep.mubr.msk.f32.mxu1 %vm496_vm0, %v36828_v30  ;;  %v36918_v43 = vld [vmem:[#allocation2 + $0x6f] sm:$0xff]  ;;  %v36922_v0 = vld [vmem:[#allocation2 + $0x87] sm:$0xff] }
 0xf38   : > { %v18641_v58 = vmax.f32 %v18609_v3, 0.0  ;;  %28974 = vmatmul.mubr.msk.f32.gmra.mrb[86].mxu1 %vm496_vm0, %v36834_v41  ;;  %v36926_v36 = vld [vmem:[#allocation2 + $0x8f] sm:$0xff]  ;;  %v36930_v37 = vld [vmem:[#allocation2 + $0xa7] sm:$0xff] }
 0xf39   : > { %v18640_v25 = vmax.f32 %v18608_v49, 0.0  ;;  %v28928_v31 = vpop.f32.mrb[92].mxu0  ;;  %v36846_v29 = vld [vmem:[#allocation2 + $0x190] sm:$0xff]  ;;  %v36938_v17 = vld [vmem:[#allocation2 + $0xc7] sm:$0xff] }
 0xf3a   : > { %18673 = vst.msk [vmem:[#allocation2 + $0x1d0] sm:$0xff] %vm496_vm0, %v18641_v58  ;;  %v18611_v26 = vadd.f32 %v28928_v31, %v36694_v8  ;;  %v18524_v23 = vpop.f32.mrb[93].mxu0  ;;  %v36840_v55 = vld [vmem:[#allocation2 + $0x188] sm:$0xff] }
 0xf3b   : > { %18672 = vst.msk [vmem:[#allocation2 + $0x1c8] sm:$0xff] %vm496_vm0, %v18640_v25  ;;  %v18610_v60 = vadd.f32 %v36694_v8, %v18524_v23  ;;  %28976 = vmatprep.mubr.msk.f32.mxu1 %vm496_vm0, %v36840_v55  ;;  %v36934_v3 = vld [vmem:[#allocation2 + $0xaf] sm:$0xff]  ;;  %v36946_v58 = vld [vmem:[#allocation2 + $0xe7] sm:$0xff] }
 0xf3c   : > { %v18643_v21 = vmax.f32 %v18611_v26, 0.0  ;;  %28977 = vmatmul.mubr.msk.f32.gmra.mrb[88].mxu1 %vm496_vm0, %v36846_v29  ;;  %v36942_v49 = vld [vmem:[#allocation2 + $0xcf] sm:$0xff]  ;;  %v36954_v31 = vld [vmem:[#allocation2 + $0x107] sm:$0xff] }
 0xf3d   : > { %v18642_v38 = vmax.f32 %v18610_v60, 0.0  ;;  %v28931_v14 = vpop.f32.mrb[94].mxu0  ;;  %v36858_v7 = vld [vmem:[#allocation2 + $0x1b0] sm:$0xff]  ;;  %v36962_v23 = vld [vmem:[#allocation2 + $0x127] sm:$0xff] }
 0xf3e   : > { %18675 = vst.msk [vmem:[#allocation2 + $0x1f0] sm:$0xff] %vm496_vm0, %v18643_v21  ;;  %v18613_v45 = vadd.f32 %v28931_v14, %v36694_v8  ;;  %v18534_v1 = vpop.f32.mrb[95].mxu0  ;;  %v36852_v33 = vld [vmem:[#allocation2 + $0x1a8] sm:$0xff]  ;;  %39297 = vst [vmem:[#allocation79_spill] sm:$0xff] %v36858_v7 }
 0xf3f   : > { %18674 = vst.msk [vmem:[#allocation2 + $0x1e8] sm:$0xff] %vm496_vm0, %v18642_v38  ;;  %v18612_v62 = vadd.f32 %v36694_v8, %v18534_v1  ;;  %28979 = vmatprep.mubr.msk.f32.mxu1 %vm496_vm0, %v36852_v33  ;;  %v36950_v25 = vld [vmem:[#allocation2 + $0xef] sm:$0xff]  ;;  %v36970_v21 = vld [vmem:[#allocation2 + $0x147] sm:$0xff] }
 0xf40   : > { %v18645_v11 = vmax.f32 %v18613_v45, 0.0  ;;  %28980 = vmatmul.mubr.msk.f32.gmra.mrb[90].mxu1 %vm496_vm0, %v36858_v7  ;;  %v36958_v26 = vld [vmem:[#allocation2 + $0x10f] sm:$0xff]  ;;  %v36978_v14 = vld [vmem:[#allocation2 + $0x167] sm:$0xff] }
 0xf41   : > { %v18644_v50 = vmax.f32 %v18612_v62, 0.0  ;;  %v36868_v8 = vld [vmem:[#allocation2 + $0x1d0] sm:$0xff]  ;;  %v36986_v1 = vld [vmem:[#allocation2 + $0x187] sm:$0xff] }
 0xf42   : > { %18677 = vst.msk [vmem:[#allocation2 + $0x210] sm:$0xff] %vm496_vm0, %v18645_v11  ;;  %v36863_v57 = vld [vmem:[#allocation2 + $0x1c8] sm:$0xff]  ;;  %39299 = vst [vmem:[#allocation46_spill] sm:$0xff] %v36868_v8 }
 0xf43   : > { %39298 = vst [vmem:[#allocation80_spill] sm:$0xff] %v36863_v57  ;;  %18676 = vst.msk [vmem:[#allocation2 + $0x208] sm:$0xff] %vm496_vm0, %v18644_v50  ;;  %28982 = vmatprep.mubr.msk.f32.mxu1 %vm496_vm0, %v36863_v57  ;;  %v36966_v60 = vld [vmem:[#allocation2 + $0x12f] sm:$0xff]  ;;  %v36994_v11 = vld [vmem:[#allocation2 + $0x1a7] sm:$0xff] }
 0xf44   : > { %28983 = vmatmul.mubr.msk.f32.gmra.mrb[92].mxu1 %vm496_vm0, %v36868_v8  ;;  %v36974_v38 = vld [vmem:[#allocation2 + $0x14f] sm:$0xff]  ;;  %v24445_v8 = vld [vmem:[%s39285_s28 + $0x80] sm:$0xff] }
 0xf45   : > { %v36876_v52 = vld [vmem:[#allocation2 + $0x1f0] sm:$0xff]  ;;  %v24446_v57 = vld [vmem:[%s39285_s28 + $0x88] sm:$0xff] }
 0xf46   : > { %v36872_v9 = vld [vmem:[#allocation2 + $0x1e8] sm:$0xff]  ;;  %39301 = vst [vmem:[#allocation25_spill] sm:$0xff] %v36876_v52 }
 0xf47   : > { %39300 = vst [vmem:[#allocation47_spill] sm:$0xff] %v36872_v9  ;;  %28985 = vmatprep.mubr.msk.f32.mxu1 %vm496_vm0, %v36872_v9  ;;  %v36982_v45 = vld [vmem:[#allocation2 + $0x16f] sm:$0xff]  ;;  %v37010_v13 = vld [vmem:[#allocation2 + $0x1e7] sm:$0xff]  ;;  %v29680_v9 = vpack.c.bf16 %v24412_v59, %v24411_v40 }
 0xf48   : > { %28986 = vmatmul.mubr.msk.f32.gmra.mrb[94].mxu1 %vm496_vm0, %v36876_v52  ;;  %v36990_v62 = vld [vmem:[#allocation2 + $0x18f] sm:$0xff] }
 0xf49   : > { %28996 = vmatprep.mubr.msk.f32.mxu1 %vm496_vm0, %v18678_v2  ;;  %v36998_v50 = vld [vmem:[#allocation2 + $0x1af] sm:$0xff]  ;;  %v37002_v2 = vld [vmem:[#allocation2 + $0x1c7] sm:$0xff] }
 0xf4a   : > { %v37006_v12 = vld [vmem:[#allocation2 + $0x1cf] sm:$0xff] }
 0xf4b   : > { %v19394_v52 = vld [vmem:[#allocation2 + $0x11] sm:$0xff]  ;;  %v37032_v7 = vld [vmem:[#allocation2 + $0x29] sm:$0xff] }
 0xf4c   : > { %28997 = vmatmul.mubr.msk.f32.vlgmr.msra.gmra.mrb[64].mxu1 %vm496_vm0, %v18679_v16  ;;  %v19393_v16 = vld [vmem:[#allocation2 + $0x9] sm:$0xff]  ;;  %v37039_v40 = vld [vmem:[#allocation2 + $0x31] sm:$0xff] }
 0xf4d   : > { %29671 = vmatpush3.bf16.msra.mxu1 %v36691_v56  ;;  %28999 = vmatprep.mubr.msk.f32.mxu1 %vm496_vm0, %v36894_v44  ;;  %v36910_v56 = vld [vmem:[#allocation2 + $0x4f] sm:$0xff] }
 0xf4e   : > { %29673 = vmatprep.subr.bf16.mxu1 %v29672_v5  ;;  %v37043_v59 = vld [vmem:[#allocation2 + $0x49] sm:$0xff] }
 0xf4f   : > { %39302 = vst [vmem:[#allocation26_spill] sm:$0xff] %v37043_v59 }
 0xf50   : > { %29000 = vmatmul.mubr.msk.f32.gmra.mrb[66].mxu1 %vm496_vm0, %v36901_v10 }
 0xf51   : > { %29002 = vmatprep.mubr.msk.f32.mxu1 %vm496_vm0, %v36905_v35  ;;  %29675 = vmatpush3.bf16.msra.mxu1 %v29672_v5  ;;  %v37014_v5 = vld [vmem:[#allocation2 + $0x1ef] sm:$0xff] }
 0xf52   : > { %29677 = vmatprep.subr.bf16.mxu1 %v36899_v22 }
 0xf54   : > { %29003 = vmatmul.mubr.msk.f32.gmra.mrb[68].mxu1 %vm496_vm0, %v36910_v56 }
 0xf55   : > { %29005 = vmatprep.mubr.msk.f32.mxu1 %vm496_vm0, %v36914_v18 }
 0xf58   : > { %29006 = vmatmul.mubr.msk.f32.gmra.mrb[70].mxu1 %vm496_vm0, %v36918_v43 }
 0xf59   : > { %29008 = vmatprep.mubr.msk.f32.mxu1 %vm496_vm0, %v36922_v0 }
 0xf5c   : > { %29009 = vmatmul.mubr.msk.f32.gmra.mrb[72].mxu1 %vm496_vm0, %v36926_v36 }
 0xf5d   : > { %29011 = vmatprep.mubr.msk.f32.mxu1 %vm496_vm0, %v36930_v37 }
 0xf60   : > { %29012 = vmatmul.mubr.msk.f32.gmra.mrb[74].mxu1 %vm496_vm0, %v36934_v3 }
 0xf61   : > { %29014 = vmatprep.mubr.msk.f32.mxu1 %vm496_vm0, %v36938_v17 }
 0xf64   : > { %29015 = vmatmul.mubr.msk.f32.gmra.mrb[76].mxu1 %vm496_vm0, %v36942_v49 }
 0xf65   : > { %29017 = vmatprep.mubr.msk.f32.mxu1 %vm496_vm0, %v36946_v58 }
 0xf68   : > { %29018 = vmatmul.mubr.msk.f32.gmra.mrb[78].mxu1 %vm496_vm0, %v36950_v25 }
 0xf69   : > { %29020 = vmatprep.mubr.msk.f32.mxu1 %vm496_vm0, %v36954_v31 }
 0xf6c   : > { %29021 = vmatmul.mubr.msk.f32.gmra.mrb[80].mxu1 %vm496_vm0, %v36958_v26 }
 0xf6d   : > { %29023 = vmatprep.mubr.msk.f32.mxu1 %vm496_vm0, %v36962_v23 }
 0xf70   : > { %29024 = vmatmul.mubr.msk.f32.gmra.mrb[82].mxu1 %vm496_vm0, %v36966_v60 }
 0xf71   : > { %29026 = vmatprep.mubr.msk.f32.mxu1 %vm496_vm0, %v36970_v21 }
 0xf74   : > { %29027 = vmatmul.mubr.msk.f32.gmra.mrb[84].mxu1 %vm496_vm0, %v36974_v38 }
 0xf75   : > { %29029 = vmatprep.mubr.msk.f32.mxu1 %vm496_vm0, %v36978_v14 }
 0xf78   : > { %29030 = vmatmul.mubr.msk.f32.gmra.mrb[86].mxu1 %vm496_vm0, %v36982_v45 }
 0xf79   : > { %29032 = vmatprep.mubr.msk.f32.mxu1 %vm496_vm0, %v36986_v1 }
 0xf7c   : > { %29033 = vmatmul.mubr.msk.f32.gmra.mrb[88].mxu1 %vm496_vm0, %v36990_v62 }
 0xf7d   : > { %29035 = vmatprep.mubr.msk.f32.mxu1 %vm496_vm0, %v36994_v11 }
 0xf80   : > { %29036 = vmatmul.mubr.msk.f32.gmra.mrb[90].mxu1 %vm496_vm0, %v36998_v50 }
 0xf81   : > { %29038 = vmatprep.mubr.msk.f32.mxu1 %vm496_vm0, %v37002_v2 }
 0xf84   : > { %29039 = vmatmul.mubr.msk.f32.gmra.mrb[92].mxu1 %vm496_vm0, %v37006_v12 }
 0xf85   : > { %29041 = vmatprep.mubr.msk.f32.mxu1 %vm496_vm0, %v37010_v13 }
 0xf88   : > { %29042 = vmatmul.mubr.msk.f32.gmra.mrb[94].mxu1 %vm496_vm0, %v37014_v5 }
 0xf89   : > { %29052 = vmatprep.mubr.msk.f32.mxu1 %vm496_vm0, %v19393_v16  ;;  %v37037_v16 = vpack.c.bf16 %v24446_v57, %v24445_v8  ;;  %v37052_v57 = vld [vmem:[#allocation2 + $0x69] sm:$0xff]  ;;  %v37056_v8 = vld [vmem:[#allocation2 + $0x71] sm:$0xff] }
 0xf8a   : > { %39304 = vst [vmem:[#allocation28_spill] sm:$0xff] %v37052_v57  ;;  %39305 = vst [vmem:[#allocation29_spill] sm:$0xff] %v37056_v8 }
 0xf8c   : > { %29053 = vmatmul.mubr.msk.f32.vlgmr.msra.gmra.mrb[64].mxu1 %vm496_vm0, %v19394_v52  ;;  %v37048_v52 = vld [vmem:[#allocation2 + $0x51] sm:$0xff] }
 0xf8d   : > { %29679 = vmatpush3.bf16.msra.mxu1 %v36899_v22  ;;  %29055 = vmatprep.mubr.msk.f32.mxu1 %vm496_vm0, %v37032_v7  ;;  %39303 = vst [vmem:[#allocation27_spill] sm:$0xff] %v37048_v52  ;;  %v37060_v22 = vld [vmem:[#allocation2 + $0x89] sm:$0xff] }
 0xf8e   : > { %29681 = vmatprep.subr.bf16.mxu1 %v29680_v9  ;;  %39306 = vst [vmem:[#allocation44_spill] sm:$0xff] %v37060_v22 }
 0xf90   : > { %29056 = vmatmul.mubr.msk.f32.gmra.mrb[66].mxu1 %vm496_vm0, %v37039_v40 }
 0xf91   : > { %29058 = vmatprep.mubr.msk.f32.mxu1 %vm496_vm0, %v37043_v59  ;;  %29683 = vmatpush3.bf16.msra.mxu1 %v29680_v9  ;;  %v37064_v9 = vld [vmem:[#allocation2 + $0x91] sm:$0xff]  ;;  %v24482_v59 = vld [vmem:[%s39285_s28 + $0xa8] sm:$0xff] }
 0xf92   : > { %29685 = vmatprep.subr.bf16.mxu1 %v37037_v16  ;;  %39307 = vst [vmem:[#allocation49_spill] sm:$0xff] %v37064_v9 }
 0xf94   : > { %29059 = vmatmul.mubr.msk.f32.gmra.mrb[68].mxu1 %vm496_vm0, %v37048_v52  ;;  %v37068_v52 = vld [vmem:[#allocation2 + $0xa9] sm:$0xff] }
 0xf95   : > { %29061 = vmatprep.mubr.msk.f32.mxu1 %vm496_vm0, %v37052_v57  ;;  %39308 = vst [vmem:[#allocation16_spill] sm:$0xff] %v37068_v52  ;;  %v37072_v57 = vld [vmem:[#allocation2 + $0xb1] sm:$0xff] }
 0xf96   : > { %39309 = vst [vmem:[#allocation71_spill] sm:$0xff] %v37072_v57 }
 0xf98   : > { %29062 = vmatmul.mubr.msk.f32.gmra.mrb[70].mxu1 %vm496_vm0, %v37056_v8  ;;  %v37076_v8 = vld [vmem:[#allocation2 + $0xc9] sm:$0xff] }
 0xf99   : > { %29064 = vmatprep.mubr.msk.f32.mxu1 %vm496_vm0, %v37060_v22  ;;  %39310 = vst [vmem:[#allocation68_spill] sm:$0xff] %v37076_v8  ;;  %v37080_v22 = vld [vmem:[#allocation2 + $0xd1] sm:$0xff] }
 0xf9a   : > { %39311 = vst [vmem:[#allocation76_spill] sm:$0xff] %v37080_v22 }
 0xf9c   : > { %29065 = vmatmul.mubr.msk.f32.gmra.mrb[72].mxu1 %vm496_vm0, %v37064_v9  ;;  %v37084_v9 = vld [vmem:[#allocation2 + $0xe9] sm:$0xff] }
 0xf9d   : > { %29067 = vmatprep.mubr.msk.f32.mxu1 %vm496_vm0, %v37068_v52  ;;  %39312 = vst [vmem:[#allocation30_spill] sm:$0xff] %v37084_v9  ;;  %v37088_v52 = vld [vmem:[#allocation2 + $0xf1] sm:$0xff] }
 0xf9e   : > { %39313 = vst [vmem:[#allocation31_spill] sm:$0xff] %v37088_v52 }
 0xfa0   : > { %29068 = vmatmul.mubr.msk.f32.gmra.mrb[74].mxu1 %vm496_vm0, %v37072_v57  ;;  %v37092_v57 = vld [vmem:[#allocation2 + $0x109] sm:$0xff] }
 0xfa1   : > { %29070 = vmatprep.mubr.msk.f32.mxu1 %vm496_vm0, %v37076_v8  ;;  %39314 = vst [vmem:[#allocation32_spill] sm:$0xff] %v37092_v57  ;;  %v37096_v8 = vld [vmem:[#allocation2 + $0x111] sm:$0xff] }
 0xfa2   : > { %39315 = vst [vmem:[#allocation33_spill] sm:$0xff] %v37096_v8 }
 0xfa4   : > { %29071 = vmatmul.mubr.msk.f32.gmra.mrb[76].mxu1 %vm496_vm0, %v37080_v22  ;;  %v37100_v22 = vld [vmem:[#allocation2 + $0x129] sm:$0xff] }
 0xfa5   : > { %29073 = vmatprep.mubr.msk.f32.mxu1 %vm496_vm0, %v37084_v9  ;;  %39316 = vst [vmem:[#allocation34_spill] sm:$0xff] %v37100_v22  ;;  %v37104_v9 = vld [vmem:[#allocation2 + $0x131] sm:$0xff] }
 0xfa6   : > { %39317 = vst [vmem:[#allocation35_spill] sm:$0xff] %v37104_v9 }
 0xfa8   : > { %29074 = vmatmul.mubr.msk.f32.gmra.mrb[78].mxu1 %vm496_vm0, %v37088_v52  ;;  %v37108_v52 = vld [vmem:[#allocation2 + $0x149] sm:$0xff] }
 0xfa9   : > { %29076 = vmatprep.mubr.msk.f32.mxu1 %vm496_vm0, %v37092_v57  ;;  %39318 = vst [vmem:[#allocation40_spill] sm:$0xff] %v37108_v52  ;;  %v37112_v57 = vld [vmem:[#allocation2 + $0x151] sm:$0xff] }
 0xfaa   : > { %39319 = vst [vmem:[#allocation42_spill] sm:$0xff] %v37112_v57 }
 0xfac   : > { %29077 = vmatmul.mubr.msk.f32.gmra.mrb[80].mxu1 %vm496_vm0, %v37096_v8  ;;  %v37116_v8 = vld [vmem:[#allocation2 + $0x169] sm:$0xff] }
 0xfad   : > { %29079 = vmatprep.mubr.msk.f32.mxu1 %vm496_vm0, %v37100_v22  ;;  %39320 = vst [vmem:[#allocation36_spill] sm:$0xff] %v37116_v8  ;;  %v37120_v22 = vld [vmem:[#allocation2 + $0x171] sm:$0xff] }
 0xfae   : > { %39321 = vst [vmem:[#allocation37_spill] sm:$0xff] %v37120_v22 }
 0xfb0   : > { %29080 = vmatmul.mubr.msk.f32.gmra.mrb[82].mxu1 %vm496_vm0, %v37104_v9  ;;  %v37124_v9 = vld [vmem:[#allocation2 + $0x189] sm:$0xff] }
 0xfb1   : > { %29082 = vmatprep.mubr.msk.f32.mxu1 %vm496_vm0, %v37108_v52  ;;  %39322 = vst [vmem:[#allocation38_spill] sm:$0xff] %v37124_v9  ;;  %v37128_v52 = vld [vmem:[#allocation2 + $0x191] sm:$0xff] }
 0xfb2   : > { %39323 = vst [vmem:[#allocation39_spill] sm:$0xff] %v37128_v52 }
 0xfb4   : > { %29083 = vmatmul.mubr.msk.f32.gmra.mrb[84].mxu1 %vm496_vm0, %v37112_v57  ;;  %v37132_v57 = vld [vmem:[#allocation2 + $0x1a9] sm:$0xff] }
 0xfb5   : > { %29085 = vmatprep.mubr.msk.f32.mxu1 %vm496_vm0, %v37116_v8  ;;  %39324 = vst [vmem:[#allocation41_spill] sm:$0xff] %v37132_v57  ;;  %v37136_v8 = vld [vmem:[#allocation2 + $0x1b1] sm:$0xff] }
 0xfb6   : > { %39325 = vst [vmem:[#allocation43_spill] sm:$0xff] %v37136_v8 }
 0xfb8   : > { %29086 = vmatmul.mubr.msk.f32.gmra.mrb[86].mxu1 %vm496_vm0, %v37120_v22  ;;  %v37140_v22 = vld [vmem:[#allocation2 + $0x1c9] sm:$0xff] }
 0xfb9   : > { %29088 = vmatprep.mubr.msk.f32.mxu1 %vm496_vm0, %v37124_v9  ;;  %39326 = vst [vmem:[#allocation45_spill] sm:$0xff] %v37140_v22  ;;  %v37144_v9 = vld [vmem:[#allocation2 + $0x1d1] sm:$0xff] }
 0xfba   : > { %39327 = vst [vmem:[#allocation63_spill] sm:$0xff] %v37144_v9 }
 0xfbc   : > { %29089 = vmatmul.mubr.msk.f32.gmra.mrb[88].mxu1 %vm496_vm0, %v37128_v52  ;;  %v37148_v52 = vld [vmem:[#allocation2 + $0x1e9] sm:$0xff] }
 0xfbd   : > { %29091 = vmatprep.mubr.msk.f32.mxu1 %vm496_vm0, %v37132_v57  ;;  %39328 = vst [vmem:[#allocation75_spill] sm:$0xff] %v37148_v52  ;;  %v37152_v57 = vld [vmem:[#allocation2 + $0x1f1] sm:$0xff] }
 0xfbe   : > { %39329 = vst [vmem:[#allocation77_spill] sm:$0xff] %v37152_v57 }
 0xfc0   : > { %29092 = vmatmul.mubr.msk.f32.gmra.mrb[90].mxu1 %vm496_vm0, %v37136_v8  ;;  %v24447_v8 = vld [vmem:[%s39285_s28 + $0x90] sm:$0xff] }
 0xfc1   : > { %29094 = vmatprep.mubr.msk.f32.mxu1 %vm496_vm0, %v37140_v22  ;;  %v24448_v22 = vld [vmem:[%s39285_s28 + $0x98] sm:$0xff] }
 0xfc4   : > { %29095 = vmatmul.mubr.msk.f32.gmra.mrb[92].mxu1 %vm496_vm0, %v37144_v9  ;;  %v29688_v9 = vpack.c.bf16 %v24448_v22, %v24447_v8  ;;  %v24517_v8 = vld [vmem:[%s39285_s28 + $0xc0] sm:$0xff]  ;;  %v24518_v22 = vld [vmem:[%s39285_s28 + $0xc8] sm:$0xff] }
 0xfc5   : > { %29097 = vmatprep.mubr.msk.f32.mxu1 %vm496_vm0, %v37148_v52  ;;  %v24481_v52 = vld [vmem:[%s39285_s28 + $0xa0] sm:$0xff] }
 0xfc8   : > { %29098 = vmatmul.mubr.msk.f32.gmra.mrb[94].mxu1 %vm496_vm0, %v37152_v57  ;;  %v29692_v57 = vpack.c.bf16 %v24482_v59, %v24481_v52  ;;  %v24484_v59 = vld [vmem:[%s39285_s28 + $0xb8] sm:$0xff] }
 0xfc9   : > { %29108 = vmatprep.mubr.msk.f32.mxu1 %vm496_vm0, %v36894_v44  ;;  %v37229_v44 = vld [vmem:[#allocation2 + $0x207] sm:$0xff] }
 0xfcc   : > { %29109 = vmatmul.mubr.msk.f32.vlgmr.msra.gmra.mrb[64].mxu1 %vm496_vm0, %v36901_v10  ;;  %v37233_v10 = vld [vmem:[#allocation2 + $0x20f] sm:$0xff] }
 0xfcd   : > { %29687 = vmatpush3.bf16.msra.mxu1 %v37037_v16  ;;  %29111 = vmatprep.mubr.msk.f32.mxu1 %vm496_vm0, %v36905_v35  ;;  %v24483_v16 = vld [vmem:[%s39285_s28 + $0xb0] sm:$0xff] }
 0xfce   : > { %29689 = vmatprep.subr.bf16.mxu1 %v29688_v9  ;;  %v29696_v52 = vpack.c.bf16 %v24484_v59, %v24483_v16  ;;  %v39349_v16 = vld [vmem:[#allocation34_spill] sm:$0xff]  ;;  %v39350_v59 = vld [vmem:[#allocation35_spill] sm:$0xff] }
 0xfd0   : > { %29112 = vmatmul.mubr.msk.f32.gmra.mrb[66].mxu1 %vm496_vm0, %v36910_v56 }
 0xfd1   : > { %29114 = vmatprep.mubr.msk.f32.mxu1 %vm496_vm0, %v36914_v18  ;;  %29691 = vmatpush3.bf16.msra.mxu1 %v29688_v9  ;;  %v29700_v9 = vpack.c.bf16 %v24518_v22, %v24517_v8  ;;  %v39352_v8 = vld [vmem:[#allocation42_spill] sm:$0xff]  ;;  %v39353_v22 = vld [vmem:[#allocation36_spill] sm:$0xff] }
 0xfd2   : > { %29693 = vmatprep.subr.bf16.mxu1 %v29692_v57 }
 0xfd4   : > { %29115 = vmatmul.mubr.msk.f32.gmra.mrb[68].mxu1 %vm496_vm0, %v36918_v43 }
 0xfd5   : > { %29117 = vmatprep.mubr.msk.f32.mxu1 %vm496_vm0, %v36922_v0 }
 0xfd8   : > { %29118 = vmatmul.mubr.msk.f32.gmra.mrb[70].mxu1 %vm496_vm0, %v36926_v36 }
 0xfd9   : > { %29120 = vmatprep.mubr.msk.f32.mxu1 %vm496_vm0, %v36930_v37 }
 0xfdc   : > { %29121 = vmatmul.mubr.msk.f32.gmra.mrb[72].mxu1 %vm496_vm0, %v36934_v3 }
 0xfdd   : > { %29123 = vmatprep.mubr.msk.f32.mxu1 %vm496_vm0, %v36938_v17 }
 0xfe0   : > { %29124 = vmatmul.mubr.msk.f32.gmra.mrb[74].mxu1 %vm496_vm0, %v36942_v49 }
 0xfe1   : > { %29126 = vmatprep.mubr.msk.f32.mxu1 %vm496_vm0, %v36946_v58 }
 0xfe4   : > { %29127 = vmatmul.mubr.msk.f32.gmra.mrb[76].mxu1 %vm496_vm0, %v36950_v25 }
 0xfe5   : > { %29129 = vmatprep.mubr.msk.f32.mxu1 %vm496_vm0, %v36954_v31 }
 0xfe8   : > { %29130 = vmatmul.mubr.msk.f32.gmra.mrb[78].mxu1 %vm496_vm0, %v36958_v26 }
 0xfe9   : > { %29132 = vmatprep.mubr.msk.f32.mxu1 %vm496_vm0, %v36962_v23 }
 0xfec   : > { %29133 = vmatmul.mubr.msk.f32.gmra.mrb[80].mxu1 %vm496_vm0, %v36966_v60 }
 0xfed   : > { %29135 = vmatprep.mubr.msk.f32.mxu1 %vm496_vm0, %v36970_v21 }
 0xff0   : > { %29136 = vmatmul.mubr.msk.f32.gmra.mrb[82].mxu1 %vm496_vm0, %v36974_v38 }
 0xff1   : > { %29138 = vmatprep.mubr.msk.f32.mxu1 %vm496_vm0, %v36978_v14 }
 0xff4   : > { %29139 = vmatmul.mubr.msk.f32.gmra.mrb[84].mxu1 %vm496_vm0, %v36982_v45 }
 0xff5   : > { %29141 = vmatprep.mubr.msk.f32.mxu1 %vm496_vm0, %v36986_v1 }
 0xff8   : > { %29142 = vmatmul.mubr.msk.f32.gmra.mrb[86].mxu1 %vm496_vm0, %v36990_v62 }
 0xff9   : > { %29144 = vmatprep.mubr.msk.f32.mxu1 %vm496_vm0, %v36994_v11 }
 0xffc   : > { %29145 = vmatmul.mubr.msk.f32.gmra.mrb[88].mxu1 %vm496_vm0, %v36998_v50 }
 0xffd   : > { %29147 = vmatprep.mubr.msk.f32.mxu1 %vm496_vm0, %v37002_v2 }
0x1000   : > { %29148 = vmatmul.mubr.msk.f32.gmra.mrb[90].mxu1 %vm496_vm0, %v37006_v12 }
0x1001   : > { %29150 = vmatprep.mubr.msk.f32.mxu1 %vm496_vm0, %v37010_v13 }
0x1004   : > { %29151 = vmatmul.mubr.msk.f32.gmra.mrb[92].mxu1 %vm496_vm0, %v37014_v5 }
0x1005   : > { %29153 = vmatprep.mubr.msk.f32.mxu1 %vm496_vm0, %v37229_v44 }
0x1008   : > { %29154 = vmatmul.mubr.msk.f32.gmra.mrb[94].mxu1 %vm496_vm0, %v37233_v10 }
0x1009   : > { %29164 = vmatprep.mubr.msk.f32.mxu1 %vm496_vm0, %v36708_v19  ;;  %v39330_v19 = vld [vmem:[#allocation79_spill] sm:$0xff] }
0x100c   : > { %29165 = vmatmul.mubr.msk.f32.vlgmr.msra.gmra.mrb[64].mxu1 %vm496_vm0, %v36714_v15  ;;  %v39331_v15 = vld [vmem:[#allocation80_spill] sm:$0xff] }
0x100d   : > { %29695 = vmatpush3.bf16.msra.mxu1 %v29692_v57  ;;  %29167 = vmatprep.mubr.msk.f32.mxu1 %vm496_vm0, %v36720_v6  ;;  %v39332_v6 = vld [vmem:[#allocation46_spill] sm:$0xff]  ;;  %v39348_v57 = vld [vmem:[#allocation33_spill] sm:$0xff] }
0x100e   : > { %29697 = vmatprep.subr.bf16.mxu1 %v29696_v52 }
0x1010   : > { %29168 = vmatmul.mubr.msk.f32.gmra.mrb[66].mxu1 %vm496_vm0, %v36726_v54  ;;  %v39333_v54 = vld [vmem:[#allocation47_spill] sm:$0xff] }
0x1011   : > { %29170 = vmatprep.mubr.msk.f32.mxu1 %vm496_vm0, %v36732_v32  ;;  %29699 = vmatpush3.bf16.msra.mxu1 %v29696_v52  ;;  %v39334_v32 = vld [vmem:[#allocation25_spill] sm:$0xff]  ;;  %v39351_v52 = vld [vmem:[#allocation40_spill] sm:$0xff] }
0x1012   : > { %29701 = vmatprep.subr.bf16.mxu1 %v29700_v9 }
0x1014   : > { %29171 = vmatmul.mubr.msk.f32.gmra.mrb[68].mxu1 %vm496_vm0, %v36738_v47  ;;  %v37309_v47 = vld [vmem:[#allocation2 + $0x208] sm:$0xff] }
0x1015   : > { %29173 = vmatprep.mubr.msk.f32.mxu1 %vm496_vm0, %v36744_v63  ;;  %v37313_v63 = vld [vmem:[#allocation2 + $0x210] sm:$0xff] }
0x1018   : > { %29174 = vmatmul.mubr.msk.f32.gmra.mrb[70].mxu1 %vm496_vm0, %v36750_v39  ;;  %v24519_v39 = vld [vmem:[%s39285_s28 + $0xd0] sm:$0xff] }
0x1019   : > { %29176 = vmatprep.mubr.msk.f32.mxu1 %vm496_vm0, %v36756_v24  ;;  %v24520_v24 = vld [vmem:[%s39285_s28 + $0xd8] sm:$0xff] }
0x101c   : > { %29177 = vmatmul.mubr.msk.f32.gmra.mrb[72].mxu1 %vm496_vm0, %v36762_v61  ;;  %v29704_v61 = vpack.c.bf16 %v24520_v24, %v24519_v39  ;;  %v39355_v39 = vld [vmem:[#allocation38_spill] sm:$0xff]  ;;  %v39356_v24 = vld [vmem:[#allocation39_spill] sm:$0xff] }
0x101d   : > { %29179 = vmatprep.mubr.msk.f32.mxu1 %vm496_vm0, %v36768_v42  ;;  %v24553_v42 = vld [vmem:[%s39285_s28 + $0xe0] sm:$0xff] }
0x1020   : > { %29180 = vmatmul.mubr.msk.f32.gmra.mrb[74].mxu1 %vm496_vm0, %v36774_v27  ;;  %v24554_v27 = vld [vmem:[%s39285_s28 + $0xe8] sm:$0xff] }
0x1021   : > { %29182 = vmatprep.mubr.msk.f32.mxu1 %vm496_vm0, %v36780_v46  ;;  %v39335_v46 = vld [vmem:[#allocation26_spill] sm:$0xff] }
0x1024   : > { %29183 = vmatmul.mubr.msk.f32.gmra.mrb[76].mxu1 %vm496_vm0, %v36786_v51  ;;  %v29708_v51 = vpack.c.bf16 %v24554_v27, %v24553_v42  ;;  %v39358_v42 = vld [vmem:[#allocation43_spill] sm:$0xff]  ;;  %v39359_v27 = vld [vmem:[#allocation45_spill] sm:$0xff] }
0x1025   : > { %29185 = vmatprep.mubr.msk.f32.mxu1 %vm496_vm0, %v36792_v28  ;;  %v39336_v28 = vld [vmem:[#allocation27_spill] sm:$0xff] }
0x1028   : > { %29186 = vmatmul.mubr.msk.f32.gmra.mrb[78].mxu1 %vm496_vm0, %v36798_v4  ;;  %v39337_v4 = vld [vmem:[#allocation28_spill] sm:$0xff] }
0x1029   : > { %29188 = vmatprep.mubr.msk.f32.mxu1 %vm496_vm0, %v36804_v48  ;;  %v39338_v48 = vld [vmem:[#allocation29_spill] sm:$0xff] }
0x102c   : > { %29189 = vmatmul.mubr.msk.f32.gmra.mrb[80].mxu1 %vm496_vm0, %v36810_v34  ;;  %v39339_v34 = vld [vmem:[#allocation44_spill] sm:$0xff] }
0x102d   : > { %29191 = vmatprep.mubr.msk.f32.mxu1 %vm496_vm0, %v36816_v20  ;;  %v39340_v20 = vld [vmem:[#allocation49_spill] sm:$0xff] }
0x1030   : > { %29192 = vmatmul.mubr.msk.f32.gmra.mrb[82].mxu1 %vm496_vm0, %v36822_v53  ;;  %v39341_v53 = vld [vmem:[#allocation16_spill] sm:$0xff] }
0x1031   : > { %29194 = vmatprep.mubr.msk.f32.mxu1 %vm496_vm0, %v36828_v30  ;;  %v39342_v30 = vld [vmem:[#allocation71_spill] sm:$0xff] }
0x1034   : > { %29195 = vmatmul.mubr.msk.f32.gmra.mrb[84].mxu1 %vm496_vm0, %v36834_v41  ;;  %v39343_v41 = vld [vmem:[#allocation68_spill] sm:$0xff] }
0x1035   : > { %29197 = vmatprep.mubr.msk.f32.mxu1 %vm496_vm0, %v36840_v55  ;;  %v39344_v55 = vld [vmem:[#allocation76_spill] sm:$0xff] }
0x1038   : > { %29198 = vmatmul.mubr.msk.f32.gmra.mrb[86].mxu1 %vm496_vm0, %v36846_v29  ;;  %v39345_v29 = vld [vmem:[#allocation30_spill] sm:$0xff] }
0x1039   : > { %29200 = vmatprep.mubr.msk.f32.mxu1 %vm496_vm0, %v36852_v33 }
0x103c   : > { %29201 = vmatmul.mubr.msk.f32.gmra.mrb[88].mxu1 %vm496_vm0, %v39330_v19 }
0x103d   : > { %29203 = vmatprep.mubr.msk.f32.mxu1 %vm496_vm0, %v39331_v15 }
0x1040   : > { %29204 = vmatmul.mubr.msk.f32.gmra.mrb[90].mxu1 %vm496_vm0, %v39332_v6 }
0x1041   : > { %29206 = vmatprep.mubr.msk.f32.mxu1 %vm496_vm0, %v39333_v54 }
0x1044   : > { %29207 = vmatmul.mubr.msk.f32.gmra.mrb[92].mxu1 %vm496_vm0, %v39334_v32 }
0x1045   : > { %29209 = vmatprep.mubr.msk.f32.mxu1 %vm496_vm0, %v37309_v47 }
0x1048   : > { %29210 = vmatmul.mubr.msk.f32.gmra.mrb[94].mxu1 %vm496_vm0, %v37313_v63 }
0x1049   : > { %29220 = vmatprep.mubr.msk.f32.mxu1 %vm496_vm0, %v37032_v7  ;;  %v39346_v7 = vld [vmem:[#allocation31_spill] sm:$0xff] }
0x104c   : > { %29221 = vmatmul.mubr.msk.f32.vlgmr.msra.gmra.mrb[64].mxu1 %vm496_vm0, %v37039_v40  ;;  %v39347_v40 = vld [vmem:[#allocation32_spill] sm:$0xff] }
0x104d   : > { %29703 = vmatpush3.bf16.msra.mxu1 %v29700_v9  ;;  %29223 = vmatprep.mubr.msk.f32.mxu1 %vm496_vm0, %v39335_v46  ;;  %v39354_v9 = vld [vmem:[#allocation37_spill] sm:$0xff] }
0x104e   : > { %29705 = vmatprep.subr.bf16.mxu1 %v29704_v61 }
0x1050   : > { %29224 = vmatmul.mubr.msk.f32.gmra.mrb[66].mxu1 %vm496_vm0, %v39336_v28 }
0x1051   : > { %29226 = vmatprep.mubr.msk.f32.mxu1 %vm496_vm0, %v39337_v4  ;;  %29707 = vmatpush3.bf16.msra.mxu1 %v29704_v61  ;;  %v39357_v61 = vld [vmem:[#allocation41_spill] sm:$0xff] }
0x1052   : > { %29709 = vmatprep.subr.bf16.mxu1 %v29708_v51 }
0x1054   : > { %29227 = vmatmul.mubr.msk.f32.gmra.mrb[68].mxu1 %vm496_vm0, %v39338_v48 }
0x1055   : > { %29229 = vmatprep.mubr.msk.f32.mxu1 %vm496_vm0, %v39339_v34 }
0x1058   : > { %29230 = vmatmul.mubr.msk.f32.gmra.mrb[70].mxu1 %vm496_vm0, %v39340_v20 }
0x1059   : > { %29232 = vmatprep.mubr.msk.f32.mxu1 %vm496_vm0, %v39341_v53 }
0x105c   : > { %29233 = vmatmul.mubr.msk.f32.gmra.mrb[72].mxu1 %vm496_vm0, %v39342_v30 }
0x105d   : > { %29235 = vmatprep.mubr.msk.f32.mxu1 %vm496_vm0, %v39343_v41 }
0x1060   : > { %29236 = vmatmul.mubr.msk.f32.gmra.mrb[74].mxu1 %vm496_vm0, %v39344_v55 }
0x1061   : > { %29238 = vmatprep.mubr.msk.f32.mxu1 %vm496_vm0, %v39345_v29 }
0x1064   : > { %29239 = vmatmul.mubr.msk.f32.gmra.mrb[76].mxu1 %vm496_vm0, %v39346_v7 }
0x1065   : > { %29241 = vmatprep.mubr.msk.f32.mxu1 %vm496_vm0, %v39347_v40 }
0x1068   : > { %29242 = vmatmul.mubr.msk.f32.gmra.mrb[78].mxu1 %vm496_vm0, %v39348_v57 }
0x1069   : > { %29244 = vmatprep.mubr.msk.f32.mxu1 %vm496_vm0, %v39349_v16 }
0x106c   : > { %29245 = vmatmul.mubr.msk.f32.gmra.mrb[80].mxu1 %vm496_vm0, %v39350_v59 }
0x106d   : > { %29247 = vmatprep.mubr.msk.f32.mxu1 %vm496_vm0, %v39351_v52 }
0x1070   : > { %29248 = vmatmul.mubr.msk.f32.gmra.mrb[82].mxu1 %vm496_vm0, %v39352_v8  ;;  %v39360_v8 = vld [vmem:[#allocation63_spill] sm:$0xff] }
0x1071   : > { %29250 = vmatprep.mubr.msk.f32.mxu1 %vm496_vm0, %v39353_v22  ;;  %v39361_v22 = vld [vmem:[#allocation75_spill] sm:$0xff] }
0x1074   : > { %29251 = vmatmul.mubr.msk.f32.gmra.mrb[84].mxu1 %vm496_vm0, %v39354_v9  ;;  %v39362_v9 = vld [vmem:[#allocation77_spill] sm:$0xff] }
0x1075   : > { %29253 = vmatprep.mubr.msk.f32.mxu1 %vm496_vm0, %v39355_v39  ;;  %v37389_v39 = vld [vmem:[#allocation2 + $0x209] sm:$0xff] }
0x1076   : > { %39363 = vst [vmem:[#allocation78_spill] sm:$0xff] %v37389_v39 }
0x1078   : > { %29254 = vmatmul.mubr.msk.f32.gmra.mrb[86].mxu1 %vm496_vm0, %v39356_v24 }
0x1079   : > { %29256 = vmatprep.mubr.msk.f32.mxu1 %vm496_vm0, %v39357_v61  ;;  %v37393_v61 = vld [vmem:[#allocation2 + $0x211] sm:$0xff] }
0x107a   : > { %39364 = vst [vmem:[#allocation79_spill] sm:$0xff] %v37393_v61 }
0x107c   : > { %29257 = vmatmul.mubr.msk.f32.gmra.mrb[88].mxu1 %vm496_vm0, %v39358_v42 }
0x107d   : > { %29259 = vmatprep.mubr.msk.f32.mxu1 %vm496_vm0, %v39359_v27  ;;  %v24555_v27 = vld [vmem:[%s39285_s28 + $0xf0] sm:$0xff] }
0x1080   : > { %29260 = vmatmul.mubr.msk.f32.gmra.mrb[90].mxu1 %vm496_vm0, %v39360_v8  ;;  %v24556_v8 = vld [vmem:[%s39285_s28 + $0xf8] sm:$0xff] }
0x1081   : > { %29262 = vmatprep.mubr.msk.f32.mxu1 %vm496_vm0, %v39361_v22  ;;  %v24590_v22 = vld [vmem:[%s39285_s28 + $0x108] sm:$0xff] }
0x1084   : > { %29263 = vmatmul.mubr.msk.f32.gmra.mrb[92].mxu1 %vm496_vm0, %v39362_v9  ;;  %v29712_v9 = vpack.c.bf16 %v24556_v8, %v24555_v27 }
0x1085   : > { %29265 = vmatprep.mubr.msk.f32.mxu1 %vm496_vm0, %v37389_v39  ;;  %v24589_v39 = vld [vmem:[%s39285_s28 + $0x100] sm:$0xff] }
0x1088   : > { %29266 = vmatmul.mubr.msk.f32.gmra.mrb[94].mxu1 %vm496_vm0, %v37393_v61  ;;  %v29716_v61 = vpack.c.bf16 %v24590_v22, %v24589_v39  ;;  %v39378_v22 = vld [vmem:[#allocation51_spill] sm:$0xff]  ;;  %v39379_v39 = vld [vmem:[#allocation52_spill] sm:$0xff] }
0x1089   : > { %29276 = vmatprep.mubr.msk.f32.mxu1 %vm496_vm0, %v36905_v35  ;;  %v20983_v35 = vld [vmem:[#allocation2 + $0x227] sm:$0xff] }
0x108c   : > { %29277 = vmatmul.mubr.msk.f32.vlgmr.msra.gmra.mrb[64].mxu1 %vm496_vm0, %v36910_v56  ;;  %v20984_v56 = vld [vmem:[#allocation2 + $0x22f] sm:$0xff] }
0x108d   : > { %29711 = vmatpush3.bf16.msra.mxu1 %v29708_v51  ;;  %29279 = vmatprep.mubr.msk.f32.mxu1 %vm496_vm0, %v36914_v18  ;;  %v24591_v18 = vld [vmem:[%s39285_s28 + $0x110] sm:$0xff] }
0x108e   : > { %29713 = vmatprep.subr.bf16.mxu1 %v29712_v9  ;;  %v21763_v51 = vld [vmem:[#allocation2 + $0x229] sm:$0xff] }
0x1090   : > { %29280 = vmatmul.mubr.msk.f32.gmra.mrb[66].mxu1 %vm496_vm0, %v36918_v43  ;;  %v24592_v43 = vld [vmem:[%s39285_s28 + $0x118] sm:$0xff] }
0x1091   : > { %29282 = vmatprep.mubr.msk.f32.mxu1 %vm496_vm0, %v36922_v0  ;;  %29715 = vmatpush3.bf16.msra.mxu1 %v29712_v9  ;;  %v21343_v0 = vld [vmem:[#allocation2 + $0x48] sm:$0xff] }
0x1092   : > { %29717 = vmatprep.subr.bf16.mxu1 %v29716_v61 }
0x1094   : > { %29283 = vmatmul.mubr.msk.f32.gmra.mrb[68].mxu1 %vm496_vm0, %v36926_v36  ;;  %v29720_v36 = vpack.c.bf16 %v24592_v43, %v24591_v18  ;;  %v39380_v43 = vld [vmem:[#allocation53_spill] sm:$0xff] }
0x1095   : > { %29285 = vmatprep.mubr.msk.f32.mxu1 %vm496_vm0, %v36930_v37  ;;  %v21344_v37 = vld [vmem:[#allocation2 + $0x50] sm:$0xff] }
0x1098   : > { %29286 = vmatmul.mubr.msk.f32.gmra.mrb[70].mxu1 %vm496_vm0, %v36934_v3  ;;  %v21345_v3 = vld [vmem:[#allocation2 + $0x68] sm:$0xff] }
0x1099   : > { %29288 = vmatprep.mubr.msk.f32.mxu1 %vm496_vm0, %v36938_v17  ;;  %v21346_v17 = vld [vmem:[#allocation2 + $0x70] sm:$0xff] }
0x109c   : > { %29289 = vmatmul.mubr.msk.f32.gmra.mrb[72].mxu1 %vm496_vm0, %v36942_v49  ;;  %v21347_v49 = vld [vmem:[#allocation2 + $0x88] sm:$0xff] }
0x109d   : > { %29291 = vmatprep.mubr.msk.f32.mxu1 %vm496_vm0, %v36946_v58  ;;  %v21348_v58 = vld [vmem:[#allocation2 + $0x90] sm:$0xff] }
0x10a0   : > { %29292 = vmatmul.mubr.msk.f32.gmra.mrb[74].mxu1 %vm496_vm0, %v36950_v25  ;;  %v21349_v25 = vld [vmem:[#allocation2 + $0xa8] sm:$0xff] }
0x10a1   : > { %29294 = vmatprep.mubr.msk.f32.mxu1 %vm496_vm0, %v36954_v31  ;;  %v21350_v31 = vld [vmem:[#allocation2 + $0xb0] sm:$0xff] }
0x10a4   : > { %29295 = vmatmul.mubr.msk.f32.gmra.mrb[76].mxu1 %vm496_vm0, %v36958_v26  ;;  %v21351_v26 = vld [vmem:[#allocation2 + $0xc8] sm:$0xff] }
0x10a5   : > { %29297 = vmatprep.mubr.msk.f32.mxu1 %vm496_vm0, %v36962_v23  ;;  %v21352_v23 = vld [vmem:[#allocation2 + $0xd0] sm:$0xff] }
0x10a8   : > { %29298 = vmatmul.mubr.msk.f32.gmra.mrb[78].mxu1 %vm496_vm0, %v36966_v60  ;;  %v21353_v60 = vld [vmem:[#allocation2 + $0xe8] sm:$0xff] }
0x10a9   : > { %29300 = vmatprep.mubr.msk.f32.mxu1 %vm496_vm0, %v36970_v21  ;;  %v21354_v21 = vld [vmem:[#allocation2 + $0xf0] sm:$0xff] }
0x10ac   : > { %29301 = vmatmul.mubr.msk.f32.gmra.mrb[80].mxu1 %vm496_vm0, %v36974_v38  ;;  %v21355_v38 = vld [vmem:[#allocation2 + $0x108] sm:$0xff] }
0x10ad   : > { %29303 = vmatprep.mubr.msk.f32.mxu1 %vm496_vm0, %v36978_v14  ;;  %v21356_v14 = vld [vmem:[#allocation2 + $0x110] sm:$0xff] }
0x10b0   : > { %29304 = vmatmul.mubr.msk.f32.gmra.mrb[82].mxu1 %vm496_vm0, %v36982_v45  ;;  %v21357_v45 = vld [vmem:[#allocation2 + $0x128] sm:$0xff] }
0x10b1   : > { %29306 = vmatprep.mubr.msk.f32.mxu1 %vm496_vm0, %v36986_v1  ;;  %v21358_v1 = vld [vmem:[#allocation2 + $0x130] sm:$0xff] }
0x10b4   : > { %29307 = vmatmul.mubr.msk.f32.gmra.mrb[84].mxu1 %vm496_vm0, %v36990_v62  ;;  %v21359_v62 = vld [vmem:[#allocation2 + $0x148] sm:$0xff] }
0x10b5   : > { %29309 = vmatprep.mubr.msk.f32.mxu1 %vm496_vm0, %v36994_v11  ;;  %v21360_v11 = vld [vmem:[#allocation2 + $0x150] sm:$0xff] }
0x10b8   : > { %29310 = vmatmul.mubr.msk.f32.gmra.mrb[86].mxu1 %vm496_vm0, %v36998_v50  ;;  %v21361_v50 = vld [vmem:[#allocation2 + $0x168] sm:$0xff] }
0x10b9   : > { %29312 = vmatprep.mubr.msk.f32.mxu1 %vm496_vm0, %v37002_v2  ;;  %v21362_v2 = vld [vmem:[#allocation2 + $0x170] sm:$0xff] }
0x10bc   : > { %29313 = vmatmul.mubr.msk.f32.gmra.mrb[88].mxu1 %vm496_vm0, %v37006_v12  ;;  %v21363_v12 = vld [vmem:[#allocation2 + $0x188] sm:$0xff] }
0x10bd   : > { %29315 = vmatprep.mubr.msk.f32.mxu1 %vm496_vm0, %v37010_v13  ;;  %v21364_v13 = vld [vmem:[#allocation2 + $0x190] sm:$0xff] }
0x10c0   : > { %29316 = vmatmul.mubr.msk.f32.gmra.mrb[90].mxu1 %vm496_vm0, %v37014_v5  ;;  %v21373_v5 = vld [vmem:[#allocation2 + $0x228] sm:$0xff] }
0x10c1   : > { %29318 = vmatprep.mubr.msk.f32.mxu1 %vm496_vm0, %v37229_v44  ;;  %v39365_v44 = vld [vmem:[#allocation42_spill] sm:$0xff] }
0x10c4   : > { %29319 = vmatmul.mubr.msk.f32.gmra.mrb[92].mxu1 %vm496_vm0, %v37233_v10  ;;  %v39366_v10 = vld [vmem:[#allocation36_spill] sm:$0xff] }
0x10c5   : > { %29321 = vmatprep.mubr.msk.f32.mxu1 %vm496_vm0, %v20983_v35 }
0x10c8   : > { %29322 = vmatmul.mubr.msk.f32.gmra.mrb[94].mxu1 %vm496_vm0, %v20984_v56 }
0x10c9   : > { %29332 = vmatprep.mubr.msk.f32.mxu1 %vm496_vm0, %v21343_v0 }
0x10cc   : > { %29333 = vmatmul.mubr.msk.f32.vlgmr.msra.gmra.mrb[64].mxu1 %vm496_vm0, %v21344_v37 }
0x10cd   : > { %29719 = vmatpush3.bf16.msra.mxu1 %v29716_v61  ;;  %29335 = vmatprep.mubr.msk.f32.mxu1 %vm496_vm0, %v21345_v3 }
0x10ce   : > { %29721 = vmatprep.subr.bf16.mxu1 %v29720_v36 }
0x10d0   : > { %29336 = vmatmul.mubr.msk.f32.gmra.mrb[66].mxu1 %vm496_vm0, %v21346_v17 }
0x10d1   : > { %29338 = vmatprep.mubr.msk.f32.mxu1 %vm496_vm0, %v21347_v49  ;;  %29723 = vmatpush3.bf16.msra.mxu1 %v29720_v36  ;;  %v39381_v36 = vld [vmem:[#allocation65_spill] sm:$0xff] }
0x10d4   : > { %29339 = vmatmul.mubr.msk.f32.gmra.mrb[68].mxu1 %vm496_vm0, %v21348_v58 }
0x10d5   : > { %29341 = vmatprep.mubr.msk.f32.mxu1 %vm496_vm0, %v21349_v25 }
0x10d8   : > { %29342 = vmatmul.mubr.msk.f32.gmra.mrb[70].mxu1 %vm496_vm0, %v21350_v31 }
0x10d9   : > { %29344 = vmatprep.mubr.msk.f32.mxu1 %vm496_vm0, %v21351_v26  ;;  %v39382_v26 = vld [vmem:[#allocation67_spill] sm:$0xff] }
0x10dc   : > { %29345 = vmatmul.mubr.msk.f32.gmra.mrb[72].mxu1 %vm496_vm0, %v21352_v23 }
0x10dd   : > { %29347 = vmatprep.mubr.msk.f32.mxu1 %vm496_vm0, %v21353_v60  ;;  %v39383_v60 = vld [vmem:[#allocation69_spill] sm:$0xff] }
0x10e0   : > { %29348 = vmatmul.mubr.msk.f32.gmra.mrb[74].mxu1 %vm496_vm0, %v21354_v21 }
0x10e1   : > { %29350 = vmatprep.mubr.msk.f32.mxu1 %vm496_vm0, %v21355_v38 }
0x10e4   : > { %29351 = vmatmul.mubr.msk.f32.gmra.mrb[76].mxu1 %vm496_vm0, %v21356_v14 }
0x10e5   : > { %29353 = vmatprep.mubr.msk.f32.mxu1 %vm496_vm0, %v21357_v45 }
0x10e8   : > { %29354 = vmatmul.mubr.msk.f32.gmra.mrb[78].mxu1 %vm496_vm0, %v21358_v1 }
0x10e9   : > { %29356 = vmatprep.mubr.msk.f32.mxu1 %vm496_vm0, %v21359_v62 }
0x10ec   : > { %29357 = vmatmul.mubr.msk.f32.gmra.mrb[80].mxu1 %vm496_vm0, %v21360_v11 }
0x10ed   : > { %29359 = vmatprep.mubr.msk.f32.mxu1 %vm496_vm0, %v21361_v50  ;;  %v39384_v50 = vld [vmem:[#allocation70_spill] sm:$0xff] }
0x10f0   : > { %29360 = vmatmul.mubr.msk.f32.gmra.mrb[82].mxu1 %vm496_vm0, %v21362_v2 }
0x10f1   : > { %29362 = vmatprep.mubr.msk.f32.mxu1 %vm496_vm0, %v21363_v12  ;;  %v39385_v12 = vld [vmem:[#allocation72_spill] sm:$0xff] }
0x10f4   : > { %29363 = vmatmul.mubr.msk.f32.gmra.mrb[84].mxu1 %vm496_vm0, %v21364_v13 }
0x10f5   : > { %29365 = vmatprep.mubr.msk.f32.mxu1 %vm496_vm0, %v36852_v33  ;;  %v21374_v33 = vld [vmem:[#allocation2 + $0x230] sm:$0xff] }
0x10f8   : > { %29366 = vmatmul.mubr.msk.f32.gmra.mrb[86].mxu1 %vm496_vm0, %v39330_v19  ;;  %v39367_v19 = vld [vmem:[#allocation37_spill] sm:$0xff] }
0x10f9   : > { %29368 = vmatprep.mubr.msk.f32.mxu1 %vm496_vm0, %v39331_v15  ;;  %v39368_v15 = vld [vmem:[#allocation38_spill] sm:$0xff] }
0x10fc   : > { %29369 = vmatmul.mubr.msk.f32.gmra.mrb[88].mxu1 %vm496_vm0, %v39332_v6  ;;  %v39369_v6 = vld [vmem:[#allocation41_spill] sm:$0xff] }
0x10fd   : > { %29371 = vmatprep.mubr.msk.f32.mxu1 %vm496_vm0, %v39333_v54  ;;  %v39370_v54 = vld [vmem:[#allocation45_spill] sm:$0xff] }
0x1100   : > { %29372 = vmatmul.mubr.msk.f32.gmra.mrb[90].mxu1 %vm496_vm0, %v39334_v32  ;;  %v39371_v32 = vld [vmem:[#allocation63_spill] sm:$0xff] }
0x1101   : > { %29374 = vmatprep.mubr.msk.f32.mxu1 %vm496_vm0, %v37309_v47  ;;  %v39372_v47 = vld [vmem:[#allocation75_spill] sm:$0xff] }
0x1104   : > { %29375 = vmatmul.mubr.msk.f32.gmra.mrb[92].mxu1 %vm496_vm0, %v37313_v63  ;;  %v39373_v63 = vld [vmem:[#allocation77_spill] sm:$0xff] }
0x1105   : > { %29377 = vmatprep.mubr.msk.f32.mxu1 %vm496_vm0, %v21373_v5 }
0x1108   : > { %29378 = vmatmul.mubr.msk.f32.gmra.mrb[94].mxu1 %vm496_vm0, %v21374_v33 }
0x1109   : > { %29388 = vmatprep.mubr.msk.f32.mxu1 %vm496_vm0, %v39335_v46  ;;  %v39374_v46 = vld [vmem:[#allocation78_spill] sm:$0xff] }
0x110c   : > { %29389 = vmatmul.mubr.msk.f32.vlgmr.msra.gmra.mrb[64].mxu1 %vm496_vm0, %v39336_v28  ;;  %v39375_v28 = vld [vmem:[#allocation79_spill] sm:$0xff] }
0x110d   : > { %29391 = vmatprep.mubr.msk.f32.mxu1 %vm496_vm0, %v39337_v4  ;;  %v21764_v4 = vld [vmem:[#allocation2 + $0x231] sm:$0xff] }
0x1110   : > { %29392 = vmatmul.mubr.msk.f32.gmra.mrb[66].mxu1 %vm496_vm0, %v39338_v48  ;;  %v37579_v48 = vld [vmem:[#allocation8] ss:$0 sm:$0xff] }
0x1111   : > { %29394 = vmatprep.mubr.msk.f32.mxu1 %vm496_vm0, %v39339_v34 }
0x1114   : > { %29395 = vmatmul.mubr.msk.f32.gmra.mrb[68].mxu1 %vm496_vm0, %v39340_v20 }
0x1115   : > { %29397 = vmatprep.mubr.msk.f32.mxu1 %vm496_vm0, %v39341_v53 }
0x1118   : > { %29398 = vmatmul.mubr.msk.f32.gmra.mrb[70].mxu1 %vm496_vm0, %v39342_v30 }
0x1119   : > { %29400 = vmatprep.mubr.msk.f32.mxu1 %vm496_vm0, %v39343_v41  ;;  %v39376_v41 = vld [vmem:[#allocation48_spill] sm:$0xff] }
0x111c   : > { %29401 = vmatmul.mubr.msk.f32.gmra.mrb[72].mxu1 %vm496_vm0, %v39344_v55 }
0x111d   : > { %29403 = vmatprep.mubr.msk.f32.mxu1 %vm496_vm0, %v39345_v29  ;;  %v39377_v29 = vld [vmem:[#allocation50_spill] sm:$0xff] }
0x1120   : > { %29404 = vmatmul.mubr.msk.f32.gmra.mrb[74].mxu1 %vm496_vm0, %v39346_v7 }
0x1121   : > { %29406 = vmatprep.mubr.msk.f32.mxu1 %vm496_vm0, %v39347_v40 }
0x1124   : > { %29407 = vmatmul.mubr.msk.f32.gmra.mrb[76].mxu1 %vm496_vm0, %v39348_v57 }
0x1125   : > { %29409 = vmatprep.mubr.msk.f32.mxu1 %vm496_vm0, %v39349_v16 }
0x1128   : > { %29410 = vmatmul.mubr.msk.f32.gmra.mrb[78].mxu1 %vm496_vm0, %v39350_v59 }
0x1129   : > { %29412 = vmatprep.mubr.msk.f32.mxu1 %vm496_vm0, %v39351_v52 }
0x112c   : > { %29413 = vmatmul.mubr.msk.f32.gmra.mrb[80].mxu1 %vm496_vm0, %v39365_v44 }
0x112d   : > { %29415 = vmatprep.mubr.msk.f32.mxu1 %vm496_vm0, %v39366_v10 }
0x1130   : > { %29416 = vmatmul.mubr.msk.f32.gmra.mrb[82].mxu1 %vm496_vm0, %v39367_v19 }
0x1131   : > { %29418 = vmatprep.mubr.msk.f32.mxu1 %vm496_vm0, %v39368_v15 }
0x1134   : > { %29419 = vmatmul.mubr.msk.f32.gmra.mrb[84].mxu1 %vm496_vm0, %v39356_v24 }
0x1135   : > { %29421 = vmatprep.mubr.msk.f32.mxu1 %vm496_vm0, %v39369_v6  ;;  %v39386_v6 = vld [vmem:[#allocation74_spill] sm:$0xff] }
0x1138   : > { %29422 = vmatmul.mubr.msk.f32.gmra.mrb[86].mxu1 %vm496_vm0, %v39358_v42 }
0x1139   : > { %29424 = vmatprep.mubr.msk.f32.mxu1 %vm496_vm0, %v39370_v54 }
0x113c   : > { %29425 = vmatmul.mubr.msk.f32.gmra.mrb[88].mxu1 %vm496_vm0, %v39371_v32  ;;  %v39387_v32 = vld [vmem:[#allocation54_spill] sm:$0xff] }
0x113d   : > { %29427 = vmatprep.mubr.msk.f32.mxu1 %vm496_vm0, %v39372_v47 }
0x1140   : > { %29428 = vmatmul.mubr.msk.f32.gmra.mrb[90].mxu1 %vm496_vm0, %v39373_v63 }
0x1141   : > { %29430 = vmatprep.mubr.msk.f32.mxu1 %vm496_vm0, %v39374_v46 }
0x1144   : > { %29431 = vmatmul.mubr.msk.f32.gmra.mrb[92].mxu1 %vm496_vm0, %v39375_v28 }
0x1145   : > { %29433 = vmatprep.mubr.msk.f32.mxu1 %vm496_vm0, %v21763_v51 }
0x1148   : > { %29434 = vmatmul.mubr.msk.f32.gmra.mrb[94].mxu1 %vm496_vm0, %v21764_v4 }
0x11df   : > { %v29390_v34 = vpop.f32.mrb[64].mxu1 }
0x11e0   : > { %v22131_v20 = vadd.f32 %v29390_v34, %v37579_v48  ;;  %v21932_v53 = vpop.f32.mrb[65].mxu1 }
0x11e1   : > { %v22130_v30 = vadd.f32 %v37579_v48, %v21932_v53 }
0x11e2   : > { %v22163_v55 = vadd.f32 %v22131_v20, %v39376_v41  ;;  %v39388_v20 = vld [vmem:[#allocation55_spill] sm:$0xff] }
0x11e3   : > { %v22162_v7 = vadd.f32 %v22130_v30, %v39377_v29  ;;  %v29393_v40 = vpop.f32.mrb[66].mxu1  ;;  %v39389_v30 = vld [vmem:[#allocation56_spill] sm:$0xff] }
0x11e4   : > { %v37585_v57 = vmul.f32 %v22163_v55, %v22163_v55  ;;  %v22133_v16 = vadd.f32 %v29393_v40, %v37579_v48  ;;  %v21942_v59 = vpop.f32.mrb[67].mxu1 }
0x11e5   : > { %v37588_v52 = vmul.f32 %v22162_v7, %v22162_v7  ;;  %v22132_v8 = vadd.f32 %v37579_v48, %v21942_v59 }
0x11e6   : > { %v22165_v9 = vadd.f32 %v22133_v16, %v39378_v22  ;;  %22260 = vrot.lane.b32.xlu1 %v37585_v57, %s31522_s22 }
0x11e7   : > { %v22164_v24 = vadd.f32 %v22132_v8, %v39379_v39  ;;  %22258 = vrot.lane.b32.xlu0 %v37588_v52, %s31522_s22  ;;  %v29396_v61 = vpop.f32.mrb[68].mxu1  ;;  %v39390_v8 = vld [vmem:[#allocation57_spill] sm:$0xff] }
0x11e8   : > { %v37597_v42 = vmul.f32 %v22165_v9, %v22165_v9  ;;  %v22135_v27 = vadd.f32 %v29396_v61, %v37579_v48  ;;  %v21952_v35 = vpop.f32.mrb[69].mxu1  ;;  %v39391_v9 = vld [vmem:[#allocation58_spill] sm:$0xff] }
0x11e9   : > { %v37600_v56 = vmul.f32 %v22164_v24, %v22164_v24  ;;  %v22134_v18 = vadd.f32 %v37579_v48, %v21952_v35 }
0x11ea   : > { %v22167_v0 = vadd.f32 %v22135_v27, %v39380_v43  ;;  %22264 = vrot.lane.b32.xlu1 %v37597_v42, %s31522_s22 }
0x11eb   : > { %v22166_v37 = vadd.f32 %v22134_v18, %v39381_v36  ;;  %22262 = vrot.lane.b32.xlu0 %v37600_v56, %s31522_s22  ;;  %v29399_v3 = vpop.f32.mrb[70].mxu1 }
0x11ec   : > { %v37609_v17 = vmul.f32 %v22167_v0, %v22167_v0  ;;  %v22137_v49 = vadd.f32 %v29399_v3, %v37579_v48  ;;  %v21962_v58 = vpop.f32.mrb[71].mxu1  ;;  %v39392_v0 = vld [vmem:[#allocation59_spill] sm:$0xff] }
0x11ed   : > { %v37612_v25 = vmul.f32 %v22166_v37, %v22166_v37  ;;  %v22136_v31 = vadd.f32 %v37579_v48, %v21962_v58  ;;  %v39393_v37 = vld [vmem:[#allocation60_spill] sm:$0xff] }
0x11ee   : > { %v22169_v23 = vadd.f32 %v22137_v49, %v39382_v26  ;;  %22268 = vrot.lane.b32.xlu1 %v37609_v17, %s31522_s22 }
0x11ef   : > { %v22168_v21 = vadd.f32 %v22136_v31, %v39383_v60  ;;  %22266 = vrot.lane.b32.xlu0 %v37612_v25, %s31522_s22  ;;  %v29402_v38 = vpop.f32.mrb[72].mxu1 }
0x11f0   : > { %v37621_v14 = vmul.f32 %v22169_v23, %v22169_v23  ;;  %v22139_v45 = vadd.f32 %v29402_v38, %v37579_v48  ;;  %v21972_v1 = vpop.f32.mrb[73].mxu1 }
0x11f1   : > { %v37624_v62 = vmul.f32 %v22168_v21, %v22168_v21  ;;  %v22138_v11 = vadd.f32 %v37579_v48, %v21972_v1  ;;  %v39394_v21 = vld [vmem:[#allocation61_spill] sm:$0xff] }
0x11f2   : > { %v22171_v2 = vadd.f32 %v22139_v45, %v39384_v50  ;;  %22272 = vrot.lane.b32.xlu1 %v37621_v14, %s31522_s22  ;;  %v39395_v45 = vld [vmem:[#allocation62_spill] sm:$0xff] }
0x11f3   : > { %v22170_v13 = vadd.f32 %v22138_v11, %v39385_v12  ;;  %22270 = vrot.lane.b32.xlu0 %v37624_v62, %s31522_s22  ;;  %v29405_v5 = vpop.f32.mrb[74].mxu1 }
0x11f4   : > { %v37633_v33 = vmul.f32 %v22171_v2, %v22171_v2  ;;  %v22141_v44 = vadd.f32 %v29405_v5, %v37579_v48  ;;  %v21982_v10 = vpop.f32.mrb[75].mxu1 }
0x11f5   : > { %v37636_v19 = vmul.f32 %v22170_v13, %v22170_v13  ;;  %v22140_v15 = vadd.f32 %v37579_v48, %v21982_v10 }
0x11f6   : > { %v22173_v54 = vadd.f32 %v22141_v44, %v39386_v6  ;;  %22276 = vrot.lane.b32.xlu1 %v37633_v33, %s31522_s22  ;;  %v39396_v44 = vld [vmem:[#allocation66_spill] sm:$0xff] }
0x11f7   : > { %v22172_v47 = vadd.f32 %v22140_v15, %v39387_v32  ;;  %22274 = vrot.lane.b32.xlu0 %v37636_v19, %s31522_s22  ;;  %v29408_v63 = vpop.f32.mrb[76].mxu1  ;;  %v39397_v15 = vld [vmem:[#allocation64_spill] sm:$0xff] }
0x11f8   : > { %v37645_v46 = vmul.f32 %v22173_v54, %v22173_v54  ;;  %v22143_v51 = vadd.f32 %v29408_v63, %v37579_v48  ;;  %v21992_v28 = vpop.f32.mrb[77].mxu1 }
0x11f9   : > { %v37648_v4 = vmul.f32 %v22172_v47, %v22172_v47  ;;  %v22142_v34 = vadd.f32 %v37579_v48, %v21992_v28 }
0x11fa   : > { %v22175_v53 = vadd.f32 %v22143_v51, %v39388_v20  ;;  %22280 = vrot.lane.b32.xlu1 %v37645_v46, %s31522_s22 }
0x11fb   : > { %v22174_v41 = vadd.f32 %v22142_v34, %v39389_v30  ;;  %22278 = vrot.lane.b32.xlu0 %v37648_v4, %s31522_s22  ;;  %v29411_v55 = vpop.f32.mrb[78].mxu1  ;;  %v39398_v34 = vld [vmem:[#allocation73_spill] sm:$0xff] }
0x11fc   : > { %v37657_v29 = vmul.f32 %v22175_v53, %v22175_v53  ;;  %v22145_v7 = vadd.f32 %v29411_v55, %v37579_v48  ;;  %v22002_v40 = vpop.f32.mrb[79].mxu1  ;;  %v39399_v53 = vld [vmem:[#allocation15_spill] sm:$0xff] }
0x11fd   : > { %v37660_v16 = vmul.f32 %v22174_v41, %v22174_v41  ;;  %v22144_v59 = vadd.f32 %v37579_v48, %v22002_v40 }
0x11fe   : > { %v22177_v22 = vadd.f32 %v22145_v7, %v39390_v8  ;;  %22284 = vrot.lane.b32.xlu1 %v37657_v29, %s31522_s22 }
0x11ff   : > { %v22176_v39 = vadd.f32 %v22144_v59, %v39391_v9  ;;  %22282 = vrot.lane.b32.xlu0 %v37660_v16, %s31522_s22  ;;  %v29414_v24 = vpop.f32.mrb[80].mxu1 }
0x1200   : > { %v37669_v61 = vmul.f32 %v22177_v22, %v22177_v22  ;;  %v22147_v27 = vadd.f32 %v29414_v24, %v37579_v48  ;;  %v22012_v35 = vpop.f32.mrb[81].mxu1  ;;  %v39400_v22 = vld [vmem:[#allocation18_spill] sm:$0xff] }
0x1201   : > { %v37672_v18 = vmul.f32 %v22176_v39, %v22176_v39  ;;  %v22146_v43 = vadd.f32 %v37579_v48, %v22012_v35  ;;  %v39401_v39 = vld [vmem:[#allocation17_spill] sm:$0xff] }
0x1202   : > { %v22179_v36 = vadd.f32 %v22147_v27, %v39392_v0  ;;  %22288 = vrot.lane.b32.xlu1 %v37669_v61, %s31522_s22 }
0x1203   : > { %v22178_v3 = vadd.f32 %v22146_v43, %v39393_v37  ;;  %22286 = vrot.lane.b32.xlu0 %v37672_v18, %s31522_s22  ;;  %v29417_v49 = vpop.f32.mrb[82].mxu1 }
0x1204   : > { %v37681_v58 = vmul.f32 %v22179_v36, %v22179_v36  ;;  %v22149_v31 = vadd.f32 %v29417_v49, %v37579_v48  ;;  %v22022_v26 = vpop.f32.mrb[83].mxu1 }
0x1205   : > { %v37684_v23 = vmul.f32 %v22178_v3, %v22178_v3  ;;  %v22148_v60 = vadd.f32 %v37579_v48, %v22022_v26  ;;  %v39402_v3 = vld [vmem:[#allocation19_spill] sm:$0xff] }
0x1206   : > { %v22181_v38 = vadd.f32 %v22149_v31, %v39394_v21  ;;  %22292 = vrot.lane.b32.xlu1 %v37681_v58, %s31522_s22  ;;  %v39403_v31 = vld [vmem:[#allocation20_spill] sm:$0xff] }
0x1207   : > { %v22180_v1 = vadd.f32 %v22148_v60, %v39395_v45  ;;  %22290 = vrot.lane.b32.xlu0 %v37684_v23, %s31522_s22  ;;  %v29420_v11 = vpop.f32.mrb[84].mxu1 }
0x1208   : > { %v37693_v50 = vmul.f32 %v22181_v38, %v22181_v38  ;;  %v22151_v2 = vadd.f32 %v29420_v11, %v37579_v48  ;;  %v22032_v12 = vpop.f32.mrb[85].mxu1 }
0x1209   : > { %v37696_v13 = vmul.f32 %v22180_v1, %v22180_v1  ;;  %v22150_v5 = vadd.f32 %v37579_v48, %v22032_v12 }
0x120a   : > { %v22183_v10 = vadd.f32 %v22151_v2, %v39396_v44  ;;  %22296 = vrot.lane.b32.xlu1 %v37693_v50, %s31522_s22  ;;  %v39404_v2 = vld [vmem:[#allocation21_spill] sm:$0xff] }
0x120b   : > { %v22182_v6 = vadd.f32 %v22150_v5, %v39397_v15  ;;  %22294 = vrot.lane.b32.xlu0 %v37696_v13, %s31522_s22  ;;  %v29423_v54 = vpop.f32.mrb[86].mxu1  ;;  %v39405_v5 = vld [vmem:[#allocation22_spill] sm:$0xff] }
0x120c   : > { %v37705_v32 = vmul.f32 %v22183_v10, %v22183_v10  ;;  %v22153_v47 = vadd.f32 %v29423_v54, %v37579_v48  ;;  %v22042_v63 = vpop.f32.mrb[87].mxu1 }
0x120d   : > { %v37708_v51 = vmul.f32 %v22182_v6, %v22182_v6  ;;  %v22152_v28 = vadd.f32 %v37579_v48, %v22042_v63 }
0x120e   : > { %v22185_v20 = vadd.f32 %v22153_v47, %v39398_v34  ;;  %22300 = vrot.lane.b32.xlu1 %v37705_v32, %s31522_s22 }
0x120f   : > { %v22184_v30 = vadd.f32 %v22152_v28, %v39399_v53  ;;  %22298 = vrot.lane.b32.xlu0 %v37708_v51, %s31522_s22  ;;  %v29426_v41 = vpop.f32.mrb[88].mxu1  ;;  %v39406_v28 = vld [vmem:[#allocation23_spill] sm:$0xff] }
0x1210   : > { %v37717_v55 = vmul.f32 %v22185_v20, %v22185_v20  ;;  %v22155_v7 = vadd.f32 %v29426_v41, %v37579_v48  ;;  %v22052_v40 = vpop.f32.mrb[89].mxu1  ;;  %v39407_v20 = vld [vmem:[#allocation24_spill] sm:$0xff] }
0x1211   : > { %v37720_v59 = vmul.f32 %v22184_v30, %v22184_v30  ;;  %v22154_v8 = vadd.f32 %v37579_v48, %v22052_v40 }
0x1212   : > { %v22187_v9 = vadd.f32 %v22155_v7, %v39400_v22  ;;  %22304 = vrot.lane.b32.xlu1 %v37717_v55, %s31522_s22 }
0x1213   : > { %v22186_v24 = vadd.f32 %v22154_v8, %v39401_v39  ;;  %22302 = vrot.lane.b32.xlu0 %v37720_v59, %s31522_s22  ;;  %v29429_v27 = vpop.f32.mrb[90].mxu1 }
0x1214   : > { %v37729_v35 = vmul.f32 %v22187_v9, %v22187_v9  ;;  %v22157_v43 = vadd.f32 %v29429_v27, %v37579_v48  ;;  %v22062_v0 = vpop.f32.mrb[91].mxu1 }
0x1215   : > { %v37732_v36 = vmul.f32 %v22186_v24, %v22186_v24  ;;  %v22156_v37 = vadd.f32 %v37579_v48, %v22062_v0 }
0x1216   : > { %v22189_v49 = vadd.f32 %v22157_v43, %v39402_v3  ;;  %22308 = vrot.lane.b32.xlu1 %v37729_v35, %s31522_s22 }
0x1217   : > { %v22188_v26 = vadd.f32 %v22156_v37, %v39403_v31  ;;  %22306 = vrot.lane.b32.xlu0 %v37732_v36, %s31522_s22  ;;  %v29432_v60 = vpop.f32.mrb[92].mxu1 }
0x1218   : > { %v37741_v21 = vmul.f32 %v22189_v49, %v22189_v49  ;;  %v22159_v38 = vadd.f32 %v29432_v60, %v37579_v48  ;;  %v22072_v45 = vpop.f32.mrb[93].mxu1 }
0x1219   : > { %v37744_v1 = vmul.f32 %v22188_v26, %v22188_v26  ;;  %v22158_v11 = vadd.f32 %v37579_v48, %v22072_v45 }
0x121a   : > { %v22191_v12 = vadd.f32 %v22159_v38, %v39404_v2  ;;  %22312 = vrot.lane.b32.xlu1 %v37741_v21, %s31522_s22 }
0x121b   : > { %v22190_v44 = vadd.f32 %v22158_v11, %v39405_v5  ;;  %22310 = vrot.lane.b32.xlu0 %v37744_v1, %s31522_s22  ;;  %v29435_v10 = vpop.f32.mrb[94].mxu1 }
0x121c   : > { %v37753_v15 = vmul.f32 %v22191_v12, %v22191_v12  ;;  %v22161_v6 = vadd.f32 %v29435_v10, %v37579_v48  ;;  %v22082_v54 = vpop.f32.mrb[95].mxu1 }
0x121d   : > { %v37756_v47 = vmul.f32 %v22190_v44, %v22190_v44  ;;  %v22160_v63 = vadd.f32 %v37579_v48, %v22082_v54  ;;  %v39408_v48 = vld [vmem:[#allocation14_spill] sm:$0xff] }
0x121e   : > { %v22193_v34 = vadd.f32 %v22161_v6, %v39406_v28  ;;  %22316 = vrot.lane.b32.xlu1 %v37753_v15, %s31522_s22 }
0x121f   : > { %v22192_v53 = vadd.f32 %v22160_v63, %v39407_v20  ;;  %22314 = vrot.lane.b32.xlu0 %v37756_v47, %s31522_s22 }
0x1220   : > { %v37765_v30 = vmul.f32 %v22193_v34, %v22193_v34 }
0x1221   : > { %v37767_v41 = vmul.f32 %v22192_v53, %v22192_v53 }
0x1222   : > { %22320 = vrot.lane.b32.xlu1 %v37765_v30, %s31522_s22 }
0x1223   : > { %22318 = vrot.lane.b32.xlu0 %v37767_v41, %s31522_s22 }
0x1227   : > { %22612 = vperm.xlu0 %31314, %v39408_v48  }
0x1258   : > { %v22261_v7 = vpop.permute.xlu1 %22260 }
0x1259   : > { %v22259_v40 = vpop.permute.xlu0 %22258  ;;  %v37775_v39 = vadd.f32 %v22261_v7, %v37585_v57 }
0x125a   : > { %v37778_v27 = vadd.f32 %v22259_v40, %v37588_v52 }
0x125b   : > { %31318 = vrsqrt.f32 %v37775_v39  ;;  %vm22395_vm5 = vcmp.eq.f32.partialorder %v37775_v39, inf  ;;  %vm22397_vm6 = vcmp.eq.f32.partialorder %v37775_v39, 0.0  ;;  %v22398_v2 = vand.u32 2147483648, %v37775_v39 }
0x125c   : > { %v22265_v8 = vpop.permute.xlu1 %22264  ;;  %31320 = vrsqrt.f32 %v37778_v27  ;;  %vm22388_vm7 = vcmp.eq.f32.partialorder %v37778_v27, inf  ;;  %vm22390_vm8 = vcmp.eq.f32.partialorder %v37778_v27, 0.0 }
0x125d   : > { %v22263_v22 = vpop.permute.xlu0 %22262  ;;  %v37782_v0 = vadd.f32 %v22265_v8, %v37597_v42 }
0x125e   : > { %v37785_v3 = vadd.f32 %v22263_v22, %v37600_v56 }
0x125f   : > { %31322 = vrsqrt.f32 %v37782_v0  ;;  %vm22409_vm9 = vcmp.eq.f32.partialorder %v37782_v0, inf  ;;  %v22412_v10 = vand.u32 2147483648, %v37782_v0  ;;  %vm22411_vm10 = vcmp.eq.f32.partialorder %v37782_v0, 0.0 }
0x1260   : > { %v22269_v9 = vpop.permute.xlu1 %22268  ;;  %31324 = vrsqrt.f32 %v37785_v3  ;;  %vm22402_vm11 = vcmp.eq.f32.partialorder %v37785_v3, inf  ;;  %v22405_v28 = vand.u32 2147483648, %v37785_v3  ;;  %vm22404_vm13 = vcmp.eq.f32.partialorder %v37785_v3, 0.0 }
0x1261   : > { %v22267_v24 = vpop.permute.xlu0 %22266  ;;  %v37789_v49 = vadd.f32 %v22269_v9, %v37609_v17 }
0x1262   : > { %v37792_v57 = vadd.f32 %v22267_v24, %v37612_v25 }
0x1263   : > { %31326 = vrsqrt.f32 %v37789_v49  ;;  %vm22423_vm12 = vcmp.eq.f32.partialorder %v37789_v49, inf  ;;  %vm22425_vm14 = vcmp.eq.f32.partialorder %v37789_v49, 0.0 }
0x1264   : > { %v22273_v43 = vpop.permute.xlu1 %22272  ;;  %31328 = vrsqrt.f32 %v37792_v57  ;;  %vm22416_vm15 = vcmp.eq.f32.partialorder %v37792_v57, inf  ;;  %vm22418_vm0 = vcmp.eq.f32.partialorder %v37792_v57, 0.0 }
0x1265   : > { %v22271_v37 = vpop.permute.xlu0 %22270  ;;  %v37798_v42 = vadd.f32 %v22273_v43, %v37621_v14  ;;  %v31319_v25 = vpop.eup %31318 }
0x1266   : > { %v37802_v56 = vadd.f32 %v22271_v37, %v37624_v62  ;;  %v31321_v45 = vpop.eup %31320  ;;  %v22394_v62 = vmul.f32 %v31319_v25, %v37775_v39  ;;  %v22419_v37 = vand.u32 2147483648, %v37792_v57 }
0x1267   : > { %31330 = vrsqrt.f32 %v37798_v42  ;;  %v22387_v44 = vmul.f32 %v31321_v45, %v37778_v27  ;;  %vm22437_vm1 = vcmp.eq.f32.partialorder %v37798_v42, inf  ;;  %vm22439_vm3 = vcmp.eq.f32.partialorder %v37798_v42, 0.0 }
0x1268   : > { %v22277_v52 = vpop.permute.xlu1 %22276  ;;  %31332 = vrsqrt.f32 %v37802_v56  ;;  %v22396_v20 = vsel %vm22395_vm5, %v37775_v39, %v22394_v62  ;;  %vm22430_vm2 = vcmp.eq.f32.partialorder %v37802_v56, inf  ;;  %vm22432_vm4 = vcmp.eq.f32.partialorder %v37802_v56, 0.0 }
0x1269   : > { %v22275_v31 = vpop.permute.xlu0 %22274  ;;  %v37807_v60 = vadd.f32 %v22277_v52, %v37633_v33  ;;  %v31323_v12 = vpop.eup %31322  ;;  %v22391_v33 = vand.u32 2147483648, %v37778_v27  ;;  %v22389_v40 = vsel %vm22388_vm7, %v37778_v27, %v22387_v44 }
0x126a   : > { %v37811_v14 = vadd.f32 %v22275_v31, %v37636_v19  ;;  %v31325_v19 = vpop.eup %31324  ;;  %v22408_v53 = vmul.f32 %v31323_v12, %v37782_v0 }
0x126b   : > { %31334 = vrsqrt.f32 %v37807_v60  ;;  %v22401_v48 = vmul.f32 %v31325_v19, %v37785_v3  ;;  %v37871_v25 = vsel %vm22390_vm8, %v22391_v33, %v22389_v40  ;;  %vm22451_vm5 = vcmp.eq.f32.partialorder %v37807_v60, inf }
0x126c   : > { %v22281_v17 = vpop.permute.xlu1 %22280  ;;  %31336 = vrsqrt.f32 %v37811_v14  ;;  %vm22444_vm7 = vcmp.eq.f32.partialorder %v37811_v14, inf  ;;  %vm22446_vm8 = vcmp.eq.f32.partialorder %v37811_v14, 0.0 }
0x126d   : > { %v22279_v26 = vpop.permute.xlu0 %22278  ;;  %v37821_v5 = vadd.f32 %v22281_v17, %v37645_v46  ;;  %v31327_v63 = vpop.eup %31326  ;;  %v37864_v17 = vsel %vm22397_vm6, %v22398_v2, %v22396_v20  ;;  %v22403_v39 = vsel %vm22402_vm11, %v37785_v3, %v22401_v48  ;;  %vm22453_vm6 = vcmp.eq.f32.partialorder %v37807_v60, 0.0 }
0x126e   : > { %v37827_v6 = vadd.f32 %v22279_v26, %v37648_v4  ;;  %v31329_v34 = vpop.eup %31328  ;;  %v22426_v4 = vand.u32 2147483648, %v37789_v49  ;;  %v22422_v8 = vmul.f32 %v31327_v63, %v37789_v49  ;;  %v22433_v26 = vand.u32 2147483648, %v37802_v56 }
0x126f   : > { %31338 = vrsqrt.f32 %v37821_v5  ;;  %v22415_v43 = vmul.f32 %v31329_v34, %v37792_v57  ;;  %v22468_v48 = vand.u32 2147483648, %v37821_v5 }
0x1270   : > { %v22285_v38 = vpop.permute.xlu1 %22284  ;;  %31340 = vrsqrt.f32 %v37827_v6  ;;  %v22424_v27 = vsel %vm22423_vm12, %v37789_v49, %v22422_v8  ;;  %vm22458_vm11 = vcmp.eq.f32.partialorder %v37827_v6, inf  ;;  %vm22460_vm12 = vcmp.eq.f32.partialorder %v37827_v6, 0.0 }
0x1271   : > { %v22283_v11 = vpop.permute.xlu0 %22282  ;;  %v37846_v7 = vadd.f32 %v22285_v38, %v37657_v29  ;;  %v31331_v24 = vpop.eup %31330  ;;  %v22417_v62 = vsel %vm22416_vm15, %v37792_v57, %v22415_v43 }
0x1272   : > { %v37854_v22 = vadd.f32 %v22283_v11, %v37660_v16  ;;  %v31333_v31 = vpop.eup %31332  ;;  %v22440_v16 = vand.u32 2147483648, %v37798_v42  ;;  %v22436_v38 = vmul.f32 %v31331_v24, %v37798_v42 }
0x1273   : > { %31342 = vrsqrt.f32 %v37846_v7  ;;  %v22429_v2 = vmul.f32 %v31333_v31, %v37802_v56 }
0x1274   : > { %v22289_v54 = vpop.permute.xlu1 %22288  ;;  %31344 = vrsqrt.f32 %v37854_v22  ;;  %vm22472_vm15 = vcmp.eq.f32.partialorder %v37854_v22, inf }
0x1275   : > { %v22287_v46 = vpop.permute.xlu0 %22286  ;;  %v37860_v29 = vadd.f32 %v22289_v54, %v37669_v61  ;;  %v22410_v61 = vsel %vm22409_vm9, %v37782_v0, %v22408_v53  ;;  %v31335_v19 = vpop.eup %31334  ;;  %v22447_v0 = vand.u32 2147483648, %v37811_v14  ;;  %vm22465_vm9 = vcmp.eq.f32.partialorder %v37821_v5, inf }
0x1276   : > { %v37888_v45 = vadd.f32 %v22287_v46, %v37672_v18  ;;  %v37900_v44 = vsel %vm22411_vm10, %v22412_v10, %v22410_v61  ;;  %v22454_v18 = vand.u32 2147483648, %v37807_v60  ;;  %v31337_v63 = vpop.eup %31336  ;;  %v37909_v46 = vsel %vm22404_vm13, %v22405_v28, %v22403_v39 }
0x1277   : > { %31346 = vrsqrt.f32 %v37860_v29  ;;  %v37920_v10 = vsel %vm22418_vm0, %v22419_v37, %v22417_v62  ;;  %v22431_v28 = vsel %vm22430_vm2, %v37802_v56, %v22429_v2  ;;  %v22450_v57 = vmul.f32 %v31335_v19, %v37807_v60 }
0x1278   : > { %v22293_v9 = vpop.permute.xlu1 %22292  ;;  %31348 = vrsqrt.f32 %v37888_v45  ;;  %v22443_v53 = vmul.f32 %v31337_v63, %v37811_v14  ;;  %vm22467_vm10 = vcmp.eq.f32.partialorder %v37821_v5, 0.0  ;;  %v37955_v24 = vsel %vm22432_vm4, %v22433_v26, %v22431_v28 }
0x1279   : > { %v22291_v52 = vpop.permute.xlu0 %22290  ;;  %v37896_v12 = vadd.f32 %v22293_v9, %v37681_v58  ;;  %v37913_v58 = vsel %vm22425_vm14, %v22426_v4, %v22424_v27  ;;  %v31339_v49 = vpop.eup %31338  ;;  %vm22479_vm13 = vcmp.eq.f32.partialorder %v37846_v7, inf  ;;  %vm22481_vm14 = vcmp.eq.f32.partialorder %v37846_v7, 0.0 }
0x127a   : > { %v37905_v54 = vadd.f32 %v22291_v52, %v37684_v23  ;;  %v22438_v23 = vsel %vm22437_vm1, %v37798_v42, %v22436_v38  ;;  %v31341_v4 = vpop.eup %31340  ;;  %v22452_v52 = vsel %vm22451_vm5, %v37807_v60, %v22450_v57  ;;  %v22482_v42 = vand.u32 2147483648, %v37846_v7 }
0x127b   : > { %31350 = vrsqrt.f32 %v37896_v12  ;;  %v37951_v9 = vsel %vm22439_vm3, %v22440_v16, %v22438_v23  ;;  %v22445_v16 = vsel %vm22444_vm7, %v37811_v14, %v22443_v53  ;;  %v22475_v26 = vand.u32 2147483648, %v37854_v22 }
0x127c   : > { %v22297_v11 = vpop.permute.xlu1 %22296  ;;  %31352 = vrsqrt.f32 %v37905_v54  ;;  %vm22474_vm0 = vcmp.eq.f32.partialorder %v37854_v22, 0.0  ;;  %vm22493_vm1 = vcmp.eq.f32.partialorder %v37860_v29, inf  ;;  %v22496_v39 = vand.u32 2147483648, %v37860_v29 }
0x127d   : > { %v22295_v33 = vpop.permute.xlu0 %22294  ;;  %v37934_v34 = vadd.f32 %v22297_v11, %v37693_v50  ;;  %v22461_v50 = vand.u32 2147483648, %v37827_v6  ;;  %v31343_v37 = vpop.eup %31342  ;;  %v37981_v38 = vsel %vm22453_vm6, %v22454_v18, %v22452_v52  ;;  %vm22495_vm2 = vcmp.eq.f32.partialorder %v37860_v29, 0.0 }
0x127e   : > { %v37941_v40 = vadd.f32 %v22295_v33, %v37696_v13  ;;  %v22464_v13 = vmul.f32 %v31339_v49, %v37821_v5  ;;  %v31345_v56 = vpop.eup %31344  ;;  %v22478_v62 = vmul.f32 %v31343_v37, %v37846_v7  ;;  %vm22486_vm3 = vcmp.eq.f32.partialorder %v37888_v45, inf }
0x127f   : > { %31354 = vrsqrt.f32 %v37934_v34  ;;  %v22471_v19 = vmul.f32 %v31345_v56, %v37854_v22  ;;  %vm22507_vm4 = vcmp.eq.f32.partialorder %v37896_v12, inf  ;;  %vm22488_vm5 = vcmp.eq.f32.partialorder %v37888_v45, 0.0 }
0x1280   : > { %v22301_v3 = vpop.permute.xlu1 %22300  ;;  %31356 = vrsqrt.f32 %v37941_v40  ;;  %v22466_v11 = vsel %vm22465_vm9, %v37821_v5, %v22464_v13  ;;  %vm22500_vm6 = vcmp.eq.f32.partialorder %v37905_v54, inf  ;;  %v22480_v57 = vsel %vm22479_vm13, %v37846_v7, %v22478_v62 }
0x1281   : > { %v22299_v20 = vpop.permute.xlu0 %22298  ;;  %v37947_v8 = vadd.f32 %v22301_v3, %v37705_v32  ;;  %v22457_v32 = vmul.f32 %v31341_v4, %v37827_v6  ;;  %v31347_v61 = vpop.eup %31346  ;;  %vm22509_vm7 = vcmp.eq.f32.partialorder %v37896_v12, 0.0  ;;  %v22503_v5 = vand.u32 2147483648, %v37905_v54 }
0x1282   : > { %v37977_v27 = vadd.f32 %v22299_v20, %v37708_v51  ;;  %v37993_v51 = vsel %vm22446_vm8, %v22447_v0, %v22445_v16  ;;  %v31349_v23 = vpop.eup %31348  ;;  %v22492_v3 = vmul.f32 %v31347_v61, %v37860_v29  ;;  %v38008_v0 = vsel %vm22467_vm10, %v22468_v48, %v22466_v11 }
0x1283   : > { %31358 = vrsqrt.f32 %v37947_v8  ;;  %v22459_v60 = vsel %vm22458_vm11, %v37827_v6, %v22457_v32  ;;  %v22473_v4 = vsel %vm22472_vm15, %v37854_v22, %v22471_v19  ;;  %v22485_v53 = vmul.f32 %v31349_v23, %v37888_v45 }
0x1284   : > { %v22305_v43 = vpop.permute.xlu1 %22304  ;;  %31360 = vrsqrt.f32 %v37977_v27  ;;  %v38016_v28 = vsel %vm22460_vm12, %v22461_v50, %v22459_v60  ;;  %vm22502_vm8 = vcmp.eq.f32.partialorder %v37905_v54, 0.0  ;;  %vm22521_vm9 = vcmp.eq.f32.partialorder %v37934_v34, inf }
0x1285   : > { %v22303_v31 = vpop.permute.xlu0 %22302  ;;  %v37989_v2 = vadd.f32 %v22305_v43, %v37717_v55  ;;  %v22489_v55 = vand.u32 2147483648, %v37888_v45  ;;  %v31351_v14 = vpop.eup %31350  ;;  %v22494_v48 = vsel %vm22493_vm1, %v37860_v29, %v22492_v3  ;;  %v38043_v52 = vsel %vm22481_vm14, %v22482_v42, %v22480_v57 }
0x1286   : > { %v38000_v18 = vadd.f32 %v22303_v31, %v37720_v59  ;;  %v22510_v59 = vand.u32 2147483648, %v37896_v12  ;;  %v31353_v49 = vpop.eup %31352  ;;  %v22506_v50 = vmul.f32 %v31351_v14, %v37896_v12  ;;  %v22524_v31 = vand.u32 2147483648, %v37934_v34 }
0x1287   : > { %31362 = vrsqrt.f32 %v37989_v2  ;;  %v22499_v32 = vmul.f32 %v31353_v49, %v37905_v54  ;;  %vm22523_vm10 = vcmp.eq.f32.partialorder %v37934_v34, 0.0  ;;  %vm22514_vm11 = vcmp.eq.f32.partialorder %v37941_v40, inf }
0x1288   : > { %v22309_v33 = vpop.permute.xlu1 %22308  ;;  %31364 = vrsqrt.f32 %v38000_v18  ;;  %v22487_v22 = vsel %vm22486_vm3, %v37888_v45, %v22485_v53  ;;  %vm22516_vm12 = vcmp.eq.f32.partialorder %v37941_v40, 0.0  ;;  %vm22535_vm13 = vcmp.eq.f32.partialorder %v37947_v8, inf }
0x1289   : > { %v22307_v63 = vpop.permute.xlu0 %22306  ;;  %v38036_v13 = vadd.f32 %v22309_v33, %v37729_v35  ;;  %v31355_v37 = vpop.eup %31354  ;;  %v38052_v35 = vsel %vm22474_vm0, %v22475_v26, %v22473_v4  ;;  %v22517_v26 = vand.u32 2147483648, %v37941_v40  ;;  %vm22537_vm14 = vcmp.eq.f32.partialorder %v37947_v8, 0.0 }
0x128a   : > { %v38039_v43 = vadd.f32 %v22307_v63, %v37732_v36  ;;  %v31357_v16 = vpop.eup %31356  ;;  %v22520_v61 = vmul.f32 %v31355_v37, %v37934_v34  ;;  %v22538_v62 = vand.u32 2147483648, %v37947_v8  ;;  %v38084_v33 = vsel %vm22488_vm5, %v22489_v55, %v22487_v22 }
0x128b   : > { %31366 = vrsqrt.f32 %v38036_v13  ;;  %v22513_v11 = vmul.f32 %v31357_v16, %v37941_v40  ;;  %vm22528_vm15 = vcmp.eq.f32.partialorder %v37977_v27, inf  ;;  %v22531_v3 = vand.u32 2147483648, %v37977_v27 }
0x128c   : > { %v22313_v20 = vpop.permute.xlu1 %22312  ;;  %31368 = vrsqrt.f32 %v38039_v43  ;;  %vm22549_vm0 = vcmp.eq.f32.partialorder %v37989_v2, inf  ;;  %v22522_v49 = vsel %vm22521_vm9, %v37934_v34, %v22520_v61  ;;  %vm22530_vm1 = vcmp.eq.f32.partialorder %v37977_v27, 0.0 }
0x128d   : > { %v22311_v6 = vpop.permute.xlu0 %22310  ;;  %v38048_v56 = vadd.f32 %v22313_v20, %v37741_v21  ;;  %v31359_v42 = vpop.eup %31358  ;;  %v38062_v21 = vsel %vm22495_vm2, %v22496_v39, %v22494_v48  ;;  %v22501_v39 = vsel %vm22500_vm6, %v37905_v54, %v22499_v32  ;;  %vm22551_vm2 = vcmp.eq.f32.partialorder %v37989_v2, 0.0 }
0x128e   : > { %v38058_v36 = vadd.f32 %v22311_v6, %v37744_v1  ;;  %v22508_v1 = vsel %vm22507_vm4, %v37896_v12, %v22506_v50  ;;  %v22534_v60 = vmul.f32 %v31359_v42, %v37947_v8  ;;  %v31361_v63 = vpop.eup %31360  ;;  %v38100_v14 = vsel %vm22502_vm8, %v22503_v5, %v22501_v39 }
0x128f   : > { %31370 = vrsqrt.f32 %v38048_v56  ;;  %v38091_v23 = vsel %vm22509_vm7, %v22510_v59, %v22508_v1  ;;  %v22552_v54 = vand.u32 2147483648, %v37989_v2  ;;  %vm22542_vm3 = vcmp.eq.f32.partialorder %v38000_v18, inf }
0x1290   : > { %v22317_v7 = vpop.permute.xlu1 %22316  ;;  %31372 = vrsqrt.f32 %v38058_v36  ;;  %v22536_v5 = vsel %vm22535_vm13, %v37947_v8, %v22534_v60  ;;  %v38126_v20 = vsel %vm22523_vm10, %v22524_v31, %v22522_v49  ;;  %vm22544_vm4 = vcmp.eq.f32.partialorder %v38000_v18, 0.0 }
0x1291   : > { %v22315_v29 = vpop.permute.xlu0 %22314  ;;  %v38096_v45 = vadd.f32 %v22317_v7, %v37753_v15  ;;  %v31363_v55 = vpop.eup %31362  ;;  %v22515_v15 = vsel %vm22514_vm11, %v37941_v40, %v22513_v11  ;;  %v22545_v53 = vand.u32 2147483648, %v38000_v18  ;;  %vm22563_vm5 = vcmp.eq.f32.partialorder %v38036_v13, inf }
0x1292   : > { %v38107_v12 = vadd.f32 %v22315_v29, %v37756_v47  ;;  %v31365_v57 = vpop.eup %31364  ;;  %v22527_v47 = vmul.f32 %v31361_v63, %v37977_v27  ;;  %v22548_v4 = vmul.f32 %v31363_v55, %v37989_v2  ;;  %v38133_v48 = vsel %vm22516_vm12, %v22517_v26, %v22515_v15 }
0x1293   : > { %31374 = vrsqrt.f32 %v38096_v45  ;;  %v22541_v50 = vmul.f32 %v31365_v57, %v38000_v18  ;;  %v38140_v34 = vsel %vm22537_vm14, %v22538_v62, %v22536_v5  ;;  %vm22565_vm6 = vcmp.eq.f32.partialorder %v38036_v13, 0.0 }
0x1294   : > { %v22321_v19 = vpop.permute.xlu1 %22320  ;;  %31376 = vrsqrt.f32 %v38107_v12  ;;  %v22566_v37 = vand.u32 2147483648, %v38036_v13  ;;  %vm22556_vm7 = vcmp.eq.f32.partialorder %v38039_v43, inf  ;;  %v22529_v31 = vsel %vm22528_vm15, %v37977_v27, %v22527_v47 }
0x1295   : > { %v38110_v59 = vadd.f32 %v22321_v19, %v37765_v30  ;;  %v22319_v30 = vpop.permute.xlu0 %22318  ;;  %v31367_v6 = vpop.eup %31366  ;;  %vm22558_vm8 = vcmp.eq.f32.partialorder %v38039_v43, 0.0  ;;  %v22559_v8 = vand.u32 2147483648, %v38039_v43  ;;  %vm22577_vm9 = vcmp.eq.f32.partialorder %v38048_v56, inf }
0x1296   : > { %v38146_v40 = vadd.f32 %v22319_v30, %v37767_v41  ;;  %v31369_v32 = vpop.eup %31368  ;;  %v22580_v16 = vand.u32 2147483648, %v38048_v56  ;;  %v22550_v42 = vsel %vm22549_vm0, %v37989_v2, %v22548_v4  ;;  %v22562_v41 = vmul.f32 %v31367_v6, %v38036_v13 }
0x1297   : > { %31378 = vrsqrt.f32 %v38110_v59  ;;  %vm22579_vm10 = vcmp.eq.f32.partialorder %v38048_v56, 0.0  ;;  %vm22570_vm11 = vcmp.eq.f32.partialorder %v38058_v36, inf  ;;  %v22543_v26 = vsel %vm22542_vm3, %v38000_v18, %v22541_v50 }
0x1298   : > { %31380 = vrsqrt.f32 %v38146_v40  ;;  %v22555_v1 = vmul.f32 %v31369_v32, %v38039_v43  ;;  %vm22572_vm12 = vcmp.eq.f32.partialorder %v38058_v36, 0.0  ;;  %v22573_v61 = vand.u32 2147483648, %v38058_v36 }
0x1299   : > { %v31371_v7 = vpop.eup %31370  ;;  %vm22647_vm13 = vcmask 15360   ;;  %v38170_v29 = vsel %vm22530_vm1, %v22531_v3, %v22529_v31  ;;  %vm22591_vm14 = vcmp.eq.f32.partialorder %v38096_v45, inf  ;;  %v38177_v62 = vsel %vm22551_vm2, %v22552_v54, %v22550_v42 }
0x129a   : > { %v31373_v22 = vpop.eup %31372  ;;  %v22576_v39 = vmul.f32 %v31371_v7, %v38048_v56  ;;  %vm22593_vm15 = vcmp.eq.f32.partialorder %v38096_v45, 0.0  ;;  %v22594_v60 = vand.u32 2147483648, %v38096_v45  ;;  %vm22584_vm0 = vcmp.eq.f32.partialorder %v38107_v12, inf }
0x129b   : > { %v22569_v11 = vmul.f32 %v31373_v22, %v38058_v36  ;;  %v38184_v27 = vsel %vm22544_vm4, %v22545_v53, %v22543_v26  ;;  %v22564_v63 = vsel %vm22563_vm5, %v38036_v13, %v22562_v41  ;;  %vm22586_vm1 = vcmp.eq.f32.partialorder %v38107_v12, 0.0 }
0x129c   : > { %v22587_v2 = vand.u32 2147483648, %v38107_v12  ;;  %v22557_v55 = vsel %vm22556_vm7, %v38039_v43, %v22555_v1  ;;  %vm22605_vm2 = vcmp.eq.f32.partialorder %v38110_v59, inf  ;;  %vm22607_vm3 = vcmp.eq.f32.partialorder %v38110_v59, 0.0 }
0x129d   : > { %v31375_v19 = vpop.eup %31374  ;;  %v22578_v18 = vsel %vm22577_vm9, %v38048_v56, %v22576_v39  ;;  %v22571_v57 = vsel %vm22570_vm11, %v38058_v36, %v22569_v11  ;;  %v22608_v54 = vand.u32 2147483648, %v38110_v59  ;;  %v22567_v47 = vsel %vm22565_vm6, %v22566_v37, %v22564_v63 }
0x129e   : > { %v31377_v3 = vpop.eup %31376  ;;  %v22590_v49 = vmul.f32 %v31375_v19, %v38096_v45  ;;  %vm22598_vm4 = vcmp.eq.f32.partialorder %v38146_v40, inf  ;;  %vm22600_vm5 = vcmp.eq.f32.partialorder %v38146_v40, 0.0  ;;  %v22560_v4 = vsel %vm22558_vm8, %v22559_v8, %v22557_v55 }
0x129f   : > { %v22583_v15 = vmul.f32 %v31377_v3, %v38107_v12  ;;  %v22601_v13 = vand.u32 2147483648, %v38146_v40  ;;  %v22581_v50 = vsel %vm22579_vm10, %v22580_v16, %v22578_v18  ;;  %v22574_v43 = vsel %vm22572_vm12, %v22573_v61, %v22571_v57 }
0x12a0   : > { %v22592_v30 = vsel %vm22591_vm14, %v38096_v45, %v22590_v49 }
0x12a1   : > { %v31379_v5 = vpop.eup %31378  ;;  %v22585_v53 = vsel %vm22584_vm0, %v38107_v12, %v22583_v15  ;;  %v22595_v37 = vsel %vm22593_vm15, %v22594_v60, %v22592_v30 }
0x12a2   : > { %v22604_v6 = vmul.f32 %v31379_v5, %v38110_v59  ;;  %v22588_v32 = vsel %vm22586_vm1, %v22587_v2, %v22585_v53  ;;  %v31381_v8 = vpop.eup %31380 }
0x12a3   : > { %v22597_v12 = vmul.f32 %v31381_v8, %v38146_v40 }
0x12a4   : > { %v22606_v7 = vsel %vm22605_vm2, %v38110_v59, %v22604_v6 }
0x12a5   : > { %v22609_v45 = vsel %vm22607_vm3, %v22608_v54, %v22606_v7 }
0x12a6   : > { %v22613_v31 = vpop.permute.xlu0 %22612 }
0x12a7   : > { %v22615_v56 = vmul.f32 %v22613_v31, %v37871_v25  ;;  %v22616_v36 = vmul.f32 %v22613_v31, %v37864_v17  ;;  %v22617_v16 = vmul.f32 %v22613_v31, %v37909_v46  ;;  %v22618_v42 = vmul.f32 %v22613_v31, %v37900_v44 }
0x12a8   : > { %v22619_v41 = vmul.f32 %v22613_v31, %v37920_v10  ;;  %v22620_v22 = vmul.f32 %v22613_v31, %v37913_v58  ;;  %v22621_v26 = vmul.f32 %v22613_v31, %v37955_v24  ;;  %v22622_v17 = vmul.f32 %v22613_v31, %v37951_v9 }
0x12a9   : > { %v22623_v25 = vmul.f32 %v22613_v31, %v37993_v51  ;;  %22648 = vst.msk [vmem:[%s38224_s16] sm:$0xff] %vm22647_vm13, %v22615_v56  ;;  %22649 = vst.msk [vmem:[%s38224_s16 + $0x8] sm:$0xff] %vm22647_vm13, %v22616_v36  ;;  %v22599_v44 = vsel %vm22598_vm4, %v38146_v40, %v22597_v12  ;;  %v22624_v46 = vmul.f32 %v22613_v31, %v37981_v38 }
0x12aa   : > { %22650 = vst.msk [vmem:[%s38224_s16 + $0x10] sm:$0xff] %vm22647_vm13, %v22617_v16  ;;  %v22625_v58 = vmul.f32 %v22613_v31, %v38016_v28  ;;  %v22626_v10 = vmul.f32 %v22613_v31, %v38008_v0  ;;  %22651 = vst.msk [vmem:[%s38224_s16 + $0x18] sm:$0xff] %vm22647_vm13, %v22618_v42  ;;  %v22602_v9 = vsel %vm22600_vm5, %v22601_v13, %v22599_v44 }
0x12ab   : > { %22652 = vst.msk [vmem:[%s38224_s16 + $0x20] sm:$0xff] %vm22647_vm13, %v22619_v41  ;;  %v22627_v24 = vmul.f32 %v22613_v31, %v38052_v35  ;;  %v22628_v51 = vmul.f32 %v22613_v31, %v38043_v52  ;;  %v22629_v38 = vmul.f32 %v22613_v31, %v38084_v33  ;;  %22653 = vst.msk [vmem:[%s38224_s16 + $0x28] sm:$0xff] %vm22647_vm13, %v22620_v22 }
0x12ac   : > { %22654 = vst.msk [vmem:[%s38224_s16 + $0x30] sm:$0xff] %vm22647_vm13, %v22621_v26  ;;  %22655 = vst.msk [vmem:[%s38224_s16 + $0x38] sm:$0xff] %vm22647_vm13, %v22622_v17  ;;  %v22630_v0 = vmul.f32 %v22613_v31, %v38062_v21  ;;  %v22631_v28 = vmul.f32 %v22613_v31, %v38100_v14  ;;  %v22632_v35 = vmul.f32 %v22613_v31, %v38091_v23 }
0x12ad   : > { %22656 = vst.msk [vmem:[%s38224_s16 + $0x40] sm:$0xff] %vm22647_vm13, %v22623_v25  ;;  %v22633_v52 = vmul.f32 %v22613_v31, %v38133_v48  ;;  %22657 = vst.msk [vmem:[%s38224_s16 + $0x48] sm:$0xff] %vm22647_vm13, %v22624_v46  ;;  %v22634_v33 = vmul.f32 %v22613_v31, %v38126_v20  ;;  %v22635_v21 = vmul.f32 %v22613_v31, %v38170_v29 }
0x12ae   : > { %22658 = vst.msk [vmem:[%s38224_s16 + $0x50] sm:$0xff] %vm22647_vm13, %v22625_v58  ;;  %22659 = vst.msk [vmem:[%s38224_s16 + $0x58] sm:$0xff] %vm22647_vm13, %v22626_v10  ;;  %v22636_v14 = vmul.f32 %v22613_v31, %v38140_v34  ;;  %v22637_v23 = vmul.f32 %v22613_v31, %v38184_v27  ;;  %v22638_v59 = vmul.f32 %v22613_v31, %v38177_v62 }
0x12af   : > { %22660 = vst.msk [vmem:[%s38224_s16 + $0x60] sm:$0xff] %vm22647_vm13, %v22627_v24  ;;  %22661 = vst.msk [vmem:[%s38224_s16 + $0x68] sm:$0xff] %vm22647_vm13, %v22628_v51  ;;  %v22639_v48 = vmul.f32 %v22613_v31, %v22560_v4  ;;  %v22640_v20 = vmul.f32 %v22613_v31, %v22567_v47  ;;  %v22641_v40 = vmul.f32 %v22613_v31, %v22574_v43 }
0x12b0   : > { %22662 = vst.msk [vmem:[%s38224_s16 + $0x70] sm:$0xff] %vm22647_vm13, %v22629_v38  ;;  %22663 = vst.msk [vmem:[%s38224_s16 + $0x78] sm:$0xff] %vm22647_vm13, %v22630_v0  ;;  %v22642_v34 = vmul.f32 %v22613_v31, %v22581_v50  ;;  %v22643_v1 = vmul.f32 %v22613_v31, %v22588_v32  ;;  %v22644_v61 = vmul.f32 %v22613_v31, %v22595_v37 }
0x12b1   : > { %22664 = vst.msk [vmem:[%s38224_s16 + $0x80] sm:$0xff] %vm22647_vm13, %v22631_v28  ;;  %22665 = vst.msk [vmem:[%s38224_s16 + $0x88] sm:$0xff] %vm22647_vm13, %v22632_v35  ;;  %v22645_v29 = vmul.f32 %v22613_v31, %v22602_v9  ;;  %v22646_v39 = vmul.f32 %v22613_v31, %v22609_v45 }
0x12b2   : > { %22666 = vst.msk [vmem:[%s38224_s16 + $0x90] sm:$0xff] %vm22647_vm13, %v22633_v52  ;;  %22667 = vst.msk [vmem:[%s38224_s16 + $0x98] sm:$0xff] %vm22647_vm13, %v22634_v33 }
0x12b3   : > { %22668 = vst.msk [vmem:[%s38224_s16 + $0xa0] sm:$0xff] %vm22647_vm13, %v22635_v21  ;;  %22669 = vst.msk [vmem:[%s38224_s16 + $0xa8] sm:$0xff] %vm22647_vm13, %v22636_v14 }
0x12b4   : > { %22670 = vst.msk [vmem:[%s38224_s16 + $0xb0] sm:$0xff] %vm22647_vm13, %v22637_v23  ;;  %22671 = vst.msk [vmem:[%s38224_s16 + $0xb8] sm:$0xff] %vm22647_vm13, %v22638_v59 }
0x12b5   : > { %22672 = vst.msk [vmem:[%s38224_s16 + $0xc0] sm:$0xff] %vm22647_vm13, %v22639_v48  ;;  %22673 = vst.msk [vmem:[%s38224_s16 + $0xc8] sm:$0xff] %vm22647_vm13, %v22640_v20 }
0x12b6   : > { %22674 = vst.msk [vmem:[%s38224_s16 + $0xd0] sm:$0xff] %vm22647_vm13, %v22641_v40  ;;  %22675 = vst.msk [vmem:[%s38224_s16 + $0xd8] sm:$0xff] %vm22647_vm13, %v22642_v34 }
0x12b7   : > { %22676 = vst.msk [vmem:[%s38224_s16 + $0xe0] sm:$0xff] %vm22647_vm13, %v22643_v1  ;;  %22677 = vst.msk [vmem:[%s38224_s16 + $0xe8] sm:$0xff] %vm22647_vm13, %v22644_v61 }
0x12b8   : > { %22678 = vst.msk [vmem:[%s38224_s16 + $0xf0] sm:$0xff] %vm22647_vm13, %v22645_v29  ;;  %22679 = vst.msk [vmem:[%s38224_s16 + $0xf8] sm:$0xff] %vm22647_vm13, %v22646_v39 }
0x12b9 PF: > { %s39410_s26 = sld [smem:[#allocation13_spill]] }
0x12bf   : > { %s26_s25 = sadd.s32 1, %s39410_s26  }
0x12c0   : > { %p23_p6 = scmp.ge.s32.totalorder %s26_s25, 4  }
0x12c2   :  { %25 = sbr.rel (!%p23_p6) target bundleno = 6 (0x6), region = 169 }
0x12c9   :  { %22701 = vsyncpa [#allocation4], 1 }
0x12ca   :  { %22703 = vsyncpa [#allocation4 + $0x1], 1 }
0x12cb   :  { %22704 = vsyncpa [#allocation6], 1 }
0x12cc   :  { %22705 = vsyncpa [#allocation9], 1 }

</bundles_post_ra>
